<compile_context>
chip_gen: v6e
topology: v6e:2x2x1
jax: 0.10.0
libtpu: 0.0.40
codegen_flags: <defaults>
</compile_context>

<pallas_src>
import jax
import jax.numpy as jnp
from jax.experimental import pallas as pl
from jax.experimental.pallas import tpu as pltpu

IN_FEATS = 28 * 28          # 784
HID = 1024
N_BRANCH = 4
OUT = 10
OUT_PAD = 128               # lane-dense padded output width


def _round_up(x, m):
    return ((x + m - 1) // m) * m


def statnet_kernel(xs_ref, ws_ref, bs_ref, wn_ref, bn_ref, out_ref, h_ref):
    # xs_ref: [4, TM, 784]  bf16     ws_ref: [4, 784, 1024] bf16
    # bs_ref: [4, 1, 1024]  f32      wn_ref: [4096, 128]    bf16 (zero-padded cols)
    # bn_ref: [1, 128]      f32      out_ref:[TM, 128]      f32
    # h_ref : [TM, 4096]    bf16 VMEM scratch (concat of the 4 branch activations)
    for i in range(N_BRANCH):  # static unrolled loop over the 4 branches
        h = jnp.dot(xs_ref[i], ws_ref[i], preferred_element_type=jnp.float32)
        h = jnp.maximum(h + bs_ref[i], 0.0)            # bias + ReLU in f32
        # Dropout(p=0.5) is identity in eval/inference mode.
        # TODO(synk): training-mode dropout (stateful PRNG mask) not implemented.
        h_ref[:, i * HID:(i + 1) * HID] = h.astype(h_ref.dtype)
    # Single fused K=4096 neck matmul over the concatenated activations.
    out_ref[...] = (
        jnp.dot(h_ref[...], wn_ref[...], preferred_element_type=jnp.float32)
        + bn_ref[...]
    )


def init_params(key):
    """Deterministic PyTorch-style uniform(-1/sqrt(fan_in), 1/sqrt(fan_in)) init."""
    ks = jax.random.split(key, 4)
    bound1 = 1.0 / jnp.sqrt(jnp.float32(IN_FEATS))
    bound2 = 1.0 / jnp.sqrt(jnp.float32(HID * N_BRANCH))
    # Branch linears: weights stored as [in, out] so the kernel does x @ W.
    Ws = jax.random.uniform(ks[0], (N_BRANCH, IN_FEATS, HID),
                            minval=-bound1, maxval=bound1, dtype=jnp.float32)
    bs = jax.random.uniform(ks[1], (N_BRANCH, 1, HID),
                            minval=-bound1, maxval=bound1, dtype=jnp.float32)
    # Neck linear: [4096, 10] stored as 4 slices of [1024, 10].
    Wn = jax.random.uniform(ks[2], (N_BRANCH, HID, OUT),
                            minval=-bound2, maxval=bound2, dtype=jnp.float32)
    bn = jax.random.uniform(ks[3], (1, OUT),
                            minval=-bound2, maxval=bound2, dtype=jnp.float32)
    return Ws, bs, Wn, bn


def statnet_forward(x, Ws, bs, Wn, bn):
    # x: [B, 28, 28, 4]
    B = x.shape[0]

    # Batch tile: small batches round up to a sublane multiple; large batches
    # tile at 256 rows so activations double-buffer behind the resident weights.
    TM = min(256, _round_up(B, 8))
    B_pad = _round_up(B, TM)
    num_tiles = pl.cdiv(B_pad, TM)

    # Glue: x[:, :, :, i] flattened == moveaxis + reshape (row-major).
    xs = jnp.moveaxis(x, 3, 0).reshape(N_BRANCH, B, IN_FEATS)        # [4, B, 784]
    if B_pad != B:
        xs = jnp.pad(xs, ((0, 0), (0, B_pad - B), (0, 0)))
    xs = xs.astype(jnp.bfloat16)

    # bf16 weights for the MXU; biases stay f32.
    Ws_bf = Ws.astype(jnp.bfloat16)                                  # [4, 784, 1024]
    # Concatenated neck weight, zero-padded to a lane-dense 128-wide output.
    Wn_full = Wn.reshape(N_BRANCH * HID, OUT)                        # [4096, 10]
    Wn_pad = jnp.pad(Wn_full, ((0, 0), (0, OUT_PAD - OUT))).astype(jnp.bfloat16)
    bn_pad = jnp.pad(bn, ((0, 0), (0, OUT_PAD - OUT)))               # [1, 128] f32

    flops = B_pad * (2 * IN_FEATS * HID * N_BRANCH + 2 * N_BRANCH * HID * OUT_PAD)
    bytes_accessed = (xs.size * 2 + Ws_bf.size * 2 + Wn_pad.size * 2
                      + bs.size * 4 + bn_pad.size * 4 + B_pad * OUT_PAD * 4)

    out_pad = pl.pallas_call(
        statnet_kernel,
        out_shape=jax.ShapeDtypeStruct((B_pad, OUT_PAD), jnp.float32),
        grid_spec=pltpu.PrefetchScalarGridSpec(
            num_scalar_prefetch=0,
            grid=(num_tiles,),
            in_specs=[
                # Activations: tiled along the batch axis (pipelined).
                pl.BlockSpec((N_BRANCH, TM, IN_FEATS), lambda i: (0, i, 0)),
                # Weights / biases: constant block index -> fetched once, resident.
                pl.BlockSpec(Ws_bf.shape, lambda i: (0, 0, 0)),
                pl.BlockSpec(bs.shape, lambda i: (0, 0, 0)),
                pl.BlockSpec(Wn_pad.shape, lambda i: (0, 0)),
                pl.BlockSpec(bn_pad.shape, lambda i: (0, 0)),
            ],
            out_specs=pl.BlockSpec((TM, OUT_PAD), lambda i: (i, 0)),
            scratch_shapes=[pltpu.VMEM((TM, N_BRANCH * HID), jnp.bfloat16)],
        ),
        compiler_params=pltpu.CompilerParams(
            dimension_semantics=(
                ("parallel",) if num_tiles > 1 else ("arbitrary",)),
            vmem_limit_bytes=40 * 1024 * 1024,
        ),
        cost_estimate=pl.CostEstimate(
            flops=flops, transcendentals=0, bytes_accessed=bytes_accessed),
    )(xs, Ws_bf, bs, Wn_pad, bn_pad)

    return out_pad[:B, :OUT]


def statnet_ref(x, Ws, bs, Wn, bn):
    """Pure-JAX f32 reference for correctness checking."""
    B = x.shape[0]
    hs = []
    for i in range(N_BRANCH):
        xi = x[:, :, :, i].reshape(B, IN_FEATS)
        hi = jnp.maximum(xi @ Ws[i] + bs[i], 0.0)
        hs.append(hi)
    x_neck = jnp.concatenate(hs, axis=1)                                  # [B, 4096]
    Wn_full = jnp.concatenate([Wn[i] for i in range(N_BRANCH)], axis=0)   # [4096, 10]
    return x_neck @ Wn_full + bn


if __name__ == "__main__":
    key = jax.random.PRNGKey(0)
    k_x, k_p = jax.random.split(key)

    B = 2
    x = jax.random.normal(k_x, (B, 28, 28, 4), dtype=jnp.float32)
    Ws, bs, Wn, bn = init_params(k_p)

    out = statnet_forward(x, Ws, bs, Wn, bn)
    out = jax.block_until_ready(out)

    ref = statnet_ref(x, Ws, bs, Wn, bn)
    assert out.shape == (B, OUT), out.shape
    # bf16 weights/activations (f32 accumulation) -> looser tolerance vs f32 ref.
    assert jnp.allclose(out, ref, atol=2e-2, rtol=2e-2), "mismatch vs reference"

    print("KERNEL_OK")
</pallas_src>

<mosaic_0001>
module attributes {stable_mosaic.version = 11 : i64} {
  func.func @statnet_kernel(%arg0: i32, %arg1: memref<4x8x784xbf16, #tpu.memory_space<vmem>>, %arg2: memref<4x784x1024xbf16, #tpu.memory_space<vmem>>, %arg3: memref<4x1x1024xf32, #tpu.memory_space<vmem>>, %arg4: memref<4096x128xbf16, #tpu.memory_space<vmem>>, %arg5: memref<1x128xf32, #tpu.memory_space<vmem>>, %arg6: memref<8x128xf32, #tpu.memory_space<vmem>>, %arg7: memref<8x4096xbf16, #tpu.memory_space<vmem>>) attributes {dimension_semantics = [#tpu.dimension_semantics<arbitrary>], iteration_bounds = array<i64: 1>, scalar_prefetch = 0 : i64, scratch_operands = 1 : i64, tpu.core_type = #tpu.core_type<tc>, window_params = [{transform_indices = @transform_0, window_bounds = array<i64: 4, 8, 784>}, {pipeline_mode = #tpu.pipeline_mode<synchronous>, transform_indices = @transform_1, window_bounds = array<i64: 4, 784, 1024>}, {pipeline_mode = #tpu.pipeline_mode<synchronous>, transform_indices = @transform_2, window_bounds = array<i64: 4, 1, 1024>}, {pipeline_mode = #tpu.pipeline_mode<synchronous>, transform_indices = @transform_3, window_bounds = array<i64: 4096, 128>}, {pipeline_mode = #tpu.pipeline_mode<synchronous>, transform_indices = @transform_4, window_bounds = array<i64: 1, 128>}, {transform_indices = @transform_5, window_bounds = array<i64: 8, 128>}]} {
    %c0 = arith.constant 0 : index
    %c0_0 = arith.constant 0 : index
    %c0_1 = arith.constant 0 : index
    %0 = vector.load %arg1[%c0, %c0_0, %c0_1] : memref<4x8x784xbf16, #tpu.memory_space<vmem>>, vector<1x8x784xbf16>
    %1 = vector.shape_cast %0 : vector<1x8x784xbf16> to vector<8x784xbf16>
    %c0_2 = arith.constant 0 : index
    %c0_3 = arith.constant 0 : index
    %c0_4 = arith.constant 0 : index
    %2 = vector.load %arg2[%c0_2, %c0_3, %c0_4] : memref<4x784x1024xbf16, #tpu.memory_space<vmem>>, vector<1x784x1024xbf16>
    %3 = vector.shape_cast %2 : vector<1x784x1024xbf16> to vector<784x1024xbf16>
    %cst = arith.constant dense<0.000000e+00> : vector<8x1024xf32>
    %4 = tpu.matmul %1, %3, %cst {dimension_numbers = #tpu.dot_dimension_numbers<[1], [0], [0], [1], [0, 0, 1, 1], [], []>} : vector<8x784xbf16>, vector<784x1024xbf16>, vector<8x1024xf32> -> vector<8x1024xf32>
    %c0_5 = arith.constant 0 : index
    %c0_6 = arith.constant 0 : index
    %c0_7 = arith.constant 0 : index
    %5 = vector.load %arg3[%c0_5, %c0_6, %c0_7] : memref<4x1x1024xf32, #tpu.memory_space<vmem>>, vector<1x1x1024xf32>
    %6 = vector.shape_cast %5 : vector<1x1x1024xf32> to vector<1x1024xf32>
    %7 = vector.broadcast %6 : vector<1x1024xf32> to vector<8x1024xf32>
    %8 = arith.addf %4, %7 : vector<8x1024xf32>
    %cst_8 = arith.constant 0.000000e+00 : f32
    %9 = vector.broadcast %cst_8 : f32 to vector<8x1024xf32>
    %10 = arith.maximumf %8, %9 : vector<8x1024xf32>
    %11 = arith.truncf %10 : vector<8x1024xf32> to vector<8x1024xbf16>
    %c0_9 = arith.constant 0 : index
    %c0_10 = arith.constant 0 : index
    %12 = vector.load %arg7[%c0_9, %c0_10] : memref<8x4096xbf16, #tpu.memory_space<vmem>>, vector<8x1024xbf16>
    tpu.vector_store %arg7[%c0_9, %c0_10], %11 {strides = array<i32>} : memref<8x4096xbf16, #tpu.memory_space<vmem>>, vector<8x1024xbf16>,
    %c1 = arith.constant 1 : index
    %c0_11 = arith.constant 0 : index
    %c0_12 = arith.constant 0 : index
    %13 = vector.load %arg1[%c1, %c0_11, %c0_12] : memref<4x8x784xbf16, #tpu.memory_space<vmem>>, vector<1x8x784xbf16>
    %14 = vector.shape_cast %13 : vector<1x8x784xbf16> to vector<8x784xbf16>
    %c1_13 = arith.constant 1 : index
    %c0_14 = arith.constant 0 : index
    %c0_15 = arith.constant 0 : index
    %15 = vector.load %arg2[%c1_13, %c0_14, %c0_15] : memref<4x784x1024xbf16, #tpu.memory_space<vmem>>, vector<1x784x1024xbf16>
    %16 = vector.shape_cast %15 : vector<1x784x1024xbf16> to vector<784x1024xbf16>
    %cst_16 = arith.constant dense<0.000000e+00> : vector<8x1024xf32>
    %17 = tpu.matmul %14, %16, %cst_16 {dimension_numbers = #tpu.dot_dimension_numbers<[1], [0], [0], [1], [0, 0, 1, 1], [], []>} : vector<8x784xbf16>, vector<784x1024xbf16>, vector<8x1024xf32> -> vector<8x1024xf32>
    %c1_17 = arith.constant 1 : index
    %c0_18 = arith.constant 0 : index
    %c0_19 = arith.constant 0 : index
    %18 = vector.load %arg3[%c1_17, %c0_18, %c0_19] : memref<4x1x1024xf32, #tpu.memory_space<vmem>>, vector<1x1x1024xf32>
    %19 = vector.shape_cast %18 : vector<1x1x1024xf32> to vector<1x1024xf32>
    %20 = vector.broadcast %19 : vector<1x1024xf32> to vector<8x1024xf32>
    %21 = arith.addf %17, %20 : vector<8x1024xf32>
    %cst_20 = arith.constant 0.000000e+00 : f32
    %22 = vector.broadcast %cst_20 : f32 to vector<8x1024xf32>
    %23 = arith.maximumf %21, %22 : vector<8x1024xf32>
    %24 = arith.truncf %23 : vector<8x1024xf32> to vector<8x1024xbf16>
    %c0_21 = arith.constant 0 : index
    %c1024 = arith.constant 1024 : index
    %25 = vector.load %arg7[%c0_21, %c1024] : memref<8x4096xbf16, #tpu.memory_space<vmem>>, vector<8x1024xbf16>
    tpu.vector_store %arg7[%c0_21, %c1024], %24 {strides = array<i32>} : memref<8x4096xbf16, #tpu.memory_space<vmem>>, vector<8x1024xbf16>,
    %c2 = arith.constant 2 : index
    %c0_22 = arith.constant 0 : index
    %c0_23 = arith.constant 0 : index
    %26 = vector.load %arg1[%c2, %c0_22, %c0_23] : memref<4x8x784xbf16, #tpu.memory_space<vmem>>, vector<1x8x784xbf16>
    %27 = vector.shape_cast %26 : vector<1x8x784xbf16> to vector<8x784xbf16>
    %c2_24 = arith.constant 2 : index
    %c0_25 = arith.constant 0 : index
    %c0_26 = arith.constant 0 : index
    %28 = vector.load %arg2[%c2_24, %c0_25, %c0_26] : memref<4x784x1024xbf16, #tpu.memory_space<vmem>>, vector<1x784x1024xbf16>
    %29 = vector.shape_cast %28 : vector<1x784x1024xbf16> to vector<784x1024xbf16>
    %cst_27 = arith.constant dense<0.000000e+00> : vector<8x1024xf32>
    %30 = tpu.matmul %27, %29, %cst_27 {dimension_numbers = #tpu.dot_dimension_numbers<[1], [0], [0], [1], [0, 0, 1, 1], [], []>} : vector<8x784xbf16>, vector<784x1024xbf16>, vector<8x1024xf32> -> vector<8x1024xf32>
    %c2_28 = arith.constant 2 : index
    %c0_29 = arith.constant 0 : index
    %c0_30 = arith.constant 0 : index
    %31 = vector.load %arg3[%c2_28, %c0_29, %c0_30] : memref<4x1x1024xf32, #tpu.memory_space<vmem>>, vector<1x1x1024xf32>
    %32 = vector.shape_cast %31 : vector<1x1x1024xf32> to vector<1x1024xf32>
    %33 = vector.broadcast %32 : vector<1x1024xf32> to vector<8x1024xf32>
    %34 = arith.addf %30, %33 : vector<8x1024xf32>
    %cst_31 = arith.constant 0.000000e+00 : f32
    %35 = vector.broadcast %cst_31 : f32 to vector<8x1024xf32>
    %36 = arith.maximumf %34, %35 : vector<8x1024xf32>
    %37 = arith.truncf %36 : vector<8x1024xf32> to vector<8x1024xbf16>
    %c0_32 = arith.constant 0 : index
    %c2048 = arith.constant 2048 : index
    %38 = vector.load %arg7[%c0_32, %c2048] : memref<8x4096xbf16, #tpu.memory_space<vmem>>, vector<8x1024xbf16>
    tpu.vector_store %arg7[%c0_32, %c2048], %37 {strides = array<i32>} : memref<8x4096xbf16, #tpu.memory_space<vmem>>, vector<8x1024xbf16>,
    %c3 = arith.constant 3 : index
    %c0_33 = arith.constant 0 : index
    %c0_34 = arith.constant 0 : index
    %39 = vector.load %arg1[%c3, %c0_33, %c0_34] : memref<4x8x784xbf16, #tpu.memory_space<vmem>>, vector<1x8x784xbf16>
    %40 = vector.shape_cast %39 : vector<1x8x784xbf16> to vector<8x784xbf16>
    %c3_35 = arith.constant 3 : index
    %c0_36 = arith.constant 0 : index
    %c0_37 = arith.constant 0 : index
    %41 = vector.load %arg2[%c3_35, %c0_36, %c0_37] : memref<4x784x1024xbf16, #tpu.memory_space<vmem>>, vector<1x784x1024xbf16>
    %42 = vector.shape_cast %41 : vector<1x784x1024xbf16> to vector<784x1024xbf16>
    %cst_38 = arith.constant dense<0.000000e+00> : vector<8x1024xf32>
    %43 = tpu.matmul %40, %42, %cst_38 {dimension_numbers = #tpu.dot_dimension_numbers<[1], [0], [0], [1], [0, 0, 1, 1], [], []>} : vector<8x784xbf16>, vector<784x1024xbf16>, vector<8x1024xf32> -> vector<8x1024xf32>
    %c3_39 = arith.constant 3 : index
    %c0_40 = arith.constant 0 : index
    %c0_41 = arith.constant 0 : index
    %44 = vector.load %arg3[%c3_39, %c0_40, %c0_41] : memref<4x1x1024xf32, #tpu.memory_space<vmem>>, vector<1x1x1024xf32>
    %45 = vector.shape_cast %44 : vector<1x1x1024xf32> to vector<1x1024xf32>
    %46 = vector.broadcast %45 : vector<1x1024xf32> to vector<8x1024xf32>
    %47 = arith.addf %43, %46 : vector<8x1024xf32>
    %cst_42 = arith.constant 0.000000e+00 : f32
    %48 = vector.broadcast %cst_42 : f32 to vector<8x1024xf32>
    %49 = arith.maximumf %47, %48 : vector<8x1024xf32>
    %50 = arith.truncf %49 : vector<8x1024xf32> to vector<8x1024xbf16>
    %c0_43 = arith.constant 0 : index
    %c3072 = arith.constant 3072 : index
    %51 = vector.load %arg7[%c0_43, %c3072] : memref<8x4096xbf16, #tpu.memory_space<vmem>>, vector<8x1024xbf16>
    tpu.vector_store %arg7[%c0_43, %c3072], %50 {strides = array<i32>} : memref<8x4096xbf16, #tpu.memory_space<vmem>>, vector<8x1024xbf16>,
    %c0_44 = arith.constant 0 : index
    %c0_45 = arith.constant 0 : index
    %52 = vector.load %arg7[%c0_44, %c0_45] : memref<8x4096xbf16, #tpu.memory_space<vmem>>, vector<8x4096xbf16>
    %c0_46 = arith.constant 0 : index
    %c0_47 = arith.constant 0 : index
    %53 = vector.load %arg4[%c0_46, %c0_47] : memref<4096x128xbf16, #tpu.memory_space<vmem>>, vector<4096x128xbf16>
    %cst_48 = arith.constant dense<0.000000e+00> : vector<8x128xf32>
    %54 = tpu.matmul %52, %53, %cst_48 {dimension_numbers = #tpu.dot_dimension_numbers<[1], [0], [0], [1], [0, 0, 1, 1], [], []>} : vector<8x4096xbf16>, vector<4096x128xbf16>, vector<8x128xf32> -> vector<8x128xf32>
    %c0_49 = arith.constant 0 : index
    %c0_50 = arith.constant 0 : index
    %55 = vector.load %arg5[%c0_49, %c0_50] : memref<1x128xf32, #tpu.memory_space<vmem>>, vector<1x128xf32>
    %56 = vector.broadcast %55 : vector<1x128xf32> to vector<8x128xf32>
    %57 = arith.addf %54, %56 : vector<8x128xf32>
    %c0_51 = arith.constant 0 : index
    %c0_52 = arith.constant 0 : index
    %58 = vector.load %arg6[%c0_51, %c0_52] : memref<8x128xf32, #tpu.memory_space<vmem>>, vector<8x128xf32>
    tpu.vector_store %arg6[%c0_51, %c0_52], %57 {strides = array<i32>} : memref<8x128xf32, #tpu.memory_space<vmem>>, vector<8x128xf32>,
    return
  }
  func.func @transform_0(%arg0: i32) -> (i32, i32, i32) {
    %c0_i32 = arith.constant 0 : i32
    %c0_i32_0 = arith.constant 0 : i32
    %c0_i32_1 = arith.constant 0 : i32
    return %c0_i32, %arg0, %c0_i32_0 : i32, i32, i32
  }
  func.func @transform_1(%arg0: i32) -> (i32, i32, i32) {
    %c0_i32 = arith.constant 0 : i32
    %c0_i32_0 = arith.constant 0 : i32
    %c0_i32_1 = arith.constant 0 : i32
    %c0_i32_2 = arith.constant 0 : i32
    return %c0_i32, %c0_i32_0, %c0_i32_1 : i32, i32, i32
  }
  func.func @transform_2(%arg0: i32) -> (i32, i32, i32) {
    %c0_i32 = arith.constant 0 : i32
    %c0_i32_0 = arith.constant 0 : i32
    %c0_i32_1 = arith.constant 0 : i32
    %c0_i32_2 = arith.constant 0 : i32
    return %c0_i32, %c0_i32_0, %c0_i32_1 : i32, i32, i32
  }
  func.func @transform_3(%arg0: i32) -> (i32, i32) {
    %c0_i32 = arith.constant 0 : i32
    %c0_i32_0 = arith.constant 0 : i32
    %c0_i32_1 = arith.constant 0 : i32
    return %c0_i32, %c0_i32_0 : i32, i32
  }
  func.func @transform_4(%arg0: i32) -> (i32, i32) {
    %c0_i32 = arith.constant 0 : i32
    %c0_i32_0 = arith.constant 0 : i32
    %c0_i32_1 = arith.constant 0 : i32
    return %c0_i32, %c0_i32_0 : i32, i32
  }
  func.func @transform_5(%arg0: i32) -> (i32, i32) {
    %c0_i32 = arith.constant 0 : i32
    %c0_i32_0 = arith.constant 0 : i32
    return %arg0, %c0_i32 : i32, i32
  }
}

</mosaic_0001>

<bundles_post_ra>
// kernel: tpu_custom_call.1
= control target key start
LH: loop header
LB: loop body
LE: loop exit
PB: predicated region body
PF: predicated region fallthrough
CT: control target
= control target key end

     0   :  { %10 = vsyncpa [#allocation4], 0  ;;  %s18878_s0 = inlined_call_operand.hbm [shape: bf16[4,8,784], index: 0, kind: input, shape index: {}]   ;;  %s18879_s1 = inlined_call_operand.hbm [shape: bf16[4,784,1024], index: 1, kind: input, shape index: {}]   ;;  %s18880_s2 = inlined_call_operand.hbm [shape: f32[4,1,1024], index: 2, kind: input, shape index: {}]   ;;  %s18881_s3 = inlined_call_operand.hbm [shape: bf16[4096,128], index: 3, kind: input, shape index: {}]   ;;  %s18882_s4 = inlined_call_operand.hbm [shape: f32[1,128], index: 4, kind: input, shape index: {}]   ;;  %s18883_s5 = inlined_call_operand.hbm [shape: f32[8,128], index: 5, kind: output, shape index: {}]  }
   0x1   :  { %11 = vsyncpa [#allocation7], 0 }
   0x2   :  { %12 = vsyncpa [#allocation10], 0 }
   0x3   :  { %13 = vsyncpa [#allocation5], 0  ;;  %s18193_s18 = smov [#allocation6]  }
   0x4   :  { %s31_s19 = sshll.u32 %s18193_s18, 4  ;;  %s32_s19 = int_to_ptr.vmem [resolvable:$true] %s31_s19 }
   0x5   :  { %s18073_s20 = scalar_lea.vmem %s32_s19, 200704  ;;  %p18078_p1 = scmp.lt.s32.totalorder %s32_s19, %s32_s19 }
   0x6   :  { %p18074_p0 = scmp.ne.s32.totalorder %s32_s19, %s18073_s20  ;;  %p18079_p2 = scmp.lt.s32.totalorder %s18073_s20, %s18073_s20 }
   0x8   :  { %p18080_p3 = por %p18079_p2, %p18078_p1 }
   0xa   :  { %p18081_p4 = pnand %p18080_p3, %p18074_p0 }
   0xc   :  { %18084 = shalt.err (!%p18081_p4)
}
   0xd   :  { %s18194_s21 = smov 512   ;;  %s18195_s22 = smov 32  }
   0xe   :  { %37 = dma.hbm_to_vmem [thread:$0]  %s18879_s1, 200704, %s32_s19, [#allocation7], %s18194_s21, %s18194_s21, %s18195_s22  }
   0xf   :  { %s18196_s25 = smov [#allocation9]  }
  0x10   :  { %s55_s26 = sshll.u32 %s18196_s25, 4  ;;  %s56_s26 = int_to_ptr.vmem [resolvable:$true] %s55_s26 }
  0x11   :  { %s18093_s27 = scalar_lea.vmem %s56_s26, 32768  ;;  %p18098_p6 = scmp.lt.s32.totalorder %s56_s26, %s56_s26 }
  0x12   :  { %p18094_p5 = scmp.ne.s32.totalorder %s56_s26, %s18093_s27  ;;  %p18099_p7 = scmp.lt.s32.totalorder %s18093_s27, %s18093_s27 }
  0x14   :  { %p18100_p8 = por %p18099_p7, %p18098_p6 }
  0x16   :  { %p18101_p9 = pnand %p18100_p8, %p18094_p5 }
  0x18   :  { %18104 = shalt.err (!%p18101_p9)
}
  0x19   :  { %s18197_s28 = smov 64   ;;  %s18198_s29 = smov 4  }
  0x1a   :  { %61 = dma.hbm_to_vmem [thread:$0]  %s18881_s3, 32768, %s56_s26, [#allocation10], %s18197_s28, %s18197_s28, %s18198_s29  }
  0x1b   :  { %s18199_s7 = smov [#allocation3]  }
  0x1c   :  { %s19_s8 = sshll.u32 %s18199_s7, 4  ;;  %s20_s8 = int_to_ptr.vmem [resolvable:$true] %s19_s8 }
  0x1d   :  { %s18113_s1 = scalar_lea.vmem %s20_s8, 1792  ;;  %p18118_p11 = scmp.lt.s32.totalorder %s20_s8, %s20_s8 }
  0x1e   :  { %p18114_p10 = scmp.ne.s32.totalorder %s20_s8, %s18113_s1  ;;  %p18119_p12 = scmp.lt.s32.totalorder %s18113_s1, %s18113_s1 }
  0x20   :  { %p18120_p13 = por %p18119_p12, %p18118_p11 }
  0x22   :  { %p18121_p0 = pnand %p18120_p13, %p18114_p10 }
  0x24   :  { %18124 = shalt.err (!%p18121_p0)
}
  0x25   :  { %s18200_s9 = smov 448   ;;  %s18201_s10 = smov 28  }
  0x26   :  { %25 = dma.hbm_to_vmem [thread:$0]  %s18878_s0, 1792, %s20_s8, [#allocation4], %s18200_s9, %s18200_s9, %s18201_s10  }
  0x27   :  { %s18202_s13 = smov [#allocation8]  }
  0x28   :  { %s43_s14 = sshll.u32 %s18202_s13, 4  ;;  %s44_s14 = int_to_ptr.vmem [resolvable:$true] %s43_s14 }
  0x29   :  { %s18133_s3 = scalar_lea.vmem %s44_s14, 512  ;;  %p18138_p2 = scmp.lt.s32.totalorder %s44_s14, %s44_s14 }
  0x2a   :  { %p18134_p1 = scmp.ne.s32.totalorder %s44_s14, %s18133_s3  ;;  %p18139_p3 = scmp.lt.s32.totalorder %s18133_s3, %s18133_s3 }
  0x2c   :  { %p18140_p4 = por %p18139_p3, %p18138_p2 }
  0x2e   :  { %p18141_p5 = pnand %p18140_p4, %p18134_p1 }
  0x30   :  { %18144 = shalt.err (!%p18141_p5)
}
  0x31   :  { %s18203_s15 = smov 128   ;;  %s18204_s16 = smov 8  }
  0x32   :  { %49 = dma.hbm_to_vmem [thread:$0]  %s18880_s2, 512, %s44_s14, [#allocation7], %s18203_s15, %s18203_s15, %s18204_s16  }
  0x33   :  { %s18205_s19 = smov [#allocation11]  }
  0x34   :  { %s68_s20 = sshll.u32 %s18205_s19, 4  ;;  %s69_s20 = int_to_ptr.vmem [resolvable:$true] %s68_s20 }
  0x35   :  { %s18153_s0 = scalar_lea.vmem %s69_s20, 16  ;;  %s18157_s21 = scalar_lea.vmem %s69_s20, 32 }
  0x36   :  { %p18154_p6 = scmp.ne.s32.totalorder %s69_s20, %s18153_s0  ;;  %p18158_p7 = scmp.lt.s32.totalorder %s69_s20, %s69_s20 }
  0x37   :  { %p18159_p8 = scmp.lt.s32.totalorder %s18157_s21, %s18153_s0 }
  0x39   :  { %p18160_p9 = por %p18159_p8, %p18158_p7 }
  0x3b   :  { %p18161_p10 = pnand %p18160_p9, %p18154_p6 }
  0x3d   :  { %18164 = shalt.err (!%p18161_p10)
}
  0x3e   :  { %71 = dma.hbm_to_vmem [thread:$0]  %s18882_s4, 16, %s69_s20, [#allocation10]  }
  0x3f   :  { %18185 = dma.done.wait [#allocation4], 1792  }
  0x40   :  { %18186 = vsyncadd [#allocation4], 4294965504 }
  0x41   :  { %18187 = dma.done.wait [#allocation7], 201216  }
  0x42   :  { %18188 = vsyncadd [#allocation7], 4294766080 }
  0x43   :  { %18189 = dma.done.wait [#allocation10], 32784  }
  0x44   :  { %18190 = vsyncadd [#allocation10], 4294934512  ;;  %v148_v0 = vld [vmem:[#allocation6 + $0x1c0] sm:$0xff]  ;;  %v18253_v53 = vld [vmem:[#allocation3] sm:$0xff]  ;;  %vm2510_vm0 = vcmask 130048   ;;  %s18207_s2 = smov [#allocation12]  }
  0x45   :  { %v152_v1 = vld [vmem:[#allocation6 + $0x1e0] sm:$0xff]  ;;  %v18255_v54 = vld [vmem:[#allocation3 + $0x8] sm:$0xff]  ;;  %v18259_v58 = vcombine.high %v18253_v53, %v18253_v53  ;;  %s15428_s4 = sshll.u32 %s18207_s2, 4  ;;  %s15429_s4 = int_to_ptr.vmem [resolvable:$true] %s15428_s4 }
  0x46   :  { %v276_v2 = vld [vmem:[#allocation6 + $0x5c0] sm:$0xff]  ;;  %v15503_v3 = vcombine.high %v148_v0, %v152_v1  ;;  %v15502_v5 = vcombine.low %v148_v0, %v152_v1  ;;  %v18263_v59 = vcombine.high %v18255_v54, %v18255_v54  ;;  %s18165_s24 = scalar_lea.vmem %s15429_s4, 128  ;;  %p18170_p12 = scmp.lt.s32.totalorder %s15429_s4, %s15429_s4 }
  0x47   :  { %v280_v4 = vld [vmem:[#allocation6 + $0x5e0] sm:$0xff]  ;;  %2546 = vmatprep.mubr.bf16.mxu0 %v18259_v58  ;;  %p18166_p11 = scmp.ne.s32.totalorder %s15429_s4, %s18165_s24  ;;  %p18171_p13 = scmp.lt.s32.totalorder %s18165_s24, %s18165_s24 }
  0x48   :  { %v140_v6 = vld [vmem:[#allocation6 + $0x180] sm:$0xff]  ;;  %v15631_v8 = vcombine.high %v276_v2, %v280_v4  ;;  %v15630_v9 = vcombine.low %v276_v2, %v280_v4  ;;  %2514 = vmatprep.subr.bf16.mxu0 %v15503_v3  ;;  %2587 = vmatprep.mubr.bf16.mxu1 %v18263_v59 }
  0x49   :  { %v144_v7 = vld [vmem:[#allocation6 + $0x1a0] sm:$0xff]  ;;  %2515 = vmatpush1.bf16.msra.mxu0 %v15502_v5  ;;  %p18172_p0 = por %p18171_p13, %p18170_p12 }
  0x4a   :  { %v15495_v10 = vcombine.high %v140_v6, %v144_v7  ;;  %v268_v11 = vld [vmem:[#allocation6 + $0x580] sm:$0xff]  ;;  %2555 = vmatprep.subr.bf16.mxu1 %v15631_v8  ;;  %v15494_v18 = vcombine.low %v140_v6, %v144_v7 }
  0x4b   :  { %v272_v12 = vld [vmem:[#allocation6 + $0x5a0] sm:$0xff]  ;;  %2556 = vmatpush1.bf16.msra.mxu1 %v15630_v9  ;;  %p18173_p1 = pnand %p18172_p0, %p18166_p11 }
  0x4c   :  { %v132_v13 = vld [vmem:[#allocation6 + $0x140] sm:$0xff]  ;;  %v15623_v14 = vcombine.high %v268_v11, %v272_v12  ;;  %2516 = vmatprep.subr.bf16.mxu0 %v15495_v10  ;;  %v15622_v19 = vcombine.low %v268_v11, %v272_v12 }
  0x4d   :  { %v136_v15 = vld [vmem:[#allocation6 + $0x160] sm:$0xff]  ;;  %2517 = vmatpush1.bf16.msra.mxu0 %v15494_v18 }
  0x4e   :  { %v260_v16 = vld [vmem:[#allocation6 + $0x540] sm:$0xff]  ;;  %v15487_v20 = vcombine.high %v132_v13, %v136_v15  ;;  %2557 = vmatprep.subr.bf16.mxu1 %v15623_v14  ;;  %v15486_v26 = vcombine.low %v132_v13, %v136_v15 }
  0x4f   :  { %v264_v17 = vld [vmem:[#allocation6 + $0x560] sm:$0xff]  ;;  %2558 = vmatpush1.bf16.msra.mxu1 %v15622_v19 }
  0x50   :  { %v15615_v21 = vcombine.high %v260_v16, %v264_v17  ;;  %v124_v22 = vld [vmem:[#allocation6 + $0x100] sm:$0xff]  ;;  %2518 = vmatprep.subr.bf16.mxu0 %v15487_v20  ;;  %v15614_v27 = vcombine.low %v260_v16, %v264_v17 }
  0x51   :  { %v128_v23 = vld [vmem:[#allocation6 + $0x120] sm:$0xff]  ;;  %2519 = vmatpush1.bf16.msra.mxu0 %v15486_v26 }
  0x52   :  { %v252_v24 = vld [vmem:[#allocation6 + $0x500] sm:$0xff]  ;;  %v15479_v28 = vcombine.high %v124_v22, %v128_v23  ;;  %2559 = vmatprep.subr.bf16.mxu1 %v15615_v21  ;;  %v15478_v34 = vcombine.low %v124_v22, %v128_v23 }
  0x53   :  { %v256_v25 = vld [vmem:[#allocation6 + $0x520] sm:$0xff]  ;;  %2560 = vmatpush1.bf16.msra.mxu1 %v15614_v27 }
  0x54   :  { %v15607_v29 = vcombine.high %v252_v24, %v256_v25  ;;  %v116_v30 = vld [vmem:[#allocation6 + $0xc0] sm:$0xff]  ;;  %2520 = vmatprep.subr.bf16.mxu0 %v15479_v28  ;;  %v15606_v35 = vcombine.low %v252_v24, %v256_v25 }
  0x55   :  { %v120_v31 = vld [vmem:[#allocation6 + $0xe0] sm:$0xff]  ;;  %2521 = vmatpush1.bf16.msra.mxu0 %v15478_v34 }
  0x56   :  { %v244_v32 = vld [vmem:[#allocation6 + $0x4c0] sm:$0xff]  ;;  %v15471_v36 = vcombine.high %v116_v30, %v120_v31  ;;  %2561 = vmatprep.subr.bf16.mxu1 %v15607_v29  ;;  %v15470_v42 = vcombine.low %v116_v30, %v120_v31 }
  0x57   :  { %v248_v33 = vld [vmem:[#allocation6 + $0x4e0] sm:$0xff]  ;;  %2562 = vmatpush1.bf16.msra.mxu1 %v15606_v35 }
  0x58   :  { %v15599_v37 = vcombine.high %v244_v32, %v248_v33  ;;  %v108_v38 = vld [vmem:[#allocation6 + $0x80] sm:$0xff]  ;;  %2522 = vmatprep.subr.bf16.mxu0 %v15471_v36  ;;  %v15598_v43 = vcombine.low %v244_v32, %v248_v33 }
  0x59   :  { %v112_v39 = vld [vmem:[#allocation6 + $0xa0] sm:$0xff]  ;;  %2523 = vmatpush1.bf16.msra.mxu0 %v15470_v42 }
  0x5a   :  { %v236_v40 = vld [vmem:[#allocation6 + $0x480] sm:$0xff]  ;;  %v15463_v44 = vcombine.high %v108_v38, %v112_v39  ;;  %2563 = vmatprep.subr.bf16.mxu1 %v15599_v37  ;;  %v15462_v50 = vcombine.low %v108_v38, %v112_v39 }
  0x5b   :  { %v240_v41 = vld [vmem:[#allocation6 + $0x4a0] sm:$0xff]  ;;  %2564 = vmatpush1.bf16.msra.mxu1 %v15598_v43 }
  0x5c   :  { %v15591_v45 = vcombine.high %v236_v40, %v240_v41  ;;  %v100_v46 = vld [vmem:[#allocation6 + $0x40] sm:$0xff]  ;;  %2524 = vmatprep.subr.bf16.mxu0 %v15463_v44  ;;  %v15590_v51 = vcombine.low %v236_v40, %v240_v41 }
  0x5d   :  { %v104_v47 = vld [vmem:[#allocation6 + $0x60] sm:$0xff]  ;;  %2525 = vmatpush1.bf16.msra.mxu0 %v15462_v50 }
  0x5e   :  { %v228_v48 = vld [vmem:[#allocation6 + $0x440] sm:$0xff]  ;;  %v15455_v52 = vcombine.high %v100_v46, %v104_v47  ;;  %2565 = vmatprep.subr.bf16.mxu1 %v15591_v45  ;;  %v15454_v62 = vcombine.low %v100_v46, %v104_v47 }
  0x5f   :  { %v232_v49 = vld [vmem:[#allocation6 + $0x460] sm:$0xff]  ;;  %2566 = vmatpush1.bf16.msra.mxu1 %v15590_v51 }
  0x60   :  { %v15583_v55 = vcombine.high %v228_v48, %v232_v49  ;;  %v92_v56 = vld [vmem:[#allocation6] sm:$0xff]  ;;  %2526 = vmatprep.subr.bf16.mxu0 %v15455_v52  ;;  %v15582_v63 = vcombine.low %v228_v48, %v232_v49 }
  0x61   :  { %v96_v57 = vld [vmem:[#allocation6 + $0x20] sm:$0xff]  ;;  %2527 = vmatpush1.bf16.msra.mxu0 %v15454_v62 }
  0x62   :  { %v220_v60 = vld [vmem:[#allocation6 + $0x400] sm:$0xff]  ;;  %v15447_v0 = vcombine.high %v92_v56, %v96_v57  ;;  %2567 = vmatprep.subr.bf16.mxu1 %v15583_v55  ;;  %v15446_v6 = vcombine.low %v92_v56, %v96_v57 }
  0x63   :  { %v224_v61 = vld [vmem:[#allocation6 + $0x420] sm:$0xff]  ;;  %2568 = vmatpush1.bf16.msra.mxu1 %v15582_v63 }
  0x64   :  { %v15575_v1 = vcombine.high %v220_v60, %v224_v61  ;;  %v212_v2 = vld [vmem:[#allocation6 + $0x3c0] sm:$0xff]  ;;  %2528 = vmatprep.subr.bf16.mxu0 %v15447_v0  ;;  %v15574_v7 = vcombine.low %v220_v60, %v224_v61 }
  0x65   :  { %v216_v3 = vld [vmem:[#allocation6 + $0x3e0] sm:$0xff]  ;;  %2529 = vmatpush1.bf16.msra.mxu0 %v15446_v6 }
  0x66   :  { %v340_v4 = vld [vmem:[#allocation6 + $0x7c0] sm:$0xff]  ;;  %v15567_v8 = vcombine.high %v212_v2, %v216_v3  ;;  %2569 = vmatprep.subr.bf16.mxu1 %v15575_v1  ;;  %v15566_v14 = vcombine.low %v212_v2, %v216_v3 }
  0x67   :  { %v344_v5 = vld [vmem:[#allocation6 + $0x7e0] sm:$0xff]  ;;  %2570 = vmatpush1.bf16.msra.mxu1 %v15574_v7 }
  0x68   :  { %v15695_v9 = vcombine.high %v340_v4, %v344_v5  ;;  %v204_v10 = vld [vmem:[#allocation6 + $0x380] sm:$0xff]  ;;  %2530 = vmatprep.subr.bf16.mxu0 %v15567_v8  ;;  %v15694_v15 = vcombine.low %v340_v4, %v344_v5 }
  0x69   :  { %v208_v11 = vld [vmem:[#allocation6 + $0x3a0] sm:$0xff]  ;;  %2531 = vmatpush2.bf16.msra.mxu0 %v15566_v14 }
  0x6a   :  { %v332_v12 = vld [vmem:[#allocation6 + $0x780] sm:$0xff]  ;;  %v15559_v16 = vcombine.high %v204_v10, %v208_v11  ;;  %2571 = vmatprep.subr.bf16.mxu1 %v15695_v9  ;;  %v15558_v22 = vcombine.low %v204_v10, %v208_v11 }
  0x6b   :  { %v336_v13 = vld [vmem:[#allocation6 + $0x7a0] sm:$0xff]  ;;  %2572 = vmatpush2.bf16.msra.mxu1 %v15694_v15 }
  0x6c   :  { %v15687_v17 = vcombine.high %v332_v12, %v336_v13  ;;  %v196_v18 = vld [vmem:[#allocation6 + $0x340] sm:$0xff]  ;;  %2532 = vmatprep.subr.bf16.mxu0 %v15559_v16  ;;  %v15686_v23 = vcombine.low %v332_v12, %v336_v13  ;;  %v18269_v16 = vcombine.low %v18253_v53, %v18253_v53 }
  0x6d   :  { %v200_v19 = vld [vmem:[#allocation6 + $0x360] sm:$0xff]  ;;  %2533 = vmatpush2.bf16.msra.mxu0 %v15558_v22 }
  0x6e   :  { %v324_v20 = vld [vmem:[#allocation6 + $0x740] sm:$0xff]  ;;  %v15551_v24 = vcombine.high %v196_v18, %v200_v19  ;;  %2573 = vmatprep.subr.bf16.mxu1 %v15687_v17  ;;  %v15550_v30 = vcombine.low %v196_v18, %v200_v19  ;;  %v149_v17 = vld [vmem:[#allocation6 + $0x1c8] sm:$0xff]  ;;  %v18273_v19 = vcombine.low %v18255_v54, %v18255_v54 }
  0x6f   :  { %v328_v21 = vld [vmem:[#allocation6 + $0x760] sm:$0xff]  ;;  %2574 = vmatpush2.bf16.msra.mxu1 %v15686_v23  ;;  %v153_v18 = vld [vmem:[#allocation6 + $0x1e8] sm:$0xff] }
  0x70   :  { %v15679_v25 = vcombine.high %v324_v20, %v328_v21  ;;  %v188_v26 = vld [vmem:[#allocation6 + $0x300] sm:$0xff]  ;;  %2534 = vmatprep.subr.bf16.mxu0 %v15551_v24  ;;  %v15678_v31 = vcombine.low %v324_v20, %v328_v21 }
  0x71   :  { %v192_v27 = vld [vmem:[#allocation6 + $0x320] sm:$0xff]  ;;  %2535 = vmatpush2.bf16.msra.mxu0 %v15550_v30 }
  0x72   :  { %v316_v28 = vld [vmem:[#allocation6 + $0x700] sm:$0xff]  ;;  %v15543_v32 = vcombine.high %v188_v26, %v192_v27  ;;  %2575 = vmatprep.subr.bf16.mxu1 %v15679_v25  ;;  %v15542_v38 = vcombine.low %v188_v26, %v192_v27  ;;  %v15505_v26 = vcombine.high %v149_v17, %v153_v18 }
  0x73   :  { %v320_v29 = vld [vmem:[#allocation6 + $0x720] sm:$0xff]  ;;  %2576 = vmatpush2.bf16.msra.mxu1 %v15678_v31  ;;  %v18884_v31 = vmov 0  }
  0x74   :  { %v15671_v33 = vcombine.high %v316_v28, %v320_v29  ;;  %v180_v34 = vld [vmem:[#allocation6 + $0x2c0] sm:$0xff]  ;;  %2536 = vmatprep.subr.bf16.mxu0 %v15543_v32  ;;  %v15670_v39 = vcombine.low %v316_v28, %v320_v29  ;;  %v141_v28 = vld [vmem:[#allocation6 + $0x188] sm:$0xff] }
  0x75   :  { %v184_v35 = vld [vmem:[#allocation6 + $0x2e0] sm:$0xff]  ;;  %2537 = vmatpush2.bf16.msra.mxu0 %v15542_v38  ;;  %v145_v29 = vld [vmem:[#allocation6 + $0x1a8] sm:$0xff] }
  0x76   :  { %v308_v36 = vld [vmem:[#allocation6 + $0x6c0] sm:$0xff]  ;;  %v15535_v40 = vcombine.high %v180_v34, %v184_v35  ;;  %2577 = vmatprep.subr.bf16.mxu1 %v15671_v33  ;;  %v15534_v46 = vcombine.low %v180_v34, %v184_v35  ;;  %v17775_v32 = vld [vmem:[#allocation3 + $0x18] ss:$0 sps:$4 sm:$0xff]   ;;  %v15504_v35 = vcombine.low %v149_v17, %v153_v18 }
  0x77   :  { %v312_v37 = vld [vmem:[#allocation6 + $0x6e0] sm:$0xff]  ;;  %2578 = vmatpush2.bf16.msra.mxu1 %v15670_v39  ;;  %v137_v38 = vld [vmem:[#allocation6 + $0x168] sm:$0xff] }
  0x78   :  { %v15663_v41 = vcombine.high %v308_v36, %v312_v37  ;;  %v172_v42 = vld [vmem:[#allocation6 + $0x280] sm:$0xff]  ;;  %2538 = vmatprep.subr.bf16.mxu0 %v15535_v40  ;;  %v15662_v47 = vcombine.low %v308_v36, %v312_v37  ;;  %v133_v37 = vld [vmem:[#allocation6 + $0x148] sm:$0xff]  ;;  %v15497_v40 = vcombine.high %v141_v28, %v145_v29 }
  0x79   :  { %v176_v43 = vld [vmem:[#allocation6 + $0x2a0] sm:$0xff]  ;;  %2539 = vmatpush2.bf16.msra.mxu0 %v15534_v46  ;;  %v129_v46 = vld [vmem:[#allocation6 + $0x128] sm:$0xff] }
  0x7a   :  { %v300_v44 = vld [vmem:[#allocation6 + $0x680] sm:$0xff]  ;;  %v15527_v48 = vcombine.high %v172_v42, %v176_v43  ;;  %2579 = vmatprep.subr.bf16.mxu1 %v15663_v41  ;;  %v15526_v56 = vcombine.low %v172_v42, %v176_v43  ;;  %v15496_v43 = vcombine.low %v141_v28, %v145_v29  ;;  %v93_v18 = vld [vmem:[#allocation6 + $0x8] sm:$0xff] }
  0x7b   :  { %v304_v45 = vld [vmem:[#allocation6 + $0x6a0] sm:$0xff]  ;;  %2580 = vmatpush2.bf16.msra.mxu1 %v15662_v47  ;;  %v217_v28 = vld [vmem:[#allocation6 + $0x3e8] sm:$0xff] }
  0x7c   :  { %v15655_v49 = vcombine.high %v300_v44, %v304_v45  ;;  %v164_v50 = vld [vmem:[#allocation6 + $0x240] sm:$0xff]  ;;  %2540 = vmatprep.subr.bf16.mxu0 %v15527_v48  ;;  %v15654_v57 = vcombine.low %v300_v44, %v304_v45  ;;  %v125_v45 = vld [vmem:[#allocation6 + $0x108] sm:$0xff]  ;;  %v15489_v48 = vcombine.high %v133_v37, %v137_v38 }
  0x7d   :  { %v168_v51 = vld [vmem:[#allocation6 + $0x260] sm:$0xff]  ;;  %2541 = vmatpush2.bf16.msra.mxu0 %v15526_v56  ;;  %v121_v56 = vld [vmem:[#allocation6 + $0xe8] sm:$0xff] }
  0x7e   :  { %v292_v52 = vld [vmem:[#allocation6 + $0x640] sm:$0xff]  ;;  %v15519_v60 = vcombine.high %v164_v50, %v168_v51  ;;  %2581 = vmatprep.subr.bf16.mxu1 %v15655_v49  ;;  %v15518_v2 = vcombine.low %v164_v50, %v168_v51  ;;  %v15488_v51 = vcombine.low %v133_v37, %v137_v38  ;;  %v209_v37 = vld [vmem:[#allocation6 + $0x3a8] sm:$0xff] }
  0x7f   :  { %v296_v55 = vld [vmem:[#allocation6 + $0x660] sm:$0xff]  ;;  %2582 = vmatpush2.bf16.msra.mxu1 %v15654_v57 }
  0x80   :  { %v15647_v61 = vcombine.high %v292_v52, %v296_v55  ;;  %v156_v62 = vld [vmem:[#allocation6 + $0x200] sm:$0xff]  ;;  %2542 = vmatprep.subr.bf16.mxu0 %v15519_v60  ;;  %v15646_v3 = vcombine.low %v292_v52, %v296_v55  ;;  %v117_v55 = vld [vmem:[#allocation6 + $0xc8] sm:$0xff]  ;;  %v15481_v60 = vcombine.high %v125_v45, %v129_v46 }
  0x81   :  { %v160_v63 = vld [vmem:[#allocation6 + $0x220] sm:$0xff]  ;;  %2543 = vmatpush2.bf16.msra.mxu0 %v15518_v2  ;;  %v113_v2 = vld [vmem:[#allocation6 + $0xa8] sm:$0xff] }
  0x82   :  { %v284_v0 = vld [vmem:[#allocation6 + $0x600] sm:$0xff]  ;;  %v15511_v4 = vcombine.high %v156_v62, %v160_v63  ;;  %2583 = vmatprep.subr.bf16.mxu1 %v15647_v61  ;;  %v15510_v10 = vcombine.low %v156_v62, %v160_v63  ;;  %v15480_v63 = vcombine.low %v125_v45, %v129_v46  ;;  %v201_v45 = vld [vmem:[#allocation6 + $0x368] sm:$0xff] }
  0x83   :  { %v288_v1 = vld [vmem:[#allocation6 + $0x620] sm:$0xff]  ;;  %2584 = vmatpush2.bf16.msra.mxu1 %v15646_v3 }
  0x84   :  { %v15639_v5 = vcombine.high %v284_v0, %v288_v1  ;;  %v404_v6 = vld [vmem:[#allocation6 + $0x9c0] sm:$0xff]  ;;  %2544 = vmatprep.subr.bf16.mxu0 %v15511_v4  ;;  %v15638_v11 = vcombine.low %v284_v0, %v288_v1  ;;  %v109_v1 = vld [vmem:[#allocation6 + $0x88] sm:$0xff]  ;;  %v15473_v4 = vcombine.high %v117_v55, %v121_v56 }
  0x85   :  { %v408_v7 = vld [vmem:[#allocation6 + $0x9e0] sm:$0xff]  ;;  %2545 = vmatpush2.bf16.msra.mxu0 %v15510_v10  ;;  %v105_v10 = vld [vmem:[#allocation6 + $0x68] sm:$0xff] }
  0x86   :  { %v476_v8 = vld [vmem:[#allocation6 + $0xc00] sm:$0xff]  ;;  %v15759_v12 = vcombine.high %v404_v6, %v408_v7  ;;  %2585 = vmatprep.subr.bf16.mxu1 %v15639_v5  ;;  %v15758_v20 = vcombine.low %v404_v6, %v408_v7  ;;  %v15472_v7 = vcombine.low %v117_v55, %v121_v56  ;;  %v193_v55 = vld [vmem:[#allocation6 + $0x328] sm:$0xff] }
  0x87   :  { %v480_v9 = vld [vmem:[#allocation6 + $0xc20] sm:$0xff]  ;;  %2586 = vmatpush2.bf16.msra.mxu1 %v15638_v11 }
  0x88   :  { %v15831_v13 = vcombine.high %v476_v8, %v480_v9  ;;  %v396_v14 = vld [vmem:[#allocation6 + $0x980] sm:$0xff]  ;;  %2596 = vmatprep.subr.bf16.mxu0 %v15759_v12  ;;  %v15830_v22 = vcombine.low %v476_v8, %v480_v9  ;;  %2547 = vmatmul.mubr.bf16.vlgmr.msra.gmra.mxu0 %v18269_v16  ;;  %v101_v9 = vld [vmem:[#allocation6 + $0x48] sm:$0xff]  ;;  %v15465_v12 = vcombine.high %v109_v1, %v113_v2 }
  0x89   :  { %v400_v15 = vld [vmem:[#allocation6 + $0x9a0] sm:$0xff]  ;;  %2597 = vmatpush1.bf16.msra.mxu0 %v15758_v20  ;;  %v97_v20 = vld [vmem:[#allocation6 + $0x28] sm:$0xff] }
  0x8a   :  { %v18275_v21 = vld [vmem:[#allocation3 + $0x10] sm:$0xff]  ;;  %v15751_v23 = vcombine.high %v396_v14, %v400_v15  ;;  %2651 = vmatprep.subr.bf16.mxu1 %v15831_v13  ;;  %2588 = vmatmul.mubr.bf16.vlgmr.msra.gmra.mxu1 %v18273_v19  ;;  %v15750_v54 = vcombine.low %v396_v14, %v400_v15  ;;  %v15464_v15 = vcombine.low %v109_v1, %v113_v2  ;;  %v185_v1 = vld [vmem:[#allocation6 + $0x2e8] sm:$0xff] }
  0x8b   :  { %v388_v24 = vld [vmem:[#allocation6 + $0x940] sm:$0xff]  ;;  %v18280_v53 = vcombine.high %v18275_v21, %v18275_v21  ;;  %2652 = vmatpush1.bf16.msra.mxu1 %v15830_v22  ;;  %2669 = vmatprep.mubr.bf16.mxu1 %v18884_v31 }
  0x8c   :  { %v392_v25 = vld [vmem:[#allocation6 + $0x960] sm:$0xff]  ;;  %2598 = vmatprep.subr.bf16.mxu0 %v15751_v23  ;;  %2678 = vmatprep.subr.bf16.mxu1 %v15505_v26  ;;  %v15457_v23 = vcombine.high %v101_v9, %v105_v10  ;;  %v15456_v26 = vcombine.low %v101_v9, %v105_v10  ;;  %v177_v9 = vld [vmem:[#allocation6 + $0x2a8] sm:$0xff] }
  0x8d   :  { %v15743_v27 = vcombine.high %v388_v24, %v392_v25  ;;  %v380_v30 = vld [vmem:[#allocation6 + $0x900] sm:$0xff]  ;;  %2628 = vmatprep.mubr.bf16.mxu0 %v18280_v53  ;;  %2599 = vmatpush1.bf16.msra.mxu0 %v15750_v54  ;;  %v15742_v34 = vcombine.low %v388_v24, %v392_v25 }
  0x8e   :  { %v384_v33 = vld [vmem:[#allocation6 + $0x920] sm:$0xff] }
  0x8f   :  { %2600 = vmatprep.subr.bf16.mxu0 %v15743_v27  ;;  %v15735_v36 = vcombine.high %v380_v30, %v384_v33  ;;  %v372_v39 = vld [vmem:[#allocation6 + $0x8c0] sm:$0xff]  ;;  %v15734_v42 = vcombine.low %v380_v30, %v384_v33  ;;  %v213_v27 = vld [vmem:[#allocation6 + $0x3c8] sm:$0xff]  ;;  %v15449_v30 = vcombine.high %v93_v18, %v97_v20 }
  0x90   :  { %v376_v41 = vld [vmem:[#allocation6 + $0x8e0] sm:$0xff] }
  0x91   :  { %2601 = vmatpush1.bf16.msra.mxu0 %v15742_v34  ;;  %v15727_v44 = vcombine.high %v372_v39, %v376_v41  ;;  %v364_v47 = vld [vmem:[#allocation6 + $0x880] sm:$0xff]  ;;  %v15726_v50 = vcombine.low %v372_v39, %v376_v41  ;;  %v15448_v34 = vcombine.low %v93_v18, %v97_v20  ;;  %v15569_v39 = vcombine.high %v213_v27, %v217_v28  ;;  %v169_v18 = vld [vmem:[#allocation6 + $0x268] sm:$0xff] }
  0x92   :  { %15838 = vmatmul.mubr.msk.bf16.vlgmr.msra.gmra.mxu1 %vm2510_vm0, %v17775_v32  ;;  %2602 = vmatprep.subr.bf16.mxu0 %v15735_v36  ;;  %v368_v49 = vld [vmem:[#allocation6 + $0x8a0] sm:$0xff]  ;;  %v205_v36 = vld [vmem:[#allocation6 + $0x388] sm:$0xff] }
  0x93   :  { %2679 = vmatpush1.bf16.msra.mxu1 %v15504_v35  ;;  %2710 = vmatprep.mubr.bf16.mxu1 %v18259_v58  ;;  %v15719_v52 = vcombine.high %v364_v47, %v368_v49  ;;  %v356_v57 = vld [vmem:[#allocation6 + $0x840] sm:$0xff]  ;;  %v15718_v62 = vcombine.low %v364_v47, %v368_v49  ;;  %v15561_v47 = vcombine.high %v205_v36, %v209_v37  ;;  %v277_v20 = vld [vmem:[#allocation6 + $0x5c8] sm:$0xff] }
  0x94   :  { %2680 = vmatprep.subr.bf16.mxu1 %v15497_v40  ;;  %v360_v61 = vld [vmem:[#allocation6 + $0x860] sm:$0xff] }
  0x95   :  { %2603 = vmatpush1.bf16.msra.mxu0 %v15734_v42  ;;  %v15711_v0 = vcombine.high %v356_v57, %v360_v61  ;;  %v348_v3 = vld [vmem:[#allocation6 + $0x800] sm:$0xff]  ;;  %v15710_v6 = vcombine.low %v356_v57, %v360_v61  ;;  %v15568_v42 = vcombine.low %v213_v27, %v217_v28  ;;  %v161_v27 = vld [vmem:[#allocation6 + $0x228] sm:$0xff] }
  0x96   :  { %2604 = vmatprep.subr.bf16.mxu0 %v15727_v44  ;;  %v352_v5 = vld [vmem:[#allocation6 + $0x820] sm:$0xff]  ;;  %v197_v44 = vld [vmem:[#allocation6 + $0x348] sm:$0xff] }
  0x97   :  { %2681 = vmatpush1.bf16.msra.mxu1 %v15496_v43  ;;  %v15703_v8 = vcombine.high %v348_v3, %v352_v5  ;;  %v468_v11 = vld [vmem:[#allocation6 + $0xbc0] sm:$0xff]  ;;  %v15702_v14 = vcombine.low %v348_v3, %v352_v5  ;;  %v15553_v57 = vcombine.high %v197_v44, %v201_v45  ;;  %v269_v28 = vld [vmem:[#allocation6 + $0x588] sm:$0xff] }
  0x98   :  { %2682 = vmatprep.subr.bf16.mxu1 %v15489_v48  ;;  %v472_v13 = vld [vmem:[#allocation6 + $0xbe0] sm:$0xff] }
  0x99   :  { %2605 = vmatpush1.bf16.msra.mxu0 %v15726_v50  ;;  %v15823_v17 = vcombine.high %v468_v11, %v472_v13  ;;  %v460_v22 = vld [vmem:[#allocation6 + $0xb80] sm:$0xff]  ;;  %v15822_v25 = vcombine.low %v468_v11, %v472_v13  ;;  %v15560_v50 = vcombine.low %v205_v36, %v209_v37  ;;  %v405_v36 = vld [vmem:[#allocation6 + $0x9c8] sm:$0xff] }
  0x9a   :  { %2606 = vmatprep.subr.bf16.mxu0 %v15719_v52  ;;  %v464_v24 = vld [vmem:[#allocation6 + $0xba0] sm:$0xff]  ;;  %v189_v52 = vld [vmem:[#allocation6 + $0x308] sm:$0xff] }
  0x9b   :  { %2683 = vmatpush1.bf16.msra.mxu1 %v15488_v51  ;;  %v15815_v54 = vcombine.high %v460_v22, %v464_v24  ;;  %v452_v29 = vld [vmem:[#allocation6 + $0xb40] sm:$0xff]  ;;  %v15814_v33 = vcombine.low %v460_v22, %v464_v24  ;;  %v15545_v3 = vcombine.high %v189_v52, %v193_v55  ;;  %v409_v37 = vld [vmem:[#allocation6 + $0x9e8] sm:$0xff] }
  0x9c   :  { %2684 = vmatprep.subr.bf16.mxu1 %v15481_v60  ;;  %v456_v32 = vld [vmem:[#allocation6 + $0xb60] sm:$0xff] }
  0x9d   :  { %2607 = vmatpush1.bf16.msra.mxu0 %v15718_v62  ;;  %v15807_v35 = vcombine.high %v452_v29, %v456_v32  ;;  %v444_v38 = vld [vmem:[#allocation6 + $0xb00] sm:$0xff]  ;;  %v15806_v41 = vcombine.low %v452_v29, %v456_v32  ;;  %v15552_v62 = vcombine.low %v197_v44, %v201_v45  ;;  %v18289_v32 = vcombine.low %v18275_v21, %v18275_v21  ;;  %v401_v44 = vld [vmem:[#allocation6 + $0x9a8] sm:$0xff] }
  0x9e   :  { %2608 = vmatprep.subr.bf16.mxu0 %v15711_v0  ;;  %v448_v40 = vld [vmem:[#allocation6 + $0xb20] sm:$0xff]  ;;  %v181_v0 = vld [vmem:[#allocation6 + $0x2c8] sm:$0xff] }
  0x9f   :  { %2685 = vmatpush1.bf16.msra.mxu1 %v15480_v63  ;;  %v15799_v43 = vcombine.high %v444_v38, %v448_v40  ;;  %v436_v46 = vld [vmem:[#allocation6 + $0xac0] sm:$0xff]  ;;  %v15798_v49 = vcombine.low %v444_v38, %v448_v40  ;;  %v15537_v11 = vcombine.high %v181_v0, %v185_v1  ;;  %v265_v40 = vld [vmem:[#allocation6 + $0x568] sm:$0xff] }
  0xa0   :  { %2686 = vmatprep.subr.bf16.mxu1 %v15473_v4  ;;  %v440_v48 = vld [vmem:[#allocation6 + $0xae0] sm:$0xff]  ;;  %v253_v45 = vld [vmem:[#allocation6 + $0x508] sm:$0xff] }
  0xa1   :  { %2609 = vmatpush1.bf16.msra.mxu0 %v15710_v6  ;;  %v15791_v51 = vcombine.high %v436_v46, %v440_v48  ;;  %v428_v56 = vld [vmem:[#allocation6 + $0xa80] sm:$0xff]  ;;  %v15790_v61 = vcombine.low %v436_v46, %v440_v48  ;;  %v15544_v6 = vcombine.low %v189_v52, %v193_v55  ;;  %v15761_v46 = vcombine.high %v405_v36, %v409_v37  ;;  %v393_v52 = vld [vmem:[#allocation6 + $0x968] sm:$0xff] }
  0xa2   :  { %2610 = vmatprep.subr.bf16.mxu0 %v15703_v8  ;;  %v432_v60 = vld [vmem:[#allocation6 + $0xaa0] sm:$0xff]  ;;  %v173_v8 = vld [vmem:[#allocation6 + $0x288] sm:$0xff] }
  0xa3   :  { %2687 = vmatpush1.bf16.msra.mxu1 %v15472_v7  ;;  %v15783_v63 = vcombine.high %v428_v56, %v432_v60  ;;  %v420_v2 = vld [vmem:[#allocation6 + $0xa40] sm:$0xff]  ;;  %v15782_v5 = vcombine.low %v428_v56, %v432_v60  ;;  %v15529_v22 = vcombine.high %v173_v8, %v177_v9  ;;  %v245_v55 = vld [vmem:[#allocation6 + $0x4c8] sm:$0xff] }
  0xa4   :  { %2688 = vmatprep.subr.bf16.mxu1 %v15465_v12  ;;  %v424_v4 = vld [vmem:[#allocation6 + $0xa60] sm:$0xff]  ;;  %v249_v56 = vld [vmem:[#allocation6 + $0x4e8] sm:$0xff] }
  0xa5   :  { %2611 = vmatpush1.bf16.msra.mxu0 %v15702_v14  ;;  %v15775_v7 = vcombine.high %v420_v2, %v424_v4  ;;  %v412_v10 = vld [vmem:[#allocation6 + $0xa00] sm:$0xff]  ;;  %v15774_v13 = vcombine.low %v420_v2, %v424_v4  ;;  %v15536_v14 = vcombine.low %v181_v0, %v185_v1  ;;  %v385_v0 = vld [vmem:[#allocation6 + $0x928] sm:$0xff]  ;;  %v15600_v4 = vcombine.low %v245_v55, %v249_v56 }
  0xa6   :  { %2612 = vmatprep.subr.bf16.mxu0 %v15823_v17  ;;  %v416_v12 = vld [vmem:[#allocation6 + $0xa20] sm:$0xff]  ;;  %v165_v17 = vld [vmem:[#allocation6 + $0x248] sm:$0xff] }
  0xa7   :  { %2689 = vmatpush1.bf16.msra.mxu1 %v15464_v15  ;;  %v15767_v15 = vcombine.high %v412_v10, %v416_v12  ;;  %v15766_v24 = vcombine.low %v412_v10, %v416_v12  ;;  %v15521_v29 = vcombine.high %v165_v17, %v169_v18  ;;  %v237_v1 = vld [vmem:[#allocation6 + $0x488] sm:$0xff] }
  0xa8   :  { %2690 = vmatprep.subr.bf16.mxu1 %v15457_v23  ;;  %v281_v23 = vld [vmem:[#allocation6 + $0x5e8] sm:$0xff] }
  0xa9   :  { %2613 = vmatpush2.bf16.msra.mxu0 %v15822_v25  ;;  %v15528_v25 = vcombine.low %v173_v8, %v177_v9  ;;  %v241_v2 = vld [vmem:[#allocation6 + $0x4a8] sm:$0xff] }
  0xaa   :  { %2614 = vmatprep.subr.bf16.mxu0 %v15815_v54  ;;  %v157_v54 = vld [vmem:[#allocation6 + $0x208] sm:$0xff]  ;;  %v15592_v12 = vcombine.low %v237_v1, %v241_v2 }
  0xab   :  { %2691 = vmatpush1.bf16.msra.mxu1 %v15456_v26  ;;  %v15633_v26 = vcombine.high %v277_v20, %v281_v23  ;;  %v15513_v38 = vcombine.high %v157_v54, %v161_v27  ;;  %v15512_v21 = vcombine.low %v157_v54, %v161_v27  ;;  %v377_v8 = vld [vmem:[#allocation6 + $0x8e8] sm:$0xff] }
  0xac   :  { %2692 = vmatprep.subr.bf16.mxu1 %v15449_v30  ;;  %v273_v30 = vld [vmem:[#allocation6 + $0x5a8] sm:$0xff] }
  0xad   :  { %2615 = vmatpush2.bf16.msra.mxu0 %v15814_v33  ;;  %v15632_v33 = vcombine.low %v277_v20, %v281_v23  ;;  %v229_v9 = vld [vmem:[#allocation6 + $0x448] sm:$0xff] }
  0xae   :  { %2616 = vmatprep.subr.bf16.mxu0 %v15807_v35  ;;  %v15625_v35 = vcombine.high %v269_v28, %v273_v30  ;;  %v233_v10 = vld [vmem:[#allocation6 + $0x468] sm:$0xff] }
  0xaf   :  { %2693 = vmatpush1.bf16.msra.mxu1 %v15448_v34  ;;  %v15520_v34 = vcombine.low %v165_v17, %v169_v18  ;;  %v369_v17 = vld [vmem:[#allocation6 + $0x8a8] sm:$0xff]  ;;  %v15584_v23 = vcombine.low %v229_v9, %v233_v10 }
  0xb0   :  { %2694 = vmatprep.subr.bf16.mxu1 %v15569_v39  ;;  %v261_v39 = vld [vmem:[#allocation6 + $0x548] sm:$0xff] }
  0xb1   :  { %2617 = vmatpush2.bf16.msra.mxu0 %v15806_v41  ;;  %v15624_v41 = vcombine.low %v269_v28, %v273_v30  ;;  %v15616_v48 = vcombine.low %v261_v39, %v265_v40  ;;  %v221_v20 = vld [vmem:[#allocation6 + $0x408] sm:$0xff] }
  0xb2   :  { %2618 = vmatprep.subr.bf16.mxu0 %v15799_v43  ;;  %v397_v43 = vld [vmem:[#allocation6 + $0x988] sm:$0xff] }
  0xb3   :  { %2695 = vmatpush2.bf16.msra.mxu1 %v15568_v42  ;;  %v15617_v42 = vcombine.high %v261_v39, %v265_v40  ;;  %v361_v54 = vld [vmem:[#allocation6 + $0x868] sm:$0xff] }
  0xb4   :  { %2696 = vmatprep.subr.bf16.mxu1 %v15561_v47  ;;  %v257_v47 = vld [vmem:[#allocation6 + $0x528] sm:$0xff] }
  0xb5   :  { %2619 = vmatpush2.bf16.msra.mxu0 %v15798_v49  ;;  %v15760_v49 = vcombine.low %v405_v36, %v409_v37  ;;  %v15608_v60 = vcombine.low %v253_v45, %v257_v47  ;;  %v341_v28 = vld [vmem:[#allocation6 + $0x7c8] sm:$0xff] }
  0xb6   :  { %2620 = vmatprep.subr.bf16.mxu0 %v15791_v51  ;;  %v389_v51 = vld [vmem:[#allocation6 + $0x948] sm:$0xff] }
  0xb7   :  { %2697 = vmatpush2.bf16.msra.mxu1 %v15560_v50  ;;  %v15609_v50 = vcombine.high %v253_v45, %v257_v47  ;;  %v353_v36 = vld [vmem:[#allocation6 + $0x828] sm:$0xff] }
  0xb8   :  { %2698 = vmatprep.subr.bf16.mxu1 %v15553_v57  ;;  %v15753_v57 = vcombine.high %v397_v43, %v401_v44  ;;  %v337_v39 = vld [vmem:[#allocation6 + $0x7a8] sm:$0xff] }
  0xb9   :  { %2621 = vmatpush2.bf16.msra.mxu0 %v15790_v61  ;;  %v15752_v61 = vcombine.low %v397_v43, %v401_v44  ;;  %v473_v43 = vld [vmem:[#allocation6 + $0xbe8] sm:$0xff] }
  0xba   :  { %2622 = vmatprep.subr.bf16.mxu0 %v15783_v63  ;;  %v381_v63 = vld [vmem:[#allocation6 + $0x908] sm:$0xff] }
  0xbb   :  { %2699 = vmatpush2.bf16.msra.mxu1 %v15552_v62  ;;  %v15601_v62 = vcombine.high %v245_v55, %v249_v56  ;;  %v325_v45 = vld [vmem:[#allocation6 + $0x748] sm:$0xff] }
  0xbc   :  { %2700 = vmatprep.subr.bf16.mxu1 %v15545_v3  ;;  %v15745_v3 = vcombine.high %v389_v51, %v393_v52  ;;  %v317_v55 = vld [vmem:[#allocation6 + $0x708] sm:$0xff] }
  0xbd   :  { %2623 = vmatpush2.bf16.msra.mxu0 %v15782_v5  ;;  %v15744_v5 = vcombine.low %v389_v51, %v393_v52  ;;  %v465_v51 = vld [vmem:[#allocation6 + $0xba8] sm:$0xff] }
  0xbe   :  { %2624 = vmatprep.subr.bf16.mxu0 %v15775_v7  ;;  %v373_v7 = vld [vmem:[#allocation6 + $0x8c8] sm:$0xff] }
  0xbf   :  { %2701 = vmatpush2.bf16.msra.mxu1 %v15544_v6  ;;  %v15593_v6 = vcombine.high %v237_v1, %v241_v2  ;;  %v15729_v18 = vcombine.high %v373_v7, %v377_v8  ;;  %v321_v56 = vld [vmem:[#allocation6 + $0x728] sm:$0xff] }
  0xc0   :  { %2702 = vmatprep.subr.bf16.mxu1 %v15537_v11  ;;  %v15737_v11 = vcombine.high %v381_v63, %v385_v0  ;;  %v309_v1 = vld [vmem:[#allocation6 + $0x6c8] sm:$0xff] }
  0xc1   :  { %2625 = vmatpush2.bf16.msra.mxu0 %v15774_v13  ;;  %v15736_v13 = vcombine.low %v381_v63, %v385_v0  ;;  %v457_v63 = vld [vmem:[#allocation6 + $0xb68] sm:$0xff] }
  0xc2   :  { %2626 = vmatprep.subr.bf16.mxu0 %v15767_v15  ;;  %v365_v15 = vld [vmem:[#allocation6 + $0x888] sm:$0xff] }
  0xc3   :  { %2703 = vmatpush2.bf16.msra.mxu1 %v15536_v14  ;;  %v15585_v14 = vcombine.high %v229_v9, %v233_v10  ;;  %v15721_v27 = vcombine.high %v365_v15, %v369_v17  ;;  %v313_v2 = vld [vmem:[#allocation6 + $0x6e8] sm:$0xff] }
  0xc4   :  { %2704 = vmatprep.subr.bf16.mxu1 %v15529_v22  ;;  %v225_v22 = vld [vmem:[#allocation6 + $0x428] sm:$0xff] }
  0xc5   :  { %2627 = vmatpush2.bf16.msra.mxu0 %v15766_v24  ;;  %v15728_v24 = vcombine.low %v373_v7, %v377_v8  ;;  %v15576_v30 = vcombine.low %v221_v20, %v225_v22  ;;  %v449_v7 = vld [vmem:[#allocation6 + $0xb28] sm:$0xff] }
  0xc6   :  { %2719 = vmatprep.subr.bf16.mxu0 %v15633_v26  ;;  %v357_v26 = vld [vmem:[#allocation6 + $0x848] sm:$0xff] }
  0xc7   :  { %2705 = vmatpush2.bf16.msra.mxu1 %v15528_v25  ;;  %v15577_v25 = vcombine.high %v221_v20, %v225_v22  ;;  %v15713_v37 = vcombine.high %v357_v26, %v361_v54  ;;  %v301_v9 = vld [vmem:[#allocation6 + $0x688] sm:$0xff] }
  0xc8   :  { %2706 = vmatprep.subr.bf16.mxu1 %v15521_v29  ;;  %2629 = vmatmul.mubr.bf16.vlgmr.msra.gmra.mxu0 %v18289_v32  ;;  %v345_v29 = vld [vmem:[#allocation6 + $0x7e8] sm:$0xff] }
  0xc9   :  { %2720 = vmatpush1.bf16.msra.mxu0 %v15632_v33  ;;  %2751 = vmatprep.mubr.bf16.mxu0 %v18263_v59  ;;  %v15720_v33 = vcombine.low %v365_v15, %v369_v17  ;;  %v15696_v40 = vcombine.low %v341_v28, %v345_v29  ;;  %v305_v10 = vld [vmem:[#allocation6 + $0x6a8] sm:$0xff] }
  0xca   :  { %2721 = vmatprep.subr.bf16.mxu0 %v15625_v35  ;;  %v349_v35 = vld [vmem:[#allocation6 + $0x808] sm:$0xff]  ;;  %v15656_v22 = vcombine.low %v301_v9, %v305_v10 }
  0xcb   :  { %2707 = vmatpush2.bf16.msra.mxu1 %v15520_v34  ;;  %v15697_v34 = vcombine.high %v341_v28, %v345_v29  ;;  %v15705_v44 = vcombine.high %v349_v35, %v353_v36  ;;  %v441_v15 = vld [vmem:[#allocation6 + $0xae8] sm:$0xff] }
  0xcc   :  { %2708 = vmatprep.subr.bf16.mxu1 %v15513_v38  ;;  %v333_v38 = vld [vmem:[#allocation6 + $0x788] sm:$0xff] }
  0xcd   :  { %2722 = vmatpush1.bf16.msra.mxu0 %v15624_v41  ;;  %v15712_v41 = vcombine.low %v357_v26, %v361_v54  ;;  %v15688_v47 = vcombine.low %v333_v38, %v337_v39  ;;  %v297_v20 = vld [vmem:[#allocation6 + $0x668] sm:$0xff] }
  0xce   :  { %2723 = vmatprep.subr.bf16.mxu0 %v15617_v42  ;;  %v469_v42 = vld [vmem:[#allocation6 + $0xbc8] sm:$0xff] }
  0xcf   :  { %2709 = vmatpush2.bf16.msra.mxu1 %v15512_v21  ;;  %v15689_v21 = vcombine.high %v333_v38, %v337_v39  ;;  %v15825_v52 = vcombine.high %v469_v42, %v473_v43  ;;  %v433_v26 = vld [vmem:[#allocation6 + $0xaa8] sm:$0xff] }
  0xd0   :  { %2760 = vmatprep.subr.bf16.mxu1 %v15761_v46  ;;  %v329_v46 = vld [vmem:[#allocation6 + $0x768] sm:$0xff] }
  0xd1   :  { %2724 = vmatpush1.bf16.msra.mxu0 %v15616_v48  ;;  %v15704_v48 = vcombine.low %v349_v35, %v353_v36  ;;  %v289_v28 = vld [vmem:[#allocation6 + $0x628] sm:$0xff] }
  0xd2   :  { %2711 = vmatmul.mubr.bf16.vlgmr.msra.gmra.mxu1 %v18269_v16  ;;  %2725 = vmatprep.subr.bf16.mxu0 %v15609_v50  ;;  %v461_v50 = vld [vmem:[#allocation6 + $0xb88] sm:$0xff] }
  0xd3   :  { %2761 = vmatpush1.bf16.msra.mxu1 %v15760_v49  ;;  %2792 = vmatprep.mubr.bf16.mxu1 %v18280_v53  ;;  %v15681_v49 = vcombine.high %v325_v45, %v329_v46  ;;  %v15817_v0 = vcombine.high %v461_v50, %v465_v51  ;;  %v425_v35 = vld [vmem:[#allocation6 + $0xa68] sm:$0xff] }
  0xd4   :  { %2762 = vmatprep.subr.bf16.mxu1 %v15753_v57  ;;  %v15680_v57 = vcombine.low %v325_v45, %v329_v46  ;;  %v481_v38 = vld [vmem:[#allocation6 + $0xc28] sm:$0xff]  ;;  %v154_v45 = vld [vmem:[#allocation6 + $0x1f0] sm:$0xff] }
  0xd5   :  { %2726 = vmatpush1.bf16.msra.mxu0 %v15608_v60  ;;  %v15824_v60 = vcombine.low %v469_v42, %v473_v43  ;;  %v417_v42 = vld [vmem:[#allocation6 + $0xa28] sm:$0xff] }
  0xd6   :  { %2727 = vmatprep.subr.bf16.mxu0 %v15601_v62  ;;  %v453_v62 = vld [vmem:[#allocation6 + $0xb48] sm:$0xff] }
  0xd7   :  { %2763 = vmatpush1.bf16.msra.mxu1 %v15752_v61  ;;  %v15673_v61 = vcombine.high %v317_v55, %v321_v56  ;;  %v15809_v8 = vcombine.high %v453_v62, %v457_v63 }
  0xd8   :  { %2764 = vmatprep.subr.bf16.mxu1 %v15745_v3  ;;  %v15672_v3 = vcombine.low %v317_v55, %v321_v56  ;;  %v142_v55 = vld [vmem:[#allocation6 + $0x190] sm:$0xff] }
  0xd9   :  { %2728 = vmatpush1.bf16.msra.mxu0 %v15600_v4  ;;  %v15816_v4 = vcombine.low %v461_v50, %v465_v51  ;;  %v278_v50 = vld [vmem:[#allocation6 + $0x5d0] sm:$0xff] }
  0xda   :  { %2729 = vmatprep.subr.bf16.mxu0 %v15593_v6  ;;  %v445_v6 = vld [vmem:[#allocation6 + $0xb08] sm:$0xff]  ;;  %v282_v51 = vld [vmem:[#allocation6 + $0x5f0] sm:$0xff] }
  0xdb   :  { %2765 = vmatpush1.bf16.msra.mxu1 %v15744_v5  ;;  %v15665_v5 = vcombine.high %v309_v1, %v313_v2  ;;  %v15801_v17 = vcombine.high %v445_v6, %v449_v7  ;;  %v146_v56 = vld [vmem:[#allocation6 + $0x1b0] sm:$0xff] }
  0xdc   :  { %2766 = vmatprep.subr.bf16.mxu1 %v15737_v11  ;;  %v15664_v11 = vcombine.low %v309_v1, %v313_v2  ;;  %v134_v1 = vld [vmem:[#allocation6 + $0x150] sm:$0xff] }
  0xdd   :  { %2730 = vmatpush1.bf16.msra.mxu0 %v15592_v12  ;;  %v15808_v12 = vcombine.low %v453_v62, %v457_v63  ;;  %v15634_v63 = vcombine.low %v278_v50, %v282_v51  ;;  %v138_v2 = vld [vmem:[#allocation6 + $0x170] sm:$0xff] }
  0xde   :  { %2731 = vmatprep.subr.bf16.mxu0 %v15585_v14  ;;  %v437_v14 = vld [vmem:[#allocation6 + $0xac8] sm:$0xff] }
  0xdf   :  { %2767 = vmatpush1.bf16.msra.mxu1 %v15736_v13  ;;  %v15657_v13 = vcombine.high %v301_v9, %v305_v10  ;;  %v15793_v54 = vcombine.high %v437_v14, %v441_v15  ;;  %v15491_v9 = vcombine.high %v134_v1, %v138_v2  ;;  %v126_v10 = vld [vmem:[#allocation6 + $0x110] sm:$0xff] }
  0xe0   :  { %2768 = vmatprep.subr.bf16.mxu1 %v15729_v18  ;;  %v293_v18 = vld [vmem:[#allocation6 + $0x648] sm:$0xff] }
  0xe1   :  { %2732 = vmatpush1.bf16.msra.mxu0 %v15584_v23  ;;  %v15800_v23 = vcombine.low %v445_v6, %v449_v7  ;;  %v15648_v29 = vcombine.low %v293_v18, %v297_v20  ;;  %v18297_v6 = vld [vmem:[#allocation3 + $0x18] ss:$0 sps:$4 sm:$0xff]   ;;  %v15498_v7 = vcombine.low %v142_v55, %v146_v56 }
  0xe2   :  { %2733 = vmatprep.subr.bf16.mxu0 %v15577_v25  ;;  %v429_v25 = vld [vmem:[#allocation6 + $0xa88] sm:$0xff] }
  0xe3   :  { %2769 = vmatpush1.bf16.msra.mxu1 %v15728_v24  ;;  %v15649_v24 = vcombine.high %v293_v18, %v297_v20  ;;  %v15785_v36 = vcombine.high %v429_v25, %v433_v26  ;;  %v118_v20 = vld [vmem:[#allocation6 + $0xd0] sm:$0xff] }
  0xe4   :  { %2770 = vmatprep.subr.bf16.mxu1 %v15721_v27  ;;  %v285_v27 = vld [vmem:[#allocation6 + $0x608] sm:$0xff] }
  0xe5   :  { %2734 = vmatpush1.bf16.msra.mxu0 %v15576_v30  ;;  %v15792_v30 = vcombine.low %v437_v14, %v441_v15  ;;  %v15640_v39 = vcombine.low %v285_v27, %v289_v28  ;;  %v258_v14 = vld [vmem:[#allocation6 + $0x530] sm:$0xff]  ;;  %v15490_v15 = vcombine.low %v134_v1, %v138_v2 }
  0xe6   :  { %2735 = vmatprep.subr.bf16.mxu0 %v15697_v34  ;;  %v421_v34 = vld [vmem:[#allocation6 + $0xa48] sm:$0xff]  ;;  %v206_v1 = vld [vmem:[#allocation6 + $0x390] sm:$0xff] }
  0xe7   :  { %2771 = vmatpush1.bf16.msra.mxu1 %v15720_v33  ;;  %v15641_v33 = vcombine.high %v285_v27, %v289_v28  ;;  %v15777_v43 = vcombine.high %v421_v34, %v425_v35  ;;  %v110_v28 = vld [vmem:[#allocation6 + $0x90] sm:$0xff] }
  0xe8   :  { %2772 = vmatprep.subr.bf16.mxu1 %v15713_v37  ;;  %v477_v37 = vld [vmem:[#allocation6 + $0xc08] sm:$0xff]  ;;  %v210_v2 = vld [vmem:[#allocation6 + $0x3b0] sm:$0xff] }
  0xe9   :  { %2736 = vmatpush2.bf16.msra.mxu0 %v15696_v40  ;;  %v15784_v40 = vcombine.low %v429_v25, %v433_v26  ;;  %v15832_v46 = vcombine.low %v477_v37, %v481_v38  ;;  %v250_v25 = vld [vmem:[#allocation6 + $0x4f0] sm:$0xff] }
  0xea   :  { %2737 = vmatprep.subr.bf16.mxu0 %v15689_v21  ;;  %v413_v21 = vld [vmem:[#allocation6 + $0xa08] sm:$0xff] }
  0xeb   :  { %2773 = vmatpush1.bf16.msra.mxu1 %v15712_v41  ;;  %v15833_v41 = vcombine.high %v477_v37, %v481_v38  ;;  %v102_v38 = vld [vmem:[#allocation6 + $0x50] sm:$0xff] }
  0xec   :  { %2774 = vmatprep.subr.bf16.mxu1 %v15705_v44  ;;  %v150_v44 = vld [vmem:[#allocation6 + $0x1d0] sm:$0xff] }
  0xed   :  { %2738 = vmatpush2.bf16.msra.mxu0 %v15688_v47  ;;  %v15776_v47 = vcombine.low %v421_v34, %v425_v35  ;;  %v15506_v62 = vcombine.low %v150_v44, %v154_v45  ;;  %v242_v34 = vld [vmem:[#allocation6 + $0x4b0] sm:$0xff] }
  0xee   :  { %2739 = vmatprep.subr.bf16.mxu0 %v15681_v49  ;;  %v15769_v49 = vcombine.high %v413_v21, %v417_v42 }
  0xef   :  { %2775 = vmatpush1.bf16.msra.mxu1 %v15704_v48  ;;  %v15507_v48 = vcombine.high %v150_v44, %v154_v45  ;;  %v94_v45 = vld [vmem:[#allocation6 + $0x10] sm:$0xff] }
  0xf0   :  { %2776 = vmatprep.subr.bf16.mxu1 %v15825_v52  ;;  %v15768_v52 = vcombine.low %v413_v21, %v417_v42  ;;  %v234_v21 = vld [vmem:[#allocation6 + $0x470] sm:$0xff] }
  0xf1   :  { %2740 = vmatpush2.bf16.msra.mxu0 %v15680_v57  ;;  %v15635_v57 = vcombine.high %v278_v50, %v282_v51 }
  0xf2   :  { %2741 = vmatprep.subr.bf16.mxu0 %v15673_v61  ;;  %v274_v61 = vld [vmem:[#allocation6 + $0x5b0] sm:$0xff] }
  0xf3   :  { %2777 = vmatpush2.bf16.msra.mxu1 %v15824_v60  ;;  %v270_v60 = vld [vmem:[#allocation6 + $0x590] sm:$0xff] }
  0xf4   :  { %2778 = vmatprep.subr.bf16.mxu1 %v15817_v0  ;;  %v15499_v0 = vcombine.high %v142_v55, %v146_v56  ;;  %v214_v55 = vld [vmem:[#allocation6 + $0x3d0] sm:$0xff] }
  0xf5   :  { %2742 = vmatpush2.bf16.msra.mxu0 %v15672_v3  ;;  %v15627_v3 = vcombine.high %v270_v60, %v274_v61  ;;  %v218_v56 = vld [vmem:[#allocation6 + $0x3f0] sm:$0xff] }
  0xf6   :  { %2743 = vmatprep.subr.bf16.mxu0 %v15665_v5  ;;  %v266_v5 = vld [vmem:[#allocation6 + $0x570] sm:$0xff] }
  0xf7   :  { %2779 = vmatpush2.bf16.msra.mxu1 %v15816_v4  ;;  %v262_v4 = vld [vmem:[#allocation6 + $0x550] sm:$0xff] }
  0xf8   :  { %2780 = vmatprep.subr.bf16.mxu1 %v15809_v8  ;;  %v15626_v8 = vcombine.low %v270_v60, %v274_v61  ;;  %v342_v60 = vld [vmem:[#allocation6 + $0x7d0] sm:$0xff] }
  0xf9   :  { %2744 = vmatpush2.bf16.msra.mxu0 %v15664_v11  ;;  %v130_v11 = vld [vmem:[#allocation6 + $0x130] sm:$0xff] }
  0xfa   :  { %2745 = vmatprep.subr.bf16.mxu0 %v15657_v13  ;;  %v254_v13 = vld [vmem:[#allocation6 + $0x510] sm:$0xff]  ;;  %v15483_v18 = vcombine.high %v126_v10, %v130_v11  ;;  %v15482_v26 = vcombine.low %v126_v10, %v130_v11 }
  0xfb   :  { %2781 = vmatpush2.bf16.msra.mxu1 %v15808_v12  ;;  %v15619_v12 = vcombine.high %v262_v4, %v266_v5  ;;  %v346_v61 = vld [vmem:[#allocation6 + $0x7f0] sm:$0xff] }
  0xfc   :  { %2782 = vmatprep.subr.bf16.mxu1 %v15801_v17  ;;  %v15618_v17 = vcombine.low %v262_v4, %v266_v5  ;;  %v334_v4 = vld [vmem:[#allocation6 + $0x790] sm:$0xff] }
  0xfd   :  { %2746 = vmatpush2.bf16.msra.mxu0 %v15656_v22  ;;  %v122_v22 = vld [vmem:[#allocation6 + $0xf0] sm:$0xff] }
  0xfe   :  { %2747 = vmatprep.subr.bf16.mxu0 %v15649_v24  ;;  %v246_v24 = vld [vmem:[#allocation6 + $0x4d0] sm:$0xff]  ;;  %v15475_v27 = vcombine.high %v118_v20, %v122_v22  ;;  %v15474_v35 = vcombine.low %v118_v20, %v122_v22 }
  0xff   :  { %2783 = vmatpush2.bf16.msra.mxu1 %v15800_v23  ;;  %v15611_v23 = vcombine.high %v254_v13, %v258_v14  ;;  %v338_v5 = vld [vmem:[#allocation6 + $0x7b0] sm:$0xff] }
 0x100   :  { %2784 = vmatprep.subr.bf16.mxu1 %v15793_v54  ;;  %v15610_v54 = vcombine.low %v254_v13, %v258_v14  ;;  %v198_v10 = vld [vmem:[#allocation6 + $0x350] sm:$0xff] }
 0x101   :  { %2748 = vmatpush2.bf16.msra.mxu0 %v15648_v29  ;;  %v114_v29 = vld [vmem:[#allocation6 + $0xb0] sm:$0xff] }
 0x102   :  { %2749 = vmatprep.subr.bf16.mxu0 %v15641_v33  ;;  %v238_v33 = vld [vmem:[#allocation6 + $0x490] sm:$0xff]  ;;  %v15467_v37 = vcombine.high %v110_v28, %v114_v29  ;;  %v15466_v42 = vcombine.low %v110_v28, %v114_v29 }
 0x103   :  { %2785 = vmatpush2.bf16.msra.mxu1 %v15792_v30  ;;  %v15603_v30 = vcombine.high %v246_v24, %v250_v25  ;;  %v202_v11 = vld [vmem:[#allocation6 + $0x370] sm:$0xff] }
 0x104   :  { %2786 = vmatprep.subr.bf16.mxu1 %v15785_v36  ;;  %v15602_v36 = vcombine.low %v246_v24, %v250_v25  ;;  %v326_v13 = vld [vmem:[#allocation6 + $0x750] sm:$0xff] }
 0x105   :  { %2750 = vmatpush2.bf16.msra.mxu0 %v15640_v39  ;;  %v106_v39 = vld [vmem:[#allocation6 + $0x70] sm:$0xff] }
 0x106   :  { %2815 = vmatprep.subr.bf16.mxu0 %v15833_v41  ;;  %v230_v41 = vld [vmem:[#allocation6 + $0x450] sm:$0xff]  ;;  %v15459_v44 = vcombine.high %v102_v38, %v106_v39  ;;  %v15458_v50 = vcombine.low %v102_v38, %v106_v39 }
 0x107   :  { %2787 = vmatpush2.bf16.msra.mxu1 %v15784_v40  ;;  %v15595_v40 = vcombine.high %v238_v33, %v242_v34  ;;  %v15586_v51 = vcombine.low %v230_v41, %v234_v21  ;;  %v330_v14 = vld [vmem:[#allocation6 + $0x770] sm:$0xff] }
 0x108   :  { %2788 = vmatprep.subr.bf16.mxu1 %v15777_v43  ;;  %2752 = vmatmul.mubr.bf16.vlgmr.msra.gmra.mxu0 %v18273_v19  ;;  %v15594_v43 = vcombine.low %v238_v33, %v242_v34  ;;  %v190_v20 = vld [vmem:[#allocation6 + $0x310] sm:$0xff] }
 0x109   :  { %2816 = vmatpush1.bf16.msra.mxu0 %v15832_v46  ;;  %2833 = vmatprep.mubr.bf16.mxu0 %v18884_v31  ;;  %v98_v46 = vld [vmem:[#allocation6 + $0x30] sm:$0xff] }
 0x10a   :  { %2842 = vmatprep.subr.bf16.mxu0 %v15507_v48  ;;  %v222_v48 = vld [vmem:[#allocation6 + $0x410] sm:$0xff] }
 0x10b   :  { %2789 = vmatpush2.bf16.msra.mxu1 %v15776_v47  ;;  %v15587_v47 = vcombine.high %v230_v41, %v234_v21  ;;  %v194_v22 = vld [vmem:[#allocation6 + $0x330] sm:$0xff] }
 0x10c   :  { %2790 = vmatprep.subr.bf16.mxu1 %v15769_v49  ;;  %v226_v49 = vld [vmem:[#allocation6 + $0x430] sm:$0xff] }
 0x10d   :  { %v318_v24 = vld [vmem:[#allocation6 + $0x710] sm:$0xff] }
 0x10e   :  { %v322_v25 = vld [vmem:[#allocation6 + $0x730] sm:$0xff] }
 0x10f   :  { %2791 = vmatpush2.bf16.msra.mxu1 %v15768_v52  ;;  %v15451_v52 = vcombine.high %v94_v45, %v98_v46  ;;  %v182_v28 = vld [vmem:[#allocation6 + $0x2d0] sm:$0xff] }
 0x110   :  { %2883 = vmatprep.subr.bf16.mxu1 %v15635_v57  ;;  %15839 = vmatmul.mubr.msk.bf16.vlgmr.msra.gmra.mxu0 %vm2510_vm0, %v18297_v6  ;;  %v15579_v57 = vcombine.high %v222_v48, %v226_v49  ;;  %v186_v29 = vld [vmem:[#allocation6 + $0x2f0] sm:$0xff] }
 0x111   :  { %2843 = vmatpush1.bf16.msra.mxu0 %v15506_v62  ;;  %2874 = vmatprep.mubr.bf16.mxu0 %v18259_v58  ;;  %v15450_v62 = vcombine.low %v94_v45, %v98_v46  ;;  %v310_v33 = vld [vmem:[#allocation6 + $0x6d0] sm:$0xff]  ;;  %v15539_v38 = vcombine.high %v182_v28, %v186_v29 }
 0x112   :  { %2793 = vmatmul.mubr.bf16.vlgmr.msra.gmra.mxu1 %v18289_v32  ;;  %2844 = vmatprep.subr.bf16.mxu0 %v15499_v0  ;;  %v15571_v0 = vcombine.high %v214_v55, %v218_v56  ;;  %v314_v34 = vld [vmem:[#allocation6 + $0x6f0] sm:$0xff] }
 0x113   :  { %2884 = vmatpush1.bf16.msra.mxu1 %v15634_v63  ;;  %2915 = vmatprep.mubr.bf16.mxu1 %v18263_v59  ;;  %v15578_v63 = vcombine.low %v222_v48, %v226_v49  ;;  %v174_v39 = vld [vmem:[#allocation6 + $0x290] sm:$0xff]  ;;  %v15667_v41 = vcombine.high %v310_v33, %v314_v34  ;;  %v15666_v45 = vcombine.low %v310_v33, %v314_v34 }
 0x114   :  { %2885 = vmatprep.subr.bf16.mxu1 %v15627_v3  ;;  %v15699_v3 = vcombine.high %v342_v60, %v346_v61  ;;  %v302_v21 = vld [vmem:[#allocation6 + $0x690] sm:$0xff] }
 0x115   :  { %2845 = vmatpush1.bf16.msra.mxu0 %v15498_v7  ;;  %v15570_v7 = vcombine.low %v214_v55, %v218_v56  ;;  %v170_v48 = vld [vmem:[#allocation6 + $0x270] sm:$0xff]  ;;  %v484_v55 = vld [vmem:[#allocation8] sm:$0xff] }
 0x116   :  { %2846 = vmatprep.subr.bf16.mxu0 %v15491_v9  ;;  %v15563_v9 = vcombine.high %v206_v1, %v210_v2 }
 0x117   :  { %2886 = vmatpush1.bf16.msra.mxu1 %v15626_v8  ;;  %v15698_v8 = vcombine.low %v342_v60, %v346_v61  ;;  %v158_v61 = vld [vmem:[#allocation6 + $0x210] sm:$0xff] }
 0x118   :  { %2887 = vmatprep.subr.bf16.mxu1 %v15619_v12  ;;  %v15691_v12 = vcombine.high %v334_v4, %v338_v5 }
 0x119   :  { %2847 = vmatpush1.bf16.msra.mxu0 %v15490_v15  ;;  %v15562_v15 = vcombine.low %v206_v1, %v210_v2  ;;  %v286_v1 = vld [vmem:[#allocation6 + $0x610] sm:$0xff] }
 0x11a   :  { %2848 = vmatprep.subr.bf16.mxu0 %v15483_v18  ;;  %v15555_v18 = vcombine.high %v198_v10, %v202_v11  ;;  %v290_v2 = vld [vmem:[#allocation6 + $0x630] sm:$0xff] }
 0x11b   :  { %2888 = vmatpush1.bf16.msra.mxu1 %v15618_v17  ;;  %v15690_v17 = vcombine.low %v334_v4, %v338_v5 }
 0x11c   :  { %2889 = vmatprep.subr.bf16.mxu1 %v15611_v23  ;;  %v15683_v23 = vcombine.high %v326_v13, %v330_v14 }
 0x11d   :  { %2849 = vmatpush1.bf16.msra.mxu0 %v15482_v26  ;;  %v15554_v26 = vcombine.low %v198_v10, %v202_v11  ;;  %v15643_v11 = vcombine.high %v286_v1, %v290_v2 }
 0x11e   :  { %2850 = vmatprep.subr.bf16.mxu0 %v15475_v27  ;;  %v15547_v27 = vcombine.high %v190_v20, %v194_v22 }
 0x11f   :  { %2890 = vmatpush1.bf16.msra.mxu1 %v15610_v54  ;;  %v15682_v54 = vcombine.low %v326_v13, %v330_v14  ;;  %v482_v13 = vld [vmem:[#allocation6 + $0xc30] sm:$0xff] }
 0x120   :  { %2891 = vmatprep.subr.bf16.mxu1 %v15603_v30  ;;  %v15675_v30 = vcombine.high %v318_v24, %v322_v25 }
 0x121   :  { %2851 = vmatpush1.bf16.msra.mxu0 %v15474_v35  ;;  %v486_v35 = vlaneseq }
 0x122   :  { %2852 = vmatprep.subr.bf16.mxu0 %v15467_v37  ;;  %v15674_v37 = vcombine.low %v318_v24, %v322_v25  ;;  %v398_v24 = vld [vmem:[#allocation6 + $0x990] sm:$0xff] }
 0x123   :  { %2892 = vmatpush1.bf16.msra.mxu1 %v15602_v36  ;;  %v15546_v36 = vcombine.low %v190_v20, %v194_v22  ;;  %v15642_v22 = vcombine.low %v286_v1, %v290_v2  ;;  %v402_v25 = vld [vmem:[#allocation6 + $0x9b0] sm:$0xff] }
 0x124   :  { %2893 = vmatprep.subr.bf16.mxu1 %v15595_v40  ;;  %v178_v40 = vld [vmem:[#allocation6 + $0x2b0] sm:$0xff] }
 0x125   :  { %2853 = vmatpush1.bf16.msra.mxu0 %v15466_v42  ;;  %v306_v42 = vld [vmem:[#allocation6 + $0x6b0] sm:$0xff]  ;;  %v15531_v46 = vcombine.high %v174_v39, %v178_v40  ;;  %v15530_v56 = vcombine.low %v174_v39, %v178_v40  ;;  %v15755_v39 = vcombine.high %v398_v24, %v402_v25 }
 0x126   :  { %2854 = vmatprep.subr.bf16.mxu0 %v15459_v44  ;;  %v15538_v44 = vcombine.low %v182_v28, %v186_v29  ;;  %v15659_v49 = vcombine.high %v302_v21, %v306_v42  ;;  %v151_v29 = vld [vmem:[#allocation6 + $0x1d8] sm:$0xff]  ;;  %v390_v40 = vld [vmem:[#allocation6 + $0x950] sm:$0xff] }
 0x127   :  { %2894 = vmatpush1.bf16.msra.mxu1 %v15594_v43  ;;  %v18304_v43 = vshrl.u32 %v486_v35, 7 }
 0x128   :  { %2895 = vmatprep.subr.bf16.mxu1 %v15587_v47  ;;  %v166_v47 = vld [vmem:[#allocation6 + $0x250] sm:$0xff] }
 0x129   :  { %2855 = vmatpush1.bf16.msra.mxu0 %v15458_v50  ;;  %v294_v50 = vld [vmem:[#allocation6 + $0x650] sm:$0xff]  ;;  %v15523_v60 = vcombine.high %v166_v47, %v170_v48 }
 0x12a   :  { %2856 = vmatprep.subr.bf16.mxu0 %v15451_v52  ;;  %v18307_v52 = vsub.s32 0, %v18304_v43 }
 0x12b   :  { %2896 = vmatpush1.bf16.msra.mxu1 %v15586_v51  ;;  %v298_v51 = vld [vmem:[#allocation6 + $0x670] sm:$0xff] }
 0x12c   :  { %2897 = vmatprep.subr.bf16.mxu1 %v15579_v57  ;;  %v15658_v57 = vcombine.low %v302_v21, %v306_v42  ;;  %v489_v4 = vrot.slane %v484_v55, %v18307_v52  ;;  %v15650_v5 = vcombine.low %v294_v50, %v298_v51 }
 0x12d   :  { %2857 = vmatpush1.bf16.msra.mxu0 %v15450_v62  ;;  %v162_v62 = vld [vmem:[#allocation6 + $0x230] sm:$0xff] }
 0x12e   :  { %2858 = vmatprep.subr.bf16.mxu0 %v15571_v0  ;;  %v18310_v0 = vsub.s32 1, %v18304_v43 }
 0x12f   :  { %2898 = vmatpush1.bf16.msra.mxu1 %v15578_v63  ;;  %v15651_v63 = vcombine.high %v294_v50, %v298_v51  ;;  %v386_v51 = vld [vmem:[#allocation6 + $0x930] sm:$0xff] }
 0x130   :  { %2899 = vmatprep.subr.bf16.mxu1 %v15699_v3  ;;  %v15522_v3 = vcombine.low %v166_v47, %v170_v48  ;;  %v493_v10 = vrot.slane %v484_v55, %v18310_v0  ;;  %v143_v47 = vld [vmem:[#allocation6 + $0x198] sm:$0xff] }
 0x131   :  { %2859 = vmatpush2.bf16.msra.mxu0 %v15570_v7  ;;  %v15515_v7 = vcombine.high %v158_v61, %v162_v62  ;;  %v147_v48 = vld [vmem:[#allocation6 + $0x1b8] sm:$0xff] }
 0x132   :  { %2860 = vmatprep.subr.bf16.mxu0 %v15563_v9  ;;  %v410_v9 = vld [vmem:[#allocation6 + $0x9f0] sm:$0xff]  ;;  %v15501_v2 = vcombine.high %v143_v47, %v147_v48 }
 0x133   :  { %2900 = vmatpush2.bf16.msra.mxu1 %v15698_v8  ;;  %v406_v8 = vld [vmem:[#allocation6 + $0x9d0] sm:$0xff] }
 0x134   :  { %2901 = vmatprep.subr.bf16.mxu1 %v15691_v12  ;;  %v478_v12 = vld [vmem:[#allocation6 + $0xc10] sm:$0xff] }
 0x135   :  { %2861 = vmatpush2.bf16.msra.mxu0 %v15562_v15  ;;  %v15835_v28 = vcombine.high %v478_v12, %v482_v13 }
 0x136   :  { %2862 = vmatprep.subr.bf16.mxu0 %v15555_v18  ;;  %v15514_v18 = vcombine.low %v158_v61, %v162_v62  ;;  %v135_v61 = vld [vmem:[#allocation6 + $0x158] sm:$0xff] }
 0x137   :  { %2902 = vmatpush2.bf16.msra.mxu1 %v15690_v17  ;;  %v139_v62 = vld [vmem:[#allocation6 + $0x178] sm:$0xff] }
 0x138   :  { %2903 = vmatprep.subr.bf16.mxu1 %v15683_v23  ;;  %v15763_v23 = vcombine.high %v406_v8, %v410_v9 }
 0x139   :  { %2863 = vmatpush2.bf16.msra.mxu0 %v15554_v26 }
 0x13a   :  { %2864 = vmatprep.subr.bf16.mxu0 %v15547_v27 }
 0x13b   :  { %2904 = vmatpush2.bf16.msra.mxu1 %v15682_v54 }
 0x13c   :  { %2905 = vmatprep.subr.bf16.mxu1 %v15675_v30  ;;  %v155_v30 = vld [vmem:[#allocation6 + $0x1f8] sm:$0xff] }
 0x13d   :  { %2865 = vmatpush2.bf16.msra.mxu0 %v15546_v36  ;;  %v15762_v36 = vcombine.low %v406_v8, %v410_v9  ;;  %v15509_v42 = vcombine.high %v151_v29, %v155_v30  ;;  %v127_v8 = vld [vmem:[#allocation6 + $0x118] sm:$0xff] }
 0x13e   :  { %2866 = vmatprep.subr.bf16.mxu0 %v15539_v38  ;;  %v15834_v38 = vcombine.low %v478_v12, %v482_v13  ;;  %v131_v9 = vld [vmem:[#allocation6 + $0x138] sm:$0xff]  ;;  %v370_v12 = vld [vmem:[#allocation6 + $0x8b0] sm:$0xff] }
 0x13f   :  { %2906 = vmatpush2.bf16.msra.mxu1 %v15674_v37 }
 0x140   :  { %2907 = vmatprep.subr.bf16.mxu1 %v15667_v41  ;;  %v394_v41 = vld [vmem:[#allocation6 + $0x970] sm:$0xff] }
 0x141   :  { %2867 = vmatpush2.bf16.msra.mxu0 %v15538_v44 }
 0x142   :  { %2868 = vmatprep.subr.bf16.mxu0 %v15531_v46  ;;  %v15747_v46 = vcombine.high %v390_v40, %v394_v41 }
 0x143   :  { %2908 = vmatpush2.bf16.msra.mxu1 %v15666_v45  ;;  %v15754_v45 = vcombine.low %v398_v24, %v402_v25  ;;  %v15484_v24 = vcombine.low %v127_v8, %v131_v9 }
 0x144   :  { %2909 = vmatprep.subr.bf16.mxu1 %v15659_v49  ;;  %v382_v49 = vld [vmem:[#allocation6 + $0x910] sm:$0xff] }
 0x145   :  { %2869 = vmatpush2.bf16.msra.mxu0 %v15530_v56  ;;  %v15746_v56 = vcombine.low %v390_v40, %v394_v41  ;;  %v474_v40 = vld [vmem:[#allocation6 + $0xbf0] sm:$0xff] }
 0x146   :  { %2870 = vmatprep.subr.bf16.mxu0 %v15523_v60  ;;  %v15739_v60 = vcombine.high %v382_v49, %v386_v51 }
 0x147   :  { %2910 = vmatpush2.bf16.msra.mxu1 %v15658_v57  ;;  %v15508_v57 = vcombine.low %v151_v29, %v155_v30  ;;  %v354_v29 = vld [vmem:[#allocation6 + $0x830] sm:$0xff] }
 0x148   :  { %2911 = vmatprep.subr.bf16.mxu1 %v15651_v63  ;;  %v2548_v14 = vpop.f32.mrf.mxu0  ;;  %v374_v63 = vld [vmem:[#allocation6 + $0x8d0] sm:$0xff] }
 0x149   :  { %v2549_v15 = vadd.f32 %v2548_v14, %v489_v4  ;;  %2871 = vmatpush2.bf16.msra.mxu0 %v15522_v3  ;;  %v378_v3 = vld [vmem:[#allocation6 + $0x8f0] sm:$0xff]  ;;  %v15738_v4 = vcombine.low %v382_v49, %v386_v51  ;;  %v15492_v14 = vcombine.low %v135_v61, %v139_v62 }
 0x14a   :  { %v2589_v17 = vpop.f32.mrf.mxu1  ;;  %v2550_v20 = vpop.f32.mrf.mxu0  ;;  %2872 = vmatprep.subr.bf16.mxu0 %v15515_v7  ;;  %v15731_v7 = vcombine.high %v374_v63, %v378_v3  ;;  %v15730_v13 = vcombine.low %v374_v63, %v378_v3  ;;  %v466_v49 = vld [vmem:[#allocation6 + $0xbb0] sm:$0xff] }
 0x14b   :  { %2912 = vmatpush2.bf16.msra.mxu1 %v15650_v5  ;;  %v18314_v26 = vadd.f32 %v2589_v17, %v2549_v15  ;;  %v2551_v54 = vadd.f32 %v2550_v20, %v493_v10  ;;  %v15500_v5 = vcombine.low %v143_v47, %v147_v48  ;;  %v366_v10 = vld [vmem:[#allocation6 + $0x890] sm:$0xff]  ;;  %v119_v15 = vld [vmem:[#allocation6 + $0xd8] sm:$0xff]  ;;  %v15485_v20 = vcombine.high %v127_v8, %v131_v9 }
 0x14c   :  { %v2591_v27 = vpop.f32.mrf.mxu1  ;;  %2913 = vmatprep.subr.bf16.mxu1 %v15643_v11  ;;  %v2552_v33 = vpop.f32.mrf.mxu0  ;;  %v15493_v11 = vcombine.high %v135_v61, %v139_v62  ;;  %v123_v17 = vld [vmem:[#allocation6 + $0xf8] sm:$0xff]  ;;  %v462_v47 = vld [vmem:[#allocation6 + $0xb90] sm:$0xff] }
 0x14d   :  { %v18316_v34 = vadd.f32 %v2591_v27, %v2551_v54  ;;  %2873 = vmatpush2.bf16.msra.mxu0 %v15514_v18  ;;  %v358_v18 = vld [vmem:[#allocation6 + $0x850] sm:$0xff]  ;;  %v111_v54 = vld [vmem:[#allocation6 + $0x98] sm:$0xff]  ;;  %v15476_v33 = vcombine.low %v119_v15, %v123_v17 }
 0x14e   :  { %v2593_v35 = vpop.f32.mrf.mxu1  ;;  %v2553_v37 = vpop.f32.mrf.mxu0  ;;  %2924 = vmatprep.subr.bf16.mxu0 %v15763_v23  ;;  %v15722_v23 = vcombine.low %v366_v10, %v370_v12  ;;  %v350_v27 = vld [vmem:[#allocation6 + $0x810] sm:$0xff] }
 0x14f   :  { %2914 = vmatpush2.bf16.msra.mxu1 %v15642_v22  ;;  %v362_v22 = vld [vmem:[#allocation6 + $0x870] sm:$0xff]  ;;  %v15707_v35 = vcombine.high %v350_v27, %v354_v29  ;;  %v107_v37 = vld [vmem:[#allocation6 + $0x78] sm:$0xff]  ;;  %v15706_v41 = vcombine.low %v350_v27, %v354_v29 }
 0x150   :  { %v2594_v21 = vpop.f32.mrf.mxu1  ;;  %2979 = vmatprep.subr.bf16.mxu1 %v15835_v28  ;;  %2875 = vmatmul.mubr.bf16.vlgmr.msra.gmra.mxu0 %v18269_v16  ;;  %v15715_v25 = vcombine.high %v358_v18, %v362_v22  ;;  %v15477_v28 = vcombine.high %v119_v15, %v123_v17  ;;  %v15714_v30 = vcombine.low %v358_v18, %v362_v22  ;;  %v454_v61 = vld [vmem:[#allocation6 + $0xb50] sm:$0xff] }
 0x151   :  { %2925 = vmatpush1.bf16.msra.mxu0 %v15762_v36  ;;  %2956 = vmatprep.mubr.bf16.mxu0 %v18280_v53  ;;  %v103_v36 = vld [vmem:[#allocation6 + $0x58] sm:$0xff]  ;;  %v458_v63 = vld [vmem:[#allocation6 + $0xb70] sm:$0xff] }
 0x152   :  { %2916 = vmatmul.mubr.bf16.vlgmr.msra.gmra.mxu1 %v18273_v19  ;;  %v18320_v44 = vpop.f32.mrf.mxu1  ;;  %2926 = vmatprep.subr.bf16.mxu0 %v15755_v39  ;;  %v15461_v48 = vcombine.high %v103_v36, %v107_v37  ;;  %v15811_v3 = vcombine.high %v454_v61, %v458_v63  ;;  %v450_v9 = vld [vmem:[#allocation6 + $0xb30] sm:$0xff] }
 0x153   :  { %2980 = vmatpush1.bf16.msra.mxu1 %v15834_v38  ;;  %2997 = vmatprep.mubr.bf16.mxu1 %v18884_v31  ;;  %v470_v38 = vld [vmem:[#allocation6 + $0xbd0] sm:$0xff] }
 0x154   :  { %v18322_v50 = vpop.f32.mrf.mxu1  ;;  %3006 = vmatprep.subr.bf16.mxu1 %v15509_v42  ;;  %v15827_v42 = vcombine.high %v470_v38, %v474_v40  ;;  %v15826_v51 = vcombine.low %v470_v38, %v474_v40  ;;  %v442_v17 = vld [vmem:[#allocation6 + $0xaf0] sm:$0xff] }
 0x155   :  { %2927 = vmatpush1.bf16.msra.mxu0 %v15754_v45  ;;  %v95_v45 = vld [vmem:[#allocation6 + $0x18] sm:$0xff] }
 0x156   :  { %v2675_v55 = vpop.f32.mrf.mxu1  ;;  %2928 = vmatprep.subr.bf16.mxu0 %v15747_v46  ;;  %v99_v46 = vld [vmem:[#allocation6 + $0x38] sm:$0xff] }
 0x157   :  { %v15460_v55 = vcombine.low %v103_v36, %v107_v37  ;;  %v15453_v62 = vcombine.high %v95_v45, %v99_v46  ;;  %v426_v37 = vld [vmem:[#allocation6 + $0xa70] sm:$0xff] }
 0x158   :  { %v2676_v1 = vpop.f32.mrf.mxu1 }
 0x159   :  { %2929 = vmatpush1.bf16.msra.mxu0 %v15746_v56  ;;  %v15819_v56 = vcombine.high %v462_v47, %v466_v49  ;;  %v15818_v1 = vcombine.low %v462_v47, %v466_v49 }
 0x15a   :  { %15840 = vmatmul.mubr.msk.bf16.vlgmr.msra.gmra.mxu1 %vm2510_vm0, %v18297_v6  ;;  %2930 = vmatprep.subr.bf16.mxu0 %v15739_v60  ;;  %v15723_v6 = vcombine.high %v366_v10, %v370_v12  ;;  %v219_v60 = vld [vmem:[#allocation6 + $0x3f8] sm:$0xff]  ;;  %v15810_v10 = vcombine.low %v454_v61, %v458_v63 }
 0x15b   :  { %3007 = vmatpush1.bf16.msra.mxu1 %v15508_v57  ;;  %3038 = vmatprep.mubr.bf16.mxu1 %v18259_v58  ;;  %v115_v58 = vld [vmem:[#allocation6 + $0xb8] sm:$0xff] }
 0x15c   :  { %3008 = vmatprep.subr.bf16.mxu1 %v15501_v2  ;;  %v15469_v39 = vcombine.high %v111_v54, %v115_v58  ;;  %v15468_v21 = vcombine.low %v111_v54, %v115_v58  ;;  %v215_v57 = vld [vmem:[#allocation6 + $0x3d8] sm:$0xff]  ;;  %v15452_v2 = vcombine.low %v95_v45, %v99_v46  ;;  %v434_v58 = vld [vmem:[#allocation6 + $0xab0] sm:$0xff] }
 0x15d   :  { %2931 = vmatpush1.bf16.msra.mxu0 %v15738_v4  ;;  %v207_v4 = vld [vmem:[#allocation6 + $0x398] sm:$0xff]  ;;  %v15573_v8 = vcombine.high %v215_v57, %v219_v60  ;;  %v418_v46 = vld [vmem:[#allocation6 + $0xa30] sm:$0xff] }
 0x15e   :  { %2932 = vmatprep.subr.bf16.mxu0 %v15731_v7  ;;  %v446_v7 = vld [vmem:[#allocation6 + $0xb10] sm:$0xff]  ;;  %v171_v61 = vld [vmem:[#allocation6 + $0x278] sm:$0xff] }
 0x15f   :  { %3009 = vmatpush1.bf16.msra.mxu1 %v15500_v5  ;;  %v211_v5 = vld [vmem:[#allocation6 + $0x3b8] sm:$0xff]  ;;  %v15803_v12 = vcombine.high %v446_v7, %v450_v9  ;;  %v15802_v18 = vcombine.low %v446_v7, %v450_v9 }
 0x160   :  { %3010 = vmatprep.subr.bf16.mxu1 %v15493_v11  ;;  %v15572_v11 = vcombine.low %v215_v57, %v219_v60  ;;  %v15565_v15 = vcombine.high %v207_v4, %v211_v5  ;;  %v167_v60 = vld [vmem:[#allocation6 + $0x258] sm:$0xff] }
 0x161   :  { %2933 = vmatpush1.bf16.msra.mxu0 %v15730_v13  ;;  %v199_v13 = vld [vmem:[#allocation6 + $0x358] sm:$0xff]  ;;  %v15525_v7 = vcombine.high %v167_v60, %v171_v61 }
 0x162   :  { %2934 = vmatprep.subr.bf16.mxu0 %v15723_v6  ;;  %v438_v6 = vld [vmem:[#allocation6 + $0xad0] sm:$0xff]  ;;  %v275_v9 = vld [vmem:[#allocation6 + $0x5b8] sm:$0xff] }
 0x163   :  { %3011 = vmatpush1.bf16.msra.mxu1 %v15492_v14  ;;  %v203_v14 = vld [vmem:[#allocation6 + $0x378] sm:$0xff]  ;;  %v15795_v22 = vcombine.high %v438_v6, %v442_v17  ;;  %v15794_v27 = vcombine.low %v438_v6, %v442_v17  ;;  %v15524_v6 = vcombine.low %v167_v60, %v171_v61 }
 0x164   :  { %3012 = vmatprep.subr.bf16.mxu1 %v15485_v20  ;;  %v15564_v20 = vcombine.low %v207_v4, %v211_v5  ;;  %v15557_v54 = vcombine.high %v199_v13, %v203_v14  ;;  %v267_v17 = vld [vmem:[#allocation6 + $0x578] sm:$0xff] }
 0x165   :  { %2935 = vmatpush1.bf16.msra.mxu0 %v15722_v23  ;;  %v191_v23 = vld [vmem:[#allocation6 + $0x318] sm:$0xff] }
 0x166   :  { %2936 = vmatprep.subr.bf16.mxu0 %v15715_v25  ;;  %v430_v25 = vld [vmem:[#allocation6 + $0xa90] sm:$0xff]  ;;  %v231_v60 = vld [vmem:[#allocation6 + $0x458] sm:$0xff] }
 0x167   :  { %3013 = vmatpush1.bf16.msra.mxu1 %v15484_v24  ;;  %v195_v24 = vld [vmem:[#allocation6 + $0x338] sm:$0xff]  ;;  %v15787_v29 = vcombine.high %v430_v25, %v434_v58  ;;  %v15786_v38 = vcombine.low %v430_v25, %v434_v58 }
 0x168   :  { %3014 = vmatprep.subr.bf16.mxu1 %v15477_v28  ;;  %v15556_v28 = vcombine.low %v199_v13, %v203_v14  ;;  %v15549_v36 = vcombine.high %v191_v23, %v195_v24  ;;  %v255_v58 = vld [vmem:[#allocation6 + $0x518] sm:$0xff] }
 0x169   :  { %2937 = vmatpush1.bf16.msra.mxu0 %v15714_v30  ;;  %v183_v30 = vld [vmem:[#allocation6 + $0x2d8] sm:$0xff] }
 0x16a   :  { %2938 = vmatprep.subr.bf16.mxu0 %v15707_v35  ;;  %v422_v35 = vld [vmem:[#allocation6 + $0xa50] sm:$0xff]  ;;  %v235_v61 = vld [vmem:[#allocation6 + $0x478] sm:$0xff] }
 0x16b   :  { %3015 = vmatpush1.bf16.msra.mxu1 %v15476_v33  ;;  %v187_v33 = vld [vmem:[#allocation6 + $0x2f8] sm:$0xff]  ;;  %v15779_v40 = vcombine.high %v422_v35, %v426_v37  ;;  %v15778_v47 = vcombine.low %v422_v35, %v426_v37 }
 0x16c   :  { %3016 = vmatprep.subr.bf16.mxu1 %v15469_v39  ;;  %v15548_v39 = vcombine.low %v191_v23, %v195_v24  ;;  %v15541_v45 = vcombine.high %v183_v30, %v187_v33 }
 0x16d   :  { %2939 = vmatpush1.bf16.msra.mxu0 %v15706_v41  ;;  %v175_v41 = vld [vmem:[#allocation6 + $0x298] sm:$0xff] }
 0x16e   :  { %2940 = vmatprep.subr.bf16.mxu0 %v15827_v42  ;;  %v414_v42 = vld [vmem:[#allocation6 + $0xa10] sm:$0xff] }
 0x16f   :  { %3017 = vmatpush1.bf16.msra.mxu1 %v15468_v21  ;;  %v179_v21 = vld [vmem:[#allocation6 + $0x2b8] sm:$0xff]  ;;  %v15771_v49 = vcombine.high %v414_v42, %v418_v46  ;;  %v15770_v63 = vcombine.low %v414_v42, %v418_v46 }
 0x170   :  { %3018 = vmatprep.subr.bf16.mxu1 %v15461_v48  ;;  %v15540_v48 = vcombine.low %v183_v30, %v187_v33 }
 0x171   :  { %2941 = vmatpush2.bf16.msra.mxu0 %v15826_v51  ;;  %v15533_v51 = vcombine.high %v175_v41, %v179_v21 }
 0x172   :  { %2942 = vmatprep.subr.bf16.mxu0 %v15819_v56  ;;  %v283_v56 = vld [vmem:[#allocation6 + $0x5f8] sm:$0xff] }
 0x173   :  { %3019 = vmatpush1.bf16.msra.mxu1 %v15460_v55  ;;  %v279_v55 = vld [vmem:[#allocation6 + $0x5d8] sm:$0xff] }
 0x174   :  { %3020 = vmatprep.subr.bf16.mxu1 %v15453_v62  ;;  %v15636_v13 = vcombine.low %v279_v55, %v283_v56 }
 0x175   :  { %2943 = vmatpush2.bf16.msra.mxu0 %v15818_v1 }
 0x176   :  { %2944 = vmatprep.subr.bf16.mxu0 %v15811_v3  ;;  %v15637_v3 = vcombine.high %v279_v55, %v283_v56 }
 0x177   :  { %3021 = vmatpush1.bf16.msra.mxu1 %v15452_v2  ;;  %v15532_v2 = vcombine.low %v175_v41, %v179_v21  ;;  %v395_v41 = vld [vmem:[#allocation6 + $0x978] sm:$0xff] }
 0x178   :  { %3022 = vmatprep.subr.bf16.mxu1 %v15573_v8  ;;  %v271_v8 = vld [vmem:[#allocation6 + $0x598] sm:$0xff] }
 0x179   :  { %2945 = vmatpush2.bf16.msra.mxu0 %v15810_v10 }
 0x17a   :  { %2946 = vmatprep.subr.bf16.mxu0 %v15803_v12  ;;  %v163_v12 = vld [vmem:[#allocation6 + $0x238] sm:$0xff] }
 0x17b   :  { %3023 = vmatpush2.bf16.msra.mxu1 %v15572_v11  ;;  %v159_v11 = vld [vmem:[#allocation6 + $0x218] sm:$0xff] }
 0x17c   :  { %3024 = vmatprep.subr.bf16.mxu1 %v15565_v15  ;;  %v15517_v15 = vcombine.high %v159_v11, %v163_v12  ;;  %v15516_v23 = vcombine.low %v159_v11, %v163_v12 }
 0x17d   :  { %2947 = vmatpush2.bf16.msra.mxu0 %v15802_v18  ;;  %v407_v18 = vld [vmem:[#allocation6 + $0x9d8] sm:$0xff] }
 0x17e   :  { %2948 = vmatprep.subr.bf16.mxu0 %v15795_v22 }
 0x17f   :  { %3025 = vmatpush2.bf16.msra.mxu1 %v15564_v20  ;;  %v411_v20 = vld [vmem:[#allocation6 + $0x9f8] sm:$0xff] }
 0x180   :  { %3026 = vmatprep.subr.bf16.mxu1 %v15557_v54  ;;  %v15765_v54 = vcombine.high %v407_v18, %v411_v20  ;;  %v15764_v35 = vcombine.low %v407_v18, %v411_v20 }
 0x181   :  { %2949 = vmatpush2.bf16.msra.mxu0 %v15794_v27  ;;  %v259_v27 = vld [vmem:[#allocation6 + $0x538] sm:$0xff] }
 0x182   :  { %2950 = vmatprep.subr.bf16.mxu0 %v15787_v29  ;;  %v403_v29 = vld [vmem:[#allocation6 + $0x9b8] sm:$0xff]  ;;  %v15612_v21 = vcombine.low %v255_v58, %v259_v27 }
 0x183   :  { %3027 = vmatpush2.bf16.msra.mxu1 %v15556_v28  ;;  %v399_v28 = vld [vmem:[#allocation6 + $0x998] sm:$0xff] }
 0x184   :  { %3028 = vmatprep.subr.bf16.mxu1 %v15549_v36  ;;  %v15613_v36 = vcombine.high %v255_v58, %v259_v27  ;;  %v15757_v37 = vcombine.high %v399_v28, %v403_v29  ;;  %v15756_v42 = vcombine.low %v399_v28, %v403_v29 }
 0x185   :  { %2951 = vmatpush2.bf16.msra.mxu0 %v15786_v38  ;;  %v247_v38 = vld [vmem:[#allocation6 + $0x4d8] sm:$0xff] }
 0x186   :  { %2952 = vmatprep.subr.bf16.mxu0 %v15779_v40  ;;  %v391_v40 = vld [vmem:[#allocation6 + $0x958] sm:$0xff] }
 0x187   :  { %3029 = vmatpush2.bf16.msra.mxu1 %v15548_v39  ;;  %v251_v39 = vld [vmem:[#allocation6 + $0x4f8] sm:$0xff]  ;;  %v15749_v46 = vcombine.high %v391_v40, %v395_v41  ;;  %v15748_v56 = vcombine.low %v391_v40, %v395_v41 }
 0x188   :  { %3030 = vmatprep.subr.bf16.mxu1 %v15541_v45  ;;  %v2630_v57 = vpop.f32.mrf.mxu0  ;;  %v15605_v45 = vcombine.high %v247_v38, %v251_v39  ;;  %v15604_v55 = vcombine.low %v247_v38, %v251_v39  ;;  %v319_v40 = vld [vmem:[#allocation6 + $0x718] sm:$0xff] }
 0x189   :  { %v2631_v62 = vadd.f32 %v2630_v57, %v18314_v26  ;;  %2953 = vmatpush2.bf16.msra.mxu0 %v15778_v47  ;;  %v239_v47 = vld [vmem:[#allocation6 + $0x498] sm:$0xff] }
 0x18a   :  { %v2632_v1 = vpop.f32.mrf.mxu0  ;;  %2954 = vmatprep.subr.bf16.mxu0 %v15771_v49  ;;  %v383_v49 = vld [vmem:[#allocation6 + $0x918] sm:$0xff] }
 0x18b   :  { %3031 = vmatpush2.bf16.msra.mxu1 %v15540_v48  ;;  %v18331_v4 = vadd.f32 %v18320_v44, %v2631_v62  ;;  %v2633_v5 = vadd.f32 %v2632_v1, %v18316_v34  ;;  %v15629_v44 = vcombine.high %v271_v8, %v275_v9  ;;  %v263_v34 = vld [vmem:[#allocation6 + $0x558] sm:$0xff] }
 0x18c   :  { %3032 = vmatprep.subr.bf16.mxu1 %v15533_v51  ;;  %v2634_v10 = vpop.f32.mrf.mxu0  ;;  %v15621_v24 = vcombine.high %v263_v34, %v267_v17  ;;  %v15620_v33 = vcombine.low %v263_v34, %v267_v17  ;;  %v243_v48 = vld [vmem:[#allocation6 + $0x4b8] sm:$0xff] }
 0x18d   :  { %v18335_v26 = vadd.f32 %v18322_v50, %v2633_v5  ;;  %2955 = vmatpush2.bf16.msra.mxu0 %v15770_v63  ;;  %v15628_v50 = vcombine.low %v271_v8, %v275_v9  ;;  %v387_v51 = vld [vmem:[#allocation6 + $0x938] sm:$0xff]  ;;  %v15596_v1 = vcombine.low %v239_v47, %v243_v48  ;;  %v15588_v10 = vcombine.low %v231_v60, %v235_v61 }
 0x18e   :  { %v2635_v14 = vpop.f32.mrf.mxu0  ;;  %3047 = vmatprep.subr.bf16.mxu0 %v15637_v3  ;;  %v15741_v57 = vcombine.high %v383_v49, %v387_v51  ;;  %v375_v62 = vld [vmem:[#allocation6 + $0x8d8] sm:$0xff] }
 0x18f   :  { %3033 = vmatpush2.bf16.msra.mxu1 %v15532_v2  ;;  %v379_v63 = vld [vmem:[#allocation6 + $0x8f8] sm:$0xff]  ;;  %v15740_v2 = vcombine.low %v383_v49, %v387_v51 }
 0x190   :  { %3034 = vmatprep.subr.bf16.mxu1 %v15525_v7  ;;  %2957 = vmatmul.mubr.bf16.vlgmr.msra.gmra.mxu0 %v18289_v32  ;;  %v15733_v3 = vcombine.high %v375_v62, %v379_v63  ;;  %v223_v5 = vld [vmem:[#allocation6 + $0x418] sm:$0xff]  ;;  %v15732_v11 = vcombine.low %v375_v62, %v379_v63 }
 0x191   :  { %3048 = vmatpush1.bf16.msra.mxu0 %v15636_v13  ;;  %3079 = vmatprep.mubr.bf16.mxu0 %v18263_v59  ;;  %v227_v7 = vld [vmem:[#allocation6 + $0x438] sm:$0xff] }
 0x192   :  { %v18338_v22 = vpop.f32.mrf.mxu1  ;;  %3049 = vmatprep.subr.bf16.mxu0 %v15629_v44  ;;  %v367_v8 = vld [vmem:[#allocation6 + $0x898] sm:$0xff]  ;;  %v15581_v12 = vcombine.high %v223_v5, %v227_v7  ;;  %v15580_v34 = vcombine.low %v223_v5, %v227_v7  ;;  %v18346_v7 = vsub.s32 2, %v18304_v43 }
 0x193   :  { %3035 = vmatpush2.bf16.msra.mxu1 %v15524_v6  ;;  %v371_v9 = vld [vmem:[#allocation6 + $0x8b8] sm:$0xff] }
 0x194   :  { %v18341_v25 = vpop.f32.mrf.mxu1  ;;  %3036 = vmatprep.subr.bf16.mxu1 %v15517_v15  ;;  %v15725_v13 = vcombine.high %v367_v8, %v371_v9  ;;  %v343_v14 = vld [vmem:[#allocation6 + $0x7d8] sm:$0xff]  ;;  %v15724_v17 = vcombine.low %v367_v8, %v371_v9 }
 0x195   :  { %3050 = vmatpush1.bf16.msra.mxu0 %v15628_v50  ;;  %v347_v6 = vld [vmem:[#allocation6 + $0x7f8] sm:$0xff] }
 0x196   :  { %v2716_v30 = vpop.f32.mrf.mxu1  ;;  %3051 = vmatprep.subr.bf16.mxu0 %v15621_v24  ;;  %v359_v44 = vld [vmem:[#allocation6 + $0x858] sm:$0xff]  ;;  %v15701_v18 = vcombine.high %v343_v14, %v347_v6  ;;  %v15700_v58 = vcombine.low %v343_v14, %v347_v6 }
 0x197   :  { %3037 = vmatpush2.bf16.msra.mxu1 %v15516_v23  ;;  %v363_v15 = vld [vmem:[#allocation6 + $0x878] sm:$0xff] }
 0x198   :  { %v2717_v59 = vpop.f32.mrf.mxu1  ;;  %3088 = vmatprep.subr.bf16.mxu1 %v15765_v54  ;;  %v15717_v20 = vcombine.high %v359_v44, %v363_v15  ;;  %v335_v50 = vld [vmem:[#allocation6 + $0x798] sm:$0xff]  ;;  %v15716_v27 = vcombine.low %v359_v44, %v363_v15  ;;  %v18351_v15 = vld [vmem:[#allocation8] sm:$0xff] }
 0x199   :  { %3052 = vmatpush1.bf16.msra.mxu0 %v15620_v33  ;;  %v339_v23 = vld [vmem:[#allocation6 + $0x7b8] sm:$0xff] }
 0x19a   :  { %3039 = vmatmul.mubr.bf16.vlgmr.msra.gmra.mxu1 %v18269_v16  ;;  %3053 = vmatprep.subr.bf16.mxu0 %v15613_v36  ;;  %v15597_v16 = vcombine.high %v239_v47, %v243_v48  ;;  %v351_v24 = vld [vmem:[#allocation6 + $0x818] sm:$0xff]  ;;  %v15693_v28 = vcombine.high %v335_v50, %v339_v23  ;;  %v15692_v59 = vcombine.low %v335_v50, %v339_v23 }
 0x19b   :  { %3089 = vmatpush1.bf16.msra.mxu1 %v15764_v35  ;;  %3120 = vmatprep.mubr.bf16.mxu1 %v18280_v53  ;;  %v15589_v53 = vcombine.high %v231_v60, %v235_v61  ;;  %v355_v54 = vld [vmem:[#allocation6 + $0x838] sm:$0xff] }
 0x19c   :  { %3090 = vmatprep.subr.bf16.mxu1 %v15757_v37  ;;  %v15709_v29 = vcombine.high %v351_v24, %v355_v54  ;;  %v327_v30 = vld [vmem:[#allocation6 + $0x758] sm:$0xff]  ;;  %v15708_v37 = vcombine.low %v351_v24, %v355_v54 }
 0x19d   :  { %3054 = vmatpush1.bf16.msra.mxu0 %v15612_v21  ;;  %v331_v33 = vld [vmem:[#allocation6 + $0x778] sm:$0xff] }
 0x19e   :  { %3055 = vmatprep.subr.bf16.mxu0 %v15605_v45  ;;  %v471_v35 = vld [vmem:[#allocation6 + $0xbd8] sm:$0xff]  ;;  %v15685_v38 = vcombine.high %v327_v30, %v331_v33  ;;  %v15684_v45 = vcombine.low %v327_v30, %v331_v33 }
 0x19f   :  { %3091 = vmatpush1.bf16.msra.mxu1 %v15756_v42  ;;  %v475_v36 = vld [vmem:[#allocation6 + $0xbf8] sm:$0xff] }
 0x1a0   :  { %3092 = vmatprep.subr.bf16.mxu1 %v15749_v46  ;;  %v15829_v39 = vcombine.high %v471_v35, %v475_v36  ;;  %v323_v41 = vld [vmem:[#allocation6 + $0x738] sm:$0xff]  ;;  %v15828_v46 = vcombine.low %v471_v35, %v475_v36 }
 0x1a1   :  { %3056 = vmatpush1.bf16.msra.mxu0 %v15604_v55  ;;  %v463_v21 = vld [vmem:[#allocation6 + $0xb98] sm:$0xff]  ;;  %v15677_v47 = vcombine.high %v319_v40, %v323_v41 }
 0x1a2   :  { %3057 = vmatprep.subr.bf16.mxu0 %v15597_v16  ;;  %v467_v42 = vld [vmem:[#allocation6 + $0xbb8] sm:$0xff]  ;;  %v15676_v16 = vcombine.low %v319_v40, %v323_v41 }
 0x1a3   :  { %3093 = vmatpush1.bf16.msra.mxu1 %v15748_v56  ;;  %v15821_v48 = vcombine.high %v463_v21, %v467_v42  ;;  %v311_v49 = vld [vmem:[#allocation6 + $0x6d8] sm:$0xff] }
 0x1a4   :  { %3094 = vmatprep.subr.bf16.mxu1 %v15741_v57  ;;  %v315_v51 = vld [vmem:[#allocation6 + $0x6f8] sm:$0xff]  ;;  %v15820_v57 = vcombine.low %v463_v21, %v467_v42 }
 0x1a5   :  { %3058 = vmatpush1.bf16.msra.mxu0 %v15596_v1  ;;  %v455_v55 = vld [vmem:[#allocation6 + $0xb58] sm:$0xff]  ;;  %v15669_v60 = vcombine.high %v311_v49, %v315_v51 }
 0x1a6   :  { %3059 = vmatprep.subr.bf16.mxu0 %v15589_v53  ;;  %v459_v56 = vld [vmem:[#allocation6 + $0xb78] sm:$0xff]  ;;  %v15668_v53 = vcombine.low %v311_v49, %v315_v51 }
 0x1a7   :  { %3095 = vmatpush1.bf16.msra.mxu1 %v15740_v2  ;;  %v15813_v61 = vcombine.high %v455_v55, %v459_v56  ;;  %v303_v62 = vld [vmem:[#allocation6 + $0x698] sm:$0xff] }
 0x1a8   :  { %3096 = vmatprep.subr.bf16.mxu1 %v15733_v3  ;;  %v307_v63 = vld [vmem:[#allocation6 + $0x6b8] sm:$0xff]  ;;  %v15812_v3 = vcombine.low %v455_v55, %v459_v56 }
 0x1a9   :  { %3060 = vmatpush1.bf16.msra.mxu0 %v15588_v10  ;;  %v447_v1 = vld [vmem:[#allocation6 + $0xb18] sm:$0xff]  ;;  %v15661_v5 = vcombine.high %v303_v62, %v307_v63  ;;  %v15660_v14 = vcombine.low %v303_v62, %v307_v63 }
 0x1aa   :  { %3061 = vmatprep.subr.bf16.mxu0 %v15581_v12  ;;  %v451_v2 = vld [vmem:[#allocation6 + $0xb38] sm:$0xff] }
 0x1ab   :  { %3097 = vmatpush1.bf16.msra.mxu1 %v15732_v11  ;;  %v15805_v8 = vcombine.high %v447_v1, %v451_v2  ;;  %v295_v9 = vld [vmem:[#allocation6 + $0x658] sm:$0xff]  ;;  %v15804_v6 = vcombine.low %v447_v1, %v451_v2 }
 0x1ac   :  { %3098 = vmatprep.subr.bf16.mxu1 %v15725_v13  ;;  %v299_v10 = vld [vmem:[#allocation6 + $0x678] sm:$0xff]  ;;  %v18349_v13 = vsub.s32 3, %v18304_v43 }
 0x1ad   :  { %3062 = vmatpush1.bf16.msra.mxu0 %v15580_v34  ;;  %v439_v11 = vld [vmem:[#allocation6 + $0xad8] sm:$0xff]  ;;  %v15653_v44 = vcombine.high %v295_v9, %v299_v10  ;;  %v497_v34 = vrot.slane %v18351_v15, %v18346_v7  ;;  %v15652_v54 = vcombine.low %v295_v9, %v299_v10 }
 0x1ae   :  { %3063 = vmatprep.subr.bf16.mxu0 %v15701_v18  ;;  %v443_v12 = vld [vmem:[#allocation6 + $0xaf8] sm:$0xff]  ;;  %v501_v24 = vrot.slane %v18351_v15, %v18349_v13 }
 0x1af   :  { %3099 = vmatpush1.bf16.msra.mxu1 %v15724_v17  ;;  %v15797_v17 = vcombine.high %v439_v11, %v443_v12  ;;  %v287_v18 = vld [vmem:[#allocation6 + $0x618] sm:$0xff] }
 0x1b0   :  { %3100 = vmatprep.subr.bf16.mxu1 %v15717_v20  ;;  %v291_v20 = vld [vmem:[#allocation6 + $0x638] sm:$0xff] }
 0x1b1   :  { %3064 = vmatpush2.bf16.msra.mxu0 %v15700_v58  ;;  %v431_v50 = vld [vmem:[#allocation6 + $0xa98] sm:$0xff]  ;;  %v15796_v58 = vcombine.low %v439_v11, %v443_v12  ;;  %v3396_v11 = vld [vmem:[#allocation6 + $0x11c0] sm:$0xff] }
 0x1b2   :  { %3065 = vmatprep.subr.bf16.mxu0 %v15693_v28  ;;  %v435_v23 = vld [vmem:[#allocation6 + $0xab8] sm:$0xff]  ;;  %v2713_v28 = vadd.f32 %v18338_v22, %v497_v34  ;;  %v3400_v12 = vld [vmem:[#allocation6 + $0x11e0] sm:$0xff] }
 0x1b3   :  { %3101 = vmatpush1.bf16.msra.mxu1 %v15716_v27  ;;  %v15645_v27 = vcombine.high %v287_v18, %v291_v20  ;;  %v479_v30 = vld [vmem:[#allocation6 + $0xc18] sm:$0xff]  ;;  %v15788_v41 = vcombine.low %v431_v50, %v435_v23 }
 0x1b4   :  { %3102 = vmatprep.subr.bf16.mxu1 %v15709_v29  ;;  %v15789_v29 = vcombine.high %v431_v50, %v435_v23  ;;  %v483_v33 = vld [vmem:[#allocation6 + $0xc38] sm:$0xff] }
 0x1b5   :  { %3066 = vmatpush2.bf16.msra.mxu0 %v15692_v59  ;;  %v423_v36 = vld [vmem:[#allocation6 + $0xa58] sm:$0xff]  ;;  %v15837_v21 = vcombine.high %v479_v30, %v483_v33  ;;  %v15836_v51 = vcombine.low %v479_v30, %v483_v33  ;;  %v3392_v30 = vld [vmem:[#allocation6 + $0x11a0] sm:$0xff] }
 0x1b6   :  { %3067 = vmatprep.subr.bf16.mxu0 %v15685_v38  ;;  %v427_v59 = vld [vmem:[#allocation6 + $0xa78] sm:$0xff] }
 0x1b7   :  { %3103 = vmatpush1.bf16.msra.mxu1 %v15708_v37  ;;  %v2715_v37 = vadd.f32 %v18341_v25, %v501_v24  ;;  %v15781_v22 = vcombine.high %v423_v36, %v427_v59  ;;  %v419_v49 = vld [vmem:[#allocation6 + $0xa38] sm:$0xff]  ;;  %v15780_v55 = vcombine.low %v423_v36, %v427_v59  ;;  %v16030_v24 = vcombine.high %v3396_v11, %v3400_v12 }
 0x1b8   :  { %3104 = vmatprep.subr.bf16.mxu1 %v15829_v39  ;;  %v15644_v39 = vcombine.low %v287_v18, %v291_v20  ;;  %v18365_v34 = vld [vmem:[#allocation3 + $0x24] sm:$0xff]  ;;  %v16029_v36 = vcombine.low %v3396_v11, %v3400_v12  ;;  %v3220_v12 = vld [vmem:[#allocation6 + $0xc40] sm:$0xff] }
 0x1b9   :  { %3068 = vmatpush2.bf16.msra.mxu0 %v15684_v45  ;;  %v3276_v45 = vld [vmem:[#allocation6 + $0xe00] sm:$0xff]  ;;  %v18376_v33 = vcombine.high %v18365_v34, %v18365_v34 }
 0x1ba   :  { %3069 = vmatprep.subr.bf16.mxu0 %v15677_v47 }
 0x1bb   :  { %3105 = vmatpush2.bf16.msra.mxu1 %v15828_v46  ;;  %v3280_v46 = vld [vmem:[#allocation6 + $0xe20] sm:$0xff] }
 0x1bc   :  { %3106 = vmatprep.subr.bf16.mxu1 %v15821_v48  ;;  %v415_v48 = vld [vmem:[#allocation6 + $0xa18] sm:$0xff]  ;;  %v15910_v56 = vcombine.high %v3276_v45, %v3280_v46 }
 0x1bd   :  { %3070 = vmatpush2.bf16.msra.mxu0 %v15676_v16  ;;  %v15773_v16 = vcombine.high %v415_v48, %v419_v49  ;;  %v15772_v2 = vcombine.low %v415_v48, %v419_v49  ;;  %v3376_v48 = vld [vmem:[#allocation6 + $0x1120] sm:$0xff] }
 0x1be   :  { %3071 = vmatprep.subr.bf16.mxu0 %v15669_v60  ;;  %v3404_v60 = vld [vmem:[#allocation6 + $0x1200] sm:$0xff] }
 0x1bf   :  { %3107 = vmatpush2.bf16.msra.mxu1 %v15820_v57 }
 0x1c0   :  { %3108 = vmatprep.subr.bf16.mxu1 %v15813_v61  ;;  %v3408_v61 = vld [vmem:[#allocation6 + $0x1220] sm:$0xff] }
 0x1c1   :  { %3072 = vmatpush2.bf16.msra.mxu0 %v15668_v53  ;;  %v16037_v20 = vcombine.low %v3404_v60, %v3408_v61 }
 0x1c2   :  { %3073 = vmatprep.subr.bf16.mxu0 %v15661_v5  ;;  %v3268_v5 = vld [vmem:[#allocation6 + $0xdc0] sm:$0xff] }
 0x1c3   :  { %3109 = vmatpush2.bf16.msra.mxu1 %v15812_v3  ;;  %v16038_v3 = vcombine.high %v3404_v60, %v3408_v61  ;;  %v3368_v60 = vld [vmem:[#allocation6 + $0x10e0] sm:$0xff] }
 0x1c4   :  { %3110 = vmatprep.subr.bf16.mxu1 %v15805_v8  ;;  %v3272_v8 = vld [vmem:[#allocation6 + $0xde0] sm:$0xff] }
 0x1c5   :  { %3074 = vmatpush2.bf16.msra.mxu0 %v15660_v14  ;;  %v18363_v14 = vld [vmem:[#allocation3 + $0x1c] sm:$0xff]  ;;  %v15902_v50 = vcombine.high %v3268_v5, %v3272_v8 }
 0x1c6   :  { %3075 = vmatprep.subr.bf16.mxu0 %v15653_v44  ;;  %v15909_v44 = vcombine.low %v3276_v45, %v3280_v46  ;;  %v3244_v45 = vld [vmem:[#allocation6 + $0xd00] sm:$0xff] }
 0x1c7   :  { %3111 = vmatpush2.bf16.msra.mxu1 %v15804_v6  ;;  %v3248_v46 = vld [vmem:[#allocation6 + $0xd20] sm:$0xff] }
 0x1c8   :  { %3112 = vmatprep.subr.bf16.mxu1 %v15797_v17  ;;  %v2753_v35 = vpop.f32.mrf.mxu0  ;;  %v15877_v61 = vcombine.low %v3244_v45, %v3248_v46 }
 0x1c9   :  { %v2754_v38 = vadd.f32 %v2753_v35, %v2713_v28  ;;  %3076 = vmatpush2.bf16.msra.mxu0 %v15652_v54  ;;  %v3260_v54 = vld [vmem:[#allocation6 + $0xd80] sm:$0xff]  ;;  %v18057_v28 = vld [vmem:[#allocation3 + $0x18] ss:$0 sps:$4 sm:$0xff]   ;;  %v15901_v35 = vcombine.low %v3268_v5, %v3272_v8 }
 0x1ca   :  { %v2755_v40 = vpop.f32.mrf.mxu0  ;;  %3077 = vmatprep.subr.bf16.mxu0 %v15645_v27  ;;  %v18371_v27 = vcombine.high %v18363_v14, %v18363_v14  ;;  %v3360_v5 = vld [vmem:[#allocation6 + $0x10a0] sm:$0xff] }
 0x1cb   :  { %3113 = vmatpush2.bf16.msra.mxu1 %v15796_v58  ;;  %v2756_v42 = vadd.f32 %v2755_v40, %v2715_v37  ;;  %v3264_v58 = vld [vmem:[#allocation6 + $0xda0] sm:$0xff] }
 0x1cc   :  { %3114 = vmatprep.subr.bf16.mxu1 %v15789_v29  ;;  %v2757_v47 = vpop.f32.mrf.mxu0  ;;  %v3388_v29 = vld [vmem:[#allocation6 + $0x1180] sm:$0xff]  ;;  %v15894_v59 = vcombine.high %v3260_v54, %v3264_v58 }
 0x1cd   :  { %3078 = vmatpush2.bf16.msra.mxu0 %v15644_v39  ;;  %v16022_v37 = vcombine.high %v3388_v29, %v3392_v30  ;;  %v3256_v39 = vld [vmem:[#allocation6 + $0xd60] sm:$0xff] }
 0x1ce   :  { %v2758_v25 = vpop.f32.mrf.mxu0  ;;  %3143 = vmatprep.subr.bf16.mxu0 %v15837_v21  ;;  %v3380_v40 = vld [vmem:[#allocation6 + $0x1140] sm:$0xff]  ;;  %v15893_v21 = vcombine.low %v3260_v54, %v3264_v58 }
 0x1cf   :  { %3115 = vmatpush2.bf16.msra.mxu1 %v15788_v41  ;;  %v3384_v41 = vld [vmem:[#allocation6 + $0x1160] sm:$0xff]  ;;  %v15878_v25 = vcombine.high %v3244_v45, %v3248_v46 }
 0x1d0   :  { %3116 = vmatprep.subr.bf16.mxu1 %v15781_v22  ;;  %3080 = vmatmul.mubr.bf16.vlgmr.msra.gmra.mxu0 %v18273_v19  ;;  %v2835_v57 = vpop.f32.mrf.mxu0  ;;  %v16014_v22 = vcombine.high %v3380_v40, %v3384_v41  ;;  %v3372_v47 = vld [vmem:[#allocation6 + $0x1100] sm:$0xff] }
 0x1d1   :  { %3144 = vmatpush1.bf16.msra.mxu0 %v15836_v51  ;;  %3161 = vmatprep.mubr.bf16.mxu0 %v18884_v31  ;;  %v16013_v51 = vcombine.low %v3380_v40, %v3384_v41  ;;  %v3340_v54 = vld [vmem:[#allocation6 + $0x1000] sm:$0xff] }
 0x1d2   :  { %v2794_v62 = vpop.f32.mrf.mxu1  ;;  %v2837_v1 = vpop.f32.mrf.mxu0  ;;  %5642 = vmatprep.subr.bf16.mxu0 %v15910_v56  ;;  %v3236_v56 = vld [vmem:[#allocation6 + $0xcc0] sm:$0xff] }
 0x1d3   :  { %v2795_v63 = vadd.f32 %v2794_v62, %v2754_v38  ;;  %3117 = vmatpush2.bf16.msra.mxu1 %v15780_v55  ;;  %v3252_v38 = vld [vmem:[#allocation6 + $0xd40] sm:$0xff]  ;;  %v16006_v55 = vcombine.high %v3372_v47, %v3376_v48  ;;  %v16005_v62 = vcombine.low %v3372_v47, %v3376_v48 }
 0x1d4   :  { %v2796_v53 = vpop.f32.mrf.mxu1  ;;  %3118 = vmatprep.subr.bf16.mxu1 %v15773_v16  ;;  %v2839_v10 = vpop.f32.mrf.mxu0  ;;  %v15885_v49 = vcombine.low %v3252_v38, %v3256_v39  ;;  %v3240_v16 = vld [vmem:[#allocation6 + $0xce0] sm:$0xff] }
 0x1d5   :  { %v18361_v9 = vadd.f32 %v2835_v57, %v2795_v63  ;;  %v2797_v19 = vadd.f32 %v2796_v53, %v2756_v42  ;;  %v15886_v42 = vcombine.high %v3252_v38, %v3256_v39  ;;  %v3364_v57 = vld [vmem:[#allocation6 + $0x10c0] sm:$0xff]  ;;  %v15870_v63 = vcombine.high %v3236_v56, %v3240_v16 }
 0x1d6   :  { %v2798_v6 = vpop.f32.mrf.mxu1  ;;  %v2840_v18 = vpop.f32.mrf.mxu0  ;;  %v3232_v53 = vld [vmem:[#allocation6 + $0xca0] sm:$0xff]  ;;  %v15869_v8 = vcombine.low %v3236_v56, %v3240_v16 }
 0x1d7   :  { %v18367_v17 = vadd.f32 %v2837_v1, %v2797_v19  ;;  %3119 = vmatpush2.bf16.msra.mxu1 %v15772_v2  ;;  %v15998_v1 = vcombine.high %v3364_v57, %v3368_v60  ;;  %v3228_v2 = vld [vmem:[#allocation6 + $0xc80] sm:$0xff]  ;;  %v15997_v19 = vcombine.low %v3364_v57, %v3368_v60 }
 0x1d8   :  { %v2799_v23 = vpop.f32.mrf.mxu1  ;;  %5683 = vmatprep.subr.bf16.mxu1 %v16038_v3  ;;  %15841 = vmatmul.mubr.msk.bf16.vlgmr.msra.gmra.mxu0 %vm2510_vm0, %v18057_v28  ;;  %v3356_v3 = vld [vmem:[#allocation6 + $0x1080] sm:$0xff]  ;;  %v15862_v10 = vcombine.high %v3228_v2, %v3232_v53 }
 0x1d9   :  { %5643 = vmatpush1.bf16.msra.mxu0 %v15909_v44  ;;  %5674 = vmatprep.mubr.bf16.mxu0 %v18371_v27  ;;  %v15990_v11 = vcombine.high %v3356_v3, %v3360_v5  ;;  %v3224_v6 = vld [vmem:[#allocation6 + $0xc60] sm:$0xff] }
 0x1da   :  { %3121 = vmatmul.mubr.bf16.vlgmr.msra.gmra.mxu1 %v18289_v32  ;;  %5644 = vmatprep.subr.bf16.mxu0 %v15902_v50  ;;  %v16021_v32 = vcombine.low %v3388_v29, %v3392_v30  ;;  %v3348_v44 = vld [vmem:[#allocation6 + $0x1040] sm:$0xff]  ;;  %v15989_v50 = vcombine.low %v3356_v3, %v3360_v5  ;;  %v15854_v23 = vcombine.high %v3220_v12, %v3224_v6 }
 0x1db   :  { %5684 = vmatpush1.bf16.msra.mxu1 %v16037_v20  ;;  %5715 = vmatprep.mubr.bf16.mxu1 %v18376_v33  ;;  %v3352_v18 = vld [vmem:[#allocation6 + $0x1060] sm:$0xff]  ;;  %v15861_v20 = vcombine.low %v3228_v2, %v3232_v53  ;;  %v15853_v30 = vcombine.low %v3220_v12, %v3224_v6 }
 0x1dc   :  { %5685 = vmatprep.subr.bf16.mxu1 %v16030_v24  ;;  %v15982_v24 = vcombine.high %v3348_v44, %v3352_v18  ;;  %v3344_v58 = vld [vmem:[#allocation6 + $0x1020] sm:$0xff] }
 0x1dd   :  { %5645 = vmatpush1.bf16.msra.mxu0 %v15901_v35  ;;  %v3468_v28 = vld [vmem:[#allocation6 + $0x1400] sm:$0xff]  ;;  %v15981_v35 = vcombine.low %v3348_v44, %v3352_v18  ;;  %v15973_v41 = vcombine.low %v3340_v54, %v3344_v58 }
 0x1de   :  { %5646 = vmatprep.subr.bf16.mxu0 %v15894_v59  ;;  %v3472_v29 = vld [vmem:[#allocation6 + $0x1420] sm:$0xff] }
 0x1df   :  { %5686 = vmatpush1.bf16.msra.mxu1 %v16029_v36  ;;  %v15974_v36 = vcombine.high %v3340_v54, %v3344_v58  ;;  %v16102_v59 = vcombine.high %v3468_v28, %v3472_v29  ;;  %v3336_v38 = vld [vmem:[#allocation6 + $0xfe0] sm:$0xff] }
 0x1e0   :  { %5687 = vmatprep.subr.bf16.mxu1 %v16022_v37  ;;  %v3332_v37 = vld [vmem:[#allocation6 + $0xfc0] sm:$0xff] }
 0x1e1   :  { %5647 = vmatpush1.bf16.msra.mxu0 %v15893_v21  ;;  %v3460_v39 = vld [vmem:[#allocation6 + $0x13c0] sm:$0xff]  ;;  %v16101_v21 = vcombine.low %v3468_v28, %v3472_v29  ;;  %v15965_v48 = vcombine.low %v3332_v37, %v3336_v38 }
 0x1e2   :  { %5648 = vmatprep.subr.bf16.mxu0 %v15886_v42  ;;  %v3464_v40 = vld [vmem:[#allocation6 + $0x13e0] sm:$0xff] }
 0x1e3   :  { %5688 = vmatpush1.bf16.msra.mxu1 %v16021_v32  ;;  %v15966_v32 = vcombine.high %v3332_v37, %v3336_v38  ;;  %v16094_v42 = vcombine.high %v3460_v39, %v3464_v40  ;;  %v3328_v45 = vld [vmem:[#allocation6 + $0xfa0] sm:$0xff]  ;;  %v18385_v37 = vsub.s32 5, %v18304_v43 }
 0x1e4   :  { %5689 = vmatprep.subr.bf16.mxu1 %v16014_v22  ;;  %v3324_v22 = vld [vmem:[#allocation6 + $0xf80] sm:$0xff] }
 0x1e5   :  { %5649 = vmatpush1.bf16.msra.mxu0 %v15885_v49  ;;  %v3452_v46 = vld [vmem:[#allocation6 + $0x1380] sm:$0xff]  ;;  %v16093_v49 = vcombine.low %v3460_v39, %v3464_v40  ;;  %v15957_v60 = vcombine.low %v3324_v22, %v3328_v45 }
 0x1e6   :  { %5650 = vmatprep.subr.bf16.mxu0 %v15878_v25  ;;  %v3456_v47 = vld [vmem:[#allocation6 + $0x13a0] sm:$0xff] }
 0x1e7   :  { %5690 = vmatpush1.bf16.msra.mxu1 %v16013_v51  ;;  %v15958_v51 = vcombine.high %v3324_v22, %v3328_v45  ;;  %v16086_v25 = vcombine.high %v3452_v46, %v3456_v47  ;;  %v3320_v56 = vld [vmem:[#allocation6 + $0xf60] sm:$0xff]  ;;  %v509_v45 = vrot.slane %v18351_v15, %v18385_v37 }
 0x1e8   :  { %5691 = vmatprep.subr.bf16.mxu1 %v16006_v55  ;;  %v3316_v55 = vld [vmem:[#allocation6 + $0xf40] sm:$0xff] }
 0x1e9   :  { %5651 = vmatpush1.bf16.msra.mxu0 %v15877_v61  ;;  %v3444_v16 = vld [vmem:[#allocation6 + $0x1340] sm:$0xff]  ;;  %v16085_v61 = vcombine.low %v3452_v46, %v3456_v47  ;;  %v15949_v5 = vcombine.low %v3316_v55, %v3320_v56 }
 0x1ea   :  { %5652 = vmatprep.subr.bf16.mxu0 %v15870_v63  ;;  %v3448_v57 = vld [vmem:[#allocation6 + $0x1360] sm:$0xff] }
 0x1eb   :  { %5692 = vmatpush1.bf16.msra.mxu1 %v16005_v62  ;;  %v15950_v62 = vcombine.high %v3316_v55, %v3320_v56  ;;  %v16078_v63 = vcombine.high %v3444_v16, %v3448_v57  ;;  %v3312_v2 = vld [vmem:[#allocation6 + $0xf20] sm:$0xff] }
 0x1ec   :  { %5693 = vmatprep.subr.bf16.mxu1 %v15998_v1  ;;  %v3308_v1 = vld [vmem:[#allocation6 + $0xf00] sm:$0xff] }
 0x1ed   :  { %5653 = vmatpush1.bf16.msra.mxu0 %v15869_v8  ;;  %v3436_v53 = vld [vmem:[#allocation6 + $0x1300] sm:$0xff]  ;;  %v16077_v8 = vcombine.low %v3444_v16, %v3448_v57  ;;  %v15941_v18 = vcombine.low %v3308_v1, %v3312_v2 }
 0x1ee   :  { %5654 = vmatprep.subr.bf16.mxu0 %v15862_v10  ;;  %v3440_v3 = vld [vmem:[#allocation6 + $0x1320] sm:$0xff] }
 0x1ef   :  { %5694 = vmatpush1.bf16.msra.mxu1 %v15997_v19  ;;  %v15942_v19 = vcombine.high %v3308_v1, %v3312_v2  ;;  %v16070_v10 = vcombine.high %v3436_v53, %v3440_v3  ;;  %v3304_v12 = vld [vmem:[#allocation6 + $0xee0] sm:$0xff] }
 0x1f0   :  { %5695 = vmatprep.subr.bf16.mxu1 %v15990_v11  ;;  %v3300_v11 = vld [vmem:[#allocation6 + $0xec0] sm:$0xff] }
 0x1f1   :  { %5655 = vmatpush1.bf16.msra.mxu0 %v15861_v20  ;;  %v3428_v6 = vld [vmem:[#allocation6 + $0x12c0] sm:$0xff]  ;;  %v16069_v20 = vcombine.low %v3436_v53, %v3440_v3  ;;  %v15933_v29 = vcombine.low %v3300_v11, %v3304_v12 }
 0x1f2   :  { %5656 = vmatprep.subr.bf16.mxu0 %v15854_v23  ;;  %v3432_v44 = vld [vmem:[#allocation6 + $0x12e0] sm:$0xff] }
 0x1f3   :  { %5696 = vmatpush1.bf16.msra.mxu1 %v15989_v50  ;;  %v15934_v50 = vcombine.high %v3300_v11, %v3304_v12  ;;  %v16062_v23 = vcombine.high %v3428_v6, %v3432_v44  ;;  %v3296_v54 = vld [vmem:[#allocation6 + $0xea0] sm:$0xff]  ;;  %v18401_v12 = vcombine.low %v18365_v34, %v18365_v34 }
 0x1f4   :  { %5697 = vmatprep.subr.bf16.mxu1 %v15982_v24  ;;  %v3292_v24 = vld [vmem:[#allocation6 + $0xe80] sm:$0xff] }
 0x1f5   :  { %5657 = vmatpush1.bf16.msra.mxu0 %v15853_v30  ;;  %v3420_v58 = vld [vmem:[#allocation6 + $0x1280] sm:$0xff]  ;;  %v18382_v30 = vsub.s32 4, %v18304_v43 }
 0x1f6   :  { %5658 = vmatprep.subr.bf16.mxu0 %v15974_v36  ;;  %v3424_v28 = vld [vmem:[#allocation6 + $0x12a0] sm:$0xff]  ;;  %v15926_v36 = vcombine.high %v3292_v24, %v3296_v54 }
 0x1f7   :  { %5698 = vmatpush1.bf16.msra.mxu1 %v15981_v35  ;;  %v16061_v35 = vcombine.low %v3428_v6, %v3432_v44  ;;  %v3284_v38 = vld [vmem:[#allocation6 + $0xe40] sm:$0xff] }
 0x1f8   :  { %5699 = vmatprep.subr.bf16.mxu1 %v16102_v59  ;;  %v16054_v59 = vcombine.high %v3420_v58, %v3424_v28  ;;  %v3288_v39 = vld [vmem:[#allocation6 + $0xe60] sm:$0xff] }
 0x1f9   :  { %5659 = vmatpush2.bf16.msra.mxu0 %v15973_v41  ;;  %v3412_v40 = vld [vmem:[#allocation6 + $0x1240] sm:$0xff]  ;;  %v15918_v22 = vcombine.high %v3284_v38, %v3288_v39  ;;  %v15917_v16 = vcombine.low %v3284_v38, %v3288_v39  ;;  %v3269_v38 = vld [vmem:[#allocation6 + $0xdc8] sm:$0xff] }
 0x1fa   :  { %5660 = vmatprep.subr.bf16.mxu0 %v15966_v32  ;;  %v3416_v41 = vld [vmem:[#allocation6 + $0x1260] sm:$0xff]  ;;  %v505_v32 = vrot.slane %v18351_v15, %v18382_v30  ;;  %v3273_v39 = vld [vmem:[#allocation6 + $0xde8] sm:$0xff] }
 0x1fb   :  { %5700 = vmatpush2.bf16.msra.mxu1 %v16101_v21  ;;  %v15925_v21 = vcombine.low %v3292_v24, %v3296_v54  ;;  %v16046_v46 = vcombine.high %v3412_v40, %v3416_v41  ;;  %v3532_v47 = vld [vmem:[#allocation6 + $0x1600] sm:$0xff] }
 0x1fc   :  { %5701 = vmatprep.subr.bf16.mxu1 %v16094_v42  ;;  %v16053_v42 = vcombine.low %v3420_v58, %v3424_v28  ;;  %v3524_v2 = vld [vmem:[#allocation6 + $0x15c0] sm:$0xff] }
 0x1fd   :  { %5661 = vmatpush2.bf16.msra.mxu0 %v15965_v48  ;;  %v3536_v48 = vld [vmem:[#allocation6 + $0x1620] sm:$0xff] }
 0x1fe   :  { %5662 = vmatprep.subr.bf16.mxu0 %v15958_v51  ;;  %v3604_v51 = vld [vmem:[#allocation6 + $0x1840] sm:$0xff]  ;;  %v16165_v6 = vcombine.low %v3532_v47, %v3536_v48 }
 0x1ff   :  { %5702 = vmatpush2.bf16.msra.mxu1 %v16093_v49  ;;  %v3528_v53 = vld [vmem:[#allocation6 + $0x15e0] sm:$0xff] }
 0x200   :  { %5703 = vmatprep.subr.bf16.mxu1 %v16086_v25  ;;  %v3608_v25 = vld [vmem:[#allocation6 + $0x1860] sm:$0xff]  ;;  %v16157_v28 = vcombine.low %v3524_v2, %v3528_v53 }
 0x201   :  { %5663 = vmatpush2.bf16.msra.mxu0 %v15957_v60  ;;  %v16045_v60 = vcombine.low %v3412_v40, %v3416_v41  ;;  %v16238_v15 = vcombine.high %v3604_v51, %v3608_v25  ;;  %v18403_v44 = vld [vmem:[#allocation3 + $0x2c] sm:$0xff] }
 0x202   :  { %5664 = vmatprep.subr.bf16.mxu0 %v15950_v62  ;;  %v3516_v24 = vld [vmem:[#allocation6 + $0x1580] sm:$0xff]  ;;  %v18408_v58 = vcombine.high %v18403_v44, %v18403_v44 }
 0x203   :  { %5704 = vmatpush2.bf16.msra.mxu1 %v16085_v61  ;;  %v16166_v61 = vcombine.high %v3532_v47, %v3536_v48  ;;  %v3520_v54 = vld [vmem:[#allocation6 + $0x15a0] sm:$0xff]  ;;  %v3261_v48 = vld [vmem:[#allocation6 + $0xd88] sm:$0xff] }
 0x204   :  { %5705 = vmatprep.subr.bf16.mxu1 %v16078_v63  ;;  %v16149_v41 = vcombine.low %v3516_v24, %v3520_v54  ;;  %v3504_v47 = vld [vmem:[#allocation6 + $0x1520] sm:$0xff] }
 0x205   :  { %5665 = vmatpush2.bf16.msra.mxu0 %v15949_v5  ;;  %v18395_v5 = vcombine.low %v18363_v14, %v18363_v14 }
 0x206   :  { %5666 = vmatprep.subr.bf16.mxu0 %v15942_v19  ;;  %v3281_v19 = vld [vmem:[#allocation6 + $0xe28] sm:$0xff] }
 0x207   :  { %5706 = vmatpush2.bf16.msra.mxu1 %v16077_v8  ;;  %v3277_v8 = vld [vmem:[#allocation6 + $0xe08] sm:$0xff] }
 0x208   :  { %5707 = vmatprep.subr.bf16.mxu1 %v16070_v10 }
 0x209   :  { %5667 = vmatpush2.bf16.msra.mxu0 %v15941_v18 }
 0x20a   :  { %5668 = vmatprep.subr.bf16.mxu0 %v15934_v50  ;;  %v16158_v50 = vcombine.high %v3524_v2, %v3528_v53  ;;  %v3484_v53 = vld [vmem:[#allocation6 + $0x1480] sm:$0xff] }
 0x20b   :  { %5708 = vmatpush2.bf16.msra.mxu1 %v16069_v20  ;;  %v16237_v20 = vcombine.low %v3604_v51, %v3608_v25  ;;  %v15903_v25 = vcombine.low %v3269_v38, %v3273_v39 }
 0x20c   :  { %5709 = vmatprep.subr.bf16.mxu1 %v16062_v23  ;;  %v15912_v23 = vcombine.high %v3277_v8, %v3281_v19 }
 0x20d   :  { %5669 = vmatpush2.bf16.msra.mxu0 %v15933_v29  ;;  %v16150_v29 = vcombine.high %v3516_v24, %v3520_v54  ;;  %v3241_v24 = vld [vmem:[#allocation6 + $0xce8] sm:$0xff] }
 0x20e   :  { %5670 = vmatprep.subr.bf16.mxu0 %v15926_v36  ;;  %v3508_v36 = vld [vmem:[#allocation6 + $0x1540] sm:$0xff] }
 0x20f   :  { %5710 = vmatpush2.bf16.msra.mxu1 %v16061_v35 }
 0x210   :  { %5711 = vmatprep.subr.bf16.mxu1 %v16054_v59  ;;  %v2876_v49 = vpop.f32.mrf.mxu0  ;;  %v3512_v59 = vld [vmem:[#allocation6 + $0x1560] sm:$0xff] }
 0x211   :  { %v2877_v55 = vadd.f32 %v2876_v49, %v505_v32  ;;  %5671 = vmatpush2.bf16.msra.mxu0 %v15925_v21  ;;  %v18417_v21 = vld [vmem:[#allocation3 + $0x34] ss:$0 sps:$4 sm:$0xff]   ;;  %v15911_v32 = vcombine.low %v3277_v8, %v3281_v19  ;;  %v3265_v49 = vld [vmem:[#allocation6 + $0xda8] sm:$0xff]  ;;  %v16141_v51 = vcombine.low %v3508_v36, %v3512_v59 }
 0x212   :  { %v2917_v56 = vpop.f32.mrf.mxu1  ;;  %v2878_v57 = vpop.f32.mrf.mxu0  ;;  %5672 = vmatprep.subr.bf16.mxu0 %v15918_v22  ;;  %v3245_v8 = vld [vmem:[#allocation6 + $0xd08] sm:$0xff] }
 0x213   :  { %5712 = vmatpush2.bf16.msra.mxu1 %v16053_v42  ;;  %v18391_v62 = vadd.f32 %v2917_v56, %v2877_v55  ;;  %v2879_v63 = vadd.f32 %v2878_v57, %v509_v45  ;;  %v16142_v42 = vcombine.high %v3508_v36, %v3512_v59  ;;  %v15904_v45 = vcombine.high %v3269_v38, %v3273_v39  ;;  %v3496_v57 = vld [vmem:[#allocation6 + $0x14e0] sm:$0xff]  ;;  %v3249_v19 = vld [vmem:[#allocation6 + $0xd28] sm:$0xff] }
 0x214   :  { %v2919_v1 = vpop.f32.mrf.mxu1  ;;  %5713 = vmatprep.subr.bf16.mxu1 %v16046_v46  ;;  %v2880_v3 = vpop.f32.mrf.mxu0  ;;  %v3500_v46 = vld [vmem:[#allocation6 + $0x1500] sm:$0xff]  ;;  %v15896_v56 = vcombine.high %v3261_v48, %v3265_v49  ;;  %v3229_v39 = vld [vmem:[#allocation6 + $0xc88] sm:$0xff] }
 0x215   :  { %v18397_v10 = vadd.f32 %v2919_v1, %v2879_v63  ;;  %5673 = vmatpush2.bf16.msra.mxu0 %v15917_v16  ;;  %v16134_v55 = vcombine.high %v3500_v46, %v3504_v47  ;;  %v3492_v16 = vld [vmem:[#allocation6 + $0x14c0] sm:$0xff]  ;;  %v16133_v63 = vcombine.low %v3500_v46, %v3504_v47  ;;  %v15895_v1 = vcombine.low %v3261_v48, %v3265_v49  ;;  %v3221_v47 = vld [vmem:[#allocation6 + $0xc48] sm:$0xff] }
 0x216   :  { %v2921_v11 = vpop.f32.mrf.mxu1  ;;  %v2881_v18 = vpop.f32.mrf.mxu0  ;;  %5724 = vmatprep.subr.bf16.mxu0 %v16166_v61  ;;  %v3257_v61 = vld [vmem:[#allocation6 + $0xd68] sm:$0xff]  ;;  %v3488_v3 = vld [vmem:[#allocation6 + $0x14a0] sm:$0xff] }
 0x217   :  { %5714 = vmatpush2.bf16.msra.mxu1 %v16045_v60  ;;  %v3253_v60 = vld [vmem:[#allocation6 + $0xd48] sm:$0xff]  ;;  %v16125_v11 = vcombine.low %v3492_v16, %v3496_v57  ;;  %v16118_v18 = vcombine.high %v3484_v53, %v3488_v3  ;;  %v16117_v54 = vcombine.low %v3484_v53, %v3488_v3  ;;  %v3596_v59 = vld [vmem:[#allocation6 + $0x1800] sm:$0xff] }
 0x218   :  { %v2922_v14 = vpop.f32.mrf.mxu1  ;;  %5779 = vmatprep.subr.bf16.mxu1 %v16238_v15  ;;  %5675 = vmatmul.mubr.bf16.vlgmr.msra.gmra.mxu0 %v18395_v5  ;;  %v16126_v15 = vcombine.high %v3492_v16, %v3496_v57  ;;  %v15888_v2 = vcombine.high %v3253_v60, %v3257_v61  ;;  %v3600_v38 = vld [vmem:[#allocation6 + $0x1820] sm:$0xff]  ;;  %v3225_v48 = vld [vmem:[#allocation6 + $0xc68] sm:$0xff] }
 0x219   :  { %5725 = vmatpush1.bf16.msra.mxu0 %v16165_v6  ;;  %5756 = vmatprep.mubr.bf16.mxu0 %v18408_v58  ;;  %v15887_v6 = vcombine.low %v3253_v60, %v3257_v61  ;;  %v3480_v14 = vld [vmem:[#allocation6 + $0x1460] sm:$0xff]  ;;  %v16229_v49 = vcombine.low %v3596_v59, %v3600_v38  ;;  %v3341_v57 = vld [vmem:[#allocation6 + $0x1008] sm:$0xff] }
 0x21a   :  { %5716 = vmatmul.mubr.bf16.vlgmr.msra.gmra.mxu1 %v18401_v12  ;;  %v18411_v34 = vpop.f32.mrf.mxu1  ;;  %5726 = vmatprep.subr.bf16.mxu0 %v16158_v50  ;;  %v3476_v50 = vld [vmem:[#allocation6 + $0x1440] sm:$0xff]  ;;  %v3345_v60 = vld [vmem:[#allocation6 + $0x1028] sm:$0xff] }
 0x21b   :  { %5780 = vmatpush1.bf16.msra.mxu1 %v16237_v20  ;;  %5797 = vmatprep.mubr.bf16.mxu1 %v18884_v31  ;;  %v15880_v20 = vcombine.high %v3245_v8, %v3249_v19  ;;  %v3592_v46 = vld [vmem:[#allocation6 + $0x17e0] sm:$0xff]  ;;  %v3333_v3 = vld [vmem:[#allocation6 + $0xfc8] sm:$0xff] }
 0x21c   :  { %v18413_v35 = vpop.f32.mrf.mxu1  ;;  %5806 = vmatprep.subr.bf16.mxu1 %v15912_v23  ;;  %v3237_v23 = vld [vmem:[#allocation6 + $0xcc8] sm:$0xff]  ;;  %v3584_v16 = vld [vmem:[#allocation6 + $0x17a0] sm:$0xff] }
 0x21d   :  { %5727 = vmatpush1.bf16.msra.mxu0 %v16157_v28  ;;  %v15879_v28 = vcombine.low %v3245_v8, %v3249_v19  ;;  %v15872_v36 = vcombine.high %v3237_v23, %v3241_v24  ;;  %v3576_v53 = vld [vmem:[#allocation6 + $0x1760] sm:$0xff]  ;;  %v3337_v8 = vld [vmem:[#allocation6 + $0xfe8] sm:$0xff] }
 0x21e   :  { %v3003_v40 = vpop.f32.mrf.mxu1  ;;  %5728 = vmatprep.subr.bf16.mxu0 %v16150_v29  ;;  %v16110_v29 = vcombine.high %v3476_v50, %v3480_v14 }
 0x21f   :  { %v3233_v40 = vld [vmem:[#allocation6 + $0xca8] sm:$0xff] }
 0x220   :  { %v3004_v22 = vpop.f32.mrf.mxu1 }
 0x221   :  { %5729 = vmatpush1.bf16.msra.mxu0 %v16149_v41  ;;  %v16109_v41 = vcombine.low %v3476_v50, %v3480_v14  ;;  %v15864_v22 = vcombine.high %v3229_v39, %v3233_v40  ;;  %v3568_v50 = vld [vmem:[#allocation6 + $0x1720] sm:$0xff]  ;;  %v3325_v14 = vld [vmem:[#allocation6 + $0xf88] sm:$0xff] }
 0x222   :  { %16245 = vmatmul.mubr.msk.bf16.vlgmr.msra.gmra.mxu1 %vm2510_vm0, %v18417_v21  ;;  %5730 = vmatprep.subr.bf16.mxu0 %v16142_v42  ;;  %v16230_v42 = vcombine.high %v3596_v59, %v3600_v38  ;;  %v3560_v59 = vld [vmem:[#allocation6 + $0x16e0] sm:$0xff]  ;;  %v3317_v38 = vld [vmem:[#allocation6 + $0xf48] sm:$0xff] }
 0x223   :  { %5807 = vmatpush1.bf16.msra.mxu1 %v15911_v32  ;;  %5838 = vmatprep.mubr.bf16.mxu1 %v18371_v27  ;;  %v15871_v32 = vcombine.low %v3237_v23, %v3241_v24  ;;  %v3329_v23 = vld [vmem:[#allocation6 + $0xfa8] sm:$0xff] }
 0x224   :  { %5808 = vmatprep.subr.bf16.mxu1 %v15904_v45  ;;  %v3588_v45 = vld [vmem:[#allocation6 + $0x17c0] sm:$0xff] }
 0x225   :  { %5731 = vmatpush1.bf16.msra.mxu0 %v16141_v51  ;;  %v15863_v51 = vcombine.low %v3229_v39, %v3233_v40  ;;  %v16221_v61 = vcombine.low %v3588_v45, %v3592_v46  ;;  %v3321_v39 = vld [vmem:[#allocation6 + $0xf68] sm:$0xff] }
 0x226   :  { %5732 = vmatprep.subr.bf16.mxu0 %v16134_v55  ;;  %v15856_v55 = vcombine.high %v3221_v47, %v3225_v48 }
 0x227   :  { %5809 = vmatpush1.bf16.msra.mxu1 %v15903_v25  ;;  %v16222_v25 = vcombine.high %v3588_v45, %v3592_v46  ;;  %v3552_v45 = vld [vmem:[#allocation6 + $0x16a0] sm:$0xff]  ;;  %v3309_v46 = vld [vmem:[#allocation6 + $0xf08] sm:$0xff] }
 0x228   :  { %5810 = vmatprep.subr.bf16.mxu1 %v15896_v56  ;;  %v3580_v56 = vld [vmem:[#allocation6 + $0x1780] sm:$0xff] }
 0x229   :  { %5733 = vmatpush1.bf16.msra.mxu0 %v16133_v63  ;;  %v15855_v63 = vcombine.low %v3221_v47, %v3225_v48  ;;  %v16213_v19 = vcombine.low %v3580_v56, %v3584_v16  ;;  %v3313_v47 = vld [vmem:[#allocation6 + $0xf28] sm:$0xff] }
 0x22a   :  { %5734 = vmatprep.subr.bf16.mxu0 %v16126_v15  ;;  %v15976_v15 = vcombine.high %v3341_v57, %v3345_v60 }
 0x22b   :  { %5811 = vmatpush1.bf16.msra.mxu1 %v15895_v1  ;;  %v16214_v1 = vcombine.high %v3580_v56, %v3584_v16  ;;  %v3544_v56 = vld [vmem:[#allocation6 + $0x1660] sm:$0xff]  ;;  %v3301_v16 = vld [vmem:[#allocation6 + $0xec8] sm:$0xff] }
 0x22c   :  { %5812 = vmatprep.subr.bf16.mxu1 %v15888_v2  ;;  %v3572_v2 = vld [vmem:[#allocation6 + $0x1740] sm:$0xff] }
 0x22d   :  { %5735 = vmatpush1.bf16.msra.mxu0 %v16125_v11  ;;  %v15975_v11 = vcombine.low %v3341_v57, %v3345_v60  ;;  %v16205_v24 = vcombine.low %v3572_v2, %v3576_v53  ;;  %v3305_v57 = vld [vmem:[#allocation6 + $0xee8] sm:$0xff] }
 0x22e   :  { %5736 = vmatprep.subr.bf16.mxu0 %v16118_v18  ;;  %v15968_v18 = vcombine.high %v3333_v3, %v3337_v8 }
 0x22f   :  { %5813 = vmatpush1.bf16.msra.mxu1 %v15887_v6  ;;  %v16206_v6 = vcombine.high %v3572_v2, %v3576_v53  ;;  %v3409_v2 = vld [vmem:[#allocation6 + $0x1228] sm:$0xff] }
 0x230   :  { %5814 = vmatprep.subr.bf16.mxu1 %v15880_v20  ;;  %v3564_v20 = vld [vmem:[#allocation6 + $0x1700] sm:$0xff] }
 0x231   :  { %5737 = vmatpush1.bf16.msra.mxu0 %v16117_v54  ;;  %v15967_v54 = vcombine.low %v3333_v3, %v3337_v8  ;;  %v16197_v40 = vcombine.low %v3564_v20, %v3568_v50  ;;  %v3293_v3 = vld [vmem:[#allocation6 + $0xe88] sm:$0xff] }
 0x232   :  { %5738 = vmatprep.subr.bf16.mxu0 %v16110_v29  ;;  %v15960_v29 = vcombine.high %v3325_v14, %v3329_v23  ;;  %v3297_v8 = vld [vmem:[#allocation6 + $0xea8] sm:$0xff] }
 0x233   :  { %5815 = vmatpush1.bf16.msra.mxu1 %v15879_v28  ;;  %v16198_v28 = vcombine.high %v3564_v20, %v3568_v50 }
 0x234   :  { %5816 = vmatprep.subr.bf16.mxu1 %v15872_v36  ;;  %v3556_v36 = vld [vmem:[#allocation6 + $0x16c0] sm:$0xff] }
 0x235   :  { %5739 = vmatpush1.bf16.msra.mxu0 %v16109_v41  ;;  %v15959_v41 = vcombine.low %v3325_v14, %v3329_v23  ;;  %v16189_v48 = vcombine.low %v3556_v36, %v3560_v59  ;;  %v15928_v23 = vcombine.high %v3293_v3, %v3297_v8 }
 0x236   :  { %5740 = vmatprep.subr.bf16.mxu0 %v16230_v42  ;;  %v15952_v42 = vcombine.high %v3317_v38, %v3321_v39 }
 0x237   :  { %5817 = vmatpush1.bf16.msra.mxu1 %v15871_v32  ;;  %v16190_v32 = vcombine.high %v3556_v36, %v3560_v59  ;;  %v3289_v36 = vld [vmem:[#allocation6 + $0xe68] sm:$0xff] }
 0x238   :  { %5818 = vmatprep.subr.bf16.mxu1 %v15864_v22  ;;  %v3548_v22 = vld [vmem:[#allocation6 + $0x1680] sm:$0xff] }
 0x239   :  { %5741 = vmatpush2.bf16.msra.mxu0 %v16229_v49  ;;  %v15951_v49 = vcombine.low %v3317_v38, %v3321_v39  ;;  %v16181_v60 = vcombine.low %v3548_v22, %v3552_v45  ;;  %v15927_v39 = vcombine.low %v3293_v3, %v3297_v8 }
 0x23a   :  { %5742 = vmatprep.subr.bf16.mxu0 %v16222_v25  ;;  %v15944_v25 = vcombine.high %v3309_v46, %v3313_v47 }
 0x23b   :  { %5819 = vmatpush1.bf16.msra.mxu1 %v15863_v51  ;;  %v16182_v51 = vcombine.high %v3548_v22, %v3552_v45 }
 0x23c   :  { %5820 = vmatprep.subr.bf16.mxu1 %v15856_v55  ;;  %v3540_v55 = vld [vmem:[#allocation6 + $0x1640] sm:$0xff] }
 0x23d   :  { %5743 = vmatpush2.bf16.msra.mxu0 %v16221_v61  ;;  %v15943_v61 = vcombine.low %v3309_v46, %v3313_v47 }
 0x23e   :  { %5744 = vmatprep.subr.bf16.mxu0 %v16214_v1  ;;  %v15936_v1 = vcombine.high %v3301_v16, %v3305_v57 }
 0x23f   :  { %5821 = vmatpush1.bf16.msra.mxu1 %v15855_v63  ;;  %v16174_v63 = vcombine.high %v3540_v55, %v3544_v56 }
 0x240   :  { %5822 = vmatprep.subr.bf16.mxu1 %v15976_v15  ;;  %v3405_v15 = vld [vmem:[#allocation6 + $0x1208] sm:$0xff] }
 0x241   :  { %5745 = vmatpush2.bf16.msra.mxu0 %v16213_v19  ;;  %v16040_v20 = vcombine.high %v3405_v15, %v3409_v2  ;;  %v16039_v38 = vcombine.low %v3405_v15, %v3409_v2  ;;  %v3377_v15 = vld [vmem:[#allocation6 + $0x1128] sm:$0xff] }
 0x242   :  { %5746 = vmatprep.subr.bf16.mxu0 %v16206_v6  ;;  %v3517_v2 = vld [vmem:[#allocation6 + $0x1588] sm:$0xff] }
 0x243   :  { %5823 = vmatpush2.bf16.msra.mxu1 %v15975_v11  ;;  %v16173_v11 = vcombine.low %v3540_v55, %v3544_v56  ;;  %v3529_v55 = vld [vmem:[#allocation6 + $0x15e8] sm:$0xff] }
 0x244   :  { %5824 = vmatprep.subr.bf16.mxu1 %v15968_v18  ;;  %v15935_v18 = vcombine.low %v3301_v16, %v3305_v57 }
 0x245   :  { %5747 = vmatpush2.bf16.msra.mxu0 %v16205_v24  ;;  %v3397_v24 = vld [vmem:[#allocation6 + $0x11c8] sm:$0xff] }
 0x246   :  { %5748 = vmatprep.subr.bf16.mxu0 %v16198_v28 }
 0x247   :  { %5825 = vmatpush2.bf16.msra.mxu1 %v15967_v54  ;;  %v3401_v54 = vld [vmem:[#allocation6 + $0x11e8] sm:$0xff] }
 0x248   :  { %5826 = vmatprep.subr.bf16.mxu1 %v15960_v29  ;;  %v3285_v29 = vld [vmem:[#allocation6 + $0xe48] sm:$0xff] }
 0x249   :  { %5749 = vmatpush2.bf16.msra.mxu0 %v16197_v40  ;;  %v15920_v40 = vcombine.high %v3285_v29, %v3289_v36  ;;  %v15919_v45 = vcombine.low %v3285_v29, %v3289_v36  ;;  %v3357_v29 = vld [vmem:[#allocation6 + $0x1088] sm:$0xff] }
 0x24a   :  { %5750 = vmatprep.subr.bf16.mxu0 %v16190_v32  ;;  %v3393_v32 = vld [vmem:[#allocation6 + $0x11a8] sm:$0xff] }
 0x24b   :  { %5827 = vmatpush2.bf16.msra.mxu1 %v15959_v41  ;;  %v3389_v41 = vld [vmem:[#allocation6 + $0x1188] sm:$0xff] }
 0x24c   :  { %5828 = vmatprep.subr.bf16.mxu1 %v15952_v42  ;;  %v3537_v42 = vld [vmem:[#allocation6 + $0x1628] sm:$0xff]  ;;  %v16024_v46 = vcombine.high %v3389_v41, %v3393_v32  ;;  %v16023_v16 = vcombine.low %v3389_v41, %v3393_v32 }
 0x24d   :  { %5751 = vmatpush2.bf16.msra.mxu0 %v16189_v48  ;;  %v3361_v36 = vld [vmem:[#allocation6 + $0x10a8] sm:$0xff] }
 0x24e   :  { %5752 = vmatprep.subr.bf16.mxu0 %v16182_v51  ;;  %v3385_v51 = vld [vmem:[#allocation6 + $0x1168] sm:$0xff] }
 0x24f   :  { %5829 = vmatpush2.bf16.msra.mxu1 %v15951_v49  ;;  %v3381_v49 = vld [vmem:[#allocation6 + $0x1148] sm:$0xff] }
 0x250   :  { %5830 = vmatprep.subr.bf16.mxu1 %v15944_v25  ;;  %v2958_v53 = vpop.f32.mrf.mxu0  ;;  %v3525_v25 = vld [vmem:[#allocation6 + $0x15c8] sm:$0xff]  ;;  %v16015_v3 = vcombine.low %v3381_v49, %v3385_v51 }
 0x251   :  { %v2959_v19 = vadd.f32 %v2958_v53, %v18391_v62  ;;  %5753 = vmatpush2.bf16.msra.mxu0 %v16181_v60  ;;  %v18429_v62 = vcombine.low %v18403_v44, %v18403_v44  ;;  %v3533_v44 = vld [vmem:[#allocation6 + $0x1608] sm:$0xff]  ;;  %v16016_v60 = vcombine.high %v3381_v49, %v3385_v51  ;;  %v16159_v8 = vcombine.low %v3525_v25, %v3529_v55 }
 0x252   :  { %v2960_v6 = vpop.f32.mrf.mxu0  ;;  %5754 = vmatprep.subr.bf16.mxu0 %v16174_v63  ;;  %v16168_v48 = vcombine.high %v3533_v44, %v3537_v42  ;;  %v16167_v57 = vcombine.low %v3533_v44, %v3537_v42  ;;  %v16160_v63 = vcombine.high %v3525_v25, %v3529_v55  ;;  %v3521_v53 = vld [vmem:[#allocation6 + $0x15a8] sm:$0xff] }
 0x253   :  { %5831 = vmatpush2.bf16.msra.mxu1 %v15943_v61  ;;  %v18424_v50 = vadd.f32 %v18411_v34, %v2959_v19  ;;  %v2961_v14 = vadd.f32 %v2960_v6, %v18397_v10  ;;  %v16032_v10 = vcombine.high %v3397_v24, %v3401_v54  ;;  %v3365_v6 = vld [vmem:[#allocation6 + $0x10c8] sm:$0xff] }
 0x254   :  { %5832 = vmatprep.subr.bf16.mxu1 %v15936_v1  ;;  %v2962_v28 = vpop.f32.mrf.mxu0  ;;  %v3373_v1 = vld [vmem:[#allocation6 + $0x1108] sm:$0xff] }
 0x255   :  { %v18432_v59 = vadd.f32 %v18413_v35, %v2961_v14  ;;  %5755 = vmatpush2.bf16.msra.mxu0 %v16173_v11  ;;  %v16031_v35 = vcombine.low %v3397_v24, %v3401_v54  ;;  %v16008_v19 = vcombine.high %v3373_v1, %v3377_v15  ;;  %v16152_v11 = vcombine.high %v3517_v2, %v3521_v53  ;;  %v3513_v14 = vld [vmem:[#allocation6 + $0x1568] sm:$0xff] }
 0x256   :  { %v2963_v34 = vpop.f32.mrf.mxu0  ;;  %5847 = vmatprep.subr.bf16.mxu0 %v16040_v20  ;;  %v3509_v20 = vld [vmem:[#allocation6 + $0x1548] sm:$0xff]  ;;  %v16151_v24 = vcombine.low %v3517_v2, %v3521_v53 }
 0x257   :  { %5833 = vmatpush2.bf16.msra.mxu1 %v15935_v18  ;;  %v3369_v18 = vld [vmem:[#allocation6 + $0x10e8] sm:$0xff]  ;;  %v16144_v28 = vcombine.high %v3509_v20, %v3513_v14 }
 0x258   :  { %5834 = vmatprep.subr.bf16.mxu1 %v15928_v23  ;;  %5757 = vmatmul.mubr.bf16.vlgmr.msra.gmra.mxu0 %v18429_v62  ;;  %v16007_v23 = vcombine.low %v3373_v1, %v3377_v15  ;;  %v16000_v54 = vcombine.high %v3365_v6, %v3369_v18  ;;  %v3505_v34 = vld [vmem:[#allocation6 + $0x1528] sm:$0xff] }
 0x259   :  { %5848 = vmatpush1.bf16.msra.mxu0 %v16039_v38  ;;  %5879 = vmatprep.mubr.bf16.mxu0 %v18376_v33  ;;  %v3501_v38 = vld [vmem:[#allocation6 + $0x1508] sm:$0xff] }
 0x25a   :  { %v18435_v22 = vpop.f32.mrf.mxu1  ;;  %5849 = vmatprep.subr.bf16.mxu0 %v16032_v10  ;;  %v16143_v10 = vcombine.low %v3509_v20, %v3513_v14  ;;  %v16136_v41 = vcombine.high %v3501_v38, %v3505_v34  ;;  %v3349_v32 = vld [vmem:[#allocation6 + $0x1048] sm:$0xff] }
 0x25b   :  { %5835 = vmatpush2.bf16.msra.mxu1 %v15927_v39  ;;  %v15999_v39 = vcombine.low %v3365_v6, %v3369_v18  ;;  %v3353_v44 = vld [vmem:[#allocation6 + $0x1068] sm:$0xff] }
 0x25c   :  { %v18438_v47 = vpop.f32.mrf.mxu1  ;;  %5836 = vmatprep.subr.bf16.mxu1 %v15920_v40  ;;  %v15992_v40 = vcombine.high %v3357_v29, %v3361_v36  ;;  %v3493_v42 = vld [vmem:[#allocation6 + $0x14c8] sm:$0xff] }
 0x25d   :  { %5850 = vmatpush1.bf16.msra.mxu0 %v16031_v35  ;;  %v3497_v35 = vld [vmem:[#allocation6 + $0x14e8] sm:$0xff] }
 0x25e   :  { %v3044_v56 = vpop.f32.mrf.mxu1  ;;  %5851 = vmatprep.subr.bf16.mxu0 %v16024_v46  ;;  %v16135_v46 = vcombine.low %v3501_v38, %v3505_v34  ;;  %v16128_v49 = vcombine.high %v3493_v42, %v3497_v35  ;;  %v3469_v51 = vld [vmem:[#allocation6 + $0x1408] sm:$0xff] }
 0x25f   :  { %5837 = vmatpush2.bf16.msra.mxu1 %v15919_v45  ;;  %v15991_v45 = vcombine.low %v3357_v29, %v3361_v36  ;;  %v3473_v25 = vld [vmem:[#allocation6 + $0x1428] sm:$0xff] }
 0x260   :  { %v3045_v61 = vpop.f32.mrf.mxu1  ;;  %5888 = vmatprep.subr.bf16.mxu1 %v16168_v48  ;;  %v15984_v48 = vcombine.high %v3349_v32, %v3353_v44  ;;  %v3485_v55 = vld [vmem:[#allocation6 + $0x1488] sm:$0xff]  ;;  %v16103_v53 = vcombine.low %v3469_v51, %v3473_v25 }
 0x261   :  { %5852 = vmatpush1.bf16.msra.mxu0 %v16023_v16  ;;  %v3489_v56 = vld [vmem:[#allocation6 + $0x14a8] sm:$0xff]  ;;  %v15983_v16 = vcombine.low %v3349_v32, %v3353_v44 }
 0x262   :  { %5839 = vmatmul.mubr.bf16.vlgmr.msra.gmra.mxu1 %v18395_v5  ;;  %5853 = vmatprep.subr.bf16.mxu0 %v16016_v60  ;;  %v16104_v60 = vcombine.high %v3469_v51, %v3473_v25  ;;  %v16120_v61 = vcombine.high %v3485_v55, %v3489_v56  ;;  %v3465_v1 = vld [vmem:[#allocation6 + $0x13e8] sm:$0xff] }
 0x263   :  { %5889 = vmatpush1.bf16.msra.mxu1 %v16167_v57  ;;  %5920 = vmatprep.mubr.bf16.mxu1 %v18408_v58  ;;  %v16127_v57 = vcombine.low %v3493_v42, %v3497_v35  ;;  %v3477_v15 = vld [vmem:[#allocation6 + $0x1448] sm:$0xff] }
 0x264   :  { %5890 = vmatprep.subr.bf16.mxu1 %v16160_v63  ;;  %v3461_v63 = vld [vmem:[#allocation6 + $0x13c8] sm:$0xff] }
 0x265   :  { %5854 = vmatpush1.bf16.msra.mxu0 %v16015_v3  ;;  %v3481_v2 = vld [vmem:[#allocation6 + $0x1468] sm:$0xff]  ;;  %v16119_v3 = vcombine.low %v3485_v55, %v3489_v56  ;;  %v16095_v14 = vcombine.low %v3461_v63, %v3465_v1 }
 0x266   :  { %5855 = vmatprep.subr.bf16.mxu0 %v16008_v19  ;;  %v16112_v19 = vcombine.high %v3477_v15, %v3481_v2  ;;  %v3457_v6 = vld [vmem:[#allocation6 + $0x13a8] sm:$0xff] }
 0x267   :  { %5891 = vmatpush1.bf16.msra.mxu1 %v16159_v8  ;;  %v16096_v8 = vcombine.high %v3461_v63, %v3465_v1  ;;  %v3597_v18 = vld [vmem:[#allocation6 + $0x1808] sm:$0xff] }
 0x268   :  { %5892 = vmatprep.subr.bf16.mxu1 %v16152_v11  ;;  %v3453_v11 = vld [vmem:[#allocation6 + $0x1388] sm:$0xff] }
 0x269   :  { %5856 = vmatpush1.bf16.msra.mxu0 %v16007_v23  ;;  %v3601_v20 = vld [vmem:[#allocation6 + $0x1828] sm:$0xff]  ;;  %v16111_v23 = vcombine.low %v3477_v15, %v3481_v2  ;;  %v16087_v34 = vcombine.low %v3453_v11, %v3457_v6 }
 0x26a   :  { %5857 = vmatprep.subr.bf16.mxu0 %v16000_v54  ;;  %v16232_v54 = vcombine.high %v3597_v18, %v3601_v20  ;;  %v3449_v29 = vld [vmem:[#allocation6 + $0x1368] sm:$0xff] }
 0x26b   :  { %5893 = vmatpush1.bf16.msra.mxu1 %v16151_v24  ;;  %v16088_v24 = vcombine.high %v3453_v11, %v3457_v6  ;;  %v3589_v36 = vld [vmem:[#allocation6 + $0x17c8] sm:$0xff]  ;;  %v18058_v11 = vld [vmem:[#allocation8] sm:$0xff] }
 0x26c   :  { %5894 = vmatprep.subr.bf16.mxu1 %v16144_v28  ;;  %v3445_v28 = vld [vmem:[#allocation6 + $0x1348] sm:$0xff] }
 0x26d   :  { %5858 = vmatpush1.bf16.msra.mxu0 %v15999_v39  ;;  %v3593_v38 = vld [vmem:[#allocation6 + $0x17e8] sm:$0xff]  ;;  %v16231_v39 = vcombine.low %v3597_v18, %v3601_v20  ;;  %v16079_v35 = vcombine.low %v3445_v28, %v3449_v29 }
 0x26e   :  { %5859 = vmatprep.subr.bf16.mxu0 %v15992_v40  ;;  %v16224_v40 = vcombine.high %v3589_v36, %v3593_v38  ;;  %v3441_v32 = vld [vmem:[#allocation6 + $0x1328] sm:$0xff] }
 0x26f   :  { %5895 = vmatpush1.bf16.msra.mxu1 %v16143_v10  ;;  %v16080_v10 = vcombine.high %v3445_v28, %v3449_v29  ;;  %v3581_v44 = vld [vmem:[#allocation6 + $0x1788] sm:$0xff] }
 0x270   :  { %5896 = vmatprep.subr.bf16.mxu1 %v16136_v41  ;;  %v3437_v41 = vld [vmem:[#allocation6 + $0x1308] sm:$0xff] }
 0x271   :  { %5860 = vmatpush1.bf16.msra.mxu0 %v15991_v45  ;;  %v3585_v42 = vld [vmem:[#allocation6 + $0x17a8] sm:$0xff]  ;;  %v16223_v45 = vcombine.low %v3589_v36, %v3593_v38  ;;  %v16071_v56 = vcombine.low %v3437_v41, %v3441_v32 }
 0x272   :  { %5861 = vmatprep.subr.bf16.mxu0 %v15984_v48  ;;  %v16216_v48 = vcombine.high %v3581_v44, %v3585_v42  ;;  %v3433_v51 = vld [vmem:[#allocation6 + $0x12e8] sm:$0xff] }
 0x273   :  { %5897 = vmatpush1.bf16.msra.mxu1 %v16135_v46  ;;  %v16072_v46 = vcombine.high %v3437_v41, %v3441_v32  ;;  %v3573_v25 = vld [vmem:[#allocation6 + $0x1748] sm:$0xff] }
 0x274   :  { %5898 = vmatprep.subr.bf16.mxu1 %v16128_v49  ;;  %v3429_v49 = vld [vmem:[#allocation6 + $0x12c8] sm:$0xff] }
 0x275   :  { %5862 = vmatpush1.bf16.msra.mxu0 %v15983_v16  ;;  %v3577_v55 = vld [vmem:[#allocation6 + $0x1768] sm:$0xff]  ;;  %v16215_v16 = vcombine.low %v3581_v44, %v3585_v42 }
 0x276   :  { %5863 = vmatprep.subr.bf16.mxu0 %v16104_v60  ;;  %v18443_v60 = vsub.s32 6, %v18304_v43  ;;  %v3421_v63 = vld [vmem:[#allocation6 + $0x1288] sm:$0xff] }
 0x277   :  { %5899 = vmatpush1.bf16.msra.mxu1 %v16127_v57  ;;  %v16064_v57 = vcombine.high %v3429_v49, %v3433_v51  ;;  %v3425_v1 = vld [vmem:[#allocation6 + $0x12a8] sm:$0xff] }
 0x278   :  { %5900 = vmatprep.subr.bf16.mxu1 %v16120_v61  ;;  %18888 = vst [vmem:[#allocation17_spill] sm:$0xff] %v18443_v60  ;;  %v16208_v61 = vcombine.high %v3573_v25, %v3577_v55  ;;  %v3565_v15 = vld [vmem:[#allocation6 + $0x1708] sm:$0xff]  ;;  %v513_v6 = vrot.slane %v18058_v11, %v18443_v60 }
 0x279   :  { %5864 = vmatpush2.bf16.msra.mxu0 %v16103_v53  ;;  %v3569_v2 = vld [vmem:[#allocation6 + $0x1728] sm:$0xff]  ;;  %v18446_v53 = vsub.s32 7, %v18304_v43  ;;  %v16055_v43 = vcombine.low %v3421_v63, %v3425_v1 }
 0x27a   :  { %5865 = vmatprep.subr.bf16.mxu0 %v16096_v8  ;;  %v16207_v8 = vcombine.low %v3573_v25, %v3577_v55  ;;  %v16200_v18 = vcombine.high %v3565_v15, %v3569_v2  ;;  %v3413_v20 = vld [vmem:[#allocation6 + $0x1248] sm:$0xff]  ;;  %v16199_v28 = vcombine.low %v3565_v15, %v3569_v2  ;;  %v3041_v36 = vadd.f32 %v18435_v22, %v513_v6  ;;  %v3406_v15 = vld [vmem:[#allocation6 + $0x1210] sm:$0xff] }
 0x27b   :  { %5901 = vmatpush1.bf16.msra.mxu1 %v16119_v3  ;;  %18889 = vst [vmem:[#allocation18_spill] sm:$0xff] %v18446_v53  ;;  %v16063_v3 = vcombine.low %v3429_v49, %v3433_v51  ;;  %v3553_v41 = vld [vmem:[#allocation6 + $0x16a8] sm:$0xff]  ;;  %v3278_v49 = vld [vmem:[#allocation6 + $0xe10] sm:$0xff] }
 0x27c   :  { %5902 = vmatprep.subr.bf16.mxu1 %v16112_v19  ;;  %v16056_v19 = vcombine.high %v3421_v63, %v3425_v1  ;;  %v3282_v51 = vld [vmem:[#allocation6 + $0xe30] sm:$0xff]  ;;  %v3541_v55 = vld [vmem:[#allocation6 + $0x1648] sm:$0xff] }
 0x27d   :  { %5866 = vmatpush2.bf16.msra.mxu0 %v16095_v14  ;;  %v3417_v14 = vld [vmem:[#allocation6 + $0x1268] sm:$0xff]  ;;  %v3410_v2 = vld [vmem:[#allocation6 + $0x1230] sm:$0xff] }
 0x27e   :  { %5867 = vmatprep.subr.bf16.mxu0 %v16088_v24  ;;  %v3561_v24 = vld [vmem:[#allocation6 + $0x16e8] sm:$0xff]  ;;  %v16048_v29 = vcombine.high %v3413_v20, %v3417_v14  ;;  %v16047_v42 = vcombine.low %v3413_v20, %v3417_v14  ;;  %v3270_v20 = vld [vmem:[#allocation6 + $0xdd0] sm:$0xff] }
 0x27f   :  { %5903 = vmatpush1.bf16.msra.mxu1 %v16111_v23  ;;  %v3557_v23 = vld [vmem:[#allocation6 + $0x16c8] sm:$0xff]  ;;  %v3274_v14 = vld [vmem:[#allocation6 + $0xdf0] sm:$0xff] }
 0x280   :  { %5904 = vmatprep.subr.bf16.mxu1 %v16232_v54  ;;  %v517_v54 = vrot.slane %v18058_v11, %v18446_v53  ;;  %v16192_v38 = vcombine.high %v3557_v23, %v3561_v24 }
 0x281   :  { %5868 = vmatpush2.bf16.msra.mxu0 %v16087_v34  ;;  %v3605_v34 = vld [vmem:[#allocation6 + $0x1848] sm:$0xff] }
 0x282   :  { %5869 = vmatprep.subr.bf16.mxu0 %v16080_v10  ;;  %v3043_v32 = vadd.f32 %v18438_v47, %v517_v54 }
 0x283   :  { %5905 = vmatpush2.bf16.msra.mxu1 %v16231_v39  ;;  %v3609_v39 = vld [vmem:[#allocation6 + $0x1868] sm:$0xff] }
 0x284   :  { %5906 = vmatprep.subr.bf16.mxu1 %v16224_v40  ;;  %v3549_v40 = vld [vmem:[#allocation6 + $0x1688] sm:$0xff] }
 0x285   :  { %5870 = vmatpush2.bf16.msra.mxu0 %v16079_v35  ;;  %v16184_v22 = vcombine.high %v3549_v40, %v3553_v41 }
 0x286   :  { %5871 = vmatprep.subr.bf16.mxu0 %v16072_v46  ;;  %v16240_v46 = vcombine.high %v3605_v34, %v3609_v39 }
 0x287   :  { %5907 = vmatpush2.bf16.msra.mxu1 %v16223_v45  ;;  %v16191_v45 = vcombine.low %v3557_v23, %v3561_v24 }
 0x288   :  { %5908 = vmatprep.subr.bf16.mxu1 %v16216_v48 }
 0x289   :  { %5872 = vmatpush2.bf16.msra.mxu0 %v16071_v56  ;;  %v3545_v56 = vld [vmem:[#allocation6 + $0x1668] sm:$0xff] }
 0x28a   :  { %5873 = vmatprep.subr.bf16.mxu0 %v16064_v57  ;;  %v16183_v57 = vcombine.low %v3549_v40, %v3553_v41  ;;  %v16176_v63 = vcombine.high %v3541_v55, %v3545_v56  ;;  %v16175_v11 = vcombine.low %v3541_v55, %v3545_v56  ;;  %v3386_v55 = vld [vmem:[#allocation6 + $0x1170] sm:$0xff] }
 0x28b   :  { %5909 = vmatpush2.bf16.msra.mxu1 %v16215_v16  ;;  %v16239_v16 = vcombine.low %v3605_v34, %v3609_v39  ;;  %v16041_v39 = vcombine.low %v3406_v15, %v3410_v2 }
 0x28c   :  { %5910 = vmatprep.subr.bf16.mxu1 %v16208_v61  ;;  %v15914_v61 = vcombine.high %v3278_v49, %v3282_v51 }
 0x28d   :  { %5874 = vmatpush2.bf16.msra.mxu0 %v16063_v3 }
 0x28e   :  { %5875 = vmatprep.subr.bf16.mxu0 %v16056_v19 }
 0x28f   :  { %5911 = vmatpush2.bf16.msra.mxu1 %v16207_v8 }
 0x290   :  { %5912 = vmatprep.subr.bf16.mxu1 %v16200_v18  ;;  %v3081_v10 = vpop.f32.mrf.mxu0  ;;  %v16042_v18 = vcombine.high %v3406_v15, %v3410_v2 }
 0x291   :  { %v3082_v44 = vadd.f32 %v3081_v10, %v3041_v36  ;;  %5876 = vmatpush2.bf16.msra.mxu0 %v16055_v43  ;;  %v3398_v43 = vld [vmem:[#allocation6 + $0x11d0] sm:$0xff]  ;;  %v15913_v36 = vcombine.low %v3278_v49, %v3282_v51  ;;  %v15906_v10 = vcombine.high %v3270_v20, %v3274_v14 }
 0x292   :  { %v3083_v35 = vpop.f32.mrf.mxu0  ;;  %5877 = vmatprep.subr.bf16.mxu0 %v16048_v29  ;;  %v3254_v49 = vld [vmem:[#allocation6 + $0xd50] sm:$0xff] }
 0x293   :  { %5913 = vmatpush2.bf16.msra.mxu1 %v16199_v28  ;;  %v3084_v48 = vadd.f32 %v3083_v35, %v3043_v32  ;;  %v3402_v28 = vld [vmem:[#allocation6 + $0x11f0] sm:$0xff] }
 0x294   :  { %5914 = vmatprep.subr.bf16.mxu1 %v16192_v38  ;;  %v3085_v25 = vpop.f32.mrf.mxu0  ;;  %v16034_v41 = vcombine.high %v3398_v43, %v3402_v28  ;;  %v3262_v32 = vld [vmem:[#allocation6 + $0xd90] sm:$0xff] }
 0x295   :  { %5878 = vmatpush2.bf16.msra.mxu0 %v16047_v42  ;;  %v3390_v42 = vld [vmem:[#allocation6 + $0x1190] sm:$0xff] }
 0x296   :  { %v3086_v47 = vpop.f32.mrf.mxu0  ;;  %5943 = vmatprep.subr.bf16.mxu0 %v16240_v46  ;;  %v3394_v35 = vld [vmem:[#allocation6 + $0x11b0] sm:$0xff]  ;;  %v16033_v46 = vcombine.low %v3398_v43, %v3402_v28 }
 0x297   :  { %5915 = vmatpush2.bf16.msra.mxu1 %v16191_v45  ;;  %v15905_v45 = vcombine.low %v3270_v20, %v3274_v14  ;;  %v3258_v51 = vld [vmem:[#allocation6 + $0xd70] sm:$0xff]  ;;  %v16025_v56 = vcombine.low %v3390_v42, %v3394_v35 }
 0x298   :  { %5916 = vmatprep.subr.bf16.mxu1 %v16184_v22  ;;  %5880 = vmatmul.mubr.bf16.vlgmr.msra.gmra.mxu0 %v18401_v12  ;;  %v3163_v1 = vpop.f32.mrf.mxu0  ;;  %v16026_v22 = vcombine.high %v3390_v42, %v3394_v35  ;;  %v3382_v25 = vld [vmem:[#allocation6 + $0x1150] sm:$0xff]  ;;  %v15889_v15 = vcombine.low %v3254_v49, %v3258_v51 }
 0x299   :  { %5944 = vmatpush1.bf16.msra.mxu0 %v16239_v16  ;;  %5961 = vmatprep.mubr.bf16.mxu0 %v18884_v31  ;;  %v15890_v16 = vcombine.high %v3254_v49, %v3258_v51  ;;  %v16018_v47 = vcombine.high %v3382_v25, %v3386_v55  ;;  %v16017_v2 = vcombine.low %v3382_v25, %v3386_v55  ;;  %v3230_v43 = vld [vmem:[#allocation6 + $0xc90] sm:$0xff] }
 0x29a   :  { %v3122_v3 = vpop.f32.mrf.mxu1  ;;  %v3165_v19 = vpop.f32.mrf.mxu0  ;;  %5970 = vmatprep.subr.bf16.mxu0 %v15914_v61  ;;  %v3250_v61 = vld [vmem:[#allocation6 + $0xd30] sm:$0xff] }
 0x29b   :  { %v3123_v8 = vadd.f32 %v3122_v3, %v3082_v44  ;;  %5917 = vmatpush2.bf16.msra.mxu1 %v16183_v57  ;;  %v3266_v44 = vld [vmem:[#allocation6 + $0xdb0] sm:$0xff] }
 0x29c   :  { %v3124_v6 = vpop.f32.mrf.mxu1  ;;  %5918 = vmatprep.subr.bf16.mxu1 %v16176_v63  ;;  %v3167_v54 = vpop.f32.mrf.mxu0  ;;  %v3246_v57 = vld [vmem:[#allocation6 + $0xd10] sm:$0xff] }
 0x29d   :  { %v18454_v23 = vadd.f32 %v3163_v1, %v3123_v8  ;;  %v3125_v24 = vadd.f32 %v3124_v6, %v3084_v48  ;;  %v15898_v48 = vcombine.high %v3262_v32, %v3266_v44  ;;  %v3374_v63 = vld [vmem:[#allocation6 + $0x1110] sm:$0xff]  ;;  %v15882_v3 = vcombine.high %v3246_v57, %v3250_v61 }
 0x29e   :  { %v3126_v29 = vpop.f32.mrf.mxu1  ;;  %v3168_v34 = vpop.f32.mrf.mxu0  ;;  %v3378_v1 = vld [vmem:[#allocation6 + $0x1130] sm:$0xff]  ;;  %v15881_v20 = vcombine.low %v3246_v57, %v3250_v61 }
 0x29f   :  { %v18456_v38 = vadd.f32 %v3165_v19, %v3125_v24  ;;  %5919 = vmatpush2.bf16.msra.mxu1 %v16175_v11  ;;  %v16010_v8 = vcombine.high %v3374_v63, %v3378_v1  ;;  %v3238_v19 = vld [vmem:[#allocation6 + $0xcd0] sm:$0xff]  ;;  %v16009_v14 = vcombine.low %v3374_v63, %v3378_v1 }
 0x2a0   :  { %v3127_v40 = vpop.f32.mrf.mxu1  ;;  %6011 = vmatprep.subr.bf16.mxu1 %v16042_v18  ;;  %16246 = vmatmul.mubr.msk.bf16.vlgmr.msra.gmra.mxu0 %vm2510_vm0, %v18417_v21  ;;  %v15897_v21 = vcombine.low %v3262_v32, %v3266_v44  ;;  %v3242_v11 = vld [vmem:[#allocation6 + $0xcf0] sm:$0xff] }
 0x2a1   :  { %5971 = vmatpush1.bf16.msra.mxu0 %v15913_v36  ;;  %6002 = vmatprep.mubr.bf16.mxu0 %v18371_v27  ;;  %v3366_v6 = vld [vmem:[#allocation6 + $0x10d0] sm:$0xff]  ;;  %v15874_v24 = vcombine.high %v3238_v19, %v3242_v11  ;;  %v15873_v34 = vcombine.low %v3238_v19, %v3242_v11 }
 0x2a2   :  { %5921 = vmatmul.mubr.bf16.vlgmr.msra.gmra.mxu1 %v18429_v62  ;;  %5972 = vmatprep.subr.bf16.mxu0 %v15906_v10  ;;  %v3370_v18 = vld [vmem:[#allocation6 + $0x10f0] sm:$0xff] }
 0x2a3   :  { %6012 = vmatpush1.bf16.msra.mxu1 %v16041_v39  ;;  %6043 = vmatprep.mubr.bf16.mxu1 %v18376_v33  ;;  %v16002_v54 = vcombine.high %v3366_v6, %v3370_v18  ;;  %v3234_v28 = vld [vmem:[#allocation6 + $0xcb0] sm:$0xff]  ;;  %v16001_v39 = vcombine.low %v3366_v6, %v3370_v18 }
 0x2a4   :  { %6013 = vmatprep.subr.bf16.mxu1 %v16034_v41  ;;  %v3358_v29 = vld [vmem:[#allocation6 + $0x1090] sm:$0xff]  ;;  %v15866_v10 = vcombine.high %v3230_v43, %v3234_v28  ;;  %v15865_v35 = vcombine.low %v3230_v43, %v3234_v28 }
 0x2a5   :  { %5973 = vmatpush1.bf16.msra.mxu0 %v15905_v45  ;;  %v3362_v36 = vld [vmem:[#allocation6 + $0x10b0] sm:$0xff] }
 0x2a6   :  { %5974 = vmatprep.subr.bf16.mxu0 %v15898_v48  ;;  %v15994_v40 = vcombine.high %v3358_v29, %v3362_v36  ;;  %v3222_v41 = vld [vmem:[#allocation6 + $0xc50] sm:$0xff]  ;;  %v15993_v45 = vcombine.low %v3358_v29, %v3362_v36 }
 0x2a7   :  { %6014 = vmatpush1.bf16.msra.mxu1 %v16033_v46  ;;  %v3226_v32 = vld [vmem:[#allocation6 + $0xc70] sm:$0xff] }
 0x2a8   :  { %6015 = vmatprep.subr.bf16.mxu1 %v16026_v22  ;;  %v3350_v44 = vld [vmem:[#allocation6 + $0x1050] sm:$0xff]  ;;  %v15858_v46 = vcombine.high %v3222_v41, %v3226_v32  ;;  %v15857_v55 = vcombine.low %v3222_v41, %v3226_v32 }
 0x2a9   :  { %5975 = vmatpush1.bf16.msra.mxu0 %v15897_v21  ;;  %v3354_v42 = vld [vmem:[#allocation6 + $0x1070] sm:$0xff] }
 0x2aa   :  { %5976 = vmatprep.subr.bf16.mxu0 %v15890_v16  ;;  %v15986_v48 = vcombine.high %v3350_v44, %v3354_v42  ;;  %v3342_v22 = vld [vmem:[#allocation6 + $0x1010] sm:$0xff]  ;;  %v15985_v21 = vcombine.low %v3350_v44, %v3354_v42 }
 0x2ab   :  { %6016 = vmatpush1.bf16.msra.mxu1 %v16025_v56  ;;  %v3346_v49 = vld [vmem:[#allocation6 + $0x1030] sm:$0xff] }
 0x2ac   :  { %6017 = vmatprep.subr.bf16.mxu1 %v16018_v47  ;;  %v3470_v51 = vld [vmem:[#allocation6 + $0x1410] sm:$0xff]  ;;  %v15978_v56 = vcombine.high %v3342_v22, %v3346_v49  ;;  %v15977_v1 = vcombine.low %v3342_v22, %v3346_v49 }
 0x2ad   :  { %5977 = vmatpush1.bf16.msra.mxu0 %v15889_v15  ;;  %v3474_v25 = vld [vmem:[#allocation6 + $0x1430] sm:$0xff] }
 0x2ae   :  { %5978 = vmatprep.subr.bf16.mxu0 %v15882_v3  ;;  %v16106_v16 = vcombine.high %v3470_v51, %v3474_v25  ;;  %v3334_v47 = vld [vmem:[#allocation6 + $0xfd0] sm:$0xff]  ;;  %v16105_v15 = vcombine.low %v3470_v51, %v3474_v25 }
 0x2af   :  { %6018 = vmatpush1.bf16.msra.mxu1 %v16017_v2  ;;  %v3338_v57 = vld [vmem:[#allocation6 + $0xff0] sm:$0xff] }
 0x2b0   :  { %6019 = vmatprep.subr.bf16.mxu1 %v16010_v8  ;;  %v3462_v61 = vld [vmem:[#allocation6 + $0x13d0] sm:$0xff]  ;;  %v15970_v2 = vcombine.high %v3334_v47, %v3338_v57  ;;  %v15969_v18 = vcombine.low %v3334_v47, %v3338_v57 }
 0x2b1   :  { %5979 = vmatpush1.bf16.msra.mxu0 %v15881_v20  ;;  %v3466_v63 = vld [vmem:[#allocation6 + $0x13f0] sm:$0xff] }
 0x2b2   :  { %5980 = vmatprep.subr.bf16.mxu0 %v15874_v24  ;;  %v16098_v3 = vcombine.high %v3462_v61, %v3466_v63  ;;  %v3326_v8 = vld [vmem:[#allocation6 + $0xf90] sm:$0xff]  ;;  %v16097_v20 = vcombine.low %v3462_v61, %v3466_v63 }
 0x2b3   :  { %6020 = vmatpush1.bf16.msra.mxu1 %v16009_v14  ;;  %v3330_v19 = vld [vmem:[#allocation6 + $0xfb0] sm:$0xff] }
 0x2b4   :  { %6021 = vmatprep.subr.bf16.mxu1 %v16002_v54  ;;  %v3454_v11 = vld [vmem:[#allocation6 + $0x1390] sm:$0xff]  ;;  %v15962_v14 = vcombine.high %v3326_v8, %v3330_v19  ;;  %v15961_v36 = vcombine.low %v3326_v8, %v3330_v19 }
 0x2b5   :  { %5981 = vmatpush1.bf16.msra.mxu0 %v15873_v34  ;;  %v3458_v6 = vld [vmem:[#allocation6 + $0x13b0] sm:$0xff] }
 0x2b6   :  { %5982 = vmatprep.subr.bf16.mxu0 %v15866_v10  ;;  %v16090_v24 = vcombine.high %v3454_v11, %v3458_v6  ;;  %v3318_v54 = vld [vmem:[#allocation6 + $0xf50] sm:$0xff]  ;;  %v16089_v34 = vcombine.low %v3454_v11, %v3458_v6 }
 0x2b7   :  { %6022 = vmatpush1.bf16.msra.mxu1 %v16001_v39  ;;  %v3322_v43 = vld [vmem:[#allocation6 + $0xf70] sm:$0xff] }
 0x2b8   :  { %6023 = vmatprep.subr.bf16.mxu1 %v15994_v40  ;;  %v3446_v28 = vld [vmem:[#allocation6 + $0x1350] sm:$0xff]  ;;  %v15954_v39 = vcombine.high %v3318_v54, %v3322_v43  ;;  %v15953_v42 = vcombine.low %v3318_v54, %v3322_v43 }
 0x2b9   :  { %5983 = vmatpush1.bf16.msra.mxu0 %v15865_v35  ;;  %v3450_v29 = vld [vmem:[#allocation6 + $0x1370] sm:$0xff] }
 0x2ba   :  { %5984 = vmatprep.subr.bf16.mxu0 %v15858_v46  ;;  %v16082_v10 = vcombine.high %v3446_v28, %v3450_v29  ;;  %v3310_v40 = vld [vmem:[#allocation6 + $0xf10] sm:$0xff]  ;;  %v16081_v35 = vcombine.low %v3446_v28, %v3450_v29 }
 0x2bb   :  { %6024 = vmatpush1.bf16.msra.mxu1 %v15993_v45  ;;  %v3314_v41 = vld [vmem:[#allocation6 + $0xf30] sm:$0xff] }
 0x2bc   :  { %6025 = vmatprep.subr.bf16.mxu1 %v15986_v48  ;;  %v3438_v32 = vld [vmem:[#allocation6 + $0x1310] sm:$0xff]  ;;  %v15946_v45 = vcombine.high %v3310_v40, %v3314_v41  ;;  %v15945_v25 = vcombine.low %v3310_v40, %v3314_v41 }
 0x2bd   :  { %5985 = vmatpush1.bf16.msra.mxu0 %v15857_v55  ;;  %v3442_v44 = vld [vmem:[#allocation6 + $0x1330] sm:$0xff] }
 0x2be   :  { %5986 = vmatprep.subr.bf16.mxu0 %v15978_v56  ;;  %v16074_v46 = vcombine.high %v3438_v32, %v3442_v44  ;;  %v3302_v48 = vld [vmem:[#allocation6 + $0xed0] sm:$0xff]  ;;  %v16073_v55 = vcombine.low %v3438_v32, %v3442_v44 }
 0x2bf   :  { %6026 = vmatpush1.bf16.msra.mxu1 %v15985_v21  ;;  %v3306_v22 = vld [vmem:[#allocation6 + $0xef0] sm:$0xff] }
 0x2c0   :  { %6027 = vmatprep.subr.bf16.mxu1 %v16106_v16  ;;  %v3430_v49 = vld [vmem:[#allocation6 + $0x12d0] sm:$0xff]  ;;  %v15938_v21 = vcombine.high %v3302_v48, %v3306_v22  ;;  %v15937_v63 = vcombine.low %v3302_v48, %v3306_v22 }
 0x2c1   :  { %5987 = vmatpush2.bf16.msra.mxu0 %v15977_v1  ;;  %v3434_v51 = vld [vmem:[#allocation6 + $0x12f0] sm:$0xff] }
 0x2c2   :  { %5988 = vmatprep.subr.bf16.mxu0 %v15970_v2  ;;  %v16066_v56 = vcombine.high %v3430_v49, %v3434_v51  ;;  %v3294_v16 = vld [vmem:[#allocation6 + $0xe90] sm:$0xff]  ;;  %v16065_v1 = vcombine.low %v3430_v49, %v3434_v51  ;;  %v18463_v2 = vld [vmem:[#allocation8 + $0x8] sm:$0xff] }
 0x2c3   :  { %6028 = vmatpush2.bf16.msra.mxu1 %v16105_v15  ;;  %v3298_v47 = vld [vmem:[#allocation6 + $0xeb0] sm:$0xff]  ;;  %v3622_v54 = vrot.slane %v18463_v2, %v18310_v0 }
 0x2c4   :  { %6029 = vmatprep.subr.bf16.mxu1 %v16098_v3  ;;  %v3422_v57 = vld [vmem:[#allocation6 + $0x1290] sm:$0xff]  ;;  %v15930_v15 = vcombine.high %v3294_v16, %v3298_v47 }
 0x2c5   :  { %5989 = vmatpush2.bf16.msra.mxu0 %v15969_v18  ;;  %v3426_v61 = vld [vmem:[#allocation6 + $0x12b0] sm:$0xff]  ;;  %v15929_v18 = vcombine.low %v3294_v16, %v3298_v47 }
 0x2c6   :  { %5990 = vmatprep.subr.bf16.mxu0 %v15962_v14  ;;  %v16058_v3 = vcombine.high %v3422_v57, %v3426_v61  ;;  %v3286_v8 = vld [vmem:[#allocation6 + $0xe50] sm:$0xff]  ;;  %v16057_v14 = vcombine.low %v3422_v57, %v3426_v61 }
 0x2c7   :  { %6030 = vmatpush2.bf16.msra.mxu1 %v16097_v20  ;;  %v3290_v19 = vld [vmem:[#allocation6 + $0xe70] sm:$0xff]  ;;  %v3618_v20 = vrot.slane %v18463_v2, %v18307_v52 }
 0x2c8   :  { %6031 = vmatprep.subr.bf16.mxu1 %v16090_v24  ;;  %v3414_v11 = vld [vmem:[#allocation6 + $0x1250] sm:$0xff]  ;;  %v15922_v24 = vcombine.high %v3286_v8, %v3290_v19  ;;  %v15921_v41 = vcombine.low %v3286_v8, %v3290_v19 }
 0x2c9   :  { %5991 = vmatpush2.bf16.msra.mxu0 %v15961_v36  ;;  %v3418_v6 = vld [vmem:[#allocation6 + $0x1270] sm:$0xff] }
 0x2ca   :  { %5992 = vmatprep.subr.bf16.mxu0 %v15954_v39  ;;  %v16050_v43 = vcombine.high %v3414_v11, %v3418_v6  ;;  %v3534_v28 = vld [vmem:[#allocation6 + $0x1610] sm:$0xff]  ;;  %v16049_v44 = vcombine.low %v3414_v11, %v3418_v6 }
 0x2cb   :  { %6032 = vmatpush2.bf16.msra.mxu1 %v16089_v34  ;;  %v3538_v29 = vld [vmem:[#allocation6 + $0x1630] sm:$0xff] }
 0x2cc   :  { %6033 = vmatprep.subr.bf16.mxu1 %v16082_v10  ;;  %v3606_v34 = vld [vmem:[#allocation6 + $0x1850] sm:$0xff]  ;;  %v16169_v16 = vcombine.low %v3534_v28, %v3538_v29 }
 0x2cd   :  { %5993 = vmatpush2.bf16.msra.mxu0 %v15953_v42  ;;  %v3610_v39 = vld [vmem:[#allocation6 + $0x1870] sm:$0xff]  ;;  %v16170_v42 = vcombine.high %v3534_v28, %v3538_v29 }
 0x2ce   :  { %5994 = vmatprep.subr.bf16.mxu0 %v15946_v45  ;;  %v16242_v48 = vcombine.high %v3606_v34, %v3610_v39  ;;  %v3526_v22 = vld [vmem:[#allocation6 + $0x15d0] sm:$0xff]  ;;  %v16241_v57 = vcombine.low %v3606_v34, %v3610_v39 }
 0x2cf   :  { %6034 = vmatpush2.bf16.msra.mxu1 %v16081_v35  ;;  %v3530_v49 = vld [vmem:[#allocation6 + $0x15f0] sm:$0xff] }
 0x2d0   :  { %6035 = vmatprep.subr.bf16.mxu1 %v16074_v46  ;;  %v16162_v61 = vcombine.high %v3526_v22, %v3530_v49  ;;  %v16161_v19 = vcombine.low %v3526_v22, %v3530_v49  ;;  %v3502_v39 = vld [vmem:[#allocation6 + $0x1510] sm:$0xff]  ;;  %v3255_v49 = vld [vmem:[#allocation6 + $0xd58] sm:$0xff] }
 0x2d1   :  { %5995 = vmatpush2.bf16.msra.mxu0 %v15945_v25  ;;  %v3279_v25 = vld [vmem:[#allocation6 + $0xe18] sm:$0xff]  ;;  %v3498_v22 = vld [vmem:[#allocation6 + $0x14f0] sm:$0xff] }
 0x2d2   :  { %5996 = vmatprep.subr.bf16.mxu0 %v15938_v21 }
 0x2d3   :  { %6036 = vmatpush2.bf16.msra.mxu1 %v16073_v55  ;;  %v3283_v55 = vld [vmem:[#allocation6 + $0xe38] sm:$0xff] }
 0x2d4   :  { %6037 = vmatprep.subr.bf16.mxu1 %v16066_v56  ;;  %v15915_v28 = vcombine.low %v3279_v25, %v3283_v55 }
 0x2d5   :  { %5997 = vmatpush2.bf16.msra.mxu0 %v15937_v63 }
 0x2d6   :  { %5998 = vmatprep.subr.bf16.mxu0 %v15930_v15  ;;  %v3518_v15 = vld [vmem:[#allocation6 + $0x1590] sm:$0xff] }
 0x2d7   :  { %6038 = vmatpush2.bf16.msra.mxu1 %v16065_v1  ;;  %v15916_v1 = vcombine.high %v3279_v25, %v3283_v55 }
 0x2d8   :  { %6039 = vmatprep.subr.bf16.mxu1 %v16058_v3  ;;  %v5676_v36 = vpop.f32.mrf.mxu0  ;;  %v3522_v3 = vld [vmem:[#allocation6 + $0x15b0] sm:$0xff] }
 0x2d9   :  { %v5677_v10 = vadd.f32 %v5676_v36, %v3618_v20  ;;  %5999 = vmatpush2.bf16.msra.mxu0 %v15929_v18  ;;  %v16154_v11 = vcombine.high %v3518_v15, %v3522_v3  ;;  %v3510_v18 = vld [vmem:[#allocation6 + $0x1550] sm:$0xff] }
 0x2da   :  { %v5717_v40 = vpop.f32.mrf.mxu1  ;;  %v5678_v32 = vpop.f32.mrf.mxu0  ;;  %6000 = vmatprep.subr.bf16.mxu0 %v15922_v24  ;;  %v3514_v20 = vld [vmem:[#allocation6 + $0x1570] sm:$0xff]  ;;  %v3275_v24 = vld [vmem:[#allocation6 + $0xdf8] sm:$0xff] }
 0x2db   :  { %6040 = vmatpush2.bf16.msra.mxu1 %v16057_v14  ;;  %v18469_v35 = vadd.f32 %v5717_v40, %v5677_v10  ;;  %v5679_v45 = vadd.f32 %v5678_v32, %v3622_v54  ;;  %v3271_v14 = vld [vmem:[#allocation6 + $0xdd8] sm:$0xff]  ;;  %v16146_v29 = vcombine.high %v3510_v18, %v3514_v20  ;;  %v3506_v10 = vld [vmem:[#allocation6 + $0x1530] sm:$0xff]  ;;  %v18481_v32 = vld [vmem:[#allocation3 + $0x34] ss:$0 sps:$4 sm:$0xff]  }
 0x2dc   :  { %v5719_v46 = vpop.f32.mrf.mxu1  ;;  %6041 = vmatprep.subr.bf16.mxu1 %v16050_v43  ;;  %v5680_v51 = vpop.f32.mrf.mxu0  ;;  %v16153_v43 = vcombine.low %v3518_v15, %v3522_v3  ;;  %v15908_v34 = vcombine.high %v3271_v14, %v3275_v24  ;;  %v3263_v40 = vld [vmem:[#allocation6 + $0xd98] sm:$0xff]  ;;  %v16137_v25 = vcombine.low %v3502_v39, %v3506_v10 }
 0x2dd   :  { %v18471_v21 = vadd.f32 %v5719_v46, %v5679_v45  ;;  %6001 = vmatpush2.bf16.msra.mxu0 %v15921_v41  ;;  %v3267_v41 = vld [vmem:[#allocation6 + $0xdb8] sm:$0xff]  ;;  %v16138_v45 = vcombine.high %v3502_v39, %v3506_v10 }
 0x2de   :  { %v5721_v56 = vpop.f32.mrf.mxu1  ;;  %v5681_v47 = vpop.f32.mrf.mxu0  ;;  %6052 = vmatprep.subr.bf16.mxu0 %v16170_v42  ;;  %v15907_v42 = vcombine.low %v3271_v14, %v3275_v24  ;;  %v15900_v46 = vcombine.high %v3263_v40, %v3267_v41  ;;  %v3259_v51 = vld [vmem:[#allocation6 + $0xd78] sm:$0xff]  ;;  %v15899_v55 = vcombine.low %v3263_v40, %v3267_v41 }
 0x2df   :  { %6042 = vmatpush2.bf16.msra.mxu1 %v16049_v44  ;;  %v16145_v44 = vcombine.low %v3510_v18, %v3514_v20  ;;  %v3486_v47 = vld [vmem:[#allocation6 + $0x1490] sm:$0xff]  ;;  %v15891_v15 = vcombine.low %v3255_v49, %v3259_v51  ;;  %v3239_v18 = vld [vmem:[#allocation6 + $0xcd8] sm:$0xff] }
 0x2e0   :  { %v5722_v63 = vpop.f32.mrf.mxu1  ;;  %6107 = vmatprep.subr.bf16.mxu1 %v16242_v48  ;;  %6003 = vmatmul.mubr.bf16.vlgmr.msra.gmra.mxu0 %v18395_v5  ;;  %v3494_v48 = vld [vmem:[#allocation6 + $0x14d0] sm:$0xff]  ;;  %v3243_v20 = vld [vmem:[#allocation6 + $0xcf8] sm:$0xff] }
 0x2e1   :  { %6053 = vmatpush1.bf16.msra.mxu0 %v16169_v16  ;;  %6084 = vmatprep.mubr.bf16.mxu0 %v18408_v58  ;;  %v16130_v56 = vcombine.high %v3494_v48, %v3498_v22  ;;  %v15892_v16 = vcombine.high %v3255_v49, %v3259_v51  ;;  %v3251_v63 = vld [vmem:[#allocation6 + $0xd38] sm:$0xff]  ;;  %v15875_v10 = vcombine.low %v3239_v18, %v3243_v20 }
 0x2e2   :  { %6044 = vmatmul.mubr.bf16.vlgmr.msra.gmra.mxu1 %v18401_v12  ;;  %v18475_v8 = vpop.f32.mrf.mxu1  ;;  %6054 = vmatprep.subr.bf16.mxu0 %v16162_v61  ;;  %v3247_v61 = vld [vmem:[#allocation6 + $0xd18] sm:$0xff] }
 0x2e3   :  { %6108 = vmatpush1.bf16.msra.mxu1 %v16241_v57  ;;  %6125 = vmatprep.mubr.bf16.mxu1 %v18884_v31  ;;  %v3490_v57 = vld [vmem:[#allocation6 + $0x14b0] sm:$0xff]  ;;  %v15884_v3 = vcombine.high %v3247_v61, %v3251_v63  ;;  %v15883_v24 = vcombine.low %v3247_v61, %v3251_v63 }
 0x2e4   :  { %v18477_v6 = vpop.f32.mrf.mxu1  ;;  %6134 = vmatprep.subr.bf16.mxu1 %v15916_v1  ;;  %v16129_v1 = vcombine.low %v3494_v48, %v3498_v22  ;;  %v16121_v14 = vcombine.low %v3486_v47, %v3490_v57 }
 0x2e5   :  { %6055 = vmatpush1.bf16.msra.mxu0 %v16161_v19  ;;  %v3478_v19 = vld [vmem:[#allocation6 + $0x1450] sm:$0xff] }
 0x2e6   :  { %v5803_v54 = vpop.f32.mrf.mxu1  ;;  %6056 = vmatprep.subr.bf16.mxu0 %v16154_v11  ;;  %v3482_v11 = vld [vmem:[#allocation6 + $0x1470] sm:$0xff] }
 0x2e7   :  { %v16114_v54 = vcombine.high %v3478_v19, %v3482_v11  ;;  %v16113_v39 = vcombine.low %v3478_v19, %v3482_v11 }
 0x2e8   :  { %v5804_v36 = vpop.f32.mrf.mxu1 }
 0x2e9   :  { %6057 = vmatpush1.bf16.msra.mxu0 %v16153_v43  ;;  %v15876_v43 = vcombine.high %v3239_v18, %v3243_v20  ;;  %v3231_v36 = vld [vmem:[#allocation6 + $0xc98] sm:$0xff] }
 0x2ea   :  { %16247 = vmatmul.mubr.msk.bf16.vlgmr.msra.gmra.mxu1 %vm2510_vm0, %v18481_v32  ;;  %6058 = vmatprep.subr.bf16.mxu0 %v16146_v29  ;;  %v3602_v29 = vld [vmem:[#allocation6 + $0x1830] sm:$0xff] }
 0x2eb   :  { %6135 = vmatpush1.bf16.msra.mxu1 %v15915_v28  ;;  %6166 = vmatprep.mubr.bf16.mxu1 %v18371_v27  ;;  %v16122_v27 = vcombine.high %v3486_v47, %v3490_v57  ;;  %v3598_v28 = vld [vmem:[#allocation6 + $0x1810] sm:$0xff] }
 0x2ec   :  { %6136 = vmatprep.subr.bf16.mxu1 %v15908_v34  ;;  %v3235_v34 = vld [vmem:[#allocation6 + $0xcb8] sm:$0xff]  ;;  %v16234_v40 = vcombine.high %v3598_v28, %v3602_v29  ;;  %v16233_v48 = vcombine.low %v3598_v28, %v3602_v29 }
 0x2ed   :  { %6059 = vmatpush1.bf16.msra.mxu0 %v16145_v44  ;;  %v15868_v41 = vcombine.high %v3231_v36, %v3235_v34  ;;  %v3590_v44 = vld [vmem:[#allocation6 + $0x17d0] sm:$0xff]  ;;  %v15867_v22 = vcombine.low %v3231_v36, %v3235_v34 }
 0x2ee   :  { %6060 = vmatprep.subr.bf16.mxu0 %v16138_v45  ;;  %v3223_v45 = vld [vmem:[#allocation6 + $0xc58] sm:$0xff] }
 0x2ef   :  { %6137 = vmatpush1.bf16.msra.mxu1 %v15907_v42  ;;  %v3594_v42 = vld [vmem:[#allocation6 + $0x17f0] sm:$0xff] }
 0x2f0   :  { %6138 = vmatprep.subr.bf16.mxu1 %v15900_v46  ;;  %v3227_v46 = vld [vmem:[#allocation6 + $0xc78] sm:$0xff]  ;;  %v16226_v49 = vcombine.high %v3590_v44, %v3594_v42  ;;  %v16225_v47 = vcombine.low %v3590_v44, %v3594_v42 }
 0x2f1   :  { %6061 = vmatpush1.bf16.msra.mxu0 %v16137_v25  ;;  %v15860_v51 = vcombine.high %v3223_v45, %v3227_v46  ;;  %v3582_v25 = vld [vmem:[#allocation6 + $0x1790] sm:$0xff]  ;;  %v15859_v57 = vcombine.low %v3223_v45, %v3227_v46 }
 0x2f2   :  { %6062 = vmatprep.subr.bf16.mxu0 %v16130_v56  ;;  %v3343_v56 = vld [vmem:[#allocation6 + $0x1018] sm:$0xff] }
 0x2f3   :  { %6139 = vmatpush1.bf16.msra.mxu1 %v15899_v55  ;;  %v3586_v55 = vld [vmem:[#allocation6 + $0x17b0] sm:$0xff] }
 0x2f4   :  { %6140 = vmatprep.subr.bf16.mxu1 %v15892_v16  ;;  %v3347_v16 = vld [vmem:[#allocation6 + $0x1038] sm:$0xff]  ;;  %v16218_v61 = vcombine.high %v3582_v25, %v3586_v55  ;;  %v16217_v19 = vcombine.low %v3582_v25, %v3586_v55 }
 0x2f5   :  { %6063 = vmatpush1.bf16.msra.mxu0 %v16129_v1  ;;  %v15980_v63 = vcombine.high %v3343_v56, %v3347_v16  ;;  %v3574_v1 = vld [vmem:[#allocation6 + $0x1750] sm:$0xff]  ;;  %v15979_v11 = vcombine.low %v3343_v56, %v3347_v16 }
 0x2f6   :  { %6064 = vmatprep.subr.bf16.mxu0 %v16122_v27  ;;  %v3335_v27 = vld [vmem:[#allocation6 + $0xfd8] sm:$0xff] }
 0x2f7   :  { %6141 = vmatpush1.bf16.msra.mxu1 %v15891_v15  ;;  %v3578_v15 = vld [vmem:[#allocation6 + $0x1770] sm:$0xff] }
 0x2f8   :  { %6142 = vmatprep.subr.bf16.mxu1 %v15884_v3  ;;  %v3339_v3 = vld [vmem:[#allocation6 + $0xff8] sm:$0xff]  ;;  %v16210_v18 = vcombine.high %v3574_v1, %v3578_v15  ;;  %v16209_v28 = vcombine.low %v3574_v1, %v3578_v15 }
 0x2f9   :  { %6065 = vmatpush1.bf16.msra.mxu0 %v16121_v14  ;;  %v15972_v20 = vcombine.high %v3335_v27, %v3339_v3  ;;  %v3566_v14 = vld [vmem:[#allocation6 + $0x1710] sm:$0xff]  ;;  %v15971_v29 = vcombine.low %v3335_v27, %v3339_v3 }
 0x2fa   :  { %6066 = vmatprep.subr.bf16.mxu0 %v16114_v54  ;;  %v3327_v54 = vld [vmem:[#allocation6 + $0xf98] sm:$0xff] }
 0x2fb   :  { %6143 = vmatpush1.bf16.msra.mxu1 %v15883_v24  ;;  %v3570_v24 = vld [vmem:[#allocation6 + $0x1730] sm:$0xff] }
 0x2fc   :  { %6144 = vmatprep.subr.bf16.mxu1 %v15876_v43  ;;  %v3331_v43 = vld [vmem:[#allocation6 + $0xfb8] sm:$0xff]  ;;  %v16202_v36 = vcombine.high %v3566_v14, %v3570_v24  ;;  %v16201_v44 = vcombine.low %v3566_v14, %v3570_v24 }
 0x2fd   :  { %6067 = vmatpush1.bf16.msra.mxu0 %v16113_v39  ;;  %v15964_v34 = vcombine.high %v3327_v54, %v3331_v43  ;;  %v3558_v39 = vld [vmem:[#allocation6 + $0x16d0] sm:$0xff]  ;;  %v15963_v42 = vcombine.low %v3327_v54, %v3331_v43  ;;  %v3299_v14 = vld [vmem:[#allocation6 + $0xeb8] sm:$0xff] }
 0x2fe   :  { %6068 = vmatprep.subr.bf16.mxu0 %v16234_v40  ;;  %v3319_v40 = vld [vmem:[#allocation6 + $0xf58] sm:$0xff] }
 0x2ff   :  { %6145 = vmatpush1.bf16.msra.mxu1 %v15875_v10  ;;  %v3562_v10 = vld [vmem:[#allocation6 + $0x16f0] sm:$0xff] }
 0x300   :  { %6146 = vmatprep.subr.bf16.mxu1 %v15868_v41  ;;  %v3323_v41 = vld [vmem:[#allocation6 + $0xf78] sm:$0xff]  ;;  %v16194_v45 = vcombine.high %v3558_v39, %v3562_v10  ;;  %v16193_v25 = vcombine.low %v3558_v39, %v3562_v10 }
 0x301   :  { %6069 = vmatpush2.bf16.msra.mxu0 %v16233_v48  ;;  %v15956_v46 = vcombine.high %v3319_v40, %v3323_v41  ;;  %v3550_v48 = vld [vmem:[#allocation6 + $0x1690] sm:$0xff]  ;;  %v15955_v55 = vcombine.low %v3319_v40, %v3323_v41  ;;  %v3399_v10 = vld [vmem:[#allocation6 + $0x11d8] sm:$0xff] }
 0x302   :  { %6070 = vmatprep.subr.bf16.mxu0 %v16226_v49  ;;  %v3311_v49 = vld [vmem:[#allocation6 + $0xf18] sm:$0xff] }
 0x303   :  { %6147 = vmatpush1.bf16.msra.mxu1 %v15867_v22  ;;  %v3554_v22 = vld [vmem:[#allocation6 + $0x16b0] sm:$0xff]  ;;  %v3403_v40 = vld [vmem:[#allocation6 + $0x11f8] sm:$0xff] }
 0x304   :  { %6148 = vmatprep.subr.bf16.mxu1 %v15860_v51  ;;  %v3315_v51 = vld [vmem:[#allocation6 + $0xf38] sm:$0xff]  ;;  %v16186_v56 = vcombine.high %v3550_v48, %v3554_v22  ;;  %v16185_v1 = vcombine.low %v3550_v48, %v3554_v22 }
 0x305   :  { %6071 = vmatpush2.bf16.msra.mxu0 %v16225_v47  ;;  %v15948_v16 = vcombine.high %v3311_v49, %v3315_v51  ;;  %v3542_v47 = vld [vmem:[#allocation6 + $0x1650] sm:$0xff]  ;;  %v15947_v15 = vcombine.low %v3311_v49, %v3315_v51  ;;  %v3395_v49 = vld [vmem:[#allocation6 + $0x11b8] sm:$0xff] }
 0x306   :  { %6072 = vmatprep.subr.bf16.mxu0 %v16218_v61  ;;  %v3303_v61 = vld [vmem:[#allocation6 + $0xed8] sm:$0xff] }
 0x307   :  { %6149 = vmatpush1.bf16.msra.mxu1 %v15859_v57  ;;  %v3546_v57 = vld [vmem:[#allocation6 + $0x1670] sm:$0xff]  ;;  %v3535_v51 = vld [vmem:[#allocation6 + $0x1618] sm:$0xff] }
 0x308   :  { %6150 = vmatprep.subr.bf16.mxu1 %v15980_v63  ;;  %v3307_v63 = vld [vmem:[#allocation6 + $0xef8] sm:$0xff]  ;;  %v16178_v27 = vcombine.high %v3542_v47, %v3546_v57  ;;  %v16177_v54 = vcombine.low %v3542_v47, %v3546_v57 }
 0x309   :  { %6073 = vmatpush2.bf16.msra.mxu0 %v16217_v19  ;;  %v15940_v3 = vcombine.high %v3303_v61, %v3307_v63  ;;  %v3407_v19 = vld [vmem:[#allocation6 + $0x1218] sm:$0xff] }
 0x30a   :  { %6074 = vmatprep.subr.bf16.mxu0 %v16210_v18 }
 0x30b   :  { %6151 = vmatpush2.bf16.msra.mxu1 %v15979_v11  ;;  %v3411_v11 = vld [vmem:[#allocation6 + $0x1238] sm:$0xff] }
 0x30c   :  { %6152 = vmatprep.subr.bf16.mxu1 %v15972_v20  ;;  %v3295_v20 = vld [vmem:[#allocation6 + $0xe98] sm:$0xff] }
 0x30d   :  { %6075 = vmatpush2.bf16.msra.mxu0 %v16209_v28  ;;  %v15939_v28 = vcombine.low %v3303_v61, %v3307_v63  ;;  %v15932_v39 = vcombine.high %v3295_v20, %v3299_v14  ;;  %v15931_v48 = vcombine.low %v3295_v20, %v3299_v14  ;;  %v3383_v61 = vld [vmem:[#allocation6 + $0x1158] sm:$0xff] }
 0x30e   :  { %6076 = vmatprep.subr.bf16.mxu0 %v16202_v36  ;;  %v3387_v63 = vld [vmem:[#allocation6 + $0x1178] sm:$0xff] }
 0x30f   :  { %6153 = vmatpush2.bf16.msra.mxu1 %v15971_v29  ;;  %v16044_v29 = vcombine.high %v3407_v19, %v3411_v11  ;;  %v3375_v20 = vld [vmem:[#allocation6 + $0x1118] sm:$0xff] }
 0x310   :  { %6154 = vmatprep.subr.bf16.mxu1 %v15964_v34  ;;  %v3379_v14 = vld [vmem:[#allocation6 + $0x1138] sm:$0xff] }
 0x311   :  { %6077 = vmatpush2.bf16.msra.mxu0 %v16201_v44  ;;  %v3287_v44 = vld [vmem:[#allocation6 + $0xe58] sm:$0xff] }
 0x312   :  { %6078 = vmatprep.subr.bf16.mxu0 %v16194_v45  ;;  %v16043_v45 = vcombine.low %v3407_v19, %v3411_v11  ;;  %v16020_v11 = vcombine.high %v3383_v61, %v3387_v63 }
 0x313   :  { %6155 = vmatpush2.bf16.msra.mxu1 %v15963_v42  ;;  %v3291_v42 = vld [vmem:[#allocation6 + $0xe78] sm:$0xff] }
 0x314   :  { %6156 = vmatprep.subr.bf16.mxu1 %v15956_v46  ;;  %v15924_v22 = vcombine.high %v3287_v44, %v3291_v42 }
 0x315   :  { %6079 = vmatpush2.bf16.msra.mxu0 %v16193_v25  ;;  %v3539_v25 = vld [vmem:[#allocation6 + $0x1638] sm:$0xff] }
 0x316   :  { %6080 = vmatprep.subr.bf16.mxu0 %v16186_v56  ;;  %v15923_v56 = vcombine.low %v3287_v44, %v3291_v42  ;;  %v16172_v57 = vcombine.high %v3535_v51, %v3539_v25  ;;  %v16171_v19 = vcombine.low %v3535_v51, %v3539_v25  ;;  %v16011_v44 = vcombine.low %v3375_v20, %v3379_v14  ;;  %v3351_v25 = vld [vmem:[#allocation6 + $0x1058] sm:$0xff] }
 0x317   :  { %6157 = vmatpush2.bf16.msra.mxu1 %v15955_v55 }
 0x318   :  { %6158 = vmatprep.subr.bf16.mxu1 %v15948_v16  ;;  %v5758_v18 = vpop.f32.mrf.mxu0 }
 0x319   :  { %v5759_v24 = vadd.f32 %v5758_v18, %v18469_v35  ;;  %6081 = vmatpush2.bf16.msra.mxu0 %v16185_v1  ;;  %v3527_v1 = vld [vmem:[#allocation6 + $0x15d8] sm:$0xff] }
 0x31a   :  { %v5760_v43 = vpop.f32.mrf.mxu0  ;;  %6082 = vmatprep.subr.bf16.mxu0 %v16178_v27 }
 0x31b   :  { %6159 = vmatpush2.bf16.msra.mxu1 %v15947_v15  ;;  %v18488_v36 = vadd.f32 %v18475_v8, %v5759_v24  ;;  %v5761_v34 = vadd.f32 %v5760_v43, %v18471_v21  ;;  %v16036_v8 = vcombine.high %v3399_v10, %v3403_v40  ;;  %v3391_v21 = vld [vmem:[#allocation6 + $0x1198] sm:$0xff]  ;;  %v16019_v43 = vcombine.low %v3383_v61, %v3387_v63 }
 0x31c   :  { %6160 = vmatprep.subr.bf16.mxu1 %v15940_v3  ;;  %v5762_v41 = vpop.f32.mrf.mxu0  ;;  %v16028_v16 = vcombine.high %v3391_v21, %v3395_v49  ;;  %v3531_v15 = vld [vmem:[#allocation6 + $0x15f8] sm:$0xff]  ;;  %v16027_v3 = vcombine.low %v3391_v21, %v3395_v49 }
 0x31d   :  { %v18492_v35 = vadd.f32 %v18477_v6, %v5761_v34  ;;  %6083 = vmatpush2.bf16.msra.mxu0 %v16177_v54  ;;  %v16035_v6 = vcombine.low %v3399_v10, %v3403_v40  ;;  %v16164_v18 = vcombine.high %v3527_v1, %v3531_v15  ;;  %v3519_v24 = vld [vmem:[#allocation6 + $0x1598] sm:$0xff] }
 0x31e   :  { %v5763_v46 = vpop.f32.mrf.mxu0  ;;  %6175 = vmatprep.subr.bf16.mxu0 %v16044_v29  ;;  %v3523_v54 = vld [vmem:[#allocation6 + $0x15b8] sm:$0xff]  ;;  %v16012_v29 = vcombine.high %v3375_v20, %v3379_v14 }
 0x31f   :  { %6161 = vmatpush2.bf16.msra.mxu1 %v15939_v28  ;;  %v16163_v28 = vcombine.low %v3527_v1, %v3531_v15  ;;  %v16156_v34 = vcombine.high %v3519_v24, %v3523_v54  ;;  %v3371_v10 = vld [vmem:[#allocation6 + $0x10f8] sm:$0xff]  ;;  %v16155_v42 = vcombine.low %v3519_v24, %v3523_v54 }
 0x320   :  { %6162 = vmatprep.subr.bf16.mxu1 %v15932_v39  ;;  %6085 = vmatmul.mubr.bf16.vlgmr.msra.gmra.mxu0 %v18429_v62  ;;  %v3367_v39 = vld [vmem:[#allocation6 + $0x10d8] sm:$0xff] }
 0x321   :  { %6176 = vmatpush1.bf16.msra.mxu0 %v16043_v45  ;;  %6207 = vmatprep.mubr.bf16.mxu0 %v18376_v33  ;;  %v3511_v40 = vld [vmem:[#allocation6 + $0x1558] sm:$0xff]  ;;  %v16003_v21 = vcombine.low %v3367_v39, %v3371_v10 }
 0x322   :  { %v18495_v55 = vpop.f32.mrf.mxu1  ;;  %6177 = vmatprep.subr.bf16.mxu0 %v16036_v8  ;;  %v3515_v41 = vld [vmem:[#allocation6 + $0x1578] sm:$0xff] }
 0x323   :  { %6163 = vmatpush2.bf16.msra.mxu1 %v15931_v48  ;;  %v16148_v45 = vcombine.high %v3511_v40, %v3515_v41  ;;  %v3359_v46 = vld [vmem:[#allocation6 + $0x1098] sm:$0xff]  ;;  %v16147_v49 = vcombine.low %v3511_v40, %v3515_v41 }
 0x324   :  { %v18498_v47 = vpop.f32.mrf.mxu1  ;;  %6164 = vmatprep.subr.bf16.mxu1 %v15924_v22  ;;  %v3363_v48 = vld [vmem:[#allocation6 + $0x10b8] sm:$0xff] }
 0x325   :  { %6178 = vmatpush1.bf16.msra.mxu0 %v16035_v6  ;;  %v3503_v8 = vld [vmem:[#allocation6 + $0x1518] sm:$0xff] }
 0x326   :  { %v5844_v27 = vpop.f32.mrf.mxu1  ;;  %6179 = vmatprep.subr.bf16.mxu0 %v16028_v16  ;;  %v3507_v22 = vld [vmem:[#allocation6 + $0x1538] sm:$0xff] }
 0x327   :  { %6165 = vmatpush2.bf16.msra.mxu1 %v15923_v56  ;;  %v16140_v51 = vcombine.high %v3503_v8, %v3507_v22  ;;  %v3355_v6 = vld [vmem:[#allocation6 + $0x1078] sm:$0xff]  ;;  %v16139_v61 = vcombine.low %v3503_v8, %v3507_v22 }
 0x328   :  { %v5845_v33 = vpop.f32.mrf.mxu1  ;;  %6216 = vmatprep.subr.bf16.mxu1 %v16172_v57  ;;  %v3495_v56 = vld [vmem:[#allocation6 + $0x14d8] sm:$0xff]  ;;  %v15995_v57 = vcombine.low %v3359_v46, %v3363_v48  ;;  %v15988_v63 = vcombine.high %v3351_v25, %v3355_v6 }
 0x329   :  { %6180 = vmatpush1.bf16.msra.mxu0 %v16027_v3  ;;  %v3499_v16 = vld [vmem:[#allocation6 + $0x14f8] sm:$0xff] }
 0x32a   :  { %6167 = vmatmul.mubr.bf16.vlgmr.msra.gmra.mxu1 %v18395_v5  ;;  %6181 = vmatprep.subr.bf16.mxu0 %v16020_v11  ;;  %v16004_v5 = vcombine.high %v3367_v39, %v3371_v10  ;;  %v16132_v1 = vcombine.high %v3495_v56, %v3499_v16  ;;  %v3471_v15 = vld [vmem:[#allocation6 + $0x1418] sm:$0xff]  ;;  %v15987_v11 = vcombine.low %v3351_v25, %v3355_v6 }
 0x32b   :  { %6217 = vmatpush1.bf16.msra.mxu1 %v16171_v19  ;;  %6248 = vmatprep.mubr.bf16.mxu1 %v18408_v58  ;;  %v15996_v58 = vcombine.high %v3359_v46, %v3363_v48  ;;  %v3475_v27 = vld [vmem:[#allocation6 + $0x1438] sm:$0xff]  ;;  %v16131_v33 = vcombine.low %v3495_v56, %v3499_v16 }
 0x32c   :  { %6218 = vmatprep.subr.bf16.mxu1 %v16164_v18  ;;  %v3487_v3 = vld [vmem:[#allocation6 + $0x1498] sm:$0xff]  ;;  %v16108_v18 = vcombine.high %v3471_v15, %v3475_v27 }
 0x32d   :  { %6182 = vmatpush1.bf16.msra.mxu0 %v16019_v43  ;;  %v3491_v19 = vld [vmem:[#allocation6 + $0x14b8] sm:$0xff] }
 0x32e   :  { %6183 = vmatprep.subr.bf16.mxu0 %v16012_v29  ;;  %v16124_v20 = vcombine.high %v3487_v3, %v3491_v19  ;;  %v3463_v14 = vld [vmem:[#allocation6 + $0x13d8] sm:$0xff]  ;;  %v16123_v29 = vcombine.low %v3487_v3, %v3491_v19 }
 0x32f   :  { %6219 = vmatpush1.bf16.msra.mxu1 %v16163_v28  ;;  %v3467_v24 = vld [vmem:[#allocation6 + $0x13f8] sm:$0xff]  ;;  %v16107_v28 = vcombine.low %v3471_v15, %v3475_v27 }
 0x330   :  { %6220 = vmatprep.subr.bf16.mxu1 %v16156_v34  ;;  %v3479_v54 = vld [vmem:[#allocation6 + $0x1458] sm:$0xff]  ;;  %v16100_v34 = vcombine.high %v3463_v14, %v3467_v24 }
 0x331   :  { %6184 = vmatpush1.bf16.msra.mxu0 %v16011_v44  ;;  %v3483_v43 = vld [vmem:[#allocation6 + $0x1478] sm:$0xff] }
 0x332   :  { %6185 = vmatprep.subr.bf16.mxu0 %v16004_v5  ;;  %v16116_v39 = vcombine.high %v3479_v54, %v3483_v43  ;;  %v3455_v10 = vld [vmem:[#allocation6 + $0x1398] sm:$0xff]  ;;  %v16115_v5 = vcombine.low %v3479_v54, %v3483_v43 }
 0x333   :  { %6221 = vmatpush1.bf16.msra.mxu1 %v16155_v42  ;;  %v3459_v40 = vld [vmem:[#allocation6 + $0x13b8] sm:$0xff]  ;;  %v16099_v42 = vcombine.low %v3463_v14, %v3467_v24 }
 0x334   :  { %6222 = vmatprep.subr.bf16.mxu1 %v16148_v45  ;;  %v3599_v41 = vld [vmem:[#allocation6 + $0x1818] sm:$0xff]  ;;  %v16092_v45 = vcombine.high %v3455_v10, %v3459_v40 }
 0x335   :  { %6186 = vmatpush1.bf16.msra.mxu0 %v16003_v21  ;;  %v3603_v44 = vld [vmem:[#allocation6 + $0x1838] sm:$0xff] }
 0x336   :  { %6187 = vmatprep.subr.bf16.mxu0 %v15996_v58  ;;  %v16236_v46 = vcombine.high %v3599_v41, %v3603_v44  ;;  %v3447_v48 = vld [vmem:[#allocation6 + $0x1358] sm:$0xff]  ;;  %v16235_v58 = vcombine.low %v3599_v41, %v3603_v44 }
 0x337   :  { %6223 = vmatpush1.bf16.msra.mxu1 %v16147_v49  ;;  %v3451_v8 = vld [vmem:[#allocation6 + $0x1378] sm:$0xff]  ;;  %v16091_v49 = vcombine.low %v3455_v10, %v3459_v40  ;;  %v3626_v10 = vrot.slane %v18463_v2, %v18346_v7 }
 0x338   :  { %6224 = vmatprep.subr.bf16.mxu1 %v16140_v51  ;;  %v3591_v22 = vld [vmem:[#allocation6 + $0x17d8] sm:$0xff]  ;;  %v16084_v51 = vcombine.high %v3447_v48, %v3451_v8 }
 0x339   :  { %6188 = vmatpush1.bf16.msra.mxu0 %v15995_v57  ;;  %v3595_v21 = vld [vmem:[#allocation6 + $0x17f8] sm:$0xff] }
 0x33a   :  { %6189 = vmatprep.subr.bf16.mxu0 %v15988_v63  ;;  %v16228_v25 = vcombine.high %v3591_v22, %v3595_v21  ;;  %v3439_v6 = vld [vmem:[#allocation6 + $0x1318] sm:$0xff]  ;;  %v16227_v63 = vcombine.low %v3591_v22, %v3595_v21  ;;  %v5841_v22 = vadd.f32 %v18495_v55, %v3626_v10 }
 0x33b   :  { %6225 = vmatpush1.bf16.msra.mxu1 %v16139_v61  ;;  %v3443_v56 = vld [vmem:[#allocation6 + $0x1338] sm:$0xff]  ;;  %v16083_v61 = vcombine.low %v3447_v48, %v3451_v8 }
 0x33c   :  { %6226 = vmatprep.subr.bf16.mxu1 %v16132_v1  ;;  %v3583_v16 = vld [vmem:[#allocation6 + $0x1798] sm:$0xff]  ;;  %v16076_v1 = vcombine.high %v3439_v6, %v3443_v56 }
 0x33d   :  { %6190 = vmatpush1.bf16.msra.mxu0 %v15987_v11  ;;  %v3587_v57 = vld [vmem:[#allocation6 + $0x17b8] sm:$0xff] }
 0x33e   :  { %6191 = vmatprep.subr.bf16.mxu0 %v16108_v18  ;;  %v16220_v15 = vcombine.high %v3583_v16, %v3587_v57  ;;  %v3431_v27 = vld [vmem:[#allocation6 + $0x12d8] sm:$0xff]  ;;  %v16219_v18 = vcombine.low %v3583_v16, %v3587_v57 }
 0x33f   :  { %6227 = vmatpush1.bf16.msra.mxu1 %v16131_v33  ;;  %v3435_v3 = vld [vmem:[#allocation6 + $0x12f8] sm:$0xff]  ;;  %v16075_v33 = vcombine.low %v3439_v6, %v3443_v56 }
 0x340   :  { %6228 = vmatprep.subr.bf16.mxu1 %v16124_v20  ;;  %v3575_v19 = vld [vmem:[#allocation6 + $0x1758] sm:$0xff]  ;;  %v16068_v20 = vcombine.high %v3431_v27, %v3435_v3 }
 0x341   :  { %6192 = vmatpush2.bf16.msra.mxu0 %v16107_v28  ;;  %v3579_v11 = vld [vmem:[#allocation6 + $0x1778] sm:$0xff] }
 0x342   :  { %6193 = vmatprep.subr.bf16.mxu0 %v16100_v34  ;;  %v16212_v14 = vcombine.high %v3575_v19, %v3579_v11  ;;  %v3423_v24 = vld [vmem:[#allocation6 + $0x1298] sm:$0xff]  ;;  %v16211_v34 = vcombine.low %v3575_v19, %v3579_v11 }
 0x343   :  { %6229 = vmatpush1.bf16.msra.mxu1 %v16123_v29  ;;  %v3427_v54 = vld [vmem:[#allocation6 + $0x12b8] sm:$0xff]  ;;  %v16067_v29 = vcombine.low %v3431_v27, %v3435_v3  ;;  %v6408_v27 = vld [vmem:[#allocation6 + $0x1a60] sm:$0xff] }
 0x344   :  { %6230 = vmatprep.subr.bf16.mxu1 %v16116_v39  ;;  %v3567_v43 = vld [vmem:[#allocation6 + $0x1718] sm:$0xff]  ;;  %v16060_v39 = vcombine.high %v3423_v24, %v3427_v54 }
 0x345   :  { %6194 = vmatpush2.bf16.msra.mxu0 %v16099_v42  ;;  %v3571_v28 = vld [vmem:[#allocation6 + $0x1738] sm:$0xff] }
 0x346   :  { %6195 = vmatprep.subr.bf16.mxu0 %v16092_v45  ;;  %v16204_v40 = vcombine.high %v3567_v43, %v3571_v28  ;;  %v3415_v41 = vld [vmem:[#allocation6 + $0x1258] sm:$0xff]  ;;  %v3630_v45 = vrot.slane %v18463_v2, %v18349_v13  ;;  %v16203_v48 = vcombine.low %v3567_v43, %v3571_v28  ;;  %v6536_v43 = vld [vmem:[#allocation6 + $0x1e60] sm:$0xff] }
 0x347   :  { %6231 = vmatpush1.bf16.msra.mxu1 %v16115_v5  ;;  %v3419_v44 = vld [vmem:[#allocation6 + $0x1278] sm:$0xff] }
 0x348   :  { %6232 = vmatprep.subr.bf16.mxu1 %v16236_v46  ;;  %v3559_v42 = vld [vmem:[#allocation6 + $0x16d8] sm:$0xff]  ;;  %v16059_v46 = vcombine.low %v3423_v24, %v3427_v54  ;;  %v16052_v8 = vcombine.high %v3415_v41, %v3419_v44  ;;  %v5843_v56 = vadd.f32 %v18498_v47, %v3630_v45  ;;  %v16051_v2 = vcombine.low %v3415_v41, %v3419_v44  ;;  %v6532_v54 = vld [vmem:[#allocation6 + $0x1e40] sm:$0xff] }
 0x349   :  { %6196 = vmatpush2.bf16.msra.mxu0 %v16091_v49  ;;  %v3563_v5 = vld [vmem:[#allocation6 + $0x16f8] sm:$0xff]  ;;  %v6396_v41 = vld [vmem:[#allocation6 + $0x1a00] sm:$0xff] }
 0x34a   :  { %6197 = vmatprep.subr.bf16.mxu0 %v16084_v51  ;;  %v16196_v21 = vcombine.high %v3559_v42, %v3563_v5  ;;  %v3607_v49 = vld [vmem:[#allocation6 + $0x1858] sm:$0xff]  ;;  %v6400_v44 = vld [vmem:[#allocation6 + $0x1a20] sm:$0xff] }
 0x34b   :  { %6233 = vmatpush2.bf16.msra.mxu1 %v16235_v58  ;;  %v3611_v58 = vld [vmem:[#allocation6 + $0x1878] sm:$0xff]  ;;  %v6524_v45 = vld [vmem:[#allocation6 + $0x1e00] sm:$0xff] }
 0x34c   :  { %6234 = vmatprep.subr.bf16.mxu1 %v16228_v25  ;;  %v3551_v25 = vld [vmem:[#allocation6 + $0x1698] sm:$0xff] }
 0x34d   :  { %6198 = vmatpush2.bf16.msra.mxu0 %v16083_v61  ;;  %v3555_v6 = vld [vmem:[#allocation6 + $0x16b8] sm:$0xff]  ;;  %v16195_v61 = vcombine.low %v3559_v42, %v3563_v5 }
 0x34e   :  { %6199 = vmatprep.subr.bf16.mxu0 %v16076_v1  ;;  %v16188_v55 = vcombine.high %v3551_v25, %v3555_v6  ;;  %v3543_v19 = vld [vmem:[#allocation6 + $0x1658] sm:$0xff] }
 0x34f   :  { %6235 = vmatpush2.bf16.msra.mxu1 %v16227_v63  ;;  %v16244_v63 = vcombine.high %v3607_v49, %v3611_v58  ;;  %v3547_v11 = vld [vmem:[#allocation6 + $0x1678] sm:$0xff] }
 0x350   :  { %6236 = vmatprep.subr.bf16.mxu1 %v16220_v15  ;;  %v6404_v15 = vld [vmem:[#allocation6 + $0x1a40] sm:$0xff] }
 0x351   :  { %6200 = vmatpush2.bf16.msra.mxu0 %v16075_v33  ;;  %v16243_v33 = vcombine.low %v3607_v49, %v3611_v58 }
 0x352   :  { %6201 = vmatprep.subr.bf16.mxu0 %v16068_v20  ;;  %v16317_v20 = vcombine.high %v6404_v15, %v6408_v27 }
 0x353   :  { %6237 = vmatpush2.bf16.msra.mxu1 %v16219_v18  ;;  %v16187_v18 = vcombine.low %v3551_v25, %v3555_v6  ;;  %v16309_v25 = vcombine.high %v6396_v41, %v6400_v44 }
 0x354   :  { %6238 = vmatprep.subr.bf16.mxu1 %v16212_v14  ;;  %v16180_v14 = vcombine.high %v3543_v19, %v3547_v11 }
 0x355   :  { %6202 = vmatpush2.bf16.msra.mxu0 %v16067_v29 }
 0x356   :  { %6203 = vmatprep.subr.bf16.mxu0 %v16060_v39  ;;  %v16179_v39 = vcombine.low %v3543_v19, %v3547_v11  ;;  %v6380_v19 = vld [vmem:[#allocation6 + $0x1980] sm:$0xff] }
 0x357   :  { %6239 = vmatpush2.bf16.msra.mxu1 %v16211_v34  ;;  %v6384_v11 = vld [vmem:[#allocation6 + $0x19a0] sm:$0xff] }
 0x358   :  { %6240 = vmatprep.subr.bf16.mxu1 %v16204_v40  ;;  %v5881_v51 = vpop.f32.mrf.mxu0  ;;  %v16445_v40 = vcombine.high %v6532_v54, %v6536_v43 }
 0x359   :  { %v5882_v16 = vadd.f32 %v5881_v51, %v5841_v22  ;;  %6204 = vmatpush2.bf16.msra.mxu0 %v16059_v46  ;;  %v6528_v46 = vld [vmem:[#allocation6 + $0x1e20] sm:$0xff]  ;;  %v16316_v22 = vcombine.low %v6404_v15, %v6408_v27  ;;  %v16444_v51 = vcombine.low %v6532_v54, %v6536_v43 }
 0x35a   :  { %v5883_v57 = vpop.f32.mrf.mxu0  ;;  %6205 = vmatprep.subr.bf16.mxu0 %v16052_v8  ;;  %v16436_v15 = vcombine.low %v6524_v45, %v6528_v46  ;;  %v6500_v54 = vld [vmem:[#allocation6 + $0x1d40] sm:$0xff] }
 0x35b   :  { %6241 = vmatpush2.bf16.msra.mxu1 %v16203_v48  ;;  %v5884_v1 = vadd.f32 %v5883_v57, %v5843_v56  ;;  %v18512_v48 = vld [vmem:[#allocation3 + $0x38] sm:$0xff]  ;;  %v16437_v56 = vcombine.high %v6524_v45, %v6528_v46  ;;  %v6504_v43 = vld [vmem:[#allocation6 + $0x1d60] sm:$0xff] }
 0x35c   :  { %6242 = vmatprep.subr.bf16.mxu1 %v16196_v21  ;;  %v5885_v3 = vpop.f32.mrf.mxu0  ;;  %v18514_v21 = vld [vmem:[#allocation3 + $0x40] sm:$0xff]  ;;  %v18520_v57 = vcombine.high %v18512_v48, %v18512_v48 }
 0x35d   :  { %6206 = vmatpush2.bf16.msra.mxu0 %v16051_v2  ;;  %v6392_v2 = vld [vmem:[#allocation6 + $0x19e0] sm:$0xff] }
 0x35e   :  { %v5886_v47 = vpop.f32.mrf.mxu0  ;;  %6271 = vmatprep.subr.bf16.mxu0 %v16244_v63  ;;  %v6520_v63 = vld [vmem:[#allocation6 + $0x1de0] sm:$0xff] }
 0x35f   :  { %6243 = vmatpush2.bf16.msra.mxu1 %v16195_v61  ;;  %v6516_v61 = vld [vmem:[#allocation6 + $0x1dc0] sm:$0xff] }
 0x360   :  { %6244 = vmatprep.subr.bf16.mxu1 %v16188_v55  ;;  %6208 = vmatmul.mubr.bf16.vlgmr.msra.gmra.mxu0 %v18401_v12  ;;  %v5963_v24 = vpop.f32.mrf.mxu0  ;;  %v16308_v55 = vcombine.low %v6396_v41, %v6400_v44  ;;  %v16429_v3 = vcombine.high %v6516_v61, %v6520_v63  ;;  %v6492_v41 = vld [vmem:[#allocation6 + $0x1d00] sm:$0xff] }
 0x361   :  { %6272 = vmatpush1.bf16.msra.mxu0 %v16243_v33  ;;  %6289 = vmatprep.mubr.bf16.mxu0 %v18884_v31  ;;  %v6512_v33 = vld [vmem:[#allocation6 + $0x1da0] sm:$0xff] }
 0x362   :  { %v5922_v28 = vpop.f32.mrf.mxu1  ;;  %v5965_v34 = vpop.f32.mrf.mxu0  ;;  %8770 = vmatprep.subr.bf16.mxu0 %v16317_v20  ;;  %v6496_v44 = vld [vmem:[#allocation6 + $0x1d20] sm:$0xff] }
 0x363   :  { %v5923_v29 = vadd.f32 %v5922_v28, %v5882_v16  ;;  %6245 = vmatpush2.bf16.msra.mxu1 %v16187_v18  ;;  %v6388_v16 = vld [vmem:[#allocation6 + $0x19c0] sm:$0xff]  ;;  %v16293_v18 = vcombine.high %v6380_v19, %v6384_v11  ;;  %v16292_v28 = vcombine.low %v6380_v19, %v6384_v11  ;;  %v16405_v46 = vcombine.high %v6492_v41, %v6496_v44 }
 0x364   :  { %v5924_v10 = vpop.f32.mrf.mxu1  ;;  %6246 = vmatprep.subr.bf16.mxu1 %v16180_v14  ;;  %v5967_v5 = vpop.f32.mrf.mxu0  ;;  %v16301_v27 = vcombine.high %v6388_v16, %v6392_v2  ;;  %v16300_v47 = vcombine.low %v6388_v16, %v6392_v2  ;;  %v6372_v14 = vld [vmem:[#allocation6 + $0x1940] sm:$0xff] }
 0x365   :  { %v18510_v42 = vadd.f32 %v5963_v24, %v5923_v29  ;;  %v5925_v12 = vadd.f32 %v5924_v10, %v5884_v1  ;;  %v18526_v1 = vcombine.high %v18514_v21, %v18514_v21  ;;  %v6376_v24 = vld [vmem:[#allocation6 + $0x1960] sm:$0xff]  ;;  %v16412_v5 = vcombine.low %v6500_v54, %v6504_v43 }
 0x366   :  { %v5926_v8 = vpop.f32.mrf.mxu1  ;;  %v5968_v58 = vpop.f32.mrf.mxu0  ;;  %v6364_v10 = vld [vmem:[#allocation6 + $0x1900] sm:$0xff] }
 0x367   :  { %v18516_v49 = vadd.f32 %v5965_v34, %v5925_v12  ;;  %6247 = vmatpush2.bf16.msra.mxu1 %v16179_v39  ;;  %v16285_v34 = vcombine.high %v6372_v14, %v6376_v24  ;;  %v16413_v39 = vcombine.high %v6500_v54, %v6504_v43  ;;  %v16284_v12 = vcombine.low %v6372_v14, %v6376_v24  ;;  %v6356_v8 = vld [vmem:[#allocation6 + $0x18c0] sm:$0xff] }
 0x368   :  { %v5927_v6 = vpop.f32.mrf.mxu1  ;;  %8811 = vmatprep.subr.bf16.mxu1 %v16445_v40  ;;  %16248 = vmatmul.mubr.msk.bf16.vlgmr.msra.gmra.mxu0 %vm2510_vm0, %v18481_v32  ;;  %v6508_v32 = vld [vmem:[#allocation6 + $0x1d80] sm:$0xff] }
 0x369   :  { %8771 = vmatpush1.bf16.msra.mxu0 %v16316_v22  ;;  %8802 = vmatprep.mubr.bf16.mxu0 %v18520_v57  ;;  %v16421_v20 = vcombine.high %v6508_v32, %v6512_v33  ;;  %v16420_v29 = vcombine.low %v6508_v32, %v6512_v33  ;;  %v6368_v40 = vld [vmem:[#allocation6 + $0x1920] sm:$0xff]  ;;  %v16404_v6 = vcombine.low %v6492_v41, %v6496_v44 }
 0x36a   :  { %6249 = vmatmul.mubr.bf16.vlgmr.msra.gmra.mxu1 %v18429_v62  ;;  %8772 = vmatprep.subr.bf16.mxu0 %v16309_v25  ;;  %v16428_v62 = vcombine.low %v6516_v61, %v6520_v63  ;;  %v16277_v45 = vcombine.high %v6364_v10, %v6368_v40  ;;  %v6360_v22 = vld [vmem:[#allocation6 + $0x18e0] sm:$0xff]  ;;  %v16276_v25 = vcombine.low %v6364_v10, %v6368_v40 }
 0x36b   :  { %8812 = vmatpush1.bf16.msra.mxu1 %v16444_v51  ;;  %8843 = vmatprep.mubr.bf16.mxu1 %v18526_v1  ;;  %v6484_v58 = vld [vmem:[#allocation6 + $0x1cc0] sm:$0xff] }
 0x36c   :  { %8813 = vmatprep.subr.bf16.mxu1 %v16437_v56  ;;  %v6488_v51 = vld [vmem:[#allocation6 + $0x1ce0] sm:$0xff]  ;;  %v16269_v56 = vcombine.high %v6356_v8, %v6360_v22 }
 0x36d   :  { %8773 = vmatpush1.bf16.msra.mxu0 %v16308_v55  ;;  %v16397_v16 = vcombine.high %v6484_v58, %v6488_v51  ;;  %v6348_v2 = vld [vmem:[#allocation6 + $0x1880] sm:$0xff] }
 0x36e   :  { %8774 = vmatprep.subr.bf16.mxu0 %v16301_v27  ;;  %v6352_v61 = vld [vmem:[#allocation6 + $0x18a0] sm:$0xff]  ;;  %v16396_v27 = vcombine.low %v6484_v58, %v6488_v51 }
 0x36f   :  { %8814 = vmatpush1.bf16.msra.mxu1 %v16436_v15  ;;  %v6476_v63 = vld [vmem:[#allocation6 + $0x1c80] sm:$0xff]  ;;  %v16268_v15 = vcombine.low %v6356_v8, %v6360_v22 }
 0x370   :  { %8815 = vmatprep.subr.bf16.mxu1 %v16429_v3  ;;  %v6480_v55 = vld [vmem:[#allocation6 + $0x1ca0] sm:$0xff]  ;;  %v16261_v3 = vcombine.high %v6348_v2, %v6352_v61 }
 0x371   :  { %8775 = vmatpush1.bf16.msra.mxu0 %v16300_v47  ;;  %v16389_v19 = vcombine.high %v6476_v63, %v6480_v55  ;;  %v6468_v11 = vld [vmem:[#allocation6 + $0x1c40] sm:$0xff] }
 0x372   :  { %8776 = vmatprep.subr.bf16.mxu0 %v16293_v18  ;;  %v6472_v32 = vld [vmem:[#allocation6 + $0x1c60] sm:$0xff]  ;;  %v16388_v18 = vcombine.low %v6476_v63, %v6480_v55 }
 0x373   :  { %8816 = vmatpush1.bf16.msra.mxu1 %v16428_v62  ;;  %v6596_v33 = vld [vmem:[#allocation6 + $0x2040] sm:$0xff]  ;;  %v16260_v62 = vcombine.low %v6348_v2, %v6352_v61 }
 0x374   :  { %8817 = vmatprep.subr.bf16.mxu1 %v16421_v20  ;;  %v6600_v47 = vld [vmem:[#allocation6 + $0x2060] sm:$0xff]  ;;  %v16381_v20 = vcombine.high %v6468_v11, %v6472_v32 }
 0x375   :  { %8777 = vmatpush1.bf16.msra.mxu0 %v16292_v28  ;;  %v16509_v14 = vcombine.high %v6596_v33, %v6600_v47  ;;  %v6460_v24 = vld [vmem:[#allocation6 + $0x1c00] sm:$0xff] }
 0x376   :  { %8778 = vmatprep.subr.bf16.mxu0 %v16285_v34  ;;  %v6464_v54 = vld [vmem:[#allocation6 + $0x1c20] sm:$0xff]  ;;  %v16508_v34 = vcombine.low %v6596_v33, %v6600_v47 }
 0x377   :  { %8818 = vmatpush1.bf16.msra.mxu1 %v16420_v29  ;;  %v6588_v43 = vld [vmem:[#allocation6 + $0x2000] sm:$0xff]  ;;  %v16380_v29 = vcombine.low %v6468_v11, %v6472_v32 }
 0x378   :  { %8819 = vmatprep.subr.bf16.mxu1 %v16413_v39  ;;  %v6592_v28 = vld [vmem:[#allocation6 + $0x2020] sm:$0xff]  ;;  %v16373_v39 = vcombine.high %v6460_v24, %v6464_v54 }
 0x379   :  { %8779 = vmatpush1.bf16.msra.mxu0 %v16284_v12  ;;  %v16501_v10 = vcombine.high %v6588_v43, %v6592_v28  ;;  %v6452_v40 = vld [vmem:[#allocation6 + $0x1bc0] sm:$0xff] }
 0x37a   :  { %8780 = vmatprep.subr.bf16.mxu0 %v16277_v45  ;;  %v6456_v41 = vld [vmem:[#allocation6 + $0x1be0] sm:$0xff]  ;;  %v16500_v45 = vcombine.low %v6588_v43, %v6592_v28 }
 0x37b   :  { %8820 = vmatpush1.bf16.msra.mxu1 %v16412_v5  ;;  %v6580_v44 = vld [vmem:[#allocation6 + $0x1fc0] sm:$0xff]  ;;  %v16372_v5 = vcombine.low %v6460_v24, %v6464_v54 }
 0x37c   :  { %8821 = vmatprep.subr.bf16.mxu1 %v16405_v46  ;;  %v6584_v12 = vld [vmem:[#allocation6 + $0x1fe0] sm:$0xff]  ;;  %v16365_v46 = vcombine.high %v6452_v40, %v6456_v41 }
 0x37d   :  { %8781 = vmatpush1.bf16.msra.mxu0 %v16276_v25  ;;  %v16493_v8 = vcombine.high %v6580_v44, %v6584_v12  ;;  %v6444_v22 = vld [vmem:[#allocation6 + $0x1b80] sm:$0xff] }
 0x37e   :  { %8782 = vmatprep.subr.bf16.mxu0 %v16269_v56  ;;  %v6448_v58 = vld [vmem:[#allocation6 + $0x1ba0] sm:$0xff]  ;;  %v16492_v56 = vcombine.low %v6580_v44, %v6584_v12 }
 0x37f   :  { %8822 = vmatpush1.bf16.msra.mxu1 %v16404_v6  ;;  %v6572_v51 = vld [vmem:[#allocation6 + $0x1f80] sm:$0xff]  ;;  %v16364_v6 = vcombine.low %v6452_v40, %v6456_v41 }
 0x380   :  { %8823 = vmatprep.subr.bf16.mxu1 %v16397_v16  ;;  %v6576_v25 = vld [vmem:[#allocation6 + $0x1fa0] sm:$0xff]  ;;  %v16357_v16 = vcombine.high %v6444_v22, %v6448_v58 }
 0x381   :  { %8783 = vmatpush1.bf16.msra.mxu0 %v16268_v15  ;;  %v16485_v2 = vcombine.high %v6572_v51, %v6576_v25  ;;  %v6436_v61 = vld [vmem:[#allocation6 + $0x1b40] sm:$0xff] }
 0x382   :  { %8784 = vmatprep.subr.bf16.mxu0 %v16261_v3  ;;  %v6440_v63 = vld [vmem:[#allocation6 + $0x1b60] sm:$0xff]  ;;  %v16484_v3 = vcombine.low %v6572_v51, %v6576_v25 }
 0x383   :  { %8824 = vmatpush1.bf16.msra.mxu1 %v16396_v27  ;;  %v6564_v55 = vld [vmem:[#allocation6 + $0x1f40] sm:$0xff]  ;;  %v16356_v27 = vcombine.low %v6444_v22, %v6448_v58 }
 0x384   :  { %8825 = vmatprep.subr.bf16.mxu1 %v16389_v19  ;;  %v6568_v15 = vld [vmem:[#allocation6 + $0x1f60] sm:$0xff]  ;;  %v16349_v19 = vcombine.high %v6436_v61, %v6440_v63 }
 0x385   :  { %8785 = vmatpush1.bf16.msra.mxu0 %v16260_v62  ;;  %v16477_v11 = vcombine.high %v6564_v55, %v6568_v15  ;;  %v6428_v32 = vld [vmem:[#allocation6 + $0x1b00] sm:$0xff] }
 0x386   :  { %8786 = vmatprep.subr.bf16.mxu0 %v16381_v20  ;;  %v6432_v33 = vld [vmem:[#allocation6 + $0x1b20] sm:$0xff]  ;;  %v16476_v20 = vcombine.low %v6564_v55, %v6568_v15 }
 0x387   :  { %8826 = vmatpush1.bf16.msra.mxu1 %v16388_v18  ;;  %v6556_v47 = vld [vmem:[#allocation6 + $0x1f00] sm:$0xff]  ;;  %v16348_v18 = vcombine.low %v6436_v61, %v6440_v63 }
 0x388   :  { %8827 = vmatprep.subr.bf16.mxu1 %v16509_v14  ;;  %v6560_v62 = vld [vmem:[#allocation6 + $0x1f20] sm:$0xff]  ;;  %v16341_v14 = vcombine.high %v6428_v32, %v6432_v33 }
 0x389   :  { %8787 = vmatpush2.bf16.msra.mxu0 %v16380_v29  ;;  %v16469_v24 = vcombine.high %v6556_v47, %v6560_v62  ;;  %v6420_v54 = vld [vmem:[#allocation6 + $0x1ac0] sm:$0xff] }
 0x38a   :  { %8788 = vmatprep.subr.bf16.mxu0 %v16373_v39  ;;  %v6424_v43 = vld [vmem:[#allocation6 + $0x1ae0] sm:$0xff]  ;;  %v16468_v39 = vcombine.low %v6556_v47, %v6560_v62 }
 0x38b   :  { %8828 = vmatpush2.bf16.msra.mxu1 %v16508_v34  ;;  %v6548_v28 = vld [vmem:[#allocation6 + $0x1ec0] sm:$0xff]  ;;  %v16340_v34 = vcombine.low %v6428_v32, %v6432_v33 }
 0x38c   :  { %8829 = vmatprep.subr.bf16.mxu1 %v16501_v10  ;;  %v6552_v29 = vld [vmem:[#allocation6 + $0x1ee0] sm:$0xff]  ;;  %v16333_v10 = vcombine.high %v6420_v54, %v6424_v43 }
 0x38d   :  { %8789 = vmatpush2.bf16.msra.mxu0 %v16372_v5  ;;  %v16461_v40 = vcombine.high %v6548_v28, %v6552_v29  ;;  %v6412_v41 = vld [vmem:[#allocation6 + $0x1a80] sm:$0xff]  ;;  %v16460_v22 = vcombine.low %v6548_v28, %v6552_v29  ;;  %v18547_v29 = vcombine.low %v18514_v21, %v18514_v21 }
 0x38e   :  { %8790 = vmatprep.subr.bf16.mxu0 %v16365_v46  ;;  %v6416_v44 = vld [vmem:[#allocation6 + $0x1aa0] sm:$0xff]  ;;  %v18531_v46 = vld [vmem:[#allocation8 + $0x8] sm:$0xff] }
 0x38f   :  { %8830 = vmatpush2.bf16.msra.mxu1 %v16500_v45  ;;  %v6540_v12 = vld [vmem:[#allocation6 + $0x1e80] sm:$0xff]  ;;  %v16332_v45 = vcombine.low %v6420_v54, %v6424_v43  ;;  %v16325_v58 = vcombine.high %v6412_v41, %v6416_v44  ;;  %v3638_v51 = vrot.slane %v18531_v46, %v18385_v37  ;;  %v16324_v15 = vcombine.low %v6412_v41, %v6416_v44  ;;  %v6409_v54 = vld [vmem:[#allocation6 + $0x1a68] sm:$0xff] }
 0x390   :  { %8831 = vmatprep.subr.bf16.mxu1 %v16493_v8  ;;  %v6544_v5 = vld [vmem:[#allocation6 + $0x1ea0] sm:$0xff]  ;;  %v3634_v8 = vrot.slane %v18531_v46, %v18382_v30 }
 0x391   :  { %8791 = vmatpush2.bf16.msra.mxu0 %v16364_v6  ;;  %v16453_v25 = vcombine.high %v6540_v12, %v6544_v5  ;;  %v6660_v6 = vld [vmem:[#allocation6 + $0x2240] sm:$0xff] }
 0x392   :  { %8792 = vmatprep.subr.bf16.mxu0 %v16357_v16  ;;  %v6736_v61 = vld [vmem:[#allocation6 + $0x24a0] sm:$0xff] }
 0x393   :  { %8832 = vmatpush2.bf16.msra.mxu1 %v16492_v56  ;;  %v6664_v56 = vld [vmem:[#allocation6 + $0x2260] sm:$0xff] }
 0x394   :  { %8833 = vmatprep.subr.bf16.mxu1 %v16485_v2  ;;  %v6732_v2 = vld [vmem:[#allocation6 + $0x2480] sm:$0xff] }
 0x395   :  { %8793 = vmatpush2.bf16.msra.mxu0 %v16356_v27  ;;  %v16645_v47 = vcombine.high %v6732_v2, %v6736_v61  ;;  %v6652_v62 = vld [vmem:[#allocation6 + $0x2200] sm:$0xff] }
 0x396   :  { %8794 = vmatprep.subr.bf16.mxu0 %v16349_v19  ;;  %v16573_v19 = vcombine.high %v6660_v6, %v6664_v56 }
 0x397   :  { %8834 = vmatpush2.bf16.msra.mxu1 %v16484_v3  ;;  %v16452_v3 = vcombine.low %v6540_v12, %v6544_v5  ;;  %v6644_v12 = vld [vmem:[#allocation6 + $0x21c0] sm:$0xff] }
 0x398   :  { %8835 = vmatprep.subr.bf16.mxu1 %v16477_v11  ;;  %v6648_v5 = vld [vmem:[#allocation6 + $0x21e0] sm:$0xff] }
 0x399   :  { %8795 = vmatpush2.bf16.msra.mxu0 %v16348_v18  ;;  %v6656_v18 = vld [vmem:[#allocation6 + $0x2220] sm:$0xff] }
 0x39a   :  { %8796 = vmatprep.subr.bf16.mxu0 %v16341_v14  ;;  %v18541_v14 = vcombine.low %v18512_v48, %v18512_v48  ;;  %v16565_v41 = vcombine.high %v6652_v62, %v6656_v18 }
 0x39b   :  { %8836 = vmatpush2.bf16.msra.mxu1 %v16476_v20 }
 0x39c   :  { %8837 = vmatprep.subr.bf16.mxu1 %v16469_v24  ;;  %v6405_v24 = vld [vmem:[#allocation6 + $0x1a48] sm:$0xff] }
 0x39d   :  { %8797 = vmatpush2.bf16.msra.mxu0 %v16340_v34  ;;  %v16572_v34 = vcombine.low %v6660_v6, %v6664_v56  ;;  %v16319_v44 = vcombine.high %v6405_v24, %v6409_v54  ;;  %v6397_v6 = vld [vmem:[#allocation6 + $0x1a08] sm:$0xff] }
 0x39e   :  { %8798 = vmatprep.subr.bf16.mxu0 %v16333_v10  ;;  %v6401_v56 = vld [vmem:[#allocation6 + $0x1a28] sm:$0xff] }
 0x39f   :  { %8838 = vmatpush2.bf16.msra.mxu1 %v16468_v39  ;;  %v18549_v39 = vld [vmem:[#allocation3 + $0x48] sm:$0xff] }
 0x3a0   :  { %8839 = vmatprep.subr.bf16.mxu1 %v16461_v40  ;;  %v6004_v16 = vpop.f32.mrf.mxu0  ;;  %v16644_v40 = vcombine.low %v6732_v2, %v6736_v61  ;;  %v16556_v2 = vcombine.low %v6644_v12, %v6648_v5  ;;  %v18563_v61 = vld [vmem:[#allocation3 + $0x50] ss:$0 sps:$4 sm:$0xff]  }
 0x3a1   :  { %v6005_v63 = vadd.f32 %v6004_v16, %v3634_v8  ;;  %8799 = vmatpush2.bf16.msra.mxu0 %v16332_v45  ;;  %v18554_v45 = vcombine.high %v18549_v39, %v18549_v39  ;;  %v16564_v8 = vcombine.low %v6652_v62, %v6656_v18  ;;  %v16310_v62 = vcombine.low %v6397_v6, %v6401_v56 }
 0x3a2   :  { %v6045_v55 = vpop.f32.mrf.mxu1  ;;  %v6006_v27 = vpop.f32.mrf.mxu0  ;;  %8800 = vmatprep.subr.bf16.mxu0 %v16325_v58 }
 0x3a3   :  { %8840 = vmatpush2.bf16.msra.mxu1 %v16460_v22  ;;  %v18537_v11 = vadd.f32 %v6045_v55, %v6005_v63  ;;  %v6007_v32 = vadd.f32 %v6006_v27, %v3638_v51  ;;  %v16557_v22 = vcombine.high %v6644_v12, %v6648_v5  ;;  %v6636_v51 = vld [vmem:[#allocation6 + $0x2180] sm:$0xff]  ;;  %v16318_v63 = vcombine.low %v6405_v24, %v6409_v54  ;;  %v6373_v5 = vld [vmem:[#allocation6 + $0x1948] sm:$0xff] }
 0x3a4   :  { %v6047_v33 = vpop.f32.mrf.mxu1  ;;  %8841 = vmatprep.subr.bf16.mxu1 %v16453_v25  ;;  %v6008_v20 = vpop.f32.mrf.mxu0  ;;  %v6640_v25 = vld [vmem:[#allocation6 + $0x21a0] sm:$0xff]  ;;  %v16311_v27 = vcombine.high %v6397_v6, %v6401_v56 }
 0x3a5   :  { %v18543_v43 = vadd.f32 %v6047_v33, %v6007_v32  ;;  %8801 = vmatpush2.bf16.msra.mxu0 %v16324_v15  ;;  %v16549_v55 = vcombine.high %v6636_v51, %v6640_v25  ;;  %v6389_v32 = vld [vmem:[#allocation6 + $0x19c8] sm:$0xff]  ;;  %v6620_v24 = vld [vmem:[#allocation6 + $0x2100] sm:$0xff] }
 0x3a6   :  { %v6049_v28 = vpop.f32.mrf.mxu1  ;;  %v6009_v10 = vpop.f32.mrf.mxu0  ;;  %8852 = vmatprep.subr.bf16.mxu0 %v16573_v19  ;;  %v6632_v19 = vld [vmem:[#allocation6 + $0x2160] sm:$0xff]  ;;  %v6393_v33 = vld [vmem:[#allocation6 + $0x19e8] sm:$0xff] }
 0x3a7   :  { %8842 = vmatpush2.bf16.msra.mxu1 %v16452_v3  ;;  %v6628_v3 = vld [vmem:[#allocation6 + $0x2140] sm:$0xff]  ;;  %v16303_v20 = vcombine.high %v6389_v32, %v6393_v33  ;;  %v6381_v28 = vld [vmem:[#allocation6 + $0x1988] sm:$0xff] }
 0x3a8   :  { %v6050_v48 = vpop.f32.mrf.mxu1  ;;  %8907 = vmatprep.subr.bf16.mxu1 %v16645_v47  ;;  %8803 = vmatmul.mubr.bf16.vlgmr.msra.gmra.mxu0 %v18541_v14  ;;  %v16548_v47 = vcombine.low %v6636_v51, %v6640_v25  ;;  %v16541_v18 = vcombine.high %v6628_v3, %v6632_v19  ;;  %v6624_v54 = vld [vmem:[#allocation6 + $0x2120] sm:$0xff]  ;;  %v16540_v10 = vcombine.low %v6628_v3, %v6632_v19 }
 0x3a9   :  { %8853 = vmatpush1.bf16.msra.mxu0 %v16572_v34  ;;  %8884 = vmatprep.mubr.bf16.mxu0 %v18554_v45  ;;  %v6385_v34 = vld [vmem:[#allocation6 + $0x19a8] sm:$0xff]  ;;  %v6616_v12 = vld [vmem:[#allocation6 + $0x20e0] sm:$0xff] }
 0x3aa   :  { %8844 = vmatmul.mubr.bf16.vlgmr.msra.gmra.mxu1 %v18547_v29  ;;  %v18557_v21 = vpop.f32.mrf.mxu1  ;;  %8854 = vmatprep.subr.bf16.mxu0 %v16565_v41  ;;  %v16533_v41 = vcombine.high %v6620_v24, %v6624_v54  ;;  %v16295_v48 = vcombine.high %v6381_v28, %v6385_v34  ;;  %v16294_v51 = vcombine.low %v6381_v28, %v6385_v34  ;;  %v6604_v56 = vld [vmem:[#allocation6 + $0x2080] sm:$0xff]  ;;  %v6349_v34 = vld [vmem:[#allocation6 + $0x1888] sm:$0xff] }
 0x3ab   :  { %8908 = vmatpush1.bf16.msra.mxu1 %v16644_v40  ;;  %8925 = vmatprep.mubr.bf16.mxu1 %v18884_v31  ;;  %v16302_v40 = vcombine.low %v6389_v32, %v6393_v33  ;;  %v6724_v19 = vld [vmem:[#allocation6 + $0x2440] sm:$0xff]  ;;  %v6357_v33 = vld [vmem:[#allocation6 + $0x18c8] sm:$0xff] }
 0x3ac   :  { %v18559_v58 = vpop.f32.mrf.mxu1  ;;  %8934 = vmatprep.subr.bf16.mxu1 %v16319_v44  ;;  %v6612_v44 = vld [vmem:[#allocation6 + $0x20c0] sm:$0xff] }
 0x3ad   :  { %8855 = vmatpush1.bf16.msra.mxu0 %v16564_v8  ;;  %v6377_v8 = vld [vmem:[#allocation6 + $0x1968] sm:$0xff]  ;;  %v16525_v25 = vcombine.high %v6612_v44, %v6616_v12  ;;  %v6728_v32 = vld [vmem:[#allocation6 + $0x2460] sm:$0xff] }
 0x3ae   :  { %v6131_v16 = vpop.f32.mrf.mxu1  ;;  %8856 = vmatprep.subr.bf16.mxu0 %v16557_v22  ;;  %v16532_v22 = vcombine.low %v6620_v24, %v6624_v54  ;;  %v16287_v6 = vcombine.high %v6373_v5, %v6377_v8  ;;  %v6716_v54 = vld [vmem:[#allocation6 + $0x2400] sm:$0xff] }
 0x3af   :  { %v6608_v16 = vld [vmem:[#allocation6 + $0x20a0] sm:$0xff] }
 0x3b0   :  { %v6132_v15 = vpop.f32.mrf.mxu1  ;;  %v6720_v28 = vld [vmem:[#allocation6 + $0x2420] sm:$0xff] }
 0x3b1   :  { %8857 = vmatpush1.bf16.msra.mxu0 %v16556_v2  ;;  %v6365_v2 = vld [vmem:[#allocation6 + $0x1908] sm:$0xff]  ;;  %v16286_v15 = vcombine.low %v6373_v5, %v6377_v8  ;;  %v6712_v5 = vld [vmem:[#allocation6 + $0x23e0] sm:$0xff] }
 0x3b2   :  { %16652 = vmatmul.mubr.msk.bf16.vlgmr.msra.gmra.mxu1 %vm2510_vm0, %v18563_v61  ;;  %8858 = vmatprep.subr.bf16.mxu0 %v16549_v55  ;;  %v16524_v55 = vcombine.low %v6612_v44, %v6616_v12  ;;  %v6708_v12 = vld [vmem:[#allocation6 + $0x23c0] sm:$0xff]  ;;  %v6469_v8 = vld [vmem:[#allocation6 + $0x1c48] sm:$0xff] }
 0x3b3   :  { %8935 = vmatpush1.bf16.msra.mxu1 %v16318_v63  ;;  %8966 = vmatprep.mubr.bf16.mxu1 %v18520_v57  ;;  %v6369_v63 = vld [vmem:[#allocation6 + $0x1928] sm:$0xff] }
 0x3b4   :  { %8936 = vmatprep.subr.bf16.mxu1 %v16311_v27  ;;  %v16517_v27 = vcombine.high %v6604_v56, %v6608_v16  ;;  %v16279_v3 = vcombine.high %v6365_v2, %v6369_v63 }
 0x3b5   :  { %8859 = vmatpush1.bf16.msra.mxu0 %v16548_v47  ;;  %v6361_v47 = vld [vmem:[#allocation6 + $0x18e8] sm:$0xff] }
 0x3b6   :  { %8860 = vmatprep.subr.bf16.mxu0 %v16541_v18  ;;  %v16278_v18 = vcombine.low %v6365_v2, %v6369_v63  ;;  %v16271_v24 = vcombine.high %v6357_v33, %v6361_v47  ;;  %v6704_v2 = vld [vmem:[#allocation6 + $0x23a0] sm:$0xff]  ;;  %v6461_v63 = vld [vmem:[#allocation6 + $0x1c08] sm:$0xff] }
 0x3b7   :  { %8937 = vmatpush1.bf16.msra.mxu1 %v16310_v62  ;;  %v16516_v62 = vcombine.low %v6604_v56, %v6608_v16  ;;  %v6700_v16 = vld [vmem:[#allocation6 + $0x2380] sm:$0xff] }
 0x3b8   :  { %8938 = vmatprep.subr.bf16.mxu1 %v16303_v20  ;;  %v16637_v20 = vcombine.high %v6724_v19, %v6728_v32 }
 0x3b9   :  { %8861 = vmatpush1.bf16.msra.mxu0 %v16540_v10  ;;  %v6353_v10 = vld [vmem:[#allocation6 + $0x18a8] sm:$0xff] }
 0x3ba   :  { %8862 = vmatprep.subr.bf16.mxu0 %v16533_v41  ;;  %v16270_v41 = vcombine.low %v6357_v33, %v6361_v47  ;;  %v16263_v44 = vcombine.high %v6349_v34, %v6353_v10  ;;  %v6696_v33 = vld [vmem:[#allocation6 + $0x2360] sm:$0xff]  ;;  %v6453_v47 = vld [vmem:[#allocation6 + $0x1bc8] sm:$0xff] }
 0x3bb   :  { %8939 = vmatpush1.bf16.msra.mxu1 %v16302_v40  ;;  %v16636_v40 = vcombine.low %v6724_v19, %v6728_v32  ;;  %v6692_v32 = vld [vmem:[#allocation6 + $0x2340] sm:$0xff] }
 0x3bc   :  { %8940 = vmatprep.subr.bf16.mxu1 %v16295_v48  ;;  %v16629_v48 = vcombine.high %v6716_v54, %v6720_v28 }
 0x3bd   :  { %8863 = vmatpush1.bf16.msra.mxu0 %v16532_v22  ;;  %v6473_v22 = vld [vmem:[#allocation6 + $0x1c68] sm:$0xff] }
 0x3be   :  { %8864 = vmatprep.subr.bf16.mxu0 %v16525_v25  ;;  %v16262_v25 = vcombine.low %v6349_v34, %v6353_v10  ;;  %v16383_v56 = vcombine.high %v6469_v8, %v6473_v22  ;;  %v6688_v34 = vld [vmem:[#allocation6 + $0x2320] sm:$0xff]  ;;  %v6445_v10 = vld [vmem:[#allocation6 + $0x1b88] sm:$0xff] }
 0x3bf   :  { %8941 = vmatpush1.bf16.msra.mxu1 %v16294_v51  ;;  %v16628_v51 = vcombine.low %v6716_v54, %v6720_v28  ;;  %v6684_v28 = vld [vmem:[#allocation6 + $0x2300] sm:$0xff] }
 0x3c0   :  { %8942 = vmatprep.subr.bf16.mxu1 %v16287_v6  ;;  %v16621_v6 = vcombine.high %v6708_v12, %v6712_v5 }
 0x3c1   :  { %8865 = vmatpush1.bf16.msra.mxu0 %v16524_v55  ;;  %v6465_v55 = vld [vmem:[#allocation6 + $0x1c28] sm:$0xff] }
 0x3c2   :  { %8866 = vmatprep.subr.bf16.mxu0 %v16517_v27  ;;  %v16382_v27 = vcombine.low %v6469_v8, %v6473_v22  ;;  %v16375_v19 = vcombine.high %v6461_v63, %v6465_v55  ;;  %v6680_v8 = vld [vmem:[#allocation6 + $0x22e0] sm:$0xff]  ;;  %v6437_v22 = vld [vmem:[#allocation6 + $0x1b48] sm:$0xff] }
 0x3c3   :  { %8943 = vmatpush1.bf16.msra.mxu1 %v16286_v15  ;;  %v16620_v15 = vcombine.low %v6708_v12, %v6712_v5  ;;  %v6676_v5 = vld [vmem:[#allocation6 + $0x22c0] sm:$0xff] }
 0x3c4   :  { %8944 = vmatprep.subr.bf16.mxu1 %v16279_v3  ;;  %v16613_v3 = vcombine.high %v6700_v16, %v6704_v2 }
 0x3c5   :  { %8867 = vmatpush1.bf16.msra.mxu0 %v16516_v62  ;;  %v6457_v62 = vld [vmem:[#allocation6 + $0x1be8] sm:$0xff] }
 0x3c6   :  { %8868 = vmatprep.subr.bf16.mxu0 %v16637_v20  ;;  %v16374_v20 = vcombine.low %v6461_v63, %v6465_v55  ;;  %v16367_v54 = vcombine.high %v6453_v47, %v6457_v62  ;;  %v6672_v63 = vld [vmem:[#allocation6 + $0x22a0] sm:$0xff]  ;;  %v6429_v55 = vld [vmem:[#allocation6 + $0x1b08] sm:$0xff] }
 0x3c7   :  { %8945 = vmatpush1.bf16.msra.mxu1 %v16278_v18  ;;  %v16612_v18 = vcombine.low %v6700_v16, %v6704_v2  ;;  %v6668_v2 = vld [vmem:[#allocation6 + $0x2280] sm:$0xff] }
 0x3c8   :  { %8946 = vmatprep.subr.bf16.mxu1 %v16271_v24  ;;  %v16605_v24 = vcombine.high %v6692_v32, %v6696_v33 }
 0x3c9   :  { %8869 = vmatpush2.bf16.msra.mxu0 %v16636_v40  ;;  %v6449_v40 = vld [vmem:[#allocation6 + $0x1ba8] sm:$0xff] }
 0x3ca   :  { %8870 = vmatprep.subr.bf16.mxu0 %v16629_v48  ;;  %v16366_v48 = vcombine.low %v6453_v47, %v6457_v62  ;;  %v16359_v12 = vcombine.high %v6445_v10, %v6449_v40  ;;  %v6537_v47 = vld [vmem:[#allocation6 + $0x1e68] sm:$0xff] }
 0x3cb   :  { %8947 = vmatpush1.bf16.msra.mxu1 %v16270_v41  ;;  %v16604_v41 = vcombine.low %v6692_v32, %v6696_v33  ;;  %v6533_v33 = vld [vmem:[#allocation6 + $0x1e48] sm:$0xff] }
 0x3cc   :  { %8948 = vmatprep.subr.bf16.mxu1 %v16263_v44  ;;  %v16597_v44 = vcombine.high %v6684_v28, %v6688_v34 }
 0x3cd   :  { %8871 = vmatpush2.bf16.msra.mxu0 %v16628_v51  ;;  %v6441_v51 = vld [vmem:[#allocation6 + $0x1b68] sm:$0xff] }
 0x3ce   :  { %8872 = vmatprep.subr.bf16.mxu0 %v16621_v6  ;;  %v16358_v6 = vcombine.low %v6445_v10, %v6449_v40  ;;  %v16351_v16 = vcombine.high %v6437_v22, %v6441_v51  ;;  %v16447_v10 = vcombine.high %v6533_v33, %v6537_v47 }
 0x3cf   :  { %8949 = vmatpush1.bf16.msra.mxu1 %v16262_v25  ;;  %v16596_v25 = vcombine.low %v6684_v28, %v6688_v34 }
 0x3d0   :  { %8950 = vmatprep.subr.bf16.mxu1 %v16383_v56  ;;  %v16589_v56 = vcombine.high %v6676_v5, %v6680_v8 }
 0x3d1   :  { %8873 = vmatpush2.bf16.msra.mxu0 %v16620_v15  ;;  %v6433_v15 = vld [vmem:[#allocation6 + $0x1b28] sm:$0xff] }
 0x3d2   :  { %8874 = vmatprep.subr.bf16.mxu0 %v16613_v3  ;;  %v16350_v3 = vcombine.low %v6437_v22, %v6441_v51  ;;  %v16343_v32 = vcombine.high %v6429_v55, %v6433_v15  ;;  %v16342_v34 = vcombine.low %v6429_v55, %v6433_v15  ;;  %v6417_v22 = vld [vmem:[#allocation6 + $0x1aa8] sm:$0xff] }
 0x3d3   :  { %8951 = vmatpush2.bf16.msra.mxu1 %v16382_v27  ;;  %v16588_v27 = vcombine.low %v6676_v5, %v6680_v8  ;;  %v6413_v8 = vld [vmem:[#allocation6 + $0x1a88] sm:$0xff] }
 0x3d4   :  { %8952 = vmatprep.subr.bf16.mxu1 %v16375_v19  ;;  %v16581_v19 = vcombine.high %v6668_v2, %v6672_v63  ;;  %v16326_v15 = vcombine.low %v6413_v8, %v6417_v22 }
 0x3d5   :  { %8875 = vmatpush2.bf16.msra.mxu0 %v16612_v18  ;;  %v6421_v18 = vld [vmem:[#allocation6 + $0x1ac8] sm:$0xff] }
 0x3d6   :  { %8876 = vmatprep.subr.bf16.mxu0 %v16605_v24 }
 0x3d7   :  { %8953 = vmatpush2.bf16.msra.mxu1 %v16374_v20  ;;  %v6425_v20 = vld [vmem:[#allocation6 + $0x1ae8] sm:$0xff] }
 0x3d8   :  { %8954 = vmatprep.subr.bf16.mxu1 %v16367_v54  ;;  %v16580_v54 = vcombine.low %v6668_v2, %v6672_v63  ;;  %v6521_v2 = vld [vmem:[#allocation6 + $0x1de8] sm:$0xff] }
 0x3d9   :  { %8877 = vmatpush2.bf16.msra.mxu0 %v16604_v41  ;;  %v6665_v63 = vld [vmem:[#allocation6 + $0x2268] sm:$0xff] }
 0x3da   :  { %8878 = vmatprep.subr.bf16.mxu0 %v16597_v44  ;;  %v6525_v44 = vld [vmem:[#allocation6 + $0x1e08] sm:$0xff] }
 0x3db   :  { %8955 = vmatpush2.bf16.msra.mxu1 %v16366_v48  ;;  %v16335_v48 = vcombine.high %v6421_v18, %v6425_v20 }
 0x3dc   :  { %8956 = vmatprep.subr.bf16.mxu1 %v16359_v12  ;;  %v6529_v12 = vld [vmem:[#allocation6 + $0x1e28] sm:$0xff] }
 0x3dd   :  { %8879 = vmatpush2.bf16.msra.mxu0 %v16596_v25  ;;  %v16446_v25 = vcombine.low %v6533_v33, %v6537_v47  ;;  %v6513_v33 = vld [vmem:[#allocation6 + $0x1da8] sm:$0xff] }
 0x3de   :  { %8880 = vmatprep.subr.bf16.mxu0 %v16589_v56  ;;  %v16327_v56 = vcombine.high %v6413_v8, %v6417_v22  ;;  %v6653_v47 = vld [vmem:[#allocation6 + $0x2208] sm:$0xff] }
 0x3df   :  { %8957 = vmatpush2.bf16.msra.mxu1 %v16358_v6  ;;  %v16334_v6 = vcombine.low %v6421_v18, %v6425_v20 }
 0x3e0   :  { %8958 = vmatprep.subr.bf16.mxu1 %v16351_v16  ;;  %v6086_v62 = vpop.f32.mrf.mxu0  ;;  %v6517_v16 = vld [vmem:[#allocation6 + $0x1dc8] sm:$0xff] }
 0x3e1   :  { %v6087_v24 = vadd.f32 %v6086_v62, %v18537_v11  ;;  %8881 = vmatpush2.bf16.msra.mxu0 %v16588_v27  ;;  %v18575_v11 = vcombine.low %v18549_v39, %v18549_v39  ;;  %v6661_v39 = vld [vmem:[#allocation6 + $0x2248] sm:$0xff]  ;;  %v16431_v27 = vcombine.high %v6517_v16, %v6521_v2  ;;  %v16430_v20 = vcombine.low %v6517_v16, %v6521_v2 }
 0x3e2   :  { %v6088_v28 = vpop.f32.mrf.mxu0  ;;  %8882 = vmatprep.subr.bf16.mxu0 %v16581_v19  ;;  %v16575_v19 = vcombine.high %v6661_v39, %v6665_v63  ;;  %v6657_v62 = vld [vmem:[#allocation6 + $0x2228] sm:$0xff] }
 0x3e3   :  { %8959 = vmatpush2.bf16.msra.mxu1 %v16350_v3  ;;  %v18570_v40 = vadd.f32 %v18557_v21, %v6087_v24  ;;  %v6089_v41 = vadd.f32 %v6088_v28, %v18543_v43  ;;  %v16439_v43 = vcombine.high %v6525_v44, %v6529_v12  ;;  %v16574_v24 = vcombine.low %v6661_v39, %v6665_v63  ;;  %v6485_v63 = vld [vmem:[#allocation6 + $0x1cc8] sm:$0xff] }
 0x3e4   :  { %8960 = vmatprep.subr.bf16.mxu1 %v16343_v32  ;;  %v6090_v5 = vpop.f32.mrf.mxu0  ;;  %v6509_v32 = vld [vmem:[#allocation6 + $0x1d88] sm:$0xff] }
 0x3e5   :  { %v18578_v51 = vadd.f32 %v18559_v58, %v6089_v41  ;;  %8883 = vmatpush2.bf16.msra.mxu0 %v16580_v54  ;;  %v16438_v58 = vcombine.low %v6525_v44, %v6529_v12  ;;  %v16423_v54 = vcombine.high %v6509_v32, %v6513_v33  ;;  %v6505_v41 = vld [vmem:[#allocation6 + $0x1d68] sm:$0xff]  ;;  %v16422_v12 = vcombine.low %v6509_v32, %v6513_v33 }
 0x3e6   :  { %v6091_v21 = vpop.f32.mrf.mxu0  ;;  %8975 = vmatprep.subr.bf16.mxu0 %v16447_v10  ;;  %v6501_v10 = vld [vmem:[#allocation6 + $0x1d48] sm:$0xff]  ;;  %v16566_v5 = vcombine.low %v6653_v47, %v6657_v62 }
 0x3e7   :  { %8961 = vmatpush2.bf16.msra.mxu1 %v16342_v34  ;;  %v16567_v34 = vcombine.high %v6653_v47, %v6657_v62  ;;  %v6649_v44 = vld [vmem:[#allocation6 + $0x21e8] sm:$0xff]  ;;  %v16415_v8 = vcombine.high %v6501_v10, %v6505_v41 }
 0x3e8   :  { %8962 = vmatprep.subr.bf16.mxu1 %v16335_v48  ;;  %8885 = vmatmul.mubr.bf16.vlgmr.msra.gmra.mxu0 %v18575_v11  ;;  %v6645_v48 = vld [vmem:[#allocation6 + $0x21c8] sm:$0xff] }
 0x3e9   :  { %8976 = vmatpush1.bf16.msra.mxu0 %v16446_v25  ;;  %9007 = vmatprep.mubr.bf16.mxu0 %v18526_v1  ;;  %v16559_v22 = vcombine.high %v6645_v48, %v6649_v44  ;;  %v6493_v25 = vld [vmem:[#allocation6 + $0x1d08] sm:$0xff]  ;;  %v16558_v16 = vcombine.low %v6645_v48, %v6649_v44 }
 0x3ea   :  { %v18581_v55 = vpop.f32.mrf.mxu1  ;;  %8977 = vmatprep.subr.bf16.mxu0 %v16439_v43  ;;  %v6497_v21 = vld [vmem:[#allocation6 + $0x1d28] sm:$0xff] }
 0x3eb   :  { %8963 = vmatpush2.bf16.msra.mxu1 %v16334_v6  ;;  %v6637_v6 = vld [vmem:[#allocation6 + $0x2188] sm:$0xff]  ;;  %v16407_v2 = vcombine.high %v6493_v25, %v6497_v21 }
 0x3ec   :  { %v18584_v3 = vpop.f32.mrf.mxu1  ;;  %8964 = vmatprep.subr.bf16.mxu1 %v16327_v56  ;;  %v6641_v43 = vld [vmem:[#allocation6 + $0x21a8] sm:$0xff]  ;;  %v16414_v56 = vcombine.low %v6501_v10, %v6505_v41 }
 0x3ed   :  { %8978 = vmatpush1.bf16.msra.mxu0 %v16438_v58  ;;  %v16551_v39 = vcombine.high %v6637_v6, %v6641_v43  ;;  %v6489_v58 = vld [vmem:[#allocation6 + $0x1ce8] sm:$0xff]  ;;  %v16550_v32 = vcombine.low %v6637_v6, %v6641_v43 }
 0x3ee   :  { %v6172_v18 = vpop.f32.mrf.mxu1  ;;  %8979 = vmatprep.subr.bf16.mxu0 %v16431_v27  ;;  %v6633_v27 = vld [vmem:[#allocation6 + $0x2168] sm:$0xff]  ;;  %v16399_v33 = vcombine.high %v6485_v63, %v6489_v58 }
 0x3ef   :  { %8965 = vmatpush2.bf16.msra.mxu1 %v16326_v15  ;;  %v6629_v15 = vld [vmem:[#allocation6 + $0x2148] sm:$0xff] }
 0x3f0   :  { %v6173_v28 = vpop.f32.mrf.mxu1  ;;  %9016 = vmatprep.subr.bf16.mxu1 %v16575_v19  ;;  %v16406_v19 = vcombine.low %v6493_v25, %v6497_v21  ;;  %v16543_v47 = vcombine.high %v6629_v15, %v6633_v27  ;;  %v6477_v62 = vld [vmem:[#allocation6 + $0x1c88] sm:$0xff] }
 0x3f1   :  { %8980 = vmatpush1.bf16.msra.mxu0 %v16430_v20  ;;  %v6481_v18 = vld [vmem:[#allocation6 + $0x1ca8] sm:$0xff]  ;;  %v16542_v28 = vcombine.low %v6629_v15, %v6633_v27 }
 0x3f2   :  { %8967 = vmatmul.mubr.bf16.vlgmr.msra.gmra.mxu1 %v18541_v14  ;;  %8981 = vmatprep.subr.bf16.mxu0 %v16423_v54  ;;  %v6621_v20 = vld [vmem:[#allocation6 + $0x2108] sm:$0xff]  ;;  %v16398_v54 = vcombine.low %v6485_v63, %v6489_v58 }
 0x3f3   :  { %9017 = vmatpush1.bf16.msra.mxu1 %v16574_v24  ;;  %9048 = vmatprep.mubr.bf16.mxu1 %v18554_v45  ;;  %v6625_v24 = vld [vmem:[#allocation6 + $0x2128] sm:$0xff] }
 0x3f4   :  { %9018 = vmatprep.subr.bf16.mxu1 %v16567_v34  ;;  %v16391_v34 = vcombine.high %v6477_v62, %v6481_v18  ;;  %v16535_v10 = vcombine.high %v6621_v20, %v6625_v24  ;;  %v6597_v41 = vld [vmem:[#allocation6 + $0x2048] sm:$0xff] }
 0x3f5   :  { %8982 = vmatpush1.bf16.msra.mxu0 %v16422_v12  ;;  %v6601_v48 = vld [vmem:[#allocation6 + $0x2068] sm:$0xff] }
 0x3f6   :  { %8983 = vmatprep.subr.bf16.mxu0 %v16415_v8  ;;  %v6613_v44 = vld [vmem:[#allocation6 + $0x20c8] sm:$0xff]  ;;  %v16534_v8 = vcombine.low %v6621_v20, %v6625_v24 }
 0x3f7   :  { %9019 = vmatpush1.bf16.msra.mxu1 %v16566_v5  ;;  %v6617_v12 = vld [vmem:[#allocation6 + $0x20e8] sm:$0xff]  ;;  %v16390_v5 = vcombine.low %v6477_v62, %v6481_v18 }
 0x3f8   :  { %9020 = vmatprep.subr.bf16.mxu1 %v16559_v22  ;;  %v16511_v22 = vcombine.high %v6597_v41, %v6601_v48  ;;  %v16527_v25 = vcombine.high %v6613_v44, %v6617_v12  ;;  %v6589_v21 = vld [vmem:[#allocation6 + $0x2008] sm:$0xff] }
 0x3f9   :  { %8984 = vmatpush1.bf16.msra.mxu0 %v16414_v56  ;;  %v6593_v6 = vld [vmem:[#allocation6 + $0x2028] sm:$0xff] }
 0x3fa   :  { %8985 = vmatprep.subr.bf16.mxu0 %v16407_v2  ;;  %v6605_v43 = vld [vmem:[#allocation6 + $0x2088] sm:$0xff]  ;;  %v16526_v2 = vcombine.low %v6613_v44, %v6617_v12 }
 0x3fb   :  { %9021 = vmatpush1.bf16.msra.mxu1 %v16558_v16  ;;  %v6609_v56 = vld [vmem:[#allocation6 + $0x20a8] sm:$0xff]  ;;  %v16510_v16 = vcombine.low %v6597_v41, %v6601_v48 }
 0x3fc   :  { %9022 = vmatprep.subr.bf16.mxu1 %v16551_v39  ;;  %v16503_v39 = vcombine.high %v6589_v21, %v6593_v6  ;;  %v16519_v63 = vcombine.high %v6605_v43, %v6609_v56  ;;  %v6581_v58 = vld [vmem:[#allocation6 + $0x1fc8] sm:$0xff] }
 0x3fd   :  { %8986 = vmatpush1.bf16.msra.mxu0 %v16406_v19  ;;  %v6585_v15 = vld [vmem:[#allocation6 + $0x1fe8] sm:$0xff] }
 0x3fe   :  { %8987 = vmatprep.subr.bf16.mxu0 %v16399_v33  ;;  %v6725_v27 = vld [vmem:[#allocation6 + $0x2448] sm:$0xff]  ;;  %v16518_v33 = vcombine.low %v6605_v43, %v6609_v56 }
 0x3ff   :  { %9023 = vmatpush1.bf16.msra.mxu1 %v16550_v32  ;;  %v6729_v19 = vld [vmem:[#allocation6 + $0x2468] sm:$0xff]  ;;  %v16502_v32 = vcombine.low %v6589_v21, %v6593_v6 }
 0x400   :  { %9024 = vmatprep.subr.bf16.mxu1 %v16543_v47  ;;  %v16495_v47 = vcombine.high %v6581_v58, %v6585_v15  ;;  %v16639_v62 = vcombine.high %v6725_v27, %v6729_v19  ;;  %v6573_v18 = vld [vmem:[#allocation6 + $0x1f88] sm:$0xff] }
 0x401   :  { %8988 = vmatpush1.bf16.msra.mxu0 %v16398_v54  ;;  %v6577_v20 = vld [vmem:[#allocation6 + $0x1fa8] sm:$0xff] }
 0x402   :  { %8989 = vmatprep.subr.bf16.mxu0 %v16391_v34  ;;  %v6717_v24 = vld [vmem:[#allocation6 + $0x2408] sm:$0xff]  ;;  %v16638_v34 = vcombine.low %v6725_v27, %v6729_v19 }
 0x403   :  { %9025 = vmatpush1.bf16.msra.mxu1 %v16542_v28  ;;  %v6721_v54 = vld [vmem:[#allocation6 + $0x2428] sm:$0xff]  ;;  %v16494_v28 = vcombine.low %v6581_v58, %v6585_v15 }
 0x404   :  { %9026 = vmatprep.subr.bf16.mxu1 %v16535_v10  ;;  %v16487_v10 = vcombine.high %v6573_v18, %v6577_v20  ;;  %v16631_v41 = vcombine.high %v6717_v24, %v6721_v54  ;;  %v6565_v48 = vld [vmem:[#allocation6 + $0x1f48] sm:$0xff] }
 0x405   :  { %8990 = vmatpush1.bf16.msra.mxu0 %v16390_v5  ;;  %v6569_v44 = vld [vmem:[#allocation6 + $0x1f68] sm:$0xff] }
 0x406   :  { %8991 = vmatprep.subr.bf16.mxu0 %v16511_v22  ;;  %v6709_v12 = vld [vmem:[#allocation6 + $0x23c8] sm:$0xff]  ;;  %v16630_v22 = vcombine.low %v6717_v24, %v6721_v54 }
 0x407   :  { %9027 = vmatpush1.bf16.msra.mxu1 %v16534_v8  ;;  %v6713_v5 = vld [vmem:[#allocation6 + $0x23e8] sm:$0xff]  ;;  %v16486_v8 = vcombine.low %v6573_v18, %v6577_v20  ;;  %v3642_v18 = vrot.slane %v18531_v46, %v18443_v60 }
 0x408   :  { %9028 = vmatprep.subr.bf16.mxu1 %v16527_v25  ;;  %v16479_v25 = vcombine.high %v6565_v48, %v6569_v44  ;;  %v16623_v21 = vcombine.high %v6709_v12, %v6713_v5  ;;  %v6557_v6 = vld [vmem:[#allocation6 + $0x1f08] sm:$0xff] }
 0x409   :  { %8992 = vmatpush2.bf16.msra.mxu0 %v16510_v16  ;;  %v6561_v43 = vld [vmem:[#allocation6 + $0x1f28] sm:$0xff] }
 0x40a   :  { %8993 = vmatprep.subr.bf16.mxu0 %v16503_v39  ;;  %v6701_v56 = vld [vmem:[#allocation6 + $0x2388] sm:$0xff]  ;;  %v16622_v39 = vcombine.low %v6709_v12, %v6713_v5  ;;  %v6169_v12 = vadd.f32 %v18581_v55, %v3642_v18 }
 0x40b   :  { %9029 = vmatpush1.bf16.msra.mxu1 %v16526_v2  ;;  %v6705_v16 = vld [vmem:[#allocation6 + $0x23a8] sm:$0xff]  ;;  %v16478_v2 = vcombine.low %v6565_v48, %v6569_v44 }
 0x40c   :  { %9030 = vmatprep.subr.bf16.mxu1 %v16519_v63  ;;  %v16471_v63 = vcombine.high %v6557_v6, %v6561_v43  ;;  %v16615_v58 = vcombine.high %v6701_v56, %v6705_v16  ;;  %v6549_v15 = vld [vmem:[#allocation6 + $0x1ec8] sm:$0xff] }
 0x40d   :  { %8994 = vmatpush2.bf16.msra.mxu0 %v16502_v32  ;;  %v6553_v27 = vld [vmem:[#allocation6 + $0x1ee8] sm:$0xff] }
 0x40e   :  { %8995 = vmatprep.subr.bf16.mxu0 %v16495_v47  ;;  %v6693_v19 = vld [vmem:[#allocation6 + $0x2348] sm:$0xff]  ;;  %v16614_v47 = vcombine.low %v6701_v56, %v6705_v16 }
 0x40f   :  { %9031 = vmatpush1.bf16.msra.mxu1 %v16518_v33  ;;  %v6697_v32 = vld [vmem:[#allocation6 + $0x2368] sm:$0xff]  ;;  %v16470_v33 = vcombine.low %v6557_v6, %v6561_v43 }
 0x410   :  { %9032 = vmatprep.subr.bf16.mxu1 %v16639_v62  ;;  %v16463_v62 = vcombine.high %v6549_v15, %v6553_v27  ;;  %v16607_v20 = vcombine.high %v6693_v19, %v6697_v32  ;;  %v6541_v24 = vld [vmem:[#allocation6 + $0x1e88] sm:$0xff]  ;;  %v16606_v48 = vcombine.low %v6693_v19, %v6697_v32 }
 0x411   :  { %8996 = vmatpush2.bf16.msra.mxu0 %v16494_v28  ;;  %v6545_v54 = vld [vmem:[#allocation6 + $0x1ea8] sm:$0xff] }
 0x412   :  { %8997 = vmatprep.subr.bf16.mxu0 %v16487_v10  ;;  %v6685_v28 = vld [vmem:[#allocation6 + $0x2308] sm:$0xff]  ;;  %v3646_v10 = vrot.slane %v18531_v46, %v18446_v53  ;;  %v16455_v44 = vcombine.high %v6541_v24, %v6545_v54  ;;  %v16454_v46 = vcombine.low %v6541_v24, %v6545_v54  ;;  %v6534_v24 = vld [vmem:[#allocation6 + $0x1e50] sm:$0xff] }
 0x413   :  { %9033 = vmatpush2.bf16.msra.mxu1 %v16638_v34  ;;  %v6689_v34 = vld [vmem:[#allocation6 + $0x2328] sm:$0xff]  ;;  %v6538_v54 = vld [vmem:[#allocation6 + $0x1e70] sm:$0xff] }
 0x414   :  { %9034 = vmatprep.subr.bf16.mxu1 %v16631_v41  ;;  %v16462_v41 = vcombine.low %v6549_v15, %v6553_v27  ;;  %v16599_v5 = vcombine.high %v6685_v28, %v6689_v34  ;;  %v6681_v6 = vld [vmem:[#allocation6 + $0x22e8] sm:$0xff]  ;;  %v6171_v43 = vadd.f32 %v18584_v3, %v3646_v10  ;;  %v6410_v15 = vld [vmem:[#allocation6 + $0x1a70] sm:$0xff] }
 0x415   :  { %8998 = vmatpush2.bf16.msra.mxu0 %v16486_v8  ;;  %v6733_v8 = vld [vmem:[#allocation6 + $0x2488] sm:$0xff] }
 0x416   :  { %8999 = vmatprep.subr.bf16.mxu0 %v16479_v25  ;;  %v6669_v19 = vld [vmem:[#allocation6 + $0x2288] sm:$0xff] }
 0x417   :  { %9035 = vmatpush2.bf16.msra.mxu1 %v16630_v22  ;;  %v6737_v22 = vld [vmem:[#allocation6 + $0x24a8] sm:$0xff] }
 0x418   :  { %9036 = vmatprep.subr.bf16.mxu1 %v16623_v21  ;;  %v6677_v21 = vld [vmem:[#allocation6 + $0x22c8] sm:$0xff] }
 0x419   :  { %9000 = vmatpush2.bf16.msra.mxu0 %v16478_v2  ;;  %v16598_v2 = vcombine.low %v6685_v28, %v6689_v34  ;;  %v16591_v55 = vcombine.high %v6677_v21, %v6681_v6  ;;  %v6673_v32 = vld [vmem:[#allocation6 + $0x22a8] sm:$0xff] }
 0x41a   :  { %9001 = vmatprep.subr.bf16.mxu0 %v16471_v63  ;;  %v16583_v18 = vcombine.high %v6669_v19, %v6673_v32 }
 0x41b   :  { %9037 = vmatpush2.bf16.msra.mxu1 %v16622_v39  ;;  %v16647_v39 = vcombine.high %v6733_v8, %v6737_v22 }
 0x41c   :  { %9038 = vmatprep.subr.bf16.mxu1 %v16615_v58  ;;  %v6406_v58 = vld [vmem:[#allocation6 + $0x1a50] sm:$0xff] }
 0x41d   :  { %9002 = vmatpush2.bf16.msra.mxu0 %v16470_v33  ;;  %v16646_v33 = vcombine.low %v6733_v8, %v6737_v22 }
 0x41e   :  { %9003 = vmatprep.subr.bf16.mxu0 %v16463_v62  ;;  %v16321_v62 = vcombine.high %v6406_v58, %v6410_v15 }
 0x41f   :  { %9039 = vmatpush2.bf16.msra.mxu1 %v16614_v47  ;;  %v16590_v47 = vcombine.low %v6677_v21, %v6681_v6  ;;  %v6526_v21 = vld [vmem:[#allocation6 + $0x1e10] sm:$0xff] }
 0x420   :  { %9040 = vmatprep.subr.bf16.mxu1 %v16607_v20  ;;  %v6209_v25 = vpop.f32.mrf.mxu0  ;;  %v6530_v6 = vld [vmem:[#allocation6 + $0x1e30] sm:$0xff] }
 0x421   :  { %v6210_v56 = vadd.f32 %v6209_v25, %v6169_v12  ;;  %9004 = vmatpush2.bf16.msra.mxu0 %v16462_v41  ;;  %v16582_v41 = vcombine.low %v6669_v19, %v6673_v32  ;;  %v6398_v12 = vld [vmem:[#allocation6 + $0x1a10] sm:$0xff] }
 0x422   :  { %v6211_v16 = vpop.f32.mrf.mxu0  ;;  %9005 = vmatprep.subr.bf16.mxu0 %v16455_v44  ;;  %v16449_v44 = vcombine.high %v6534_v24, %v6538_v54  ;;  %v6390_v19 = vld [vmem:[#allocation6 + $0x19d0] sm:$0xff] }
 0x423   :  { %9041 = vmatpush2.bf16.msra.mxu1 %v16606_v48  ;;  %v6212_v63 = vadd.f32 %v6211_v16, %v6171_v43  ;;  %v6394_v32 = vld [vmem:[#allocation6 + $0x19f0] sm:$0xff] }
 0x424   :  { %9042 = vmatprep.subr.bf16.mxu1 %v16599_v5  ;;  %v6213_v27 = vpop.f32.mrf.mxu0  ;;  %v6402_v5 = vld [vmem:[#allocation6 + $0x1a30] sm:$0xff] }
 0x425   :  { %9006 = vmatpush2.bf16.msra.mxu0 %v16454_v46  ;;  %v16320_v46 = vcombine.low %v6406_v58, %v6410_v15  ;;  %v16441_v27 = vcombine.high %v6526_v21, %v6530_v6  ;;  %v16312_v58 = vcombine.low %v6398_v12, %v6402_v5  ;;  %v16440_v15 = vcombine.low %v6526_v21, %v6530_v6  ;;  %v6366_v21 = vld [vmem:[#allocation6 + $0x1910] sm:$0xff] }
 0x426   :  { %v6214_v3 = vpop.f32.mrf.mxu0  ;;  %9071 = vmatprep.subr.bf16.mxu0 %v16647_v39  ;;  %v16313_v39 = vcombine.high %v6398_v12, %v6402_v5  ;;  %v6370_v6 = vld [vmem:[#allocation6 + $0x1930] sm:$0xff] }
 0x427   :  { %9043 = vmatpush2.bf16.msra.mxu1 %v16598_v2  ;;  %v16448_v2 = vcombine.low %v6534_v24, %v6538_v54  ;;  %v16305_v3 = vcombine.high %v6390_v19, %v6394_v32  ;;  %v6514_v24 = vld [vmem:[#allocation6 + $0x1db0] sm:$0xff] }
 0x428   :  { %9044 = vmatprep.subr.bf16.mxu1 %v16591_v55  ;;  %9008 = vmatmul.mubr.bf16.vlgmr.msra.gmra.mxu0 %v18547_v29  ;;  %v6291_v20 = vpop.f32.mrf.mxu0 }
 0x429   :  { %9072 = vmatpush1.bf16.msra.mxu0 %v16646_v33  ;;  %9089 = vmatprep.mubr.bf16.mxu0 %v18884_v31  ;;  %v6522_v33 = vld [vmem:[#allocation6 + $0x1df0] sm:$0xff] }
 0x42a   :  { %v6250_v28 = vpop.f32.mrf.mxu1  ;;  %v6293_v10 = vpop.f32.mrf.mxu0  ;;  %9098 = vmatprep.subr.bf16.mxu0 %v16321_v62  ;;  %v6382_v62 = vld [vmem:[#allocation6 + $0x1990] sm:$0xff] }
 0x42b   :  { %v6251_v34 = vadd.f32 %v6250_v28, %v6210_v56  ;;  %9045 = vmatpush2.bf16.msra.mxu1 %v16590_v47 }
 0x42c   :  { %v6252_v48 = vpop.f32.mrf.mxu1  ;;  %9046 = vmatprep.subr.bf16.mxu1 %v16583_v18  ;;  %v6295_v25 = vpop.f32.mrf.mxu0  ;;  %v6386_v18 = vld [vmem:[#allocation6 + $0x19b0] sm:$0xff] }
 0x42d   :  { %v18596_v8 = vadd.f32 %v6291_v20, %v6251_v34  ;;  %v6253_v22 = vadd.f32 %v6252_v48, %v6212_v63  ;;  %v6518_v63 = vld [vmem:[#allocation6 + $0x1dd0] sm:$0xff]  ;;  %v16297_v28 = vcombine.high %v6382_v62, %v6386_v18  ;;  %v16296_v12 = vcombine.low %v6382_v62, %v6386_v18 }
 0x42e   :  { %v6254_v43 = vpop.f32.mrf.mxu1  ;;  %v6296_v56 = vpop.f32.mrf.mxu0  ;;  %v16433_v47 = vcombine.high %v6518_v63, %v6522_v33  ;;  %v6510_v20 = vld [vmem:[#allocation6 + $0x1d90] sm:$0xff]  ;;  %v16432_v54 = vcombine.low %v6518_v63, %v6522_v33  ;;  %v16280_v33 = vcombine.low %v6366_v21, %v6370_v6 }
 0x42f   :  { %v18598_v16 = vadd.f32 %v6293_v10, %v6253_v22  ;;  %9047 = vmatpush2.bf16.msra.mxu1 %v16582_v41  ;;  %v16425_v34 = vcombine.high %v6510_v20, %v6514_v24  ;;  %v6374_v10 = vld [vmem:[#allocation6 + $0x1950] sm:$0xff]  ;;  %v16424_v5 = vcombine.low %v6510_v20, %v6514_v24 }
 0x430   :  { %v6255_v55 = vpop.f32.mrf.mxu1  ;;  %9139 = vmatprep.subr.bf16.mxu1 %v16449_v44  ;;  %16653 = vmatmul.mubr.msk.bf16.vlgmr.msra.gmra.mxu0 %vm2510_vm0, %v18563_v61  ;;  %v16304_v61 = vcombine.low %v6390_v19, %v6394_v32  ;;  %v6378_v41 = vld [vmem:[#allocation6 + $0x1970] sm:$0xff] }
 0x431   :  { %9099 = vmatpush1.bf16.msra.mxu0 %v16320_v46  ;;  %9130 = vmatprep.mubr.bf16.mxu0 %v18520_v57  ;;  %v6502_v48 = vld [vmem:[#allocation6 + $0x1d50] sm:$0xff]  ;;  %v16289_v22 = vcombine.high %v6374_v10, %v6378_v41  ;;  %v16288_v56 = vcombine.low %v6374_v10, %v6378_v41 }
 0x432   :  { %9049 = vmatmul.mubr.bf16.vlgmr.msra.gmra.mxu1 %v18575_v11  ;;  %9100 = vmatprep.subr.bf16.mxu0 %v16313_v39  ;;  %v6506_v44 = vld [vmem:[#allocation6 + $0x1d70] sm:$0xff]  ;;  %v16281_v39 = vcombine.high %v6366_v21, %v6370_v6 }
 0x433   :  { %9140 = vmatpush1.bf16.msra.mxu1 %v16448_v2  ;;  %9171 = vmatprep.mubr.bf16.mxu1 %v18526_v1  ;;  %v16417_v25 = vcombine.high %v6502_v48, %v6506_v44  ;;  %v6494_v43 = vld [vmem:[#allocation6 + $0x1d10] sm:$0xff]  ;;  %v16416_v2 = vcombine.low %v6502_v48, %v6506_v44 }
 0x434   :  { %9141 = vmatprep.subr.bf16.mxu1 %v16441_v27  ;;  %v6498_v46 = vld [vmem:[#allocation6 + $0x1d30] sm:$0xff] }
 0x435   :  { %9101 = vmatpush1.bf16.msra.mxu0 %v16312_v58  ;;  %v16409_v55 = vcombine.high %v6494_v43, %v6498_v46  ;;  %v6358_v27 = vld [vmem:[#allocation6 + $0x18d0] sm:$0xff]  ;;  %v16408_v58 = vcombine.low %v6494_v43, %v6498_v46 }
 0x436   :  { %9102 = vmatprep.subr.bf16.mxu0 %v16305_v3  ;;  %v6362_v19 = vld [vmem:[#allocation6 + $0x18f0] sm:$0xff] }
 0x437   :  { %9142 = vmatpush1.bf16.msra.mxu1 %v16440_v15  ;;  %v6486_v32 = vld [vmem:[#allocation6 + $0x1cd0] sm:$0xff]  ;;  %v16273_v15 = vcombine.high %v6358_v27, %v6362_v19  ;;  %v16272_v24 = vcombine.low %v6358_v27, %v6362_v19 }
 0x438   :  { %9143 = vmatprep.subr.bf16.mxu1 %v16433_v47  ;;  %v6490_v63 = vld [vmem:[#allocation6 + $0x1cf0] sm:$0xff] }
 0x439   :  { %9103 = vmatpush1.bf16.msra.mxu0 %v16304_v61  ;;  %v16401_v3 = vcombine.high %v6486_v32, %v6490_v63  ;;  %v6350_v47 = vld [vmem:[#allocation6 + $0x1890] sm:$0xff]  ;;  %v16400_v61 = vcombine.low %v6486_v32, %v6490_v63 }
 0x43a   :  { %9104 = vmatprep.subr.bf16.mxu0 %v16297_v28  ;;  %v6354_v62 = vld [vmem:[#allocation6 + $0x18b0] sm:$0xff] }
 0x43b   :  { %9144 = vmatpush1.bf16.msra.mxu1 %v16432_v54  ;;  %v6478_v18 = vld [vmem:[#allocation6 + $0x1c90] sm:$0xff]  ;;  %v16265_v54 = vcombine.high %v6350_v47, %v6354_v62  ;;  %v16264_v44 = vcombine.low %v6350_v47, %v6354_v62 }
 0x43c   :  { %9145 = vmatprep.subr.bf16.mxu1 %v16425_v34  ;;  %v6482_v20 = vld [vmem:[#allocation6 + $0x1cb0] sm:$0xff] }
 0x43d   :  { %9105 = vmatpush1.bf16.msra.mxu0 %v16296_v12  ;;  %v16393_v28 = vcombine.high %v6478_v18, %v6482_v20  ;;  %v6470_v34 = vld [vmem:[#allocation6 + $0x1c50] sm:$0xff]  ;;  %v16392_v12 = vcombine.low %v6478_v18, %v6482_v20 }
 0x43e   :  { %9106 = vmatprep.subr.bf16.mxu0 %v16289_v22  ;;  %v6474_v10 = vld [vmem:[#allocation6 + $0x1c70] sm:$0xff] }
 0x43f   :  { %9146 = vmatpush1.bf16.msra.mxu1 %v16424_v5  ;;  %v6598_v41 = vld [vmem:[#allocation6 + $0x2050] sm:$0xff]  ;;  %v16385_v5 = vcombine.high %v6470_v34, %v6474_v10  ;;  %v16384_v46 = vcombine.low %v6470_v34, %v6474_v10 }
 0x440   :  { %9147 = vmatprep.subr.bf16.mxu1 %v16417_v25  ;;  %v6602_v48 = vld [vmem:[#allocation6 + $0x2070] sm:$0xff] }
 0x441   :  { %9107 = vmatpush1.bf16.msra.mxu0 %v16288_v56  ;;  %v16513_v22 = vcombine.high %v6598_v41, %v6602_v48  ;;  %v6462_v25 = vld [vmem:[#allocation6 + $0x1c10] sm:$0xff]  ;;  %v16512_v56 = vcombine.low %v6598_v41, %v6602_v48 }
 0x442   :  { %9108 = vmatprep.subr.bf16.mxu0 %v16281_v39  ;;  %v6466_v21 = vld [vmem:[#allocation6 + $0x1c30] sm:$0xff] }
 0x443   :  { %9148 = vmatpush1.bf16.msra.mxu1 %v16416_v2  ;;  %v6590_v6 = vld [vmem:[#allocation6 + $0x2010] sm:$0xff]  ;;  %v16377_v2 = vcombine.high %v6462_v25, %v6466_v21  ;;  %v16376_v63 = vcombine.low %v6462_v25, %v6466_v21 }
 0x444   :  { %9149 = vmatprep.subr.bf16.mxu1 %v16409_v55  ;;  %v6594_v43 = vld [vmem:[#allocation6 + $0x2030] sm:$0xff] }
 0x445   :  { %9109 = vmatpush1.bf16.msra.mxu0 %v16280_v33  ;;  %v16505_v39 = vcombine.high %v6590_v6, %v6594_v43  ;;  %v6454_v55 = vld [vmem:[#allocation6 + $0x1bd0] sm:$0xff]  ;;  %v16504_v33 = vcombine.low %v6590_v6, %v6594_v43 }
 0x446   :  { %9110 = vmatprep.subr.bf16.mxu0 %v16273_v15  ;;  %v6458_v27 = vld [vmem:[#allocation6 + $0x1bf0] sm:$0xff] }
 0x447   :  { %9150 = vmatpush1.bf16.msra.mxu1 %v16408_v58  ;;  %v6582_v19 = vld [vmem:[#allocation6 + $0x1fd0] sm:$0xff]  ;;  %v16369_v58 = vcombine.high %v6454_v55, %v6458_v27  ;;  %v16368_v20 = vcombine.low %v6454_v55, %v6458_v27 }
 0x448   :  { %9151 = vmatprep.subr.bf16.mxu1 %v16401_v3  ;;  %v6586_v32 = vld [vmem:[#allocation6 + $0x1ff0] sm:$0xff] }
 0x449   :  { %9111 = vmatpush1.bf16.msra.mxu0 %v16272_v24  ;;  %v16497_v15 = vcombine.high %v6582_v19, %v6586_v32  ;;  %v6446_v3 = vld [vmem:[#allocation6 + $0x1b90] sm:$0xff]  ;;  %v16496_v24 = vcombine.low %v6582_v19, %v6586_v32 }
 0x44a   :  { %9112 = vmatprep.subr.bf16.mxu0 %v16265_v54  ;;  %v6450_v47 = vld [vmem:[#allocation6 + $0x1bb0] sm:$0xff] }
 0x44b   :  { %9152 = vmatpush1.bf16.msra.mxu1 %v16400_v61  ;;  %v6574_v62 = vld [vmem:[#allocation6 + $0x1f90] sm:$0xff]  ;;  %v16361_v61 = vcombine.high %v6446_v3, %v6450_v47  ;;  %v16360_v48 = vcombine.low %v6446_v3, %v6450_v47 }
 0x44c   :  { %9153 = vmatprep.subr.bf16.mxu1 %v16393_v28  ;;  %v6578_v18 = vld [vmem:[#allocation6 + $0x1fb0] sm:$0xff] }
 0x44d   :  { %9113 = vmatpush1.bf16.msra.mxu0 %v16264_v44  ;;  %v16489_v54 = vcombine.high %v6574_v62, %v6578_v18  ;;  %v6438_v28 = vld [vmem:[#allocation6 + $0x1b50] sm:$0xff]  ;;  %v16488_v44 = vcombine.low %v6574_v62, %v6578_v18 }
 0x44e   :  { %9114 = vmatprep.subr.bf16.mxu0 %v16385_v5  ;;  %v6442_v34 = vld [vmem:[#allocation6 + $0x1b70] sm:$0xff] }
 0x44f   :  { %9154 = vmatpush1.bf16.msra.mxu1 %v16392_v12  ;;  %v6566_v10 = vld [vmem:[#allocation6 + $0x1f50] sm:$0xff]  ;;  %v16353_v12 = vcombine.high %v6438_v28, %v6442_v34  ;;  %v16352_v43 = vcombine.low %v6438_v28, %v6442_v34 }
 0x450   :  { %9155 = vmatprep.subr.bf16.mxu1 %v16513_v22  ;;  %v6570_v41 = vld [vmem:[#allocation6 + $0x1f70] sm:$0xff] }
 0x451   :  { %9115 = vmatpush2.bf16.msra.mxu0 %v16384_v46  ;;  %v16481_v5 = vcombine.high %v6566_v10, %v6570_v41  ;;  %v6430_v22 = vld [vmem:[#allocation6 + $0x1b10] sm:$0xff]  ;;  %v16480_v46 = vcombine.low %v6566_v10, %v6570_v41 }
 0x452   :  { %9116 = vmatprep.subr.bf16.mxu0 %v16377_v2  ;;  %v6434_v25 = vld [vmem:[#allocation6 + $0x1b30] sm:$0xff] }
 0x453   :  { %9156 = vmatpush2.bf16.msra.mxu1 %v16512_v56  ;;  %v6558_v21 = vld [vmem:[#allocation6 + $0x1f10] sm:$0xff]  ;;  %v16345_v56 = vcombine.high %v6430_v22, %v6434_v25  ;;  %v16344_v32 = vcombine.low %v6430_v22, %v6434_v25 }
 0x454   :  { %9157 = vmatprep.subr.bf16.mxu1 %v16505_v39  ;;  %v6562_v6 = vld [vmem:[#allocation6 + $0x1f30] sm:$0xff] }
 0x455   :  { %9117 = vmatpush2.bf16.msra.mxu0 %v16376_v63  ;;  %v16473_v2 = vcombine.high %v6558_v21, %v6562_v6  ;;  %v6422_v39 = vld [vmem:[#allocation6 + $0x1ad0] sm:$0xff]  ;;  %v16472_v63 = vcombine.low %v6558_v21, %v6562_v6 }
 0x456   :  { %9118 = vmatprep.subr.bf16.mxu0 %v16369_v58  ;;  %v6426_v55 = vld [vmem:[#allocation6 + $0x1af0] sm:$0xff] }
 0x457   :  { %9158 = vmatpush2.bf16.msra.mxu1 %v16504_v33  ;;  %v6550_v27 = vld [vmem:[#allocation6 + $0x1ed0] sm:$0xff]  ;;  %v16337_v33 = vcombine.high %v6422_v39, %v6426_v55 }
 0x458   :  { %9159 = vmatprep.subr.bf16.mxu1 %v16497_v15  ;;  %v6554_v19 = vld [vmem:[#allocation6 + $0x1ef0] sm:$0xff] }
 0x459   :  { %9119 = vmatpush2.bf16.msra.mxu0 %v16368_v20  ;;  %v18605_v58 = vld [vmem:[#allocation8 + $0x10] sm:$0xff]  ;;  %v16465_v15 = vcombine.high %v6550_v27, %v6554_v19  ;;  %v16336_v20 = vcombine.low %v6422_v39, %v6426_v55 }
 0x45a   :  { %9120 = vmatprep.subr.bf16.mxu0 %v16361_v61  ;;  %v6414_v3 = vld [vmem:[#allocation6 + $0x1a90] sm:$0xff]  ;;  %v16464_v61 = vcombine.low %v6550_v27, %v6554_v19  ;;  %v6750_v28 = vrot.slane %v18605_v58, %v18310_v0 }
 0x45b   :  { %9160 = vmatpush2.bf16.msra.mxu1 %v16496_v24  ;;  %v6418_v47 = vld [vmem:[#allocation6 + $0x1ab0] sm:$0xff]  ;;  %v6746_v24 = vrot.slane %v18605_v58, %v18307_v52 }
 0x45c   :  { %9161 = vmatprep.subr.bf16.mxu1 %v16489_v54  ;;  %v6542_v62 = vld [vmem:[#allocation6 + $0x1e90] sm:$0xff]  ;;  %v16329_v54 = vcombine.high %v6414_v3, %v6418_v47  ;;  %v16328_v25 = vcombine.low %v6414_v3, %v6418_v47 }
 0x45d   :  { %9121 = vmatpush2.bf16.msra.mxu0 %v16360_v48  ;;  %v6546_v18 = vld [vmem:[#allocation6 + $0x1eb0] sm:$0xff] }
 0x45e   :  { %9122 = vmatprep.subr.bf16.mxu0 %v16353_v12  ;;  %v16457_v34 = vcombine.high %v6542_v62, %v6546_v18  ;;  %v6662_v10 = vld [vmem:[#allocation6 + $0x2250] sm:$0xff]  ;;  %v16456_v6 = vcombine.low %v6542_v62, %v6546_v18 }
 0x45f   :  { %9162 = vmatpush2.bf16.msra.mxu1 %v16488_v44  ;;  %v6666_v41 = vld [vmem:[#allocation6 + $0x2270] sm:$0xff] }
 0x460   :  { %9163 = vmatprep.subr.bf16.mxu1 %v16481_v5  ;;  %v6734_v44 = vld [vmem:[#allocation6 + $0x2490] sm:$0xff]  ;;  %v16576_v3 = vcombine.low %v6662_v10, %v6666_v41 }
 0x461   :  { %9123 = vmatpush2.bf16.msra.mxu0 %v16352_v43  ;;  %v6738_v12 = vld [vmem:[#allocation6 + $0x24b0] sm:$0xff]  ;;  %v16577_v43 = vcombine.high %v6662_v10, %v6666_v41 }
 0x462   :  { %9124 = vmatprep.subr.bf16.mxu0 %v16345_v56  ;;  %v16649_v39 = vcombine.high %v6734_v44, %v6738_v12  ;;  %v6654_v55 = vld [vmem:[#allocation6 + $0x2210] sm:$0xff]  ;;  %v16648_v62 = vcombine.low %v6734_v44, %v6738_v12  ;;  %v6399_v12 = vld [vmem:[#allocation6 + $0x1a18] sm:$0xff] }
 0x463   :  { %9164 = vmatpush2.bf16.msra.mxu1 %v16480_v46  ;;  %v6658_v27 = vld [vmem:[#allocation6 + $0x2230] sm:$0xff] }
 0x464   :  { %9165 = vmatprep.subr.bf16.mxu1 %v16473_v2  ;;  %v16569_v18 = vcombine.high %v6654_v55, %v6658_v27  ;;  %v6642_v44 = vld [vmem:[#allocation6 + $0x21b0] sm:$0xff] }
 0x465   :  { %9125 = vmatpush2.bf16.msra.mxu0 %v16344_v32  ;;  %v6407_v32 = vld [vmem:[#allocation6 + $0x1a58] sm:$0xff] }
 0x466   :  { %9126 = vmatprep.subr.bf16.mxu0 %v16337_v33 }
 0x467   :  { %9166 = vmatpush2.bf16.msra.mxu1 %v16472_v63  ;;  %v6411_v63 = vld [vmem:[#allocation6 + $0x1a78] sm:$0xff] }
 0x468   :  { %9167 = vmatprep.subr.bf16.mxu1 %v16465_v15  ;;  %v8804_v48 = vpop.f32.mrf.mxu0 }
 0x469   :  { %v8805_v5 = vadd.f32 %v8804_v48, %v6746_v24  ;;  %9127 = vmatpush2.bf16.msra.mxu0 %v16336_v20  ;;  %v16323_v24 = vcombine.high %v6407_v32, %v6411_v63  ;;  %v6638_v48 = vld [vmem:[#allocation6 + $0x2190] sm:$0xff] }
 0x46a   :  { %v8845_v22 = vpop.f32.mrf.mxu1  ;;  %v8806_v21 = vpop.f32.mrf.mxu0  ;;  %9128 = vmatprep.subr.bf16.mxu0 %v16329_v54  ;;  %v6650_v54 = vld [vmem:[#allocation6 + $0x21f0] sm:$0xff] }
 0x46b   :  { %9168 = vmatpush2.bf16.msra.mxu1 %v16464_v61  ;;  %v18611_v46 = vadd.f32 %v8845_v22, %v8805_v5  ;;  %v8807_v56 = vadd.f32 %v8806_v21, %v6750_v28  ;;  %v6646_v61 = vld [vmem:[#allocation6 + $0x21d0] sm:$0xff]  ;;  %v6403_v5 = vld [vmem:[#allocation6 + $0x1a38] sm:$0xff]  ;;  %v16322_v21 = vcombine.low %v6407_v32, %v6411_v63 }
 0x46c   :  { %v8847_v2 = vpop.f32.mrf.mxu1  ;;  %9169 = vmatprep.subr.bf16.mxu1 %v16457_v34  ;;  %v8808_v19 = vpop.f32.mrf.mxu0  ;;  %v16568_v34 = vcombine.low %v6654_v55, %v6658_v27  ;;  %v16561_v10 = vcombine.high %v6646_v61, %v6650_v54  ;;  %v6391_v55 = vld [vmem:[#allocation6 + $0x19d8] sm:$0xff]  ;;  %v6622_v63 = vld [vmem:[#allocation6 + $0x2110] sm:$0xff] }
 0x46d   :  { %v18613_v33 = vadd.f32 %v8847_v2, %v8807_v56  ;;  %9129 = vmatpush2.bf16.msra.mxu0 %v16328_v25  ;;  %v16560_v25 = vcombine.low %v6646_v61, %v6650_v54  ;;  %v16315_v56 = vcombine.high %v6399_v12, %v6403_v5  ;;  %v6630_v2 = vld [vmem:[#allocation6 + $0x2150] sm:$0xff]  ;;  %v6395_v27 = vld [vmem:[#allocation6 + $0x19f8] sm:$0xff]  ;;  %v18623_v19 = vld [vmem:[#allocation3 + $0x50] ss:$0 sps:$4 sm:$0xff]  }
 0x46e   :  { %v8849_v15 = vpop.f32.mrf.mxu1  ;;  %v8809_v47 = vpop.f32.mrf.mxu0  ;;  %9180 = vmatprep.subr.bf16.mxu0 %v16577_v43  ;;  %v16307_v32 = vcombine.high %v6391_v55, %v6395_v27  ;;  %v16306_v61 = vcombine.low %v6391_v55, %v6395_v27 }
 0x46f   :  { %9170 = vmatpush2.bf16.msra.mxu1 %v16456_v6  ;;  %v16553_v6 = vcombine.high %v6638_v48, %v6642_v44  ;;  %v16552_v15 = vcombine.low %v6638_v48, %v6642_v44  ;;  %v6618_v48 = vld [vmem:[#allocation6 + $0x20f0] sm:$0xff]  ;;  %v6375_v44 = vld [vmem:[#allocation6 + $0x1958] sm:$0xff] }
 0x470   :  { %v8850_v20 = vpop.f32.mrf.mxu1  ;;  %9235 = vmatprep.subr.bf16.mxu1 %v16649_v39  ;;  %9131 = vmatmul.mubr.bf16.vlgmr.msra.gmra.mxu0 %v18541_v14  ;;  %v6634_v39 = vld [vmem:[#allocation6 + $0x2170] sm:$0xff] }
 0x471   :  { %9181 = vmatpush1.bf16.msra.mxu0 %v16576_v3  ;;  %9212 = vmatprep.mubr.bf16.mxu0 %v18554_v45  ;;  %v16314_v3 = vcombine.low %v6399_v12, %v6403_v5  ;;  %v16545_v47 = vcombine.high %v6630_v2, %v6634_v39  ;;  %v6387_v20 = vld [vmem:[#allocation6 + $0x19b8] sm:$0xff] }
 0x472   :  { %9172 = vmatmul.mubr.bf16.vlgmr.msra.gmra.mxu1 %v18547_v29  ;;  %v18617_v28 = vpop.f32.mrf.mxu1  ;;  %9182 = vmatprep.subr.bf16.mxu0 %v16569_v18  ;;  %v6383_v18 = vld [vmem:[#allocation6 + $0x1998] sm:$0xff] }
 0x473   :  { %9236 = vmatpush1.bf16.msra.mxu1 %v16648_v62  ;;  %9253 = vmatprep.mubr.bf16.mxu1 %v18884_v31  ;;  %v6626_v62 = vld [vmem:[#allocation6 + $0x2130] sm:$0xff]  ;;  %v6379_v12 = vld [vmem:[#allocation6 + $0x1978] sm:$0xff] }
 0x474   :  { %v18619_v41 = vpop.f32.mrf.mxu1  ;;  %9262 = vmatprep.subr.bf16.mxu1 %v16323_v24  ;;  %v16544_v24 = vcombine.low %v6630_v2, %v6634_v39  ;;  %v16537_v54 = vcombine.high %v6622_v63, %v6626_v62  ;;  %v16536_v5 = vcombine.low %v6622_v63, %v6626_v62  ;;  %v16290_v39 = vcombine.low %v6375_v44, %v6379_v12 }
 0x475   :  { %9183 = vmatpush1.bf16.msra.mxu0 %v16568_v34  ;;  %v16299_v34 = vcombine.high %v6383_v18, %v6387_v20 }
 0x476   :  { %v8931_v22 = vpop.f32.mrf.mxu1  ;;  %9184 = vmatprep.subr.bf16.mxu0 %v16561_v10  ;;  %v6614_v10 = vld [vmem:[#allocation6 + $0x20d0] sm:$0xff] }
 0x477   :  { %v16298_v22 = vcombine.low %v6383_v18, %v6387_v20  ;;  %v16528_v2 = vcombine.low %v6614_v10, %v6618_v48 }
 0x478   :  { %v8932_v43 = vpop.f32.mrf.mxu1 }
 0x479   :  { %9185 = vmatpush1.bf16.msra.mxu0 %v16560_v25  ;;  %v16291_v25 = vcombine.high %v6375_v44, %v6379_v12  ;;  %v6367_v43 = vld [vmem:[#allocation6 + $0x1918] sm:$0xff] }
 0x47a   :  { %16654 = vmatmul.mubr.msk.bf16.vlgmr.msra.gmra.mxu1 %vm2510_vm0, %v18623_v19  ;;  %9186 = vmatprep.subr.bf16.mxu0 %v16553_v6  ;;  %v6610_v6 = vld [vmem:[#allocation6 + $0x20b0] sm:$0xff] }
 0x47b   :  { %9263 = vmatpush1.bf16.msra.mxu1 %v16322_v21  ;;  %9294 = vmatprep.mubr.bf16.mxu1 %v18520_v57  ;;  %v16529_v57 = vcombine.high %v6614_v10, %v6618_v48  ;;  %v6606_v21 = vld [vmem:[#allocation6 + $0x2090] sm:$0xff] }
 0x47c   :  { %9264 = vmatprep.subr.bf16.mxu1 %v16315_v56  ;;  %v6371_v56 = vld [vmem:[#allocation6 + $0x1938] sm:$0xff]  ;;  %v16521_v55 = vcombine.high %v6606_v21, %v6610_v6  ;;  %v16520_v63 = vcombine.low %v6606_v21, %v6610_v6 }
 0x47d   :  { %9187 = vmatpush1.bf16.msra.mxu0 %v16552_v15  ;;  %v16283_v27 = vcombine.high %v6367_v43, %v6371_v56  ;;  %v6726_v15 = vld [vmem:[#allocation6 + $0x2450] sm:$0xff]  ;;  %v16282_v62 = vcombine.low %v6367_v43, %v6371_v56 }
 0x47e   :  { %9188 = vmatprep.subr.bf16.mxu0 %v16545_v47  ;;  %v6359_v47 = vld [vmem:[#allocation6 + $0x18d8] sm:$0xff] }
 0x47f   :  { %9265 = vmatpush1.bf16.msra.mxu1 %v16314_v3  ;;  %v6730_v3 = vld [vmem:[#allocation6 + $0x2470] sm:$0xff] }
 0x480   :  { %9266 = vmatprep.subr.bf16.mxu1 %v16307_v32  ;;  %v6363_v32 = vld [vmem:[#allocation6 + $0x18f8] sm:$0xff]  ;;  %v16641_v18 = vcombine.high %v6726_v15, %v6730_v3  ;;  %v16640_v10 = vcombine.low %v6726_v15, %v6730_v3 }
 0x481   :  { %9189 = vmatpush1.bf16.msra.mxu0 %v16544_v24  ;;  %v16275_v20 = vcombine.high %v6359_v47, %v6363_v32  ;;  %v6718_v24 = vld [vmem:[#allocation6 + $0x2410] sm:$0xff]  ;;  %v16274_v48 = vcombine.low %v6359_v47, %v6363_v32 }
 0x482   :  { %9190 = vmatprep.subr.bf16.mxu0 %v16537_v54  ;;  %v6351_v54 = vld [vmem:[#allocation6 + $0x1898] sm:$0xff] }
 0x483   :  { %9267 = vmatpush1.bf16.msra.mxu1 %v16306_v61  ;;  %v6722_v61 = vld [vmem:[#allocation6 + $0x2430] sm:$0xff] }
 0x484   :  { %9268 = vmatprep.subr.bf16.mxu1 %v16299_v34  ;;  %v6355_v34 = vld [vmem:[#allocation6 + $0x18b8] sm:$0xff]  ;;  %v16633_v44 = vcombine.high %v6718_v24, %v6722_v61  ;;  %v16632_v21 = vcombine.low %v6718_v24, %v6722_v61 }
 0x485   :  { %9191 = vmatpush1.bf16.msra.mxu0 %v16536_v5  ;;  %v16267_v12 = vcombine.high %v6351_v54, %v6355_v34  ;;  %v6710_v5 = vld [vmem:[#allocation6 + $0x23d0] sm:$0xff]  ;;  %v16266_v6 = vcombine.low %v6351_v54, %v6355_v34 }
 0x486   :  { %9192 = vmatprep.subr.bf16.mxu0 %v16529_v57  ;;  %v6471_v57 = vld [vmem:[#allocation6 + $0x1c58] sm:$0xff] }
 0x487   :  { %9269 = vmatpush1.bf16.msra.mxu1 %v16298_v22  ;;  %v6714_v22 = vld [vmem:[#allocation6 + $0x23f0] sm:$0xff] }
 0x488   :  { %9270 = vmatprep.subr.bf16.mxu1 %v16291_v25  ;;  %v6475_v25 = vld [vmem:[#allocation6 + $0x1c78] sm:$0xff]  ;;  %v16625_v43 = vcombine.high %v6710_v5, %v6714_v22  ;;  %v16624_v15 = vcombine.low %v6710_v5, %v6714_v22 }
 0x489   :  { %9193 = vmatpush1.bf16.msra.mxu0 %v16528_v2  ;;  %v16387_v56 = vcombine.high %v6471_v57, %v6475_v25  ;;  %v6702_v2 = vld [vmem:[#allocation6 + $0x2390] sm:$0xff]  ;;  %v16386_v3 = vcombine.low %v6471_v57, %v6475_v25 }
 0x48a   :  { %9194 = vmatprep.subr.bf16.mxu0 %v16521_v55  ;;  %v6463_v55 = vld [vmem:[#allocation6 + $0x1c18] sm:$0xff] }
 0x48b   :  { %9271 = vmatpush1.bf16.msra.mxu1 %v16290_v39  ;;  %v6706_v39 = vld [vmem:[#allocation6 + $0x23b0] sm:$0xff] }
 0x48c   :  { %9272 = vmatprep.subr.bf16.mxu1 %v16283_v27  ;;  %v6467_v27 = vld [vmem:[#allocation6 + $0x1c38] sm:$0xff]  ;;  %v16617_v47 = vcombine.high %v6702_v2, %v6706_v39  ;;  %v16616_v24 = vcombine.low %v6702_v2, %v6706_v39 }
 0x48d   :  { %9195 = vmatpush1.bf16.msra.mxu0 %v16520_v63  ;;  %v16379_v32 = vcombine.high %v6463_v55, %v6467_v27  ;;  %v6694_v63 = vld [vmem:[#allocation6 + $0x2350] sm:$0xff]  ;;  %v16378_v61 = vcombine.low %v6463_v55, %v6467_v27 }
 0x48e   :  { %9196 = vmatprep.subr.bf16.mxu0 %v16641_v18  ;;  %v6455_v18 = vld [vmem:[#allocation6 + $0x1bd8] sm:$0xff] }
 0x48f   :  { %9273 = vmatpush1.bf16.msra.mxu1 %v16282_v62  ;;  %v6698_v62 = vld [vmem:[#allocation6 + $0x2370] sm:$0xff] }
 0x490   :  { %9274 = vmatprep.subr.bf16.mxu1 %v16275_v20  ;;  %v6459_v20 = vld [vmem:[#allocation6 + $0x1bf8] sm:$0xff]  ;;  %v16609_v54 = vcombine.high %v6694_v63, %v6698_v62  ;;  %v16608_v5 = vcombine.low %v6694_v63, %v6698_v62 }
 0x491   :  { %9197 = vmatpush2.bf16.msra.mxu0 %v16640_v10  ;;  %v16371_v34 = vcombine.high %v6455_v18, %v6459_v20  ;;  %v6686_v10 = vld [vmem:[#allocation6 + $0x2310] sm:$0xff]  ;;  %v16370_v22 = vcombine.low %v6455_v18, %v6459_v20 }
 0x492   :  { %9198 = vmatprep.subr.bf16.mxu0 %v16633_v44  ;;  %v6447_v44 = vld [vmem:[#allocation6 + $0x1b98] sm:$0xff] }
 0x493   :  { %9275 = vmatpush1.bf16.msra.mxu1 %v16274_v48  ;;  %v6690_v48 = vld [vmem:[#allocation6 + $0x2330] sm:$0xff] }
 0x494   :  { %9276 = vmatprep.subr.bf16.mxu1 %v16267_v12  ;;  %v6451_v12 = vld [vmem:[#allocation6 + $0x1bb8] sm:$0xff]  ;;  %v16601_v57 = vcombine.high %v6686_v10, %v6690_v48  ;;  %v16600_v2 = vcombine.low %v6686_v10, %v6690_v48 }
 0x495   :  { %9199 = vmatpush2.bf16.msra.mxu0 %v16632_v21  ;;  %v16363_v25 = vcombine.high %v6447_v44, %v6451_v12  ;;  %v6678_v21 = vld [vmem:[#allocation6 + $0x22d0] sm:$0xff]  ;;  %v16362_v39 = vcombine.low %v6447_v44, %v6451_v12  ;;  %v6427_v10 = vld [vmem:[#allocation6 + $0x1af8] sm:$0xff] }
 0x496   :  { %9200 = vmatprep.subr.bf16.mxu0 %v16625_v43  ;;  %v6439_v43 = vld [vmem:[#allocation6 + $0x1b58] sm:$0xff] }
 0x497   :  { %9277 = vmatpush1.bf16.msra.mxu1 %v16266_v6  ;;  %v6682_v6 = vld [vmem:[#allocation6 + $0x22f0] sm:$0xff] }
 0x498   :  { %9278 = vmatprep.subr.bf16.mxu1 %v16387_v56  ;;  %v6443_v56 = vld [vmem:[#allocation6 + $0x1b78] sm:$0xff]  ;;  %v16593_v55 = vcombine.high %v6678_v21, %v6682_v6  ;;  %v16592_v63 = vcombine.low %v6678_v21, %v6682_v6 }
 0x499   :  { %9201 = vmatpush2.bf16.msra.mxu0 %v16624_v15  ;;  %v16355_v27 = vcombine.high %v6439_v43, %v6443_v56  ;;  %v6670_v15 = vld [vmem:[#allocation6 + $0x2290] sm:$0xff]  ;;  %v16354_v62 = vcombine.low %v6439_v43, %v6443_v56  ;;  %v6527_v6 = vld [vmem:[#allocation6 + $0x1e18] sm:$0xff] }
 0x49a   :  { %9202 = vmatprep.subr.bf16.mxu0 %v16617_v47  ;;  %v6431_v47 = vld [vmem:[#allocation6 + $0x1b18] sm:$0xff] }
 0x49b   :  { %9279 = vmatpush2.bf16.msra.mxu1 %v16386_v3  ;;  %v6674_v3 = vld [vmem:[#allocation6 + $0x22b0] sm:$0xff]  ;;  %v6531_v43 = vld [vmem:[#allocation6 + $0x1e38] sm:$0xff] }
 0x49c   :  { %9280 = vmatprep.subr.bf16.mxu1 %v16379_v32  ;;  %v6435_v32 = vld [vmem:[#allocation6 + $0x1b38] sm:$0xff]  ;;  %v16585_v18 = vcombine.high %v6670_v15, %v6674_v3  ;;  %v16584_v44 = vcombine.low %v6670_v15, %v6674_v3 }
 0x49d   :  { %9203 = vmatpush2.bf16.msra.mxu0 %v16616_v24  ;;  %v16347_v20 = vcombine.high %v6431_v47, %v6435_v32  ;;  %v6535_v24 = vld [vmem:[#allocation6 + $0x1e58] sm:$0xff] }
 0x49e   :  { %9204 = vmatprep.subr.bf16.mxu0 %v16609_v54 }
 0x49f   :  { %9281 = vmatpush2.bf16.msra.mxu1 %v16378_v61  ;;  %v6539_v61 = vld [vmem:[#allocation6 + $0x1e78] sm:$0xff] }
 0x4a0   :  { %9282 = vmatprep.subr.bf16.mxu1 %v16371_v34  ;;  %v6423_v34 = vld [vmem:[#allocation6 + $0x1ad8] sm:$0xff] }
 0x4a1   :  { %9205 = vmatpush2.bf16.msra.mxu0 %v16608_v5  ;;  %v16346_v5 = vcombine.low %v6431_v47, %v6435_v32  ;;  %v16339_v21 = vcombine.high %v6423_v34, %v6427_v10  ;;  %v16338_v15 = vcombine.low %v6423_v34, %v6427_v10  ;;  %v6523_v47 = vld [vmem:[#allocation6 + $0x1df8] sm:$0xff] }
 0x4a2   :  { %9206 = vmatprep.subr.bf16.mxu0 %v16601_v57  ;;  %v6663_v32 = vld [vmem:[#allocation6 + $0x2258] sm:$0xff] }
 0x4a3   :  { %9283 = vmatpush2.bf16.msra.mxu1 %v16370_v22  ;;  %v16451_v22 = vcombine.high %v6535_v24, %v6539_v61  ;;  %v6515_v34 = vld [vmem:[#allocation6 + $0x1db8] sm:$0xff] }
 0x4a4   :  { %9284 = vmatprep.subr.bf16.mxu1 %v16363_v25  ;;  %v6655_v10 = vld [vmem:[#allocation6 + $0x2218] sm:$0xff] }
 0x4a5   :  { %9207 = vmatpush2.bf16.msra.mxu0 %v16600_v2  ;;  %v6415_v2 = vld [vmem:[#allocation6 + $0x1a98] sm:$0xff] }
 0x4a6   :  { %9208 = vmatprep.subr.bf16.mxu0 %v16593_v55  ;;  %v16450_v55 = vcombine.low %v6535_v24, %v6539_v61 }
 0x4a7   :  { %9285 = vmatpush2.bf16.msra.mxu1 %v16362_v39  ;;  %v6419_v39 = vld [vmem:[#allocation6 + $0x1ab8] sm:$0xff] }
 0x4a8   :  { %9286 = vmatprep.subr.bf16.mxu1 %v16355_v27  ;;  %v8886_v54 = vpop.f32.mrf.mxu0  ;;  %v16331_v3 = vcombine.high %v6415_v2, %v6419_v39 }
 0x4a9   :  { %v8887_v48 = vadd.f32 %v8886_v54, %v18611_v46  ;;  %9209 = vmatpush2.bf16.msra.mxu0 %v16592_v63  ;;  %v6667_v63 = vld [vmem:[#allocation6 + $0x2278] sm:$0xff] }
 0x4aa   :  { %v8888_v12 = vpop.f32.mrf.mxu0  ;;  %9210 = vmatprep.subr.bf16.mxu0 %v16585_v18  ;;  %v16330_v18 = vcombine.low %v6415_v2, %v6419_v39  ;;  %v16579_v61 = vcombine.high %v6663_v32, %v6667_v63  ;;  %v6511_v54 = vld [vmem:[#allocation6 + $0x1d98] sm:$0xff] }
 0x4ab   :  { %9287 = vmatpush2.bf16.msra.mxu1 %v16354_v62  ;;  %v18630_v57 = vadd.f32 %v18617_v28, %v8887_v48  ;;  %v8889_v25 = vadd.f32 %v8888_v12, %v18613_v33  ;;  %v16443_v28 = vcombine.high %v6527_v6, %v6531_v43  ;;  %v6519_v33 = vld [vmem:[#allocation6 + $0x1dd8] sm:$0xff]  ;;  %v16426_v2 = vcombine.low %v6511_v54, %v6515_v34 }
 0x4ac   :  { %9288 = vmatprep.subr.bf16.mxu1 %v16347_v20  ;;  %v8890_v56 = vpop.f32.mrf.mxu0  ;;  %v16435_v20 = vcombine.high %v6519_v33, %v6523_v47  ;;  %v6659_v48 = vld [vmem:[#allocation6 + $0x2238] sm:$0xff]  ;;  %v16434_v12 = vcombine.low %v6519_v33, %v6523_v47 }
 0x4ad   :  { %v18634_v46 = vadd.f32 %v18619_v41, %v8889_v25  ;;  %9211 = vmatpush2.bf16.msra.mxu0 %v16584_v44  ;;  %v16442_v41 = vcombine.low %v6527_v6, %v6531_v43  ;;  %v16571_v25 = vcombine.high %v6655_v10, %v6659_v48  ;;  %v6507_v6 = vld [vmem:[#allocation6 + $0x1d78] sm:$0xff]  ;;  %v16570_v39 = vcombine.low %v6655_v10, %v6659_v48 }
 0x4ae   :  { %v8891_v27 = vpop.f32.mrf.mxu0  ;;  %9303 = vmatprep.subr.bf16.mxu0 %v16451_v22  ;;  %v16427_v22 = vcombine.high %v6511_v54, %v6515_v34  ;;  %v6647_v43 = vld [vmem:[#allocation6 + $0x21d8] sm:$0xff] }
 0x4af   :  { %9289 = vmatpush2.bf16.msra.mxu1 %v16346_v5  ;;  %v16578_v5 = vcombine.low %v6663_v32, %v6667_v63  ;;  %v6651_v56 = vld [vmem:[#allocation6 + $0x21f8] sm:$0xff] }
 0x4b0   :  { %9290 = vmatprep.subr.bf16.mxu1 %v16339_v21  ;;  %9213 = vmatmul.mubr.bf16.vlgmr.msra.gmra.mxu0 %v18575_v11  ;;  %v6503_v21 = vld [vmem:[#allocation6 + $0x1d58] sm:$0xff]  ;;  %v16563_v27 = vcombine.high %v6647_v43, %v6651_v56  ;;  %v16562_v32 = vcombine.low %v6647_v43, %v6651_v56 }
 0x4b1   :  { %9304 = vmatpush1.bf16.msra.mxu0 %v16450_v55  ;;  %9335 = vmatprep.mubr.bf16.mxu0 %v18526_v1  ;;  %v16419_v55 = vcombine.high %v6503_v21, %v6507_v6  ;;  %v6643_v33 = vld [vmem:[#allocation6 + $0x21b8] sm:$0xff]  ;;  %v16418_v47 = vcombine.low %v6503_v21, %v6507_v6 }
 0x4b2   :  { %v18637_v62 = vpop.f32.mrf.mxu1  ;;  %9305 = vmatprep.subr.bf16.mxu0 %v16443_v28  ;;  %v6499_v28 = vld [vmem:[#allocation6 + $0x1d38] sm:$0xff] }
 0x4b3   :  { %9291 = vmatpush2.bf16.msra.mxu1 %v16338_v15  ;;  %v6495_v15 = vld [vmem:[#allocation6 + $0x1d18] sm:$0xff] }
 0x4b4   :  { %v18640_v24 = vpop.f32.mrf.mxu1  ;;  %9292 = vmatprep.subr.bf16.mxu1 %v16331_v3  ;;  %v6639_v3 = vld [vmem:[#allocation6 + $0x2198] sm:$0xff]  ;;  %v16410_v54 = vcombine.low %v6495_v15, %v6499_v28 }
 0x4b5   :  { %9306 = vmatpush1.bf16.msra.mxu0 %v16442_v41  ;;  %v16555_v63 = vcombine.high %v6639_v3, %v6643_v33  ;;  %v6487_v41 = vld [vmem:[#allocation6 + $0x1cd8] sm:$0xff]  ;;  %v16554_v34 = vcombine.low %v6639_v3, %v6643_v33 }
 0x4b6   :  { %v8972_v44 = vpop.f32.mrf.mxu1  ;;  %9307 = vmatprep.subr.bf16.mxu0 %v16435_v20  ;;  %v6631_v20 = vld [vmem:[#allocation6 + $0x2158] sm:$0xff] }
 0x4b7   :  { %9293 = vmatpush2.bf16.msra.mxu1 %v16330_v18  ;;  %v6491_v18 = vld [vmem:[#allocation6 + $0x1cf8] sm:$0xff] }
 0x4b8   :  { %v8973_v1 = vpop.f32.mrf.mxu1  ;;  %9344 = vmatprep.subr.bf16.mxu1 %v16579_v61  ;;  %v6635_v61 = vld [vmem:[#allocation6 + $0x2178] sm:$0xff] }
 0x4b9   :  { %9308 = vmatpush1.bf16.msra.mxu0 %v16434_v12  ;;  %v16547_v10 = vcombine.high %v6631_v20, %v6635_v61  ;;  %v6479_v48 = vld [vmem:[#allocation6 + $0x1c98] sm:$0xff]  ;;  %v16546_v1 = vcombine.low %v6631_v20, %v6635_v61 }
 0x4ba   :  { %9295 = vmatmul.mubr.bf16.vlgmr.msra.gmra.mxu1 %v18541_v14  ;;  %9309 = vmatprep.subr.bf16.mxu0 %v16427_v22  ;;  %v16411_v14 = vcombine.high %v6495_v15, %v6499_v28  ;;  %v6483_v44 = vld [vmem:[#allocation6 + $0x1cb8] sm:$0xff]  ;;  %v16402_v22 = vcombine.low %v6487_v41, %v6491_v18 }
 0x4bb   :  { %9345 = vmatpush1.bf16.msra.mxu1 %v16578_v5  ;;  %9376 = vmatprep.mubr.bf16.mxu1 %v18554_v45  ;;  %v16403_v45 = vcombine.high %v6487_v41, %v6491_v18  ;;  %v6623_v12 = vld [vmem:[#allocation6 + $0x2118] sm:$0xff] }
 0x4bc   :  { %9346 = vmatprep.subr.bf16.mxu1 %v16571_v25  ;;  %v6627_v5 = vld [vmem:[#allocation6 + $0x2138] sm:$0xff]  ;;  %v16395_v25 = vcombine.high %v6479_v48, %v6483_v44 }
 0x4bd   :  { %9310 = vmatpush1.bf16.msra.mxu0 %v16426_v2  ;;  %v16539_v21 = vcombine.high %v6623_v12, %v6627_v5  ;;  %v6599_v6 = vld [vmem:[#allocation6 + $0x2058] sm:$0xff] }
 0x4be   :  { %9311 = vmatprep.subr.bf16.mxu0 %v16419_v55  ;;  %v6603_v43 = vld [vmem:[#allocation6 + $0x2078] sm:$0xff]  ;;  %v16538_v55 = vcombine.low %v6623_v12, %v6627_v5 }
 0x4bf   :  { %9347 = vmatpush1.bf16.msra.mxu1 %v16570_v39  ;;  %v6615_v56 = vld [vmem:[#allocation6 + $0x20d8] sm:$0xff]  ;;  %v16394_v39 = vcombine.low %v6479_v48, %v6483_v44 }
 0x4c0   :  { %9348 = vmatprep.subr.bf16.mxu1 %v16563_v27  ;;  %v6619_v2 = vld [vmem:[#allocation6 + $0x20f8] sm:$0xff]  ;;  %v16515_v27 = vcombine.high %v6599_v6, %v6603_v43 }
 0x4c1   :  { %9312 = vmatpush1.bf16.msra.mxu0 %v16418_v47  ;;  %v16531_v15 = vcombine.high %v6615_v56, %v6619_v2  ;;  %v6591_v28 = vld [vmem:[#allocation6 + $0x2018] sm:$0xff] }
 0x4c2   :  { %9313 = vmatprep.subr.bf16.mxu0 %v16411_v14  ;;  %v6595_v3 = vld [vmem:[#allocation6 + $0x2038] sm:$0xff]  ;;  %v16530_v14 = vcombine.low %v6615_v56, %v6619_v2 }
 0x4c3   :  { %9349 = vmatpush1.bf16.msra.mxu1 %v16562_v32  ;;  %v6607_v33 = vld [vmem:[#allocation6 + $0x2098] sm:$0xff]  ;;  %v16514_v32 = vcombine.low %v6599_v6, %v6603_v43 }
 0x4c4   :  { %9350 = vmatprep.subr.bf16.mxu1 %v16555_v63  ;;  %v6611_v47 = vld [vmem:[#allocation6 + $0x20b8] sm:$0xff]  ;;  %v16507_v63 = vcombine.high %v6591_v28, %v6595_v3 }
 0x4c5   :  { %9314 = vmatpush1.bf16.msra.mxu0 %v16410_v54  ;;  %v16523_v41 = vcombine.high %v6607_v33, %v6611_v47  ;;  %v6583_v18 = vld [vmem:[#allocation6 + $0x1fd8] sm:$0xff] }
 0x4c6   :  { %9315 = vmatprep.subr.bf16.mxu0 %v16403_v45  ;;  %v6587_v20 = vld [vmem:[#allocation6 + $0x1ff8] sm:$0xff]  ;;  %v16522_v45 = vcombine.low %v6607_v33, %v6611_v47 }
 0x4c7   :  { %9351 = vmatpush1.bf16.msra.mxu1 %v16554_v34  ;;  %v6727_v61 = vld [vmem:[#allocation6 + $0x2458] sm:$0xff]  ;;  %v16506_v34 = vcombine.low %v6591_v28, %v6595_v3 }
 0x4c8   :  { %9352 = vmatprep.subr.bf16.mxu1 %v16547_v10  ;;  %v6731_v54 = vld [vmem:[#allocation6 + $0x2478] sm:$0xff]  ;;  %v16499_v10 = vcombine.high %v6583_v18, %v6587_v20 }
 0x4c9   :  { %9316 = vmatpush1.bf16.msra.mxu0 %v16402_v22  ;;  %v16643_v48 = vcombine.high %v6727_v61, %v6731_v54  ;;  %v6575_v44 = vld [vmem:[#allocation6 + $0x1f98] sm:$0xff] }
 0x4ca   :  { %9317 = vmatprep.subr.bf16.mxu0 %v16395_v25  ;;  %v6579_v12 = vld [vmem:[#allocation6 + $0x1fb8] sm:$0xff]  ;;  %v16642_v25 = vcombine.low %v6727_v61, %v6731_v54 }
 0x4cb   :  { %9353 = vmatpush1.bf16.msra.mxu1 %v16546_v1  ;;  %v6719_v5 = vld [vmem:[#allocation6 + $0x2418] sm:$0xff]  ;;  %v16498_v1 = vcombine.low %v6583_v18, %v6587_v20 }
 0x4cc   :  { %9354 = vmatprep.subr.bf16.mxu1 %v16539_v21  ;;  %v6723_v22 = vld [vmem:[#allocation6 + $0x2438] sm:$0xff]  ;;  %v16491_v21 = vcombine.high %v6575_v44, %v6579_v12 }
 0x4cd   :  { %9318 = vmatpush1.bf16.msra.mxu0 %v16394_v39  ;;  %v16635_v6 = vcombine.high %v6719_v5, %v6723_v22  ;;  %v6567_v43 = vld [vmem:[#allocation6 + $0x1f58] sm:$0xff] }
 0x4ce   :  { %9319 = vmatprep.subr.bf16.mxu0 %v16515_v27  ;;  %v6571_v56 = vld [vmem:[#allocation6 + $0x1f78] sm:$0xff]  ;;  %v16634_v27 = vcombine.low %v6719_v5, %v6723_v22 }
 0x4cf   :  { %9355 = vmatpush1.bf16.msra.mxu1 %v16538_v55  ;;  %v6711_v2 = vld [vmem:[#allocation6 + $0x23d8] sm:$0xff]  ;;  %v16490_v55 = vcombine.low %v6575_v44, %v6579_v12  ;;  %v6754_v44 = vrot.slane %v18605_v58, %v18346_v7 }
 0x4d0   :  { %9356 = vmatprep.subr.bf16.mxu1 %v16531_v15  ;;  %v6715_v39 = vld [vmem:[#allocation6 + $0x23f8] sm:$0xff]  ;;  %v16483_v15 = vcombine.high %v6567_v43, %v6571_v56 }
 0x4d1   :  { %9320 = vmatpush2.bf16.msra.mxu0 %v16514_v32  ;;  %v16627_v28 = vcombine.high %v6711_v2, %v6715_v39  ;;  %v6559_v3 = vld [vmem:[#allocation6 + $0x1f18] sm:$0xff] }
 0x4d2   :  { %9321 = vmatprep.subr.bf16.mxu0 %v16507_v63  ;;  %v6563_v33 = vld [vmem:[#allocation6 + $0x1f38] sm:$0xff]  ;;  %v16626_v63 = vcombine.low %v6711_v2, %v6715_v39  ;;  %v8969_v2 = vadd.f32 %v18637_v62, %v6754_v44 }
 0x4d3   :  { %9357 = vmatpush1.bf16.msra.mxu1 %v16530_v14  ;;  %v6703_v47 = vld [vmem:[#allocation6 + $0x2398] sm:$0xff]  ;;  %v16482_v14 = vcombine.low %v6567_v43, %v6571_v56 }
 0x4d4   :  { %9358 = vmatprep.subr.bf16.mxu1 %v16523_v41  ;;  %v6707_v32 = vld [vmem:[#allocation6 + $0x23b8] sm:$0xff]  ;;  %v16475_v41 = vcombine.high %v6559_v3, %v6563_v33 }
 0x4d5   :  { %9322 = vmatpush2.bf16.msra.mxu0 %v16506_v34  ;;  %v16619_v18 = vcombine.high %v6703_v47, %v6707_v32  ;;  %v6551_v20 = vld [vmem:[#allocation6 + $0x1ed8] sm:$0xff] }
 0x4d6   :  { %9323 = vmatprep.subr.bf16.mxu0 %v16499_v10  ;;  %v6555_v61 = vld [vmem:[#allocation6 + $0x1ef8] sm:$0xff]  ;;  %v16618_v10 = vcombine.low %v6703_v47, %v6707_v32 }
 0x4d7   :  { %9359 = vmatpush1.bf16.msra.mxu1 %v16522_v45  ;;  %v6695_v54 = vld [vmem:[#allocation6 + $0x2358] sm:$0xff]  ;;  %v16474_v45 = vcombine.low %v6559_v3, %v6563_v33 }
 0x4d8   :  { %9360 = vmatprep.subr.bf16.mxu1 %v16643_v48  ;;  %v6699_v34 = vld [vmem:[#allocation6 + $0x2378] sm:$0xff]  ;;  %v16467_v48 = vcombine.high %v6551_v20, %v6555_v61 }
 0x4d9   :  { %9324 = vmatpush2.bf16.msra.mxu0 %v16498_v1  ;;  %v16611_v12 = vcombine.high %v6695_v54, %v6699_v34  ;;  %v6543_v5 = vld [vmem:[#allocation6 + $0x1e98] sm:$0xff]  ;;  %v16610_v43 = vcombine.low %v6695_v54, %v6699_v34 }
 0x4da   :  { %9325 = vmatprep.subr.bf16.mxu0 %v16491_v21  ;;  %v6547_v22 = vld [vmem:[#allocation6 + $0x1eb8] sm:$0xff]  ;;  %v6758_v21 = vrot.slane %v18605_v58, %v18349_v13 }
 0x4db   :  { %9361 = vmatpush2.bf16.msra.mxu1 %v16642_v25  ;;  %v6687_v1 = vld [vmem:[#allocation6 + $0x2318] sm:$0xff]  ;;  %v16459_v56 = vcombine.high %v6543_v5, %v6547_v22  ;;  %v16458_v58 = vcombine.low %v6543_v5, %v6547_v22  ;;  %v9660_v5 = vld [vmem:[#allocation6 + $0x2a80] sm:$0xff] }
 0x4dc   :  { %9362 = vmatprep.subr.bf16.mxu1 %v16635_v6  ;;  %v6691_v25 = vld [vmem:[#allocation6 + $0x2338] sm:$0xff]  ;;  %v16466_v6 = vcombine.low %v6551_v20, %v6555_v61  ;;  %v8971_v33 = vadd.f32 %v18640_v24, %v6758_v21  ;;  %v9536_v20 = vld [vmem:[#allocation6 + $0x26a0] sm:$0xff] }
 0x4dd   :  { %9326 = vmatpush2.bf16.msra.mxu0 %v16490_v55  ;;  %v16603_v39 = vcombine.high %v6687_v1, %v6691_v25  ;;  %v6735_v55 = vld [vmem:[#allocation6 + $0x2498] sm:$0xff]  ;;  %v9664_v22 = vld [vmem:[#allocation6 + $0x2aa0] sm:$0xff] }
 0x4de   :  { %9327 = vmatprep.subr.bf16.mxu0 %v16483_v15  ;;  %v6683_v3 = vld [vmem:[#allocation6 + $0x22f8] sm:$0xff] }
 0x4df   :  { %9363 = vmatpush2.bf16.msra.mxu1 %v16634_v27  ;;  %v6739_v27 = vld [vmem:[#allocation6 + $0x24b8] sm:$0xff] }
 0x4e0   :  { %9364 = vmatprep.subr.bf16.mxu1 %v16627_v28  ;;  %v6679_v28 = vld [vmem:[#allocation6 + $0x22d8] sm:$0xff] }
 0x4e1   :  { %9328 = vmatpush2.bf16.msra.mxu0 %v16482_v14  ;;  %v16602_v14 = vcombine.low %v6687_v1, %v6691_v25  ;;  %v16595_v62 = vcombine.high %v6679_v28, %v6683_v3  ;;  %v6671_v54 = vld [vmem:[#allocation6 + $0x2298] sm:$0xff] }
 0x4e2   :  { %9329 = vmatprep.subr.bf16.mxu0 %v16475_v41  ;;  %v6675_v34 = vld [vmem:[#allocation6 + $0x22b8] sm:$0xff] }
 0x4e3   :  { %9365 = vmatpush2.bf16.msra.mxu1 %v16626_v63  ;;  %v16651_v63 = vcombine.high %v6735_v55, %v6739_v27  ;;  %v16587_v44 = vcombine.high %v6671_v54, %v6675_v34 }
 0x4e4   :  { %9366 = vmatprep.subr.bf16.mxu1 %v16619_v18  ;;  %v9532_v18 = vld [vmem:[#allocation6 + $0x2680] sm:$0xff] }
 0x4e5   :  { %9330 = vmatpush2.bf16.msra.mxu0 %v16474_v45  ;;  %v16650_v45 = vcombine.low %v6735_v55, %v6739_v27 }
 0x4e6   :  { %9331 = vmatprep.subr.bf16.mxu0 %v16467_v48  ;;  %v16724_v48 = vcombine.high %v9532_v18, %v9536_v20 }
 0x4e7   :  { %9367 = vmatpush2.bf16.msra.mxu1 %v16618_v10  ;;  %v16594_v10 = vcombine.low %v6679_v28, %v6683_v3  ;;  %v9656_v28 = vld [vmem:[#allocation6 + $0x2a60] sm:$0xff] }
 0x4e8   :  { %9368 = vmatprep.subr.bf16.mxu1 %v16611_v12  ;;  %v9009_v15 = vpop.f32.mrf.mxu0  ;;  %v18654_v3 = vld [vmem:[#allocation3 + $0x54] sm:$0xff] }
 0x4e9   :  { %v9010_v47 = vadd.f32 %v9009_v15, %v8969_v2  ;;  %9332 = vmatpush2.bf16.msra.mxu0 %v16466_v6  ;;  %v16586_v6 = vcombine.low %v6671_v54, %v6675_v34  ;;  %v9524_v2 = vld [vmem:[#allocation6 + $0x2640] sm:$0xff] }
 0x4ea   :  { %v9011_v32 = vpop.f32.mrf.mxu0  ;;  %9333 = vmatprep.subr.bf16.mxu0 %v16459_v56  ;;  %v16852_v56 = vcombine.high %v9660_v5, %v9664_v22  ;;  %v9652_v15 = vld [vmem:[#allocation6 + $0x2a40] sm:$0xff] }
 0x4eb   :  { %9369 = vmatpush2.bf16.msra.mxu1 %v16610_v43  ;;  %v9012_v41 = vadd.f32 %v9011_v32, %v8971_v33  ;;  %v16844_v54 = vcombine.high %v9652_v15, %v9656_v28  ;;  %v9516_v34 = vld [vmem:[#allocation6 + $0x2600] sm:$0xff] }
 0x4ec   :  { %9370 = vmatprep.subr.bf16.mxu1 %v16603_v39  ;;  %v9013_v61 = vpop.f32.mrf.mxu0  ;;  %v9528_v39 = vld [vmem:[#allocation6 + $0x2660] sm:$0xff] }
 0x4ed   :  { %9334 = vmatpush2.bf16.msra.mxu0 %v16458_v58  ;;  %v16723_v58 = vcombine.low %v9532_v18, %v9536_v20  ;;  %v9644_v18 = vld [vmem:[#allocation6 + $0x2a00] sm:$0xff] }
 0x4ee   :  { %v9014_v24 = vpop.f32.mrf.mxu0  ;;  %9399 = vmatprep.subr.bf16.mxu0 %v16651_v63  ;;  %v16851_v63 = vcombine.low %v9660_v5, %v9664_v22  ;;  %v9648_v20 = vld [vmem:[#allocation6 + $0x2a20] sm:$0xff] }
 0x4ef   :  { %9371 = vmatpush2.bf16.msra.mxu1 %v16602_v14  ;;  %v9508_v5 = vld [vmem:[#allocation6 + $0x25c0] sm:$0xff] }
 0x4f0   :  { %9372 = vmatprep.subr.bf16.mxu1 %v16595_v62  ;;  %9336 = vmatmul.mubr.bf16.vlgmr.msra.gmra.mxu0 %v18547_v29  ;;  %v9091_v12 = vpop.f32.mrf.mxu0  ;;  %v16716_v62 = vcombine.high %v9524_v2, %v9528_v39  ;;  %v9512_v22 = vld [vmem:[#allocation6 + $0x25e0] sm:$0xff] }
 0x4f1   :  { %9400 = vmatpush1.bf16.msra.mxu0 %v16650_v45  ;;  %9417 = vmatprep.mubr.bf16.mxu0 %v18884_v31  ;;  %v18662_v45 = vcombine.high %v18654_v3, %v18654_v3 }
 0x4f2   :  { %v9050_v1 = vpop.f32.mrf.mxu1  ;;  %v9093_v21 = vpop.f32.mrf.mxu0  ;;  %11898 = vmatprep.subr.bf16.mxu0 %v16724_v48  ;;  %v16843_v48 = vcombine.low %v9652_v15, %v9656_v28 }
 0x4f3   :  { %v9051_v25 = vadd.f32 %v9050_v1, %v9010_v47  ;;  %9373 = vmatpush2.bf16.msra.mxu1 %v16594_v10  ;;  %v18656_v47 = vld [vmem:[#allocation3 + $0x5c] sm:$0xff]  ;;  %v16715_v10 = vcombine.low %v9524_v2, %v9528_v39  ;;  %v9640_v1 = vld [vmem:[#allocation6 + $0x29e0] sm:$0xff] }
 0x4f4   :  { %v9052_v43 = vpop.f32.mrf.mxu1  ;;  %9374 = vmatprep.subr.bf16.mxu1 %v16587_v44  ;;  %v9095_v27 = vpop.f32.mrf.mxu0  ;;  %v18668_v24 = vcombine.high %v18656_v47, %v18656_v47  ;;  %v9628_v2 = vld [vmem:[#allocation6 + $0x2980] sm:$0xff] }
 0x4f5   :  { %v18652_v55 = vadd.f32 %v9091_v12, %v9051_v25  ;;  %v9053_v29 = vadd.f32 %v9052_v43, %v9012_v41  ;;  %v9520_v41 = vld [vmem:[#allocation6 + $0x2620] sm:$0xff]  ;;  %v16836_v12 = vcombine.high %v9644_v18, %v9648_v20 }
 0x4f6   :  { %v9054_v33 = vpop.f32.mrf.mxu1  ;;  %v9096_v14 = vpop.f32.mrf.mxu0  ;;  %v16708_v44 = vcombine.high %v9516_v34, %v9520_v41  ;;  %v16707_v25 = vcombine.low %v9516_v34, %v9520_v41  ;;  %v9500_v43 = vld [vmem:[#allocation6 + $0x2580] sm:$0xff] }
 0x4f7   :  { %18890 = vst [vmem:[#allocation19_spill] sm:$0xff] %v18652_v55  ;;  %v18658_v32 = vadd.f32 %v9093_v21, %v9053_v29  ;;  %9375 = vmatpush2.bf16.msra.mxu1 %v16586_v6  ;;  %v16700_v21 = vcombine.high %v9508_v5, %v9512_v22  ;;  %v9632_v39 = vld [vmem:[#allocation6 + $0x29a0] sm:$0xff]  ;;  %v16699_v29 = vcombine.low %v9508_v5, %v9512_v22 }
 0x4f8   :  { %v9055_v61 = vpop.f32.mrf.mxu1  ;;  %11939 = vmatprep.subr.bf16.mxu1 %v16852_v56  ;;  %16655 = vmatmul.mubr.msk.bf16.vlgmr.msra.gmra.mxu0 %vm2510_vm0, %v18623_v19  ;;  %v9636_v19 = vld [vmem:[#allocation6 + $0x29c0] sm:$0xff]  ;;  %v16820_v28 = vcombine.high %v9628_v2, %v9632_v39 }
 0x4f9   :  { %11899 = vmatpush1.bf16.msra.mxu0 %v16723_v58  ;;  %11930 = vmatprep.mubr.bf16.mxu0 %v18662_v45  ;;  %v16828_v6 = vcombine.high %v9636_v19, %v9640_v1  ;;  %v9504_v56 = vld [vmem:[#allocation6 + $0x25a0] sm:$0xff]  ;;  %v16827_v27 = vcombine.low %v9636_v19, %v9640_v1  ;;  %v16819_v61 = vcombine.low %v9628_v2, %v9632_v39 }
 0x4fa   :  { %9377 = vmatmul.mubr.bf16.vlgmr.msra.gmra.mxu1 %v18575_v11  ;;  %11900 = vmatprep.subr.bf16.mxu0 %v16716_v62  ;;  %v16835_v11 = vcombine.low %v9644_v18, %v9648_v20  ;;  %v16692_v15 = vcombine.high %v9500_v43, %v9504_v56  ;;  %v9492_v33 = vld [vmem:[#allocation6 + $0x2540] sm:$0xff]  ;;  %v16691_v62 = vcombine.low %v9500_v43, %v9504_v56 }
 0x4fb   :  { %11940 = vmatpush1.bf16.msra.mxu1 %v16851_v63  ;;  %11971 = vmatprep.mubr.bf16.mxu1 %v18668_v24  ;;  %v9496_v58 = vld [vmem:[#allocation6 + $0x2560] sm:$0xff] }
 0x4fc   :  { %11941 = vmatprep.subr.bf16.mxu1 %v16844_v54  ;;  %v9620_v14 = vld [vmem:[#allocation6 + $0x2940] sm:$0xff]  ;;  %v16684_v54 = vcombine.high %v9492_v33, %v9496_v58 }
 0x4fd   :  { %11901 = vmatpush1.bf16.msra.mxu0 %v16715_v10  ;;  %v9624_v63 = vld [vmem:[#allocation6 + $0x2960] sm:$0xff] }
 0x4fe   :  { %11902 = vmatprep.subr.bf16.mxu0 %v16708_v44  ;;  %v16812_v34 = vcombine.high %v9620_v14, %v9624_v63  ;;  %v9484_v41 = vld [vmem:[#allocation6 + $0x2500] sm:$0xff]  ;;  %v16811_v44 = vcombine.low %v9620_v14, %v9624_v63 }
 0x4ff   :  { %11942 = vmatpush1.bf16.msra.mxu1 %v16843_v48  ;;  %v9488_v18 = vld [vmem:[#allocation6 + $0x2520] sm:$0xff]  ;;  %v16683_v48 = vcombine.low %v9492_v33, %v9496_v58 }
 0x500   :  { %11943 = vmatprep.subr.bf16.mxu1 %v16836_v12  ;;  %v9612_v20 = vld [vmem:[#allocation6 + $0x2900] sm:$0xff]  ;;  %v16676_v12 = vcombine.high %v9484_v41, %v9488_v18 }
 0x501   :  { %11903 = vmatpush1.bf16.msra.mxu0 %v16707_v25  ;;  %v9616_v10 = vld [vmem:[#allocation6 + $0x2920] sm:$0xff] }
 0x502   :  { %11904 = vmatprep.subr.bf16.mxu0 %v16700_v21  ;;  %v16804_v5 = vcombine.high %v9612_v20, %v9616_v10  ;;  %v9476_v22 = vld [vmem:[#allocation6 + $0x24c0] sm:$0xff]  ;;  %v16803_v21 = vcombine.low %v9612_v20, %v9616_v10 }
 0x503   :  { %11944 = vmatpush1.bf16.msra.mxu1 %v16835_v11  ;;  %v9480_v19 = vld [vmem:[#allocation6 + $0x24e0] sm:$0xff]  ;;  %v16675_v11 = vcombine.low %v9484_v41, %v9488_v18 }
 0x504   :  { %11945 = vmatprep.subr.bf16.mxu1 %v16828_v6  ;;  %v9604_v1 = vld [vmem:[#allocation6 + $0x28c0] sm:$0xff]  ;;  %v16668_v6 = vcombine.high %v9476_v22, %v9480_v19 }
 0x505   :  { %11905 = vmatpush1.bf16.msra.mxu0 %v16699_v29  ;;  %v9608_v25 = vld [vmem:[#allocation6 + $0x28e0] sm:$0xff] }
 0x506   :  { %11906 = vmatprep.subr.bf16.mxu0 %v16692_v15  ;;  %v16796_v43 = vcombine.high %v9604_v1, %v9608_v25  ;;  %v9596_v56 = vld [vmem:[#allocation6 + $0x2880] sm:$0xff]  ;;  %v16795_v15 = vcombine.low %v9604_v1, %v9608_v25 }
 0x507   :  { %11946 = vmatpush1.bf16.msra.mxu1 %v16827_v27  ;;  %v9600_v2 = vld [vmem:[#allocation6 + $0x28a0] sm:$0xff]  ;;  %v16667_v27 = vcombine.low %v9476_v22, %v9480_v19 }
 0x508   :  { %11947 = vmatprep.subr.bf16.mxu1 %v16820_v28  ;;  %v9724_v39 = vld [vmem:[#allocation6 + $0x2c80] sm:$0xff]  ;;  %v16788_v28 = vcombine.high %v9596_v56, %v9600_v2 }
 0x509   :  { %11907 = vmatpush1.bf16.msra.mxu0 %v16691_v62  ;;  %v9728_v29 = vld [vmem:[#allocation6 + $0x2ca0] sm:$0xff] }
 0x50a   :  { %11908 = vmatprep.subr.bf16.mxu0 %v16684_v54  ;;  %v16916_v33 = vcombine.high %v9724_v39, %v9728_v29  ;;  %v9588_v58 = vld [vmem:[#allocation6 + $0x2840] sm:$0xff]  ;;  %v16915_v54 = vcombine.low %v9724_v39, %v9728_v29 }
 0x50b   :  { %11948 = vmatpush1.bf16.msra.mxu1 %v16819_v61  ;;  %v9592_v14 = vld [vmem:[#allocation6 + $0x2860] sm:$0xff]  ;;  %v16787_v61 = vcombine.low %v9596_v56, %v9600_v2 }
 0x50c   :  { %11949 = vmatprep.subr.bf16.mxu1 %v16812_v34  ;;  %v9716_v63 = vld [vmem:[#allocation6 + $0x2c40] sm:$0xff]  ;;  %v16780_v34 = vcombine.high %v9588_v58, %v9592_v14 }
 0x50d   :  { %11909 = vmatpush1.bf16.msra.mxu0 %v16683_v48  ;;  %v9720_v62 = vld [vmem:[#allocation6 + $0x2c60] sm:$0xff] }
 0x50e   :  { %11910 = vmatprep.subr.bf16.mxu0 %v16676_v12  ;;  %v16908_v41 = vcombine.high %v9716_v63, %v9720_v62  ;;  %v9580_v18 = vld [vmem:[#allocation6 + $0x2800] sm:$0xff]  ;;  %v16907_v12 = vcombine.low %v9716_v63, %v9720_v62 }
 0x50f   :  { %11950 = vmatpush1.bf16.msra.mxu1 %v16811_v44  ;;  %v9584_v20 = vld [vmem:[#allocation6 + $0x2820] sm:$0xff]  ;;  %v16779_v44 = vcombine.low %v9588_v58, %v9592_v14 }
 0x510   :  { %11951 = vmatprep.subr.bf16.mxu1 %v16804_v5  ;;  %v9708_v10 = vld [vmem:[#allocation6 + $0x2c00] sm:$0xff]  ;;  %v16772_v5 = vcombine.high %v9580_v18, %v9584_v20 }
 0x511   :  { %11911 = vmatpush1.bf16.msra.mxu0 %v16675_v11  ;;  %v9712_v48 = vld [vmem:[#allocation6 + $0x2c20] sm:$0xff] }
 0x512   :  { %11912 = vmatprep.subr.bf16.mxu0 %v16668_v6  ;;  %v16900_v22 = vcombine.high %v9708_v10, %v9712_v48  ;;  %v9572_v19 = vld [vmem:[#allocation6 + $0x27c0] sm:$0xff]  ;;  %v16899_v6 = vcombine.low %v9708_v10, %v9712_v48 }
 0x513   :  { %11952 = vmatpush1.bf16.msra.mxu1 %v16803_v21  ;;  %v9576_v1 = vld [vmem:[#allocation6 + $0x27e0] sm:$0xff]  ;;  %v16771_v21 = vcombine.low %v9580_v18, %v9584_v20 }
 0x514   :  { %11953 = vmatprep.subr.bf16.mxu1 %v16796_v43  ;;  %v9700_v25 = vld [vmem:[#allocation6 + $0x2bc0] sm:$0xff]  ;;  %v16764_v43 = vcombine.high %v9572_v19, %v9576_v1 }
 0x515   :  { %11913 = vmatpush1.bf16.msra.mxu0 %v16667_v27  ;;  %v9704_v11 = vld [vmem:[#allocation6 + $0x2be0] sm:$0xff] }
 0x516   :  { %11914 = vmatprep.subr.bf16.mxu0 %v16788_v28  ;;  %v16892_v56 = vcombine.high %v9700_v25, %v9704_v11  ;;  %v9564_v2 = vld [vmem:[#allocation6 + $0x2780] sm:$0xff]  ;;  %v16891_v28 = vcombine.low %v9700_v25, %v9704_v11 }
 0x517   :  { %11954 = vmatpush1.bf16.msra.mxu1 %v16795_v15  ;;  %v9568_v39 = vld [vmem:[#allocation6 + $0x27a0] sm:$0xff]  ;;  %v16763_v15 = vcombine.low %v9572_v19, %v9576_v1 }
 0x518   :  { %11955 = vmatprep.subr.bf16.mxu1 %v16916_v33  ;;  %v9692_v29 = vld [vmem:[#allocation6 + $0x2b80] sm:$0xff]  ;;  %v16756_v33 = vcombine.high %v9564_v2, %v9568_v39 }
 0x519   :  { %11915 = vmatpush2.bf16.msra.mxu0 %v16787_v61  ;;  %v9696_v27 = vld [vmem:[#allocation6 + $0x2ba0] sm:$0xff] }
 0x51a   :  { %11916 = vmatprep.subr.bf16.mxu0 %v16780_v34  ;;  %v16884_v58 = vcombine.high %v9692_v29, %v9696_v27  ;;  %v9556_v14 = vld [vmem:[#allocation6 + $0x2740] sm:$0xff]  ;;  %v16883_v34 = vcombine.low %v9692_v29, %v9696_v27 }
 0x51b   :  { %11956 = vmatpush2.bf16.msra.mxu1 %v16915_v54  ;;  %v9560_v63 = vld [vmem:[#allocation6 + $0x2760] sm:$0xff]  ;;  %v16755_v54 = vcombine.low %v9564_v2, %v9568_v39 }
 0x51c   :  { %11957 = vmatprep.subr.bf16.mxu1 %v16908_v41  ;;  %v9684_v62 = vld [vmem:[#allocation6 + $0x2b40] sm:$0xff]  ;;  %v16748_v41 = vcombine.high %v9556_v14, %v9560_v63 }
 0x51d   :  { %11917 = vmatpush2.bf16.msra.mxu0 %v16779_v44  ;;  %v9688_v61 = vld [vmem:[#allocation6 + $0x2b60] sm:$0xff] }
 0x51e   :  { %11918 = vmatprep.subr.bf16.mxu0 %v16772_v5  ;;  %v16876_v18 = vcombine.high %v9684_v62, %v9688_v61  ;;  %v9548_v20 = vld [vmem:[#allocation6 + $0x2700] sm:$0xff]  ;;  %v16875_v5 = vcombine.low %v9684_v62, %v9688_v61 }
 0x51f   :  { %11958 = vmatpush2.bf16.msra.mxu1 %v16907_v12  ;;  %v9552_v10 = vld [vmem:[#allocation6 + $0x2720] sm:$0xff]  ;;  %v16747_v12 = vcombine.low %v9556_v14, %v9560_v63 }
 0x520   :  { %11959 = vmatprep.subr.bf16.mxu1 %v16900_v22  ;;  %v9676_v48 = vld [vmem:[#allocation6 + $0x2b00] sm:$0xff]  ;;  %v16740_v22 = vcombine.high %v9548_v20, %v9552_v10 }
 0x521   :  { %11919 = vmatpush2.bf16.msra.mxu0 %v16771_v21  ;;  %v9680_v44 = vld [vmem:[#allocation6 + $0x2b20] sm:$0xff] }
 0x522   :  { %11920 = vmatprep.subr.bf16.mxu0 %v16764_v43  ;;  %v16868_v19 = vcombine.high %v9676_v48, %v9680_v44  ;;  %v9540_v1 = vld [vmem:[#allocation6 + $0x26c0] sm:$0xff]  ;;  %v18673_v43 = vld [vmem:[#allocation8 + $0x10] sm:$0xff]  ;;  %v16867_v2 = vcombine.low %v9676_v48, %v9680_v44 }
 0x523   :  { %11960 = vmatpush2.bf16.msra.mxu1 %v16899_v6  ;;  %v9544_v25 = vld [vmem:[#allocation6 + $0x26e0] sm:$0xff]  ;;  %v16739_v6 = vcombine.low %v9548_v20, %v9552_v10  ;;  %v6766_v29 = vrot.slane %v18673_v43, %v18385_v37 }
 0x524   :  { %11961 = vmatprep.subr.bf16.mxu1 %v16892_v56  ;;  %v9668_v11 = vld [vmem:[#allocation6 + $0x2ac0] sm:$0xff]  ;;  %v6762_v56 = vrot.slane %v18673_v43, %v18382_v30  ;;  %v16732_v39 = vcombine.high %v9540_v1, %v9544_v25  ;;  %v16731_v61 = vcombine.low %v9540_v1, %v9544_v25  ;;  %v9537_v1 = vld [vmem:[#allocation6 + $0x26a8] sm:$0xff] }
 0x525   :  { %11921 = vmatpush2.bf16.msra.mxu0 %v16763_v15  ;;  %v9672_v21 = vld [vmem:[#allocation6 + $0x2ae0] sm:$0xff] }
 0x526   :  { %11922 = vmatprep.subr.bf16.mxu0 %v16756_v33  ;;  %v16860_v27 = vcombine.high %v9668_v11, %v9672_v21  ;;  %v9788_v15 = vld [vmem:[#allocation6 + $0x2e80] sm:$0xff] }
 0x527   :  { %11962 = vmatpush2.bf16.msra.mxu1 %v16891_v28  ;;  %v9792_v28 = vld [vmem:[#allocation6 + $0x2ea0] sm:$0xff] }
 0x528   :  { %11963 = vmatprep.subr.bf16.mxu1 %v16884_v58  ;;  %v9860_v58 = vld [vmem:[#allocation6 + $0x30c0] sm:$0xff] }
 0x529   :  { %11923 = vmatpush2.bf16.msra.mxu0 %v16755_v54  ;;  %v9864_v14 = vld [vmem:[#allocation6 + $0x30e0] sm:$0xff] }
 0x52a   :  { %11924 = vmatprep.subr.bf16.mxu0 %v16748_v41  ;;  %v16980_v41 = vcombine.high %v9788_v15, %v9792_v28  ;;  %v17052_v48 = vcombine.high %v9860_v58, %v9864_v14  ;;  %v9780_v44 = vld [vmem:[#allocation6 + $0x2e40] sm:$0xff] }
 0x52b   :  { %11964 = vmatpush2.bf16.msra.mxu1 %v16883_v34  ;;  %v16859_v34 = vcombine.low %v9668_v11, %v9672_v21  ;;  %v18689_v11 = vcombine.low %v18656_v47, %v18656_v47  ;;  %v16979_v21 = vcombine.low %v9788_v15, %v9792_v28 }
 0x52c   :  { %11965 = vmatprep.subr.bf16.mxu1 %v16876_v18 }
 0x52d   :  { %11925 = vmatpush2.bf16.msra.mxu0 %v16747_v12  ;;  %v9784_v12 = vld [vmem:[#allocation6 + $0x2e60] sm:$0xff] }
 0x52e   :  { %11926 = vmatprep.subr.bf16.mxu0 %v16740_v22  ;;  %v18683_v22 = vcombine.low %v18654_v3, %v18654_v3  ;;  %v16971_v15 = vcombine.low %v9780_v44, %v9784_v12 }
 0x52f   :  { %11966 = vmatpush2.bf16.msra.mxu1 %v16875_v5 }
 0x530   :  { %11967 = vmatprep.subr.bf16.mxu1 %v16868_v19  ;;  %v9132_v33 = vpop.f32.mrf.mxu0  ;;  %v9533_v19 = vld [vmem:[#allocation6 + $0x2688] sm:$0xff] }
 0x531   :  { %v9133_v63 = vadd.f32 %v9132_v33, %v6762_v56  ;;  %11927 = vmatpush2.bf16.msra.mxu0 %v16739_v6  ;;  %v18691_v56 = vld [vmem:[#allocation3 + $0x64] sm:$0xff]  ;;  %v9772_v33 = vld [vmem:[#allocation6 + $0x2e00] sm:$0xff] }
 0x532   :  { %v9173_v62 = vpop.f32.mrf.mxu1  ;;  %v9134_v54 = vpop.f32.mrf.mxu0  ;;  %11928 = vmatprep.subr.bf16.mxu0 %v16732_v39  ;;  %v17051_v39 = vcombine.low %v9860_v58, %v9864_v14  ;;  %v9764_v14 = vld [vmem:[#allocation6 + $0x2dc0] sm:$0xff] }
 0x533   :  { %11968 = vmatpush2.bf16.msra.mxu1 %v16867_v2  ;;  %v18679_v18 = vadd.f32 %v9173_v62, %v9133_v63  ;;  %v9135_v20 = vadd.f32 %v9134_v54, %v6766_v29  ;;  %v16972_v29 = vcombine.high %v9780_v44, %v9784_v12  ;;  %v9776_v63 = vld [vmem:[#allocation6 + $0x2e20] sm:$0xff]  ;;  %v18696_v62 = vcombine.high %v18691_v56, %v18691_v56  ;;  %v9525_v54 = vld [vmem:[#allocation6 + $0x2648] sm:$0xff] }
 0x534   :  { %v9175_v10 = vpop.f32.mrf.mxu1  ;;  %11969 = vmatprep.subr.bf16.mxu1 %v16860_v27  ;;  %v9136_v5 = vpop.f32.mrf.mxu0  ;;  %v16726_v27 = vcombine.high %v9533_v19, %v9537_v1  ;;  %v16964_v28 = vcombine.high %v9772_v33, %v9776_v63 }
 0x535   :  { %v18685_v25 = vadd.f32 %v9175_v10, %v9135_v20  ;;  %11929 = vmatpush2.bf16.msra.mxu0 %v16731_v61  ;;  %v9768_v61 = vld [vmem:[#allocation6 + $0x2de0] sm:$0xff]  ;;  %v16963_v20 = vcombine.low %v9772_v33, %v9776_v63  ;;  %v18705_v10 = vld [vmem:[#allocation3 + $0x6c] ss:$0 sps:$4 sm:$0xff]   ;;  %v9509_v63 = vld [vmem:[#allocation6 + $0x25c8] sm:$0xff] }
 0x536   :  { %v9177_v6 = vpop.f32.mrf.mxu1  ;;  %v9137_v2 = vpop.f32.mrf.mxu0  ;;  %11980 = vmatprep.subr.bf16.mxu0 %v16980_v41  ;;  %v16956_v44 = vcombine.high %v9764_v14, %v9768_v61 }
 0x537   :  { %11970 = vmatpush2.bf16.msra.mxu1 %v16859_v34  ;;  %v9529_v34 = vld [vmem:[#allocation6 + $0x2668] sm:$0xff]  ;;  %v9756_v6 = vld [vmem:[#allocation6 + $0x2d80] sm:$0xff] }
 0x538   :  { %v9178_v3 = vpop.f32.mrf.mxu1  ;;  %12035 = vmatprep.subr.bf16.mxu1 %v17052_v48  ;;  %11931 = vmatmul.mubr.bf16.vlgmr.msra.gmra.mxu0 %v18683_v22  ;;  %v16725_v48 = vcombine.low %v9533_v19, %v9537_v1  ;;  %v16718_v5 = vcombine.high %v9525_v54, %v9529_v34  ;;  %v9517_v2 = vld [vmem:[#allocation6 + $0x2608] sm:$0xff]  ;;  %v9748_v19 = vld [vmem:[#allocation6 + $0x2d40] sm:$0xff] }
 0x539   :  { %11981 = vmatpush1.bf16.msra.mxu0 %v16979_v21  ;;  %12012 = vmatprep.mubr.bf16.mxu0 %v18696_v62  ;;  %v9760_v21 = vld [vmem:[#allocation6 + $0x2da0] sm:$0xff]  ;;  %v16717_v3 = vcombine.low %v9525_v54, %v9529_v34  ;;  %v9501_v34 = vld [vmem:[#allocation6 + $0x2588] sm:$0xff] }
 0x53a   :  { %11972 = vmatmul.mubr.bf16.vlgmr.msra.gmra.mxu1 %v18689_v11  ;;  %v18699_v47 = vpop.f32.mrf.mxu1  ;;  %11982 = vmatprep.subr.bf16.mxu0 %v16972_v29  ;;  %v16955_v29 = vcombine.low %v9764_v14, %v9768_v61  ;;  %v9752_v1 = vld [vmem:[#allocation6 + $0x2d60] sm:$0xff] }
 0x53b   :  { %12036 = vmatpush1.bf16.msra.mxu1 %v17051_v39  ;;  %12053 = vmatprep.mubr.bf16.mxu1 %v18884_v31  ;;  %v9521_v39 = vld [vmem:[#allocation6 + $0x2628] sm:$0xff]  ;;  %v9740_v61 = vld [vmem:[#allocation6 + $0x2d00] sm:$0xff] }
 0x53c   :  { %v18701_v58 = vpop.f32.mrf.mxu1  ;;  %12062 = vmatprep.subr.bf16.mxu1 %v16726_v27  ;;  %v16948_v27 = vcombine.high %v9756_v6, %v9760_v21  ;;  %v16710_v33 = vcombine.high %v9517_v2, %v9521_v39  ;;  %v9744_v54 = vld [vmem:[#allocation6 + $0x2d20] sm:$0xff] }
 0x53d   :  { %11983 = vmatpush1.bf16.msra.mxu0 %v16971_v15  ;;  %v9513_v15 = vld [vmem:[#allocation6 + $0x25e8] sm:$0xff] }
 0x53e   :  { %v9259_v41 = vpop.f32.mrf.mxu1  ;;  %11984 = vmatprep.subr.bf16.mxu0 %v16964_v28  ;;  %v16947_v28 = vcombine.low %v9756_v6, %v9760_v21  ;;  %v16702_v14 = vcombine.high %v9509_v63, %v9513_v15  ;;  %v9736_v6 = vld [vmem:[#allocation6 + $0x2ce0] sm:$0xff]  ;;  %v9493_v21 = vld [vmem:[#allocation6 + $0x2548] sm:$0xff] }
 0x53f   :  { %v16709_v41 = vcombine.low %v9517_v2, %v9521_v39  ;;  %v9497_v2 = vld [vmem:[#allocation6 + $0x2568] sm:$0xff]  ;;  %v16931_v39 = vcombine.low %v9740_v61, %v9744_v54 }
 0x540   :  { %v9260_v12 = vpop.f32.mrf.mxu1 }
 0x541   :  { %11985 = vmatpush1.bf16.msra.mxu0 %v16963_v20  ;;  %v16940_v12 = vcombine.high %v9748_v19, %v9752_v1  ;;  %v9505_v20 = vld [vmem:[#allocation6 + $0x25a8] sm:$0xff] }
 0x542   :  { %17059 = vmatmul.mubr.msk.bf16.vlgmr.msra.gmra.mxu1 %vm2510_vm0, %v18705_v10  ;;  %11986 = vmatprep.subr.bf16.mxu0 %v16956_v44  ;;  %v16701_v44 = vcombine.low %v9509_v63, %v9513_v15  ;;  %v16694_v31 = vcombine.high %v9501_v34, %v9505_v20  ;;  %v9489_v63 = vld [vmem:[#allocation6 + $0x2528] sm:$0xff] }
 0x543   :  { %12063 = vmatpush1.bf16.msra.mxu1 %v16725_v48  ;;  %12094 = vmatprep.mubr.bf16.mxu1 %v18662_v45  ;;  %v16939_v48 = vcombine.low %v9748_v19, %v9752_v1  ;;  %v9856_v19 = vld [vmem:[#allocation6 + $0x30a0] sm:$0xff]  ;;  %v9485_v1 = vld [vmem:[#allocation6 + $0x2508] sm:$0xff] }
 0x544   :  { %12064 = vmatprep.subr.bf16.mxu1 %v16718_v5  ;;  %v16932_v5 = vcombine.high %v9740_v61, %v9744_v54  ;;  %v9848_v61 = vld [vmem:[#allocation6 + $0x3060] sm:$0xff]  ;;  %v9477_v54 = vld [vmem:[#allocation6 + $0x24c8] sm:$0xff] }
 0x545   :  { %11987 = vmatpush1.bf16.msra.mxu0 %v16955_v29  ;;  %v9732_v29 = vld [vmem:[#allocation6 + $0x2cc0] sm:$0xff] }
 0x546   :  { %11988 = vmatprep.subr.bf16.mxu0 %v16948_v27  ;;  %v16924_v27 = vcombine.high %v9732_v29, %v9736_v6  ;;  %v16923_v15 = vcombine.low %v9732_v29, %v9736_v6  ;;  %v9840_v29 = vld [vmem:[#allocation6 + $0x3020] sm:$0xff]  ;;  %v9597_v6 = vld [vmem:[#allocation6 + $0x2888] sm:$0xff] }
 0x547   :  { %12065 = vmatpush1.bf16.msra.mxu1 %v16717_v3  ;;  %v16693_v3 = vcombine.low %v9501_v34, %v9505_v20  ;;  %v9481_v34 = vld [vmem:[#allocation6 + $0x24e8] sm:$0xff] }
 0x548   :  { %12066 = vmatprep.subr.bf16.mxu1 %v16710_v33  ;;  %v16686_v33 = vcombine.high %v9493_v21, %v9497_v2 }
 0x549   :  { %11989 = vmatpush1.bf16.msra.mxu0 %v16947_v28  ;;  %v9852_v28 = vld [vmem:[#allocation6 + $0x3080] sm:$0xff] }
 0x54a   :  { %11990 = vmatprep.subr.bf16.mxu0 %v16940_v12  ;;  %v17044_v12 = vcombine.high %v9852_v28, %v9856_v19  ;;  %v17043_v20 = vcombine.low %v9852_v28, %v9856_v19  ;;  %v9832_v28 = vld [vmem:[#allocation6 + $0x2fe0] sm:$0xff]  ;;  %v9589_v19 = vld [vmem:[#allocation6 + $0x2848] sm:$0xff] }
 0x54b   :  { %12067 = vmatpush1.bf16.msra.mxu1 %v16709_v41  ;;  %v16685_v41 = vcombine.low %v9493_v21, %v9497_v2  ;;  %v9601_v21 = vld [vmem:[#allocation6 + $0x28a8] sm:$0xff] }
 0x54c   :  { %12068 = vmatprep.subr.bf16.mxu1 %v16702_v14  ;;  %v16678_v14 = vcombine.high %v9485_v1, %v9489_v63 }
 0x54d   :  { %11991 = vmatpush1.bf16.msra.mxu0 %v16939_v48  ;;  %v9844_v48 = vld [vmem:[#allocation6 + $0x3040] sm:$0xff] }
 0x54e   :  { %11992 = vmatprep.subr.bf16.mxu0 %v16932_v5  ;;  %v16670_v5 = vcombine.high %v9477_v54, %v9481_v34  ;;  %v17035_v2 = vcombine.low %v9844_v48, %v9848_v61 }
 0x54f   :  { %12069 = vmatpush1.bf16.msra.mxu1 %v16701_v44  ;;  %v17036_v44 = vcombine.high %v9844_v48, %v9848_v61  ;;  %v9824_v48 = vld [vmem:[#allocation6 + $0x2fa0] sm:$0xff]  ;;  %v9581_v61 = vld [vmem:[#allocation6 + $0x2808] sm:$0xff] }
 0x550   :  { %12070 = vmatprep.subr.bf16.mxu1 %v16694_v31  ;;  %v16677_v31 = vcombine.low %v9485_v1, %v9489_v63  ;;  %v9593_v1 = vld [vmem:[#allocation6 + $0x2868] sm:$0xff] }
 0x551   :  { %11993 = vmatpush1.bf16.msra.mxu0 %v16931_v39  ;;  %v9836_v39 = vld [vmem:[#allocation6 + $0x3000] sm:$0xff] }
 0x552   :  { %11994 = vmatprep.subr.bf16.mxu0 %v16924_v27  ;;  %v17028_v27 = vcombine.high %v9836_v39, %v9840_v29  ;;  %v17027_v63 = vcombine.low %v9836_v39, %v9840_v29  ;;  %v9816_v39 = vld [vmem:[#allocation6 + $0x2f60] sm:$0xff]  ;;  %v9573_v29 = vld [vmem:[#allocation6 + $0x27c8] sm:$0xff] }
 0x553   :  { %12071 = vmatpush1.bf16.msra.mxu1 %v16693_v3  ;;  %v16669_v3 = vcombine.low %v9477_v54, %v9481_v34  ;;  %v9585_v54 = vld [vmem:[#allocation6 + $0x2828] sm:$0xff] }
 0x554   :  { %12072 = vmatprep.subr.bf16.mxu1 %v16686_v33  ;;  %v16790_v33 = vcombine.high %v9597_v6, %v9601_v21 }
 0x555   :  { %11995 = vmatpush1.bf16.msra.mxu0 %v16923_v15  ;;  %v9828_v15 = vld [vmem:[#allocation6 + $0x2fc0] sm:$0xff] }
 0x556   :  { %11996 = vmatprep.subr.bf16.mxu0 %v17044_v12  ;;  %v17020_v12 = vcombine.high %v9828_v15, %v9832_v28  ;;  %v17019_v34 = vcombine.low %v9828_v15, %v9832_v28  ;;  %v9808_v15 = vld [vmem:[#allocation6 + $0x2f20] sm:$0xff]  ;;  %v9565_v28 = vld [vmem:[#allocation6 + $0x2788] sm:$0xff] }
 0x557   :  { %12073 = vmatpush1.bf16.msra.mxu1 %v16685_v41  ;;  %v16789_v41 = vcombine.low %v9597_v6, %v9601_v21  ;;  %v9577_v6 = vld [vmem:[#allocation6 + $0x27e8] sm:$0xff] }
 0x558   :  { %12074 = vmatprep.subr.bf16.mxu1 %v16678_v14  ;;  %v16782_v14 = vcombine.high %v9589_v19, %v9593_v1 }
 0x559   :  { %11997 = vmatpush2.bf16.msra.mxu0 %v17043_v20  ;;  %v9820_v20 = vld [vmem:[#allocation6 + $0x2f80] sm:$0xff] }
 0x55a   :  { %11998 = vmatprep.subr.bf16.mxu0 %v17036_v44  ;;  %v17012_v44 = vcombine.high %v9820_v20, %v9824_v48  ;;  %v17011_v21 = vcombine.low %v9820_v20, %v9824_v48  ;;  %v9800_v20 = vld [vmem:[#allocation6 + $0x2ee0] sm:$0xff]  ;;  %v9557_v48 = vld [vmem:[#allocation6 + $0x2748] sm:$0xff] }
 0x55b   :  { %12075 = vmatpush1.bf16.msra.mxu1 %v16677_v31  ;;  %v16781_v31 = vcombine.low %v9589_v19, %v9593_v1  ;;  %v9569_v19 = vld [vmem:[#allocation6 + $0x27a8] sm:$0xff] }
 0x55c   :  { %12076 = vmatprep.subr.bf16.mxu1 %v16670_v5  ;;  %v16774_v5 = vcombine.high %v9581_v61, %v9585_v54 }
 0x55d   :  { %11999 = vmatpush2.bf16.msra.mxu0 %v17035_v2  ;;  %v9812_v2 = vld [vmem:[#allocation6 + $0x2f40] sm:$0xff] }
 0x55e   :  { %12000 = vmatprep.subr.bf16.mxu0 %v17028_v27  ;;  %v17004_v27 = vcombine.high %v9812_v2, %v9816_v39  ;;  %v17003_v1 = vcombine.low %v9812_v2, %v9816_v39  ;;  %v9665_v2 = vld [vmem:[#allocation6 + $0x2aa8] sm:$0xff] }
 0x55f   :  { %12077 = vmatpush1.bf16.msra.mxu1 %v16669_v3  ;;  %v16773_v3 = vcombine.low %v9581_v61, %v9585_v54  ;;  %v9561_v61 = vld [vmem:[#allocation6 + $0x2768] sm:$0xff] }
 0x560   :  { %12078 = vmatprep.subr.bf16.mxu1 %v16790_v33  ;;  %v16766_v33 = vcombine.high %v9573_v29, %v9577_v6  ;;  %v16749_v55 = vcombine.low %v9557_v48, %v9561_v61 }
 0x561   :  { %12001 = vmatpush2.bf16.msra.mxu0 %v17027_v63  ;;  %v9804_v63 = vld [vmem:[#allocation6 + $0x2f00] sm:$0xff] }
 0x562   :  { %12002 = vmatprep.subr.bf16.mxu0 %v17020_v12  ;;  %v16996_v12 = vcombine.high %v9804_v63, %v9808_v15  ;;  %v16995_v54 = vcombine.low %v9804_v63, %v9808_v15 }
 0x563   :  { %12079 = vmatpush2.bf16.msra.mxu1 %v16789_v41  ;;  %v16765_v41 = vcombine.low %v9573_v29, %v9577_v6  ;;  %v9549_v29 = vld [vmem:[#allocation6 + $0x2708] sm:$0xff] }
 0x564   :  { %12080 = vmatprep.subr.bf16.mxu1 %v16782_v14  ;;  %v16758_v14 = vcombine.high %v9565_v28, %v9569_v19  ;;  %v9553_v6 = vld [vmem:[#allocation6 + $0x2728] sm:$0xff] }
 0x565   :  { %12003 = vmatpush2.bf16.msra.mxu0 %v17019_v34  ;;  %v9796_v34 = vld [vmem:[#allocation6 + $0x2ec0] sm:$0xff] }
 0x566   :  { %12004 = vmatprep.subr.bf16.mxu0 %v17012_v44  ;;  %v16988_v44 = vcombine.high %v9796_v34, %v9800_v20 }
 0x567   :  { %12081 = vmatpush2.bf16.msra.mxu1 %v16781_v31  ;;  %v16757_v31 = vcombine.low %v9565_v28, %v9569_v19  ;;  %v16742_v19 = vcombine.high %v9549_v29, %v9553_v6 }
 0x568   :  { %12082 = vmatprep.subr.bf16.mxu1 %v16774_v5  ;;  %v16750_v5 = vcombine.high %v9557_v48, %v9561_v61  ;;  %v16741_v61 = vcombine.low %v9549_v29, %v9553_v6  ;;  %v9637_v6 = vld [vmem:[#allocation6 + $0x29c8] sm:$0xff] }
 0x569   :  { %12005 = vmatpush2.bf16.msra.mxu0 %v17011_v21  ;;  %v9661_v21 = vld [vmem:[#allocation6 + $0x2a88] sm:$0xff] }
 0x56a   :  { %12006 = vmatprep.subr.bf16.mxu0 %v17004_v27  ;;  %v16987_v27 = vcombine.low %v9796_v34, %v9800_v20  ;;  %v16854_v63 = vcombine.high %v9661_v21, %v9665_v2  ;;  %v9545_v34 = vld [vmem:[#allocation6 + $0x26e8] sm:$0xff]  ;;  %v16853_v48 = vcombine.low %v9661_v21, %v9665_v2 }
 0x56b   :  { %12083 = vmatpush2.bf16.msra.mxu1 %v16773_v3 }
 0x56c   :  { %12084 = vmatprep.subr.bf16.mxu1 %v16766_v33 }
 0x56d   :  { %12007 = vmatpush2.bf16.msra.mxu0 %v17003_v1  ;;  %v9653_v1 = vld [vmem:[#allocation6 + $0x2a48] sm:$0xff] }
 0x56e   :  { %12008 = vmatprep.subr.bf16.mxu0 %v16996_v12 }
 0x56f   :  { %12085 = vmatpush2.bf16.msra.mxu1 %v16765_v41  ;;  %v9657_v41 = vld [vmem:[#allocation6 + $0x2a68] sm:$0xff] }
 0x570   :  { %12086 = vmatprep.subr.bf16.mxu1 %v16758_v14  ;;  %v9214_v39 = vpop.f32.mrf.mxu0  ;;  %v9541_v14 = vld [vmem:[#allocation6 + $0x26c8] sm:$0xff] }
 0x571   :  { %v9215_v3 = vadd.f32 %v9214_v39, %v18679_v18  ;;  %12009 = vmatpush2.bf16.msra.mxu0 %v16995_v54  ;;  %v18717_v18 = vcombine.low %v18691_v56, %v18691_v56  ;;  %v16734_v54 = vcombine.high %v9541_v14, %v9545_v34  ;;  %v9789_v56 = vld [vmem:[#allocation6 + $0x2e88] sm:$0xff] }
 0x572   :  { %v9216_v33 = vpop.f32.mrf.mxu0  ;;  %12010 = vmatprep.subr.bf16.mxu0 %v16988_v44  ;;  %v9649_v44 = vld [vmem:[#allocation6 + $0x2a28] sm:$0xff] }
 0x573   :  { %12087 = vmatpush2.bf16.msra.mxu1 %v16757_v31  ;;  %v18712_v15 = vadd.f32 %v18699_v47, %v9215_v3  ;;  %v9217_v28 = vadd.f32 %v9216_v33, %v18685_v25  ;;  %v16846_v25 = vcombine.high %v9653_v1, %v9657_v41  ;;  %v9645_v31 = vld [vmem:[#allocation6 + $0x2a08] sm:$0xff] }
 0x574   :  { %12088 = vmatprep.subr.bf16.mxu1 %v16750_v5  ;;  %v9218_v12 = vpop.f32.mrf.mxu0  ;;  %v9793_v5 = vld [vmem:[#allocation6 + $0x2ea8] sm:$0xff]  ;;  %v16838_v21 = vcombine.high %v9645_v31, %v9649_v44 }
 0x575   :  { %v18720_v20 = vadd.f32 %v18701_v58, %v9217_v28  ;;  %12011 = vmatpush2.bf16.msra.mxu0 %v16987_v27  ;;  %v16845_v58 = vcombine.low %v9653_v1, %v9657_v41  ;;  %v16982_v29 = vcombine.high %v9789_v56, %v9793_v5  ;;  %v9641_v3 = vld [vmem:[#allocation6 + $0x29e8] sm:$0xff]  ;;  %v16837_v28 = vcombine.low %v9645_v31, %v9649_v44 }
 0x576   :  { %v9219_v47 = vpop.f32.mrf.mxu0  ;;  %12103 = vmatprep.subr.bf16.mxu0 %v16854_v63  ;;  %v9781_v27 = vld [vmem:[#allocation6 + $0x2e48] sm:$0xff]  ;;  %v16830_v1 = vcombine.high %v9637_v6, %v9641_v3 }
 0x577   :  { %12089 = vmatpush2.bf16.msra.mxu1 %v16749_v55  ;;  %v16733_v55 = vcombine.low %v9541_v14, %v9545_v34  ;;  %v9785_v33 = vld [vmem:[#allocation6 + $0x2e68] sm:$0xff] }
 0x578   :  { %12090 = vmatprep.subr.bf16.mxu1 %v16742_v19  ;;  %12013 = vmatmul.mubr.bf16.vlgmr.msra.gmra.mxu0 %v18717_v18  ;;  %v16981_v19 = vcombine.low %v9789_v56, %v9793_v5  ;;  %v16974_v12 = vcombine.high %v9781_v27, %v9785_v33  ;;  %v9629_v14 = vld [vmem:[#allocation6 + $0x2988] sm:$0xff] }
 0x579   :  { %12104 = vmatpush1.bf16.msra.mxu0 %v16853_v48  ;;  %12135 = vmatprep.mubr.bf16.mxu0 %v18668_v24  ;;  %v9633_v34 = vld [vmem:[#allocation6 + $0x29a8] sm:$0xff] }
 0x57a   :  { %v18723_v39 = vpop.f32.mrf.mxu1  ;;  %12105 = vmatprep.subr.bf16.mxu0 %v16846_v25  ;;  %v9773_v48 = vld [vmem:[#allocation6 + $0x2e08] sm:$0xff]  ;;  %v16973_v25 = vcombine.low %v9781_v27, %v9785_v33 }
 0x57b   :  { %12091 = vmatpush2.bf16.msra.mxu1 %v16741_v61  ;;  %v9777_v47 = vld [vmem:[#allocation6 + $0x2e28] sm:$0xff]  ;;  %v16829_v61 = vcombine.low %v9637_v6, %v9641_v3 }
 0x57c   :  { %v18726_v2 = vpop.f32.mrf.mxu1  ;;  %12092 = vmatprep.subr.bf16.mxu1 %v16734_v54  ;;  %v16822_v54 = vcombine.high %v9629_v14, %v9633_v34  ;;  %v16966_v31 = vcombine.high %v9773_v48, %v9777_v47  ;;  %v9621_v44 = vld [vmem:[#allocation6 + $0x2948] sm:$0xff] }
 0x57d   :  { %12106 = vmatpush1.bf16.msra.mxu0 %v16845_v58  ;;  %v9625_v56 = vld [vmem:[#allocation6 + $0x2968] sm:$0xff] }
 0x57e   :  { %v9300_v63 = vpop.f32.mrf.mxu1  ;;  %12107 = vmatprep.subr.bf16.mxu0 %v16838_v21  ;;  %v9765_v5 = vld [vmem:[#allocation6 + $0x2dc8] sm:$0xff]  ;;  %v16965_v21 = vcombine.low %v9773_v48, %v9777_v47 }
 0x57f   :  { %12093 = vmatpush2.bf16.msra.mxu1 %v16733_v55  ;;  %v9769_v58 = vld [vmem:[#allocation6 + $0x2de8] sm:$0xff]  ;;  %v16821_v55 = vcombine.low %v9629_v14, %v9633_v34 }
 0x580   :  { %v9301_v41 = vpop.f32.mrf.mxu1  ;;  %12144 = vmatprep.subr.bf16.mxu1 %v16982_v29  ;;  %v16814_v29 = vcombine.high %v9621_v44, %v9625_v56  ;;  %v16958_v6 = vcombine.high %v9765_v5, %v9769_v58  ;;  %v9613_v3 = vld [vmem:[#allocation6 + $0x2908] sm:$0xff] }
 0x581   :  { %12108 = vmatpush1.bf16.msra.mxu0 %v16837_v28  ;;  %v9617_v27 = vld [vmem:[#allocation6 + $0x2928] sm:$0xff]  ;;  %v16813_v28 = vcombine.low %v9621_v44, %v9625_v56 }
 0x582   :  { %12095 = vmatmul.mubr.bf16.vlgmr.msra.gmra.mxu1 %v18683_v22  ;;  %12109 = vmatprep.subr.bf16.mxu0 %v16830_v1  ;;  %v9757_v33 = vld [vmem:[#allocation6 + $0x2d88] sm:$0xff]  ;;  %v16806_v1 = vcombine.high %v9613_v3, %v9617_v27  ;;  %v16805_v47 = vcombine.low %v9613_v3, %v9617_v27 }
 0x583   :  { %12145 = vmatpush1.bf16.msra.mxu1 %v16981_v19  ;;  %12176 = vmatprep.mubr.bf16.mxu1 %v18696_v62  ;;  %v9761_v63 = vld [vmem:[#allocation6 + $0x2da8] sm:$0xff]  ;;  %v16957_v19 = vcombine.low %v9765_v5, %v9769_v58 }
 0x584   :  { %12146 = vmatprep.subr.bf16.mxu1 %v16974_v12  ;;  %v16950_v41 = vcombine.high %v9757_v33, %v9761_v63  ;;  %v9605_v12 = vld [vmem:[#allocation6 + $0x28c8] sm:$0xff] }
 0x585   :  { %12110 = vmatpush1.bf16.msra.mxu0 %v16829_v61  ;;  %v9609_v14 = vld [vmem:[#allocation6 + $0x28e8] sm:$0xff]  ;;  %v16949_v61 = vcombine.low %v9757_v33, %v9761_v63 }
 0x586   :  { %12111 = vmatprep.subr.bf16.mxu0 %v16822_v54  ;;  %v9749_v34 = vld [vmem:[#allocation6 + $0x2d48] sm:$0xff]  ;;  %v16797_v58 = vcombine.low %v9605_v12, %v9609_v14 }
 0x587   :  { %12147 = vmatpush1.bf16.msra.mxu1 %v16973_v25  ;;  %v9753_v48 = vld [vmem:[#allocation6 + $0x2d68] sm:$0xff]  ;;  %v16798_v25 = vcombine.high %v9605_v12, %v9609_v14 }
 0x588   :  { %12148 = vmatprep.subr.bf16.mxu1 %v16966_v31  ;;  %v16942_v54 = vcombine.high %v9749_v34, %v9753_v48  ;;  %v9725_v31 = vld [vmem:[#allocation6 + $0x2c88] sm:$0xff] }
 0x589   :  { %12112 = vmatpush1.bf16.msra.mxu0 %v16821_v55  ;;  %v9729_v44 = vld [vmem:[#allocation6 + $0x2ca8] sm:$0xff]  ;;  %v16941_v55 = vcombine.low %v9749_v34, %v9753_v48 }
 0x58a   :  { %12113 = vmatprep.subr.bf16.mxu0 %v16814_v29  ;;  %v9741_v56 = vld [vmem:[#allocation6 + $0x2d08] sm:$0xff]  ;;  %v16917_v63 = vcombine.low %v9725_v31, %v9729_v44 }
 0x58b   :  { %12149 = vmatpush1.bf16.msra.mxu1 %v16965_v21  ;;  %v9745_v5 = vld [vmem:[#allocation6 + $0x2d28] sm:$0xff]  ;;  %v16918_v21 = vcombine.high %v9725_v31, %v9729_v44 }
 0x58c   :  { %12150 = vmatprep.subr.bf16.mxu1 %v16958_v6  ;;  %v16934_v29 = vcombine.high %v9741_v56, %v9745_v5  ;;  %v9717_v6 = vld [vmem:[#allocation6 + $0x2c48] sm:$0xff] }
 0x58d   :  { %12114 = vmatpush1.bf16.msra.mxu0 %v16813_v28  ;;  %v9721_v3 = vld [vmem:[#allocation6 + $0x2c68] sm:$0xff]  ;;  %v16933_v28 = vcombine.low %v9741_v56, %v9745_v5 }
 0x58e   :  { %12115 = vmatprep.subr.bf16.mxu0 %v16806_v1  ;;  %v9733_v27 = vld [vmem:[#allocation6 + $0x2cc8] sm:$0xff]  ;;  %v16909_v48 = vcombine.low %v9717_v6, %v9721_v3 }
 0x58f   :  { %12151 = vmatpush1.bf16.msra.mxu1 %v16957_v19  ;;  %v9737_v33 = vld [vmem:[#allocation6 + $0x2ce8] sm:$0xff]  ;;  %v16910_v19 = vcombine.high %v9717_v6, %v9721_v3 }
 0x590   :  { %12152 = vmatprep.subr.bf16.mxu1 %v16950_v41  ;;  %v16926_v1 = vcombine.high %v9733_v27, %v9737_v33  ;;  %v9709_v41 = vld [vmem:[#allocation6 + $0x2c08] sm:$0xff] }
 0x591   :  { %12116 = vmatpush1.bf16.msra.mxu0 %v16805_v47  ;;  %v9713_v12 = vld [vmem:[#allocation6 + $0x2c28] sm:$0xff]  ;;  %v16925_v47 = vcombine.low %v9733_v27, %v9737_v33 }
 0x592   :  { %12117 = vmatprep.subr.bf16.mxu0 %v16798_v25  ;;  %v9853_v14 = vld [vmem:[#allocation6 + $0x3088] sm:$0xff]  ;;  %v16901_v5 = vcombine.low %v9709_v41, %v9713_v12 }
 0x593   :  { %12153 = vmatpush1.bf16.msra.mxu1 %v16949_v61  ;;  %v9857_v34 = vld [vmem:[#allocation6 + $0x30a8] sm:$0xff]  ;;  %v16902_v61 = vcombine.high %v9709_v41, %v9713_v12 }
 0x594   :  { %12154 = vmatprep.subr.bf16.mxu1 %v16942_v54  ;;  %v17046_v25 = vcombine.high %v9853_v14, %v9857_v34  ;;  %v9701_v54 = vld [vmem:[#allocation6 + $0x2bc8] sm:$0xff] }
 0x595   :  { %12118 = vmatpush1.bf16.msra.mxu0 %v16797_v58  ;;  %v9705_v31 = vld [vmem:[#allocation6 + $0x2be8] sm:$0xff]  ;;  %v17045_v58 = vcombine.low %v9853_v14, %v9857_v34 }
 0x596   :  { %12119 = vmatprep.subr.bf16.mxu0 %v16918_v21  ;;  %v9845_v44 = vld [vmem:[#allocation6 + $0x3048] sm:$0xff]  ;;  %v16893_v33 = vcombine.low %v9701_v54, %v9705_v31 }
 0x597   :  { %12155 = vmatpush1.bf16.msra.mxu1 %v16941_v55  ;;  %v9849_v56 = vld [vmem:[#allocation6 + $0x3068] sm:$0xff]  ;;  %v16894_v55 = vcombine.high %v9701_v54, %v9705_v31 }
 0x598   :  { %12156 = vmatprep.subr.bf16.mxu1 %v16934_v29  ;;  %v17038_v21 = vcombine.high %v9845_v44, %v9849_v56  ;;  %v9693_v29 = vld [vmem:[#allocation6 + $0x2b88] sm:$0xff] }
 0x599   :  { %12120 = vmatpush2.bf16.msra.mxu0 %v16917_v63  ;;  %v9697_v6 = vld [vmem:[#allocation6 + $0x2ba8] sm:$0xff]  ;;  %v17037_v63 = vcombine.low %v9845_v44, %v9849_v56 }
 0x59a   :  { %12121 = vmatprep.subr.bf16.mxu0 %v16910_v19  ;;  %v9837_v3 = vld [vmem:[#allocation6 + $0x3008] sm:$0xff]  ;;  %v16885_v34 = vcombine.low %v9693_v29, %v9697_v6 }
 0x59b   :  { %12157 = vmatpush1.bf16.msra.mxu1 %v16933_v28  ;;  %v9841_v27 = vld [vmem:[#allocation6 + $0x3028] sm:$0xff]  ;;  %v16886_v28 = vcombine.high %v9693_v29, %v9697_v6 }
 0x59c   :  { %12158 = vmatprep.subr.bf16.mxu1 %v16926_v1  ;;  %v17030_v19 = vcombine.high %v9837_v3, %v9841_v27  ;;  %v9685_v1 = vld [vmem:[#allocation6 + $0x2b48] sm:$0xff] }
 0x59d   :  { %12122 = vmatpush2.bf16.msra.mxu0 %v16909_v48  ;;  %v9689_v41 = vld [vmem:[#allocation6 + $0x2b68] sm:$0xff]  ;;  %v17029_v48 = vcombine.low %v9837_v3, %v9841_v27 }
 0x59e   :  { %12123 = vmatprep.subr.bf16.mxu0 %v16902_v61  ;;  %v9829_v12 = vld [vmem:[#allocation6 + $0x2fc8] sm:$0xff]  ;;  %v16877_v56 = vcombine.low %v9685_v1, %v9689_v41 }
 0x59f   :  { %12159 = vmatpush1.bf16.msra.mxu1 %v16925_v47  ;;  %v9833_v14 = vld [vmem:[#allocation6 + $0x2fe8] sm:$0xff]  ;;  %v16878_v47 = vcombine.high %v9685_v1, %v9689_v41 }
 0x5a0   :  { %12160 = vmatprep.subr.bf16.mxu1 %v17046_v25  ;;  %v17022_v61 = vcombine.high %v9829_v12, %v9833_v14  ;;  %v9677_v25 = vld [vmem:[#allocation6 + $0x2b08] sm:$0xff] }
 0x5a1   :  { %12124 = vmatpush2.bf16.msra.mxu0 %v16901_v5  ;;  %v9681_v54 = vld [vmem:[#allocation6 + $0x2b28] sm:$0xff]  ;;  %v17021_v5 = vcombine.low %v9829_v12, %v9833_v14 }
 0x5a2   :  { %12125 = vmatprep.subr.bf16.mxu0 %v16894_v55  ;;  %v9821_v31 = vld [vmem:[#allocation6 + $0x2f88] sm:$0xff]  ;;  %v6770_v55 = vrot.slane %v18673_v43, %v18443_v60 }
 0x5a3   :  { %12161 = vmatpush2.bf16.msra.mxu1 %v17045_v58  ;;  %v9825_v44 = vld [vmem:[#allocation6 + $0x2fa8] sm:$0xff]  ;;  %v16870_v58 = vcombine.high %v9677_v25, %v9681_v54 }
 0x5a4   :  { %12162 = vmatprep.subr.bf16.mxu1 %v17038_v21  ;;  %v17014_v21 = vcombine.high %v9821_v31, %v9825_v44  ;;  %v9669_v29 = vld [vmem:[#allocation6 + $0x2ac8] sm:$0xff]  ;;  %v9297_v1 = vadd.f32 %v18723_v39, %v6770_v55 }
 0x5a5   :  { %12126 = vmatpush2.bf16.msra.mxu0 %v16893_v33  ;;  %v9673_v6 = vld [vmem:[#allocation6 + $0x2ae8] sm:$0xff]  ;;  %v6774_v33 = vrot.slane %v18673_v43, %v18446_v53 }
 0x5a6   :  { %12127 = vmatprep.subr.bf16.mxu0 %v16886_v28  ;;  %v9813_v3 = vld [vmem:[#allocation6 + $0x2f48] sm:$0xff]  ;;  %v17013_v28 = vcombine.low %v9821_v31, %v9825_v44  ;;  %v16861_v43 = vcombine.low %v9669_v29, %v9673_v6 }
 0x5a7   :  { %12163 = vmatpush2.bf16.msra.mxu1 %v17037_v63  ;;  %v9817_v27 = vld [vmem:[#allocation6 + $0x2f68] sm:$0xff]  ;;  %v16869_v63 = vcombine.low %v9677_v25, %v9681_v54 }
 0x5a8   :  { %12164 = vmatprep.subr.bf16.mxu1 %v17030_v19  ;;  %v16862_v19 = vcombine.high %v9669_v29, %v9673_v6  ;;  %v17006_v41 = vcombine.high %v9813_v3, %v9817_v27  ;;  %v9861_v12 = vld [vmem:[#allocation6 + $0x30c8] sm:$0xff]  ;;  %v17005_v54 = vcombine.low %v9813_v3, %v9817_v27  ;;  %v9662_v27 = vld [vmem:[#allocation6 + $0x2a90] sm:$0xff] }
 0x5a9   :  { %12128 = vmatpush2.bf16.msra.mxu0 %v16885_v34  ;;  %v9865_v14 = vld [vmem:[#allocation6 + $0x30e8] sm:$0xff] }
 0x5aa   :  { %12129 = vmatprep.subr.bf16.mxu0 %v16878_v47  ;;  %v9809_v47 = vld [vmem:[#allocation6 + $0x2f28] sm:$0xff]  ;;  %v17054_v31 = vcombine.high %v9861_v12, %v9865_v14  ;;  %v17053_v53 = vcombine.low %v9861_v12, %v9865_v14 }
 0x5ab   :  { %12165 = vmatpush2.bf16.msra.mxu1 %v17029_v48  ;;  %v9805_v48 = vld [vmem:[#allocation6 + $0x2f08] sm:$0xff] }
 0x5ac   :  { %12166 = vmatprep.subr.bf16.mxu1 %v17022_v61  ;;  %v9299_v61 = vadd.f32 %v18726_v2, %v6774_v33  ;;  %v16998_v39 = vcombine.high %v9805_v48, %v9809_v47  ;;  %v9797_v55 = vld [vmem:[#allocation6 + $0x2ec8] sm:$0xff]  ;;  %v16997_v33 = vcombine.low %v9805_v48, %v9809_v47  ;;  %v9526_v48 = vld [vmem:[#allocation6 + $0x2650] sm:$0xff] }
 0x5ad   :  { %12130 = vmatpush2.bf16.msra.mxu0 %v16877_v56  ;;  %v9534_v56 = vld [vmem:[#allocation6 + $0x2690] sm:$0xff] }
 0x5ae   :  { %12131 = vmatprep.subr.bf16.mxu0 %v16870_v58  ;;  %v9530_v47 = vld [vmem:[#allocation6 + $0x2670] sm:$0xff] }
 0x5af   :  { %12167 = vmatpush2.bf16.msra.mxu1 %v17021_v5  ;;  %v9538_v5 = vld [vmem:[#allocation6 + $0x26b0] sm:$0xff] }
 0x5b0   :  { %12168 = vmatprep.subr.bf16.mxu1 %v17014_v21  ;;  %v9337_v34 = vpop.f32.mrf.mxu0  ;;  %v9801_v21 = vld [vmem:[#allocation6 + $0x2ee8] sm:$0xff]  ;;  %v16728_v29 = vcombine.high %v9534_v56, %v9538_v5 }
 0x5b1   :  { %v9338_v60 = vadd.f32 %v9337_v34, %v9297_v1  ;;  %12132 = vmatpush2.bf16.msra.mxu0 %v16869_v63  ;;  %v16990_v6 = vcombine.high %v9797_v55, %v9801_v21  ;;  %v9666_v63 = vld [vmem:[#allocation6 + $0x2ab0] sm:$0xff]  ;;  %v16989_v12 = vcombine.low %v9797_v55, %v9801_v21  ;;  %v16720_v55 = vcombine.high %v9526_v48, %v9530_v47 }
 0x5b2   :  { %v9339_v25 = vpop.f32.mrf.mxu0  ;;  %12133 = vmatprep.subr.bf16.mxu0 %v16862_v19  ;;  %v18891_v19 = vmov 0   ;;  %v16856_v34 = vcombine.high %v9662_v27, %v9666_v63 }
 0x5b3   :  { %12169 = vmatpush2.bf16.msra.mxu1 %v17013_v28  ;;  %v9340_v44 = vadd.f32 %v9339_v25, %v9299_v61 }
 0x5b4   :  { %12170 = vmatprep.subr.bf16.mxu1 %v17006_v41  ;;  %v9341_v58 = vpop.f32.mrf.mxu0 }
 0x5b5   :  { %12134 = vmatpush2.bf16.msra.mxu0 %v16861_v43 }
 0x5b6   :  { %v9342_v2 = vpop.f32.mrf.mxu0  ;;  %12199 = vmatprep.subr.bf16.mxu0 %v17054_v31  ;;  %v9658_v31 = vld [vmem:[#allocation6 + $0x2a70] sm:$0xff] }
 0x5b7   :  { %12171 = vmatpush2.bf16.msra.mxu1 %v17005_v54  ;;  %v9654_v54 = vld [vmem:[#allocation6 + $0x2a50] sm:$0xff]  ;;  %v16855_v2 = vcombine.low %v9662_v27, %v9666_v63 }
 0x5b8   :  { %12172 = vmatprep.subr.bf16.mxu1 %v16998_v39  ;;  %12136 = vmatmul.mubr.bf16.vlgmr.msra.gmra.mxu0 %v18689_v11  ;;  %v9419_v3 = vpop.f32.mrf.mxu0  ;;  %v9510_v63 = vld [vmem:[#allocation6 + $0x25d0] sm:$0xff] }
 0x5b9   :  { %12200 = vmatpush1.bf16.msra.mxu0 %v17053_v53  ;;  %12217 = vmatprep.mubr.bf16.mxu0 %v18891_v19  ;;  %v16727_v53 = vcombine.low %v9534_v56, %v9538_v5  ;;  %v16719_v56 = vcombine.low %v9526_v48, %v9530_v47  ;;  %v16847_v5 = vcombine.low %v9654_v54, %v9658_v31  ;;  %v9502_v47 = vld [vmem:[#allocation6 + $0x2590] sm:$0xff] }
 0x5ba   :  { %v9378_v28 = vpop.f32.mrf.mxu1  ;;  %v9421_v41 = vpop.f32.mrf.mxu0  ;;  %12226 = vmatprep.subr.bf16.mxu0 %v16728_v29  ;;  %v9518_v29 = vld [vmem:[#allocation6 + $0x2610] sm:$0xff] }
 0x5bb   :  { %v9379_v1 = vadd.f32 %v9378_v28, %v9338_v60  ;;  %12173 = vmatpush2.bf16.msra.mxu1 %v16997_v33  ;;  %v16848_v33 = vcombine.high %v9654_v54, %v9658_v31  ;;  %v9634_v54 = vld [vmem:[#allocation6 + $0x29b0] sm:$0xff] }
 0x5bc   :  { %v9380_v14 = vpop.f32.mrf.mxu1  ;;  %12174 = vmatprep.subr.bf16.mxu1 %v16990_v6  ;;  %v9423_v25 = vpop.f32.mrf.mxu0  ;;  %v9522_v6 = vld [vmem:[#allocation6 + $0x2630] sm:$0xff] }
 0x5bd   :  { %v18738_v61 = vadd.f32 %v9419_v3, %v9379_v1  ;;  %v9381_v43 = vadd.f32 %v9380_v14, %v9340_v44  ;;  %v9646_v44 = vld [vmem:[#allocation6 + $0x2a10] sm:$0xff]  ;;  %v16712_v28 = vcombine.high %v9518_v29, %v9522_v6 }
 0x5be   :  { %v9382_v39 = vpop.f32.mrf.mxu1  ;;  %v9424_v60 = vpop.f32.mrf.mxu0  ;;  %v9650_v3 = vld [vmem:[#allocation6 + $0x2a30] sm:$0xff] }
 0x5bf   :  { %18892 = vst [vmem:[#allocation20_spill] sm:$0xff] %v18738_v61  ;;  %v18740_v58 = vadd.f32 %v9421_v41, %v9381_v43  ;;  %12175 = vmatpush2.bf16.msra.mxu1 %v16989_v12  ;;  %v16840_v27 = vcombine.high %v9646_v44, %v9650_v3  ;;  %v9514_v1 = vld [vmem:[#allocation6 + $0x25f0] sm:$0xff]  ;;  %v16839_v14 = vcombine.low %v9646_v44, %v9650_v3  ;;  %v9539_v61 = vld [vmem:[#allocation6 + $0x26b8] sm:$0xff] }
 0x5c0   :  { %v9383_v21 = vpop.f32.mrf.mxu1  ;;  %12267 = vmatprep.subr.bf16.mxu1 %v16856_v34  ;;  %17060 = vmatmul.mubr.msk.bf16.vlgmr.msra.gmra.mxu0 %vm2510_vm0, %v18705_v10  ;;  %v9638_v41 = vld [vmem:[#allocation6 + $0x29d0] sm:$0xff]  ;;  %v16711_v10 = vcombine.low %v9518_v29, %v9522_v6  ;;  %v16704_v34 = vcombine.high %v9510_v63, %v9514_v1  ;;  %v16703_v31 = vcombine.low %v9510_v63, %v9514_v1 }
 0x5c1   :  { %12227 = vmatpush1.bf16.msra.mxu0 %v16727_v53  ;;  %12258 = vmatprep.mubr.bf16.mxu0 %v18662_v45  ;;  %v9642_v12 = vld [vmem:[#allocation6 + $0x29f0] sm:$0xff] }
 0x5c2   :  { %12177 = vmatmul.mubr.bf16.vlgmr.msra.gmra.mxu1 %v18717_v18  ;;  %12228 = vmatprep.subr.bf16.mxu0 %v16720_v55  ;;  %v16832_v48 = vcombine.high %v9638_v41, %v9642_v12  ;;  %v9506_v43 = vld [vmem:[#allocation6 + $0x25b0] sm:$0xff]  ;;  %v16831_v39 = vcombine.low %v9638_v41, %v9642_v12 }
 0x5c3   :  { %12268 = vmatpush1.bf16.msra.mxu1 %v16855_v2  ;;  %12299 = vmatprep.mubr.bf16.mxu1 %v18668_v24  ;;  %v9630_v25 = vld [vmem:[#allocation6 + $0x2990] sm:$0xff]  ;;  %v16696_v53 = vcombine.high %v9502_v47, %v9506_v43  ;;  %v16695_v29 = vcombine.low %v9502_v47, %v9506_v43 }
 0x5c4   :  { %12269 = vmatprep.subr.bf16.mxu1 %v16848_v33  ;;  %v16824_v60 = vcombine.high %v9630_v25, %v9634_v54  ;;  %v9494_v2 = vld [vmem:[#allocation6 + $0x2550] sm:$0xff]  ;;  %v16823_v6 = vcombine.low %v9630_v25, %v9634_v54 }
 0x5c5   :  { %12229 = vmatpush1.bf16.msra.mxu0 %v16719_v56  ;;  %v9498_v55 = vld [vmem:[#allocation6 + $0x2570] sm:$0xff] }
 0x5c6   :  { %12230 = vmatprep.subr.bf16.mxu0 %v16712_v28  ;;  %v9622_v21 = vld [vmem:[#allocation6 + $0x2950] sm:$0xff]  ;;  %v16688_v44 = vcombine.high %v9494_v2, %v9498_v55  ;;  %v16687_v63 = vcombine.low %v9494_v2, %v9498_v55 }
 0x5c7   :  { %12270 = vmatpush1.bf16.msra.mxu1 %v16847_v5  ;;  %v9626_v33 = vld [vmem:[#allocation6 + $0x2970] sm:$0xff] }
 0x5c8   :  { %12271 = vmatprep.subr.bf16.mxu1 %v16840_v27  ;;  %v16816_v3 = vcombine.high %v9622_v21, %v9626_v33  ;;  %v9486_v56 = vld [vmem:[#allocation6 + $0x2510] sm:$0xff]  ;;  %v16815_v1 = vcombine.low %v9622_v21, %v9626_v33 }
 0x5c9   :  { %12231 = vmatpush1.bf16.msra.mxu0 %v16711_v10  ;;  %v9490_v5 = vld [vmem:[#allocation6 + $0x2530] sm:$0xff] }
 0x5ca   :  { %12232 = vmatprep.subr.bf16.mxu0 %v16704_v34  ;;  %v9614_v28 = vld [vmem:[#allocation6 + $0x2910] sm:$0xff]  ;;  %v16680_v41 = vcombine.high %v9486_v56, %v9490_v5  ;;  %v16679_v47 = vcombine.low %v9486_v56, %v9490_v5 }
 0x5cb   :  { %12272 = vmatpush1.bf16.msra.mxu1 %v16839_v14  ;;  %v9618_v27 = vld [vmem:[#allocation6 + $0x2930] sm:$0xff] }
 0x5cc   :  { %12273 = vmatprep.subr.bf16.mxu1 %v16832_v48  ;;  %v16808_v12 = vcombine.high %v9614_v28, %v9618_v27  ;;  %v9478_v10 = vld [vmem:[#allocation6 + $0x24d0] sm:$0xff]  ;;  %v16807_v43 = vcombine.low %v9614_v28, %v9618_v27 }
 0x5cd   :  { %12233 = vmatpush1.bf16.msra.mxu0 %v16703_v31  ;;  %v9482_v14 = vld [vmem:[#allocation6 + $0x24f0] sm:$0xff] }
 0x5ce   :  { %12234 = vmatprep.subr.bf16.mxu0 %v16696_v53  ;;  %v9606_v34 = vld [vmem:[#allocation6 + $0x28d0] sm:$0xff]  ;;  %v16672_v25 = vcombine.high %v9478_v10, %v9482_v14  ;;  %v16671_v2 = vcombine.low %v9478_v10, %v9482_v14 }
 0x5cf   :  { %12274 = vmatpush1.bf16.msra.mxu1 %v16831_v39  ;;  %v9610_v48 = vld [vmem:[#allocation6 + $0x28f0] sm:$0xff] }
 0x5d0   :  { %12275 = vmatprep.subr.bf16.mxu1 %v16824_v60  ;;  %v16800_v54 = vcombine.high %v9606_v34, %v9610_v48  ;;  %v9598_v31 = vld [vmem:[#allocation6 + $0x2890] sm:$0xff]  ;;  %v16799_v55 = vcombine.low %v9606_v34, %v9610_v48 }
 0x5d1   :  { %12235 = vmatpush1.bf16.msra.mxu0 %v16695_v29  ;;  %v9602_v39 = vld [vmem:[#allocation6 + $0x28b0] sm:$0xff] }
 0x5d2   :  { %12236 = vmatprep.subr.bf16.mxu0 %v16688_v44  ;;  %v9726_v53 = vld [vmem:[#allocation6 + $0x2c90] sm:$0xff]  ;;  %v16792_v21 = vcombine.high %v9598_v31, %v9602_v39  ;;  %v16791_v56 = vcombine.low %v9598_v31, %v9602_v39 }
 0x5d3   :  { %12276 = vmatpush1.bf16.msra.mxu1 %v16823_v6  ;;  %v9730_v60 = vld [vmem:[#allocation6 + $0x2cb0] sm:$0xff] }
 0x5d4   :  { %12277 = vmatprep.subr.bf16.mxu1 %v16816_v3  ;;  %v16920_v33 = vcombine.high %v9726_v53, %v9730_v60  ;;  %v9590_v29 = vld [vmem:[#allocation6 + $0x2850] sm:$0xff]  ;;  %v16919_v5 = vcombine.low %v9726_v53, %v9730_v60 }
 0x5d5   :  { %12237 = vmatpush1.bf16.msra.mxu0 %v16687_v63  ;;  %v9594_v6 = vld [vmem:[#allocation6 + $0x2870] sm:$0xff] }
 0x5d6   :  { %12238 = vmatprep.subr.bf16.mxu0 %v16680_v41  ;;  %v9718_v44 = vld [vmem:[#allocation6 + $0x2c50] sm:$0xff]  ;;  %v16784_v28 = vcombine.high %v9590_v29, %v9594_v6  ;;  %v16783_v10 = vcombine.low %v9590_v29, %v9594_v6 }
 0x5d7   :  { %12278 = vmatpush1.bf16.msra.mxu1 %v16815_v1  ;;  %v9722_v3 = vld [vmem:[#allocation6 + $0x2c70] sm:$0xff] }
 0x5d8   :  { %12279 = vmatprep.subr.bf16.mxu1 %v16808_v12  ;;  %v16912_v27 = vcombine.high %v9718_v44, %v9722_v3  ;;  %v9582_v63 = vld [vmem:[#allocation6 + $0x2810] sm:$0xff]  ;;  %v16911_v14 = vcombine.low %v9718_v44, %v9722_v3 }
 0x5d9   :  { %12239 = vmatpush1.bf16.msra.mxu0 %v16679_v47  ;;  %v9586_v1 = vld [vmem:[#allocation6 + $0x2830] sm:$0xff] }
 0x5da   :  { %12240 = vmatprep.subr.bf16.mxu0 %v16672_v25  ;;  %v9710_v41 = vld [vmem:[#allocation6 + $0x2c10] sm:$0xff]  ;;  %v16776_v34 = vcombine.high %v9582_v63, %v9586_v1  ;;  %v16775_v31 = vcombine.low %v9582_v63, %v9586_v1 }
 0x5db   :  { %12280 = vmatpush1.bf16.msra.mxu1 %v16807_v43  ;;  %v9714_v12 = vld [vmem:[#allocation6 + $0x2c30] sm:$0xff] }
 0x5dc   :  { %12281 = vmatprep.subr.bf16.mxu1 %v16800_v54  ;;  %v16904_v48 = vcombine.high %v9710_v41, %v9714_v12  ;;  %v9574_v47 = vld [vmem:[#allocation6 + $0x27d0] sm:$0xff]  ;;  %v16903_v39 = vcombine.low %v9710_v41, %v9714_v12 }
 0x5dd   :  { %12241 = vmatpush1.bf16.msra.mxu0 %v16671_v2  ;;  %v9578_v43 = vld [vmem:[#allocation6 + $0x27f0] sm:$0xff] }
 0x5de   :  { %12242 = vmatprep.subr.bf16.mxu0 %v16792_v21  ;;  %v9702_v25 = vld [vmem:[#allocation6 + $0x2bd0] sm:$0xff]  ;;  %v16768_v53 = vcombine.high %v9574_v47, %v9578_v43  ;;  %v16767_v29 = vcombine.low %v9574_v47, %v9578_v43 }
 0x5df   :  { %12282 = vmatpush1.bf16.msra.mxu1 %v16799_v55  ;;  %v9706_v54 = vld [vmem:[#allocation6 + $0x2bf0] sm:$0xff] }
 0x5e0   :  { %12283 = vmatprep.subr.bf16.mxu1 %v16920_v33  ;;  %v16896_v60 = vcombine.high %v9702_v25, %v9706_v54  ;;  %v9566_v2 = vld [vmem:[#allocation6 + $0x2790] sm:$0xff]  ;;  %v16895_v6 = vcombine.low %v9702_v25, %v9706_v54  ;;  %v18747_v54 = vld [vmem:[#allocation8 + $0x18] sm:$0xff] }
 0x5e1   :  { %12243 = vmatpush2.bf16.msra.mxu0 %v16791_v56  ;;  %v9570_v55 = vld [vmem:[#allocation6 + $0x27b0] sm:$0xff] }
 0x5e2   :  { %12244 = vmatprep.subr.bf16.mxu0 %v16784_v28  ;;  %v9694_v21 = vld [vmem:[#allocation6 + $0x2b90] sm:$0xff]  ;;  %v16760_v44 = vcombine.high %v9566_v2, %v9570_v55  ;;  %v16759_v63 = vcombine.low %v9566_v2, %v9570_v55 }
 0x5e3   :  { %12284 = vmatpush2.bf16.msra.mxu1 %v16919_v5  ;;  %v9698_v33 = vld [vmem:[#allocation6 + $0x2bb0] sm:$0xff] }
 0x5e4   :  { %12285 = vmatprep.subr.bf16.mxu1 %v16912_v27  ;;  %v16888_v3 = vcombine.high %v9694_v21, %v9698_v33  ;;  %v9558_v56 = vld [vmem:[#allocation6 + $0x2750] sm:$0xff]  ;;  %v16887_v1 = vcombine.low %v9694_v21, %v9698_v33  ;;  %v9874_v21 = vrot.slane %v18747_v54, %v18307_v52 }
 0x5e5   :  { %12245 = vmatpush2.bf16.msra.mxu0 %v16783_v10  ;;  %v9562_v5 = vld [vmem:[#allocation6 + $0x2770] sm:$0xff] }
 0x5e6   :  { %12246 = vmatprep.subr.bf16.mxu0 %v16776_v34  ;;  %v9686_v28 = vld [vmem:[#allocation6 + $0x2b50] sm:$0xff]  ;;  %v16752_v41 = vcombine.high %v9558_v56, %v9562_v5  ;;  %v16751_v47 = vcombine.low %v9558_v56, %v9562_v5 }
 0x5e7   :  { %12286 = vmatpush2.bf16.msra.mxu1 %v16911_v14  ;;  %v9690_v27 = vld [vmem:[#allocation6 + $0x2b70] sm:$0xff] }
 0x5e8   :  { %12287 = vmatprep.subr.bf16.mxu1 %v16904_v48  ;;  %v16880_v12 = vcombine.high %v9686_v28, %v9690_v27  ;;  %v9550_v10 = vld [vmem:[#allocation6 + $0x2710] sm:$0xff]  ;;  %v16879_v43 = vcombine.low %v9686_v28, %v9690_v27 }
 0x5e9   :  { %12247 = vmatpush2.bf16.msra.mxu0 %v16775_v31  ;;  %v9554_v14 = vld [vmem:[#allocation6 + $0x2730] sm:$0xff] }
 0x5ea   :  { %12248 = vmatprep.subr.bf16.mxu0 %v16768_v53  ;;  %v9678_v34 = vld [vmem:[#allocation6 + $0x2b10] sm:$0xff]  ;;  %v16744_v25 = vcombine.high %v9550_v10, %v9554_v14  ;;  %v16743_v55 = vcombine.low %v9550_v10, %v9554_v14 }
 0x5eb   :  { %12288 = vmatpush2.bf16.msra.mxu1 %v16903_v39  ;;  %v9682_v48 = vld [vmem:[#allocation6 + $0x2b30] sm:$0xff] }
 0x5ec   :  { %12289 = vmatprep.subr.bf16.mxu1 %v16896_v60  ;;  %v16872_v31 = vcombine.high %v9678_v34, %v9682_v48  ;;  %v9542_v39 = vld [vmem:[#allocation6 + $0x26d0] sm:$0xff]  ;;  %v16871_v33 = vcombine.low %v9678_v34, %v9682_v48 }
 0x5ed   :  { %12249 = vmatpush2.bf16.msra.mxu0 %v16767_v29  ;;  %v9546_v53 = vld [vmem:[#allocation6 + $0x26f0] sm:$0xff] }
 0x5ee   :  { %12250 = vmatprep.subr.bf16.mxu0 %v16760_v44  ;;  %v9670_v60 = vld [vmem:[#allocation6 + $0x2ad0] sm:$0xff]  ;;  %v16736_v29 = vcombine.high %v9542_v39, %v9546_v53 }
 0x5ef   :  { %12290 = vmatpush2.bf16.msra.mxu1 %v16895_v6  ;;  %v9674_v2 = vld [vmem:[#allocation6 + $0x2af0] sm:$0xff]  ;;  %v9878_v6 = vrot.slane %v18747_v54, %v18310_v0 }
 0x5f0   :  { %12291 = vmatprep.subr.bf16.mxu1 %v16888_v3  ;;  %v16864_v44 = vcombine.high %v9670_v60, %v9674_v2  ;;  %v9790_v3 = vld [vmem:[#allocation6 + $0x2e90] sm:$0xff] }
 0x5f1   :  { %12251 = vmatpush2.bf16.msra.mxu0 %v16759_v63  ;;  %v9794_v56 = vld [vmem:[#allocation6 + $0x2eb0] sm:$0xff] }
 0x5f2   :  { %12252 = vmatprep.subr.bf16.mxu0 %v16752_v41  ;;  %v9862_v28 = vld [vmem:[#allocation6 + $0x30d0] sm:$0xff]  ;;  %v16735_v41 = vcombine.low %v9542_v39, %v9546_v53  ;;  %v16984_v10 = vcombine.high %v9790_v3, %v9794_v56  ;;  %v16983_v39 = vcombine.low %v9790_v3, %v9794_v56 }
 0x5f3   :  { %12292 = vmatpush2.bf16.msra.mxu1 %v16887_v1  ;;  %v9866_v27 = vld [vmem:[#allocation6 + $0x30f0] sm:$0xff] }
 0x5f4   :  { %12293 = vmatprep.subr.bf16.mxu1 %v16880_v12  ;;  %v16863_v12 = vcombine.low %v9670_v60, %v9674_v2  ;;  %v17056_v0 = vcombine.high %v9862_v28, %v9866_v27  ;;  %v17055_v60 = vcombine.low %v9862_v28, %v9866_v27  ;;  %v9766_v28 = vld [vmem:[#allocation6 + $0x2dd0] sm:$0xff] }
 0x5f5   :  { %12253 = vmatpush2.bf16.msra.mxu0 %v16751_v47  ;;  %v9782_v47 = vld [vmem:[#allocation6 + $0x2e50] sm:$0xff] }
 0x5f6   :  { %12254 = vmatprep.subr.bf16.mxu0 %v16744_v25  ;;  %v9770_v27 = vld [vmem:[#allocation6 + $0x2df0] sm:$0xff] }
 0x5f7   :  { %12294 = vmatpush2.bf16.msra.mxu1 %v16879_v43  ;;  %v9786_v43 = vld [vmem:[#allocation6 + $0x2e70] sm:$0xff] }
 0x5f8   :  { %12295 = vmatprep.subr.bf16.mxu1 %v16872_v31  ;;  %v11932_v5 = vpop.f32.mrf.mxu0  ;;  %v9535_v31 = vld [vmem:[#allocation6 + $0x2698] sm:$0xff]  ;;  %v16976_v2 = vcombine.high %v9782_v47, %v9786_v43 }
 0x5f9   :  { %v11933_v63 = vadd.f32 %v11932_v5, %v9874_v21  ;;  %12255 = vmatpush2.bf16.msra.mxu0 %v16743_v55 }
 0x5fa   :  { %v11973_v1 = vpop.f32.mrf.mxu1  ;;  %v11934_v52 = vpop.f32.mrf.mxu0  ;;  %12256 = vmatprep.subr.bf16.mxu0 %v16736_v29  ;;  %v16730_v29 = vcombine.high %v9535_v31, %v9539_v61 }
 0x5fb   :  { %12296 = vmatpush2.bf16.msra.mxu1 %v16871_v33  ;;  %v18753_v14 = vadd.f32 %v11973_v1, %v11933_v63  ;;  %v11935_v34 = vadd.f32 %v11934_v52, %v9878_v6  ;;  %v9774_v6 = vld [vmem:[#allocation6 + $0x2e10] sm:$0xff]  ;;  %v16975_v63 = vcombine.low %v9782_v47, %v9786_v43  ;;  %v9527_v1 = vld [vmem:[#allocation6 + $0x2658] sm:$0xff] }
 0x5fc   :  { %v11975_v48 = vpop.f32.mrf.mxu1  ;;  %12297 = vmatprep.subr.bf16.mxu1 %v16864_v44  ;;  %v11936_v25 = vpop.f32.mrf.mxu0  ;;  %v9778_v44 = vld [vmem:[#allocation6 + $0x2e30] sm:$0xff] }
 0x5fd   :  { %v18755_v21 = vadd.f32 %v11975_v48, %v11935_v34  ;;  %12257 = vmatpush2.bf16.msra.mxu0 %v16735_v41  ;;  %v16968_v3 = vcombine.high %v9774_v6, %v9778_v44  ;;  %v9531_v41 = vld [vmem:[#allocation6 + $0x2678] sm:$0xff]  ;;  %v16960_v34 = vcombine.high %v9766_v28, %v9770_v27  ;;  %v9758_v47 = vld [vmem:[#allocation6 + $0x2d90] sm:$0xff] }
 0x5fe   :  { %v11977_v55 = vpop.f32.mrf.mxu1  ;;  %v11937_v53 = vpop.f32.mrf.mxu0  ;;  %12308 = vmatprep.subr.bf16.mxu0 %v16984_v10  ;;  %v16729_v10 = vcombine.low %v9535_v31, %v9539_v61  ;;  %v9762_v43 = vld [vmem:[#allocation6 + $0x2db0] sm:$0xff]  ;;  %v9519_v25 = vld [vmem:[#allocation6 + $0x2618] sm:$0xff] }
 0x5ff   :  { %12298 = vmatpush2.bf16.msra.mxu1 %v16863_v12  ;;  %v16967_v12 = vcombine.low %v9774_v6, %v9778_v44  ;;  %v9523_v55 = vld [vmem:[#allocation6 + $0x2638] sm:$0xff]  ;;  %v16959_v53 = vcombine.low %v9766_v28, %v9770_v27  ;;  %v9750_v31 = vld [vmem:[#allocation6 + $0x2d50] sm:$0xff]  ;;  %v16951_v44 = vcombine.low %v9758_v47, %v9762_v43 }
 0x600   :  { %v11978_v33 = vpop.f32.mrf.mxu1  ;;  %12363 = vmatprep.subr.bf16.mxu1 %v17056_v0  ;;  %12259 = vmatmul.mubr.bf16.vlgmr.msra.gmra.mxu0 %v18683_v22  ;;  %v16722_v0 = vcombine.high %v9527_v1, %v9531_v41  ;;  %v16714_v61 = vcombine.high %v9519_v25, %v9523_v55  ;;  %v9515_v6 = vld [vmem:[#allocation6 + $0x25f8] sm:$0xff]  ;;  %v9742_v27 = vld [vmem:[#allocation6 + $0x2d10] sm:$0xff] }
 0x601   :  { %12309 = vmatpush1.bf16.msra.mxu0 %v16983_v39  ;;  %12340 = vmatprep.mubr.bf16.mxu0 %v18696_v62  ;;  %v18765_v39 = vld [vmem:[#allocation3 + $0x6c] ss:$0 sps:$4 sm:$0xff]   ;;  %v9754_v33 = vld [vmem:[#allocation6 + $0x2d70] sm:$0xff] }
 0x602   :  { %12300 = vmatmul.mubr.bf16.vlgmr.msra.gmra.mxu1 %v18689_v11  ;;  %v18759_v5 = vpop.f32.mrf.mxu1  ;;  %12310 = vmatprep.subr.bf16.mxu0 %v16976_v2  ;;  %v16952_v2 = vcombine.high %v9758_v47, %v9762_v43  ;;  %v9495_v47 = vld [vmem:[#allocation6 + $0x2558] sm:$0xff] }
 0x603   :  { %12364 = vmatpush1.bf16.msra.mxu1 %v17055_v60  ;;  %12381 = vmatprep.mubr.bf16.mxu1 %v18891_v19  ;;  %v16721_v60 = vcombine.low %v9527_v1, %v9531_v41  ;;  %v9746_v1 = vld [vmem:[#allocation6 + $0x2d30] sm:$0xff]  ;;  %v9503_v41 = vld [vmem:[#allocation6 + $0x2598] sm:$0xff] }
 0x604   :  { %v18761_v56 = vpop.f32.mrf.mxu1  ;;  %12390 = vmatprep.subr.bf16.mxu1 %v16730_v29  ;;  %v9511_v29 = vld [vmem:[#allocation6 + $0x25d8] sm:$0xff] }
 0x605   :  { %12311 = vmatpush1.bf16.msra.mxu0 %v16975_v63  ;;  %v16713_v63 = vcombine.low %v9519_v25, %v9523_v55  ;;  %v16706_v28 = vcombine.high %v9511_v29, %v9515_v6  ;;  %v9499_v43 = vld [vmem:[#allocation6 + $0x2578] sm:$0xff]  ;;  %v16935_v25 = vcombine.low %v9742_v27, %v9746_v1 }
 0x606   :  { %v12059_v52 = vpop.f32.mrf.mxu1  ;;  %12312 = vmatprep.subr.bf16.mxu0 %v16968_v3  ;;  %v16944_v3 = vcombine.high %v9750_v31, %v9754_v33 }
 0x607   :  { %v9507_v52 = vld [vmem:[#allocation6 + $0x25b8] sm:$0xff] }
 0x608   :  { %v12060_v48 = vpop.f32.mrf.mxu1  ;;  %v16697_v55 = vcombine.low %v9503_v41, %v9507_v52 }
 0x609   :  { %12313 = vmatpush1.bf16.msra.mxu0 %v16967_v12  ;;  %v16943_v12 = vcombine.low %v9750_v31, %v9754_v33  ;;  %v9734_v48 = vld [vmem:[#allocation6 + $0x2cd0] sm:$0xff]  ;;  %v9487_v31 = vld [vmem:[#allocation6 + $0x2518] sm:$0xff] }
 0x60a   :  { %17061 = vmatmul.mubr.msk.bf16.vlgmr.msra.gmra.mxu1 %vm2510_vm0, %v18765_v39  ;;  %12314 = vmatprep.subr.bf16.mxu0 %v16960_v34  ;;  %v16698_v34 = vcombine.high %v9503_v41, %v9507_v52  ;;  %v9491_v33 = vld [vmem:[#allocation6 + $0x2538] sm:$0xff] }
 0x60b   :  { %12391 = vmatpush1.bf16.msra.mxu1 %v16729_v10  ;;  %12422 = vmatprep.mubr.bf16.mxu1 %v18662_v45  ;;  %v16705_v10 = vcombine.low %v9511_v29, %v9515_v6  ;;  %v16936_v45 = vcombine.high %v9742_v27, %v9746_v1  ;;  %v16689_v6 = vcombine.low %v9495_v47, %v9499_v43  ;;  %v9479_v27 = vld [vmem:[#allocation6 + $0x24d8] sm:$0xff] }
 0x60c   :  { %12392 = vmatprep.subr.bf16.mxu1 %v16722_v0  ;;  %v9738_v0 = vld [vmem:[#allocation6 + $0x2cf0] sm:$0xff]  ;;  %v9483_v1 = vld [vmem:[#allocation6 + $0x24f8] sm:$0xff]  ;;  %v16681_v52 = vcombine.low %v9487_v31, %v9491_v33 }
 0x60d   :  { %12315 = vmatpush1.bf16.msra.mxu0 %v16959_v53  ;;  %v16928_v53 = vcombine.high %v9734_v48, %v9738_v0  ;;  %v16927_v29 = vcombine.low %v9734_v48, %v9738_v0  ;;  %v9599_v48 = vld [vmem:[#allocation6 + $0x2898] sm:$0xff] }
 0x60e   :  { %12316 = vmatprep.subr.bf16.mxu0 %v16952_v2  ;;  %v9854_v2 = vld [vmem:[#allocation6 + $0x3090] sm:$0xff]  ;;  %v9603_v0 = vld [vmem:[#allocation6 + $0x28b8] sm:$0xff] }
 0x60f   :  { %12393 = vmatpush1.bf16.msra.mxu1 %v16721_v60  ;;  %v16690_v60 = vcombine.high %v9495_v47, %v9499_v43  ;;  %v16673_v43 = vcombine.low %v9479_v27, %v9483_v1 }
 0x610   :  { %12394 = vmatprep.subr.bf16.mxu1 %v16714_v61  ;;  %v9858_v61 = vld [vmem:[#allocation6 + $0x30b0] sm:$0xff] }
 0x611   :  { %12317 = vmatpush1.bf16.msra.mxu0 %v16951_v44  ;;  %v17048_v44 = vcombine.high %v9854_v2, %v9858_v61  ;;  %v17047_v41 = vcombine.low %v9854_v2, %v9858_v61  ;;  %v9591_v2 = vld [vmem:[#allocation6 + $0x2858] sm:$0xff] }
 0x612   :  { %12318 = vmatprep.subr.bf16.mxu0 %v16944_v3  ;;  %v9846_v3 = vld [vmem:[#allocation6 + $0x3050] sm:$0xff]  ;;  %v9595_v61 = vld [vmem:[#allocation6 + $0x2878] sm:$0xff] }
 0x613   :  { %12395 = vmatpush1.bf16.msra.mxu1 %v16713_v63  ;;  %v16682_v63 = vcombine.high %v9487_v31, %v9491_v33  ;;  %v16793_v33 = vcombine.low %v9599_v48, %v9603_v0 }
 0x614   :  { %12396 = vmatprep.subr.bf16.mxu1 %v16706_v28  ;;  %v9850_v28 = vld [vmem:[#allocation6 + $0x3070] sm:$0xff] }
 0x615   :  { %12319 = vmatpush1.bf16.msra.mxu0 %v16943_v12  ;;  %v17040_v12 = vcombine.high %v9846_v3, %v9850_v28  ;;  %v17039_v47 = vcombine.low %v9846_v3, %v9850_v28  ;;  %v9583_v3 = vld [vmem:[#allocation6 + $0x2818] sm:$0xff] }
 0x616   :  { %12320 = vmatprep.subr.bf16.mxu0 %v16936_v45  ;;  %v9838_v45 = vld [vmem:[#allocation6 + $0x3010] sm:$0xff]  ;;  %v9587_v28 = vld [vmem:[#allocation6 + $0x2838] sm:$0xff] }
 0x617   :  { %12397 = vmatpush1.bf16.msra.mxu1 %v16705_v10  ;;  %v16674_v10 = vcombine.high %v9479_v27, %v9483_v1  ;;  %v16785_v1 = vcombine.low %v9591_v2, %v9595_v61 }
 0x618   :  { %12398 = vmatprep.subr.bf16.mxu1 %v16698_v34  ;;  %v9842_v34 = vld [vmem:[#allocation6 + $0x3030] sm:$0xff] }
 0x619   :  { %12321 = vmatpush1.bf16.msra.mxu0 %v16935_v25  ;;  %v17032_v25 = vcombine.high %v9838_v45, %v9842_v34  ;;  %v17031_v31 = vcombine.low %v9838_v45, %v9842_v34  ;;  %v9575_v45 = vld [vmem:[#allocation6 + $0x27d8] sm:$0xff] }
 0x61a   :  { %12322 = vmatprep.subr.bf16.mxu0 %v16928_v53  ;;  %v9830_v53 = vld [vmem:[#allocation6 + $0x2fd0] sm:$0xff]  ;;  %v9579_v34 = vld [vmem:[#allocation6 + $0x27f8] sm:$0xff] }
 0x61b   :  { %12399 = vmatpush1.bf16.msra.mxu1 %v16697_v55  ;;  %v16794_v55 = vcombine.high %v9599_v48, %v9603_v0  ;;  %v16777_v0 = vcombine.low %v9583_v3, %v9587_v28 }
 0x61c   :  { %12400 = vmatprep.subr.bf16.mxu1 %v16690_v60  ;;  %v9834_v60 = vld [vmem:[#allocation6 + $0x2ff0] sm:$0xff] }
 0x61d   :  { %12323 = vmatpush1.bf16.msra.mxu0 %v16927_v29  ;;  %v17024_v29 = vcombine.high %v9830_v53, %v9834_v60  ;;  %v17023_v27 = vcombine.low %v9830_v53, %v9834_v60  ;;  %v9567_v53 = vld [vmem:[#allocation6 + $0x2798] sm:$0xff] }
 0x61e   :  { %12324 = vmatprep.subr.bf16.mxu0 %v17048_v44  ;;  %v9822_v44 = vld [vmem:[#allocation6 + $0x2f90] sm:$0xff]  ;;  %v9571_v60 = vld [vmem:[#allocation6 + $0x27b8] sm:$0xff] }
 0x61f   :  { %12401 = vmatpush1.bf16.msra.mxu1 %v16689_v6  ;;  %v16786_v6 = vcombine.high %v9591_v2, %v9595_v61  ;;  %v16769_v61 = vcombine.low %v9575_v45, %v9579_v34 }
 0x620   :  { %12402 = vmatprep.subr.bf16.mxu1 %v16682_v63  ;;  %v9826_v63 = vld [vmem:[#allocation6 + $0x2fb0] sm:$0xff] }
 0x621   :  { %12325 = vmatpush2.bf16.msra.mxu0 %v17047_v41  ;;  %v17016_v41 = vcombine.high %v9822_v44, %v9826_v63  ;;  %v17015_v48 = vcombine.low %v9822_v44, %v9826_v63  ;;  %v9559_v44 = vld [vmem:[#allocation6 + $0x2758] sm:$0xff] }
 0x622   :  { %12326 = vmatprep.subr.bf16.mxu0 %v17040_v12  ;;  %v9814_v12 = vld [vmem:[#allocation6 + $0x2f50] sm:$0xff]  ;;  %v9563_v63 = vld [vmem:[#allocation6 + $0x2778] sm:$0xff] }
 0x623   :  { %12403 = vmatpush1.bf16.msra.mxu1 %v16681_v52  ;;  %v16778_v52 = vcombine.high %v9583_v3, %v9587_v28  ;;  %v16761_v28 = vcombine.low %v9567_v53, %v9571_v60 }
 0x624   :  { %12404 = vmatprep.subr.bf16.mxu1 %v16674_v10  ;;  %v9818_v10 = vld [vmem:[#allocation6 + $0x2f70] sm:$0xff] }
 0x625   :  { %12327 = vmatpush2.bf16.msra.mxu0 %v17039_v47  ;;  %v17008_v47 = vcombine.high %v9814_v12, %v9818_v10  ;;  %v17007_v2 = vcombine.low %v9814_v12, %v9818_v10  ;;  %v9551_v10 = vld [vmem:[#allocation6 + $0x2718] sm:$0xff] }
 0x626   :  { %12328 = vmatprep.subr.bf16.mxu0 %v17032_v25  ;;  %v9806_v25 = vld [vmem:[#allocation6 + $0x2f10] sm:$0xff] }
 0x627   :  { %12405 = vmatpush1.bf16.msra.mxu1 %v16673_v43  ;;  %v16770_v43 = vcombine.high %v9575_v45, %v9579_v34  ;;  %v9555_v45 = vld [vmem:[#allocation6 + $0x2738] sm:$0xff] }
 0x628   :  { %12406 = vmatprep.subr.bf16.mxu1 %v16794_v55  ;;  %v9810_v55 = vld [vmem:[#allocation6 + $0x2f30] sm:$0xff] }
 0x629   :  { %12329 = vmatpush2.bf16.msra.mxu0 %v17031_v31  ;;  %v17000_v31 = vcombine.high %v9806_v25, %v9810_v55  ;;  %v16999_v3 = vcombine.low %v9806_v25, %v9810_v55 }
 0x62a   :  { %12330 = vmatprep.subr.bf16.mxu0 %v17024_v29  ;;  %v9798_v29 = vld [vmem:[#allocation6 + $0x2ed0] sm:$0xff] }
 0x62b   :  { %12407 = vmatpush2.bf16.msra.mxu1 %v16793_v33  ;;  %v16762_v33 = vcombine.high %v9567_v53, %v9571_v60  ;;  %v16746_v53 = vcombine.high %v9551_v10, %v9555_v45  ;;  %v9655_v60 = vld [vmem:[#allocation6 + $0x2a58] sm:$0xff] }
 0x62c   :  { %12408 = vmatprep.subr.bf16.mxu1 %v16786_v6  ;;  %v9802_v6 = vld [vmem:[#allocation6 + $0x2ef0] sm:$0xff] }
 0x62d   :  { %12331 = vmatpush2.bf16.msra.mxu0 %v17023_v27  ;;  %v16992_v27 = vcombine.high %v9798_v29, %v9802_v6 }
 0x62e   :  { %12332 = vmatprep.subr.bf16.mxu0 %v17016_v41  ;;  %v9663_v41 = vld [vmem:[#allocation6 + $0x2a98] sm:$0xff] }
 0x62f   :  { %12409 = vmatpush2.bf16.msra.mxu1 %v16785_v1  ;;  %v16754_v1 = vcombine.high %v9559_v44, %v9563_v63 }
 0x630   :  { %12410 = vmatprep.subr.bf16.mxu1 %v16778_v52  ;;  %v9667_v52 = vld [vmem:[#allocation6 + $0x2ab8] sm:$0xff] }
 0x631   :  { %12333 = vmatpush2.bf16.msra.mxu0 %v17015_v48  ;;  %v16991_v48 = vcombine.low %v9798_v29, %v9802_v6  ;;  %v16857_v29 = vcombine.low %v9663_v41, %v9667_v52 }
 0x632   :  { %12334 = vmatprep.subr.bf16.mxu0 %v17008_v47  ;;  %v16753_v47 = vcombine.low %v9559_v44, %v9563_v63  ;;  %v16745_v44 = vcombine.low %v9551_v10, %v9555_v45  ;;  %v9639_v45 = vld [vmem:[#allocation6 + $0x29d8] sm:$0xff] }
 0x633   :  { %12411 = vmatpush2.bf16.msra.mxu1 %v16777_v0 }
 0x634   :  { %12412 = vmatprep.subr.bf16.mxu1 %v16770_v43  ;;  %v16858_v43 = vcombine.high %v9663_v41, %v9667_v52 }
 0x635   :  { %12335 = vmatpush2.bf16.msra.mxu0 %v17007_v2  ;;  %v9659_v2 = vld [vmem:[#allocation6 + $0x2a78] sm:$0xff] }
 0x636   :  { %12336 = vmatprep.subr.bf16.mxu0 %v17000_v31  ;;  %v9543_v31 = vld [vmem:[#allocation6 + $0x26d8] sm:$0xff] }
 0x637   :  { %12413 = vmatpush2.bf16.msra.mxu1 %v16769_v61 }
 0x638   :  { %12414 = vmatprep.subr.bf16.mxu1 %v16762_v33  ;;  %v12014_v12 = vpop.f32.mrf.mxu0  ;;  %v9547_v33 = vld [vmem:[#allocation6 + $0x26f8] sm:$0xff] }
 0x639   :  { %v12015_v34 = vadd.f32 %v12014_v12, %v18753_v14  ;;  %12337 = vmatpush2.bf16.msra.mxu0 %v16999_v3  ;;  %v16738_v63 = vcombine.high %v9543_v31, %v9547_v33  ;;  %v9651_v3 = vld [vmem:[#allocation6 + $0x2a38] sm:$0xff]  ;;  %v16737_v41 = vcombine.low %v9543_v31, %v9547_v33 }
 0x63a   :  { %v12016_v0 = vpop.f32.mrf.mxu0  ;;  %12338 = vmatprep.subr.bf16.mxu0 %v16992_v27  ;;  %v9795_v27 = vld [vmem:[#allocation6 + $0x2eb8] sm:$0xff] }
 0x63b   :  { %12415 = vmatpush2.bf16.msra.mxu1 %v16761_v28  ;;  %v18772_v25 = vadd.f32 %v18759_v5, %v12015_v34  ;;  %v12017_v55 = vadd.f32 %v12016_v0, %v18755_v21  ;;  %v16850_v5 = vcombine.high %v9655_v60, %v9659_v2  ;;  %v9647_v21 = vld [vmem:[#allocation6 + $0x2a18] sm:$0xff] }
 0x63c   :  { %12416 = vmatprep.subr.bf16.mxu1 %v16754_v1  ;;  %v12018_v61 = vpop.f32.mrf.mxu0  ;;  %v9791_v28 = vld [vmem:[#allocation6 + $0x2e98] sm:$0xff]  ;;  %v16842_v52 = vcombine.high %v9647_v21, %v9651_v3 }
 0x63d   :  { %v18776_v14 = vadd.f32 %v18761_v56, %v12017_v55  ;;  %12339 = vmatpush2.bf16.msra.mxu0 %v16991_v48  ;;  %v16849_v56 = vcombine.low %v9655_v60, %v9659_v2  ;;  %v16986_v10 = vcombine.high %v9791_v28, %v9795_v27  ;;  %v9643_v34 = vld [vmem:[#allocation6 + $0x29f8] sm:$0xff]  ;;  %v16985_v55 = vcombine.low %v9791_v28, %v9795_v27 }
 0x63e   :  { %v12019_v6 = vpop.f32.mrf.mxu0  ;;  %12431 = vmatprep.subr.bf16.mxu0 %v16858_v43  ;;  %v9783_v48 = vld [vmem:[#allocation6 + $0x2e58] sm:$0xff]  ;;  %v16841_v43 = vcombine.low %v9647_v21, %v9651_v3 }
 0x63f   :  { %12417 = vmatpush2.bf16.msra.mxu1 %v16753_v47  ;;  %v9787_v0 = vld [vmem:[#allocation6 + $0x2e78] sm:$0xff] }
 0x640   :  { %12418 = vmatprep.subr.bf16.mxu1 %v16746_v53  ;;  %12341 = vmatmul.mubr.bf16.vlgmr.msra.gmra.mxu0 %v18717_v18  ;;  %v16834_v53 = vcombine.high %v9639_v45, %v9643_v34  ;;  %v16978_v60 = vcombine.high %v9783_v48, %v9787_v0  ;;  %v9631_v2 = vld [vmem:[#allocation6 + $0x2998] sm:$0xff]  ;;  %v16977_v6 = vcombine.low %v9783_v48, %v9787_v0 }
 0x641   :  { %12432 = vmatpush1.bf16.msra.mxu0 %v16857_v29  ;;  %12463 = vmatprep.mubr.bf16.mxu0 %v18668_v24  ;;  %v9635_v61 = vld [vmem:[#allocation6 + $0x29b8] sm:$0xff]  ;;  %v16833_v29 = vcombine.low %v9639_v45, %v9643_v34 }
 0x642   :  { %v18779_v1 = vpop.f32.mrf.mxu1  ;;  %12433 = vmatprep.subr.bf16.mxu0 %v16850_v5  ;;  %v9775_v31 = vld [vmem:[#allocation6 + $0x2e18] sm:$0xff]  ;;  %v16825_v27 = vcombine.low %v9631_v2, %v9635_v61 }
 0x643   :  { %12419 = vmatpush2.bf16.msra.mxu1 %v16745_v44  ;;  %v9779_v33 = vld [vmem:[#allocation6 + $0x2e38] sm:$0xff]  ;;  %v16826_v44 = vcombine.high %v9631_v2, %v9635_v61 }
 0x644   :  { %v18782_v12 = vpop.f32.mrf.mxu1  ;;  %12420 = vmatprep.subr.bf16.mxu1 %v16738_v63  ;;  %v16970_v5 = vcombine.high %v9775_v31, %v9779_v33  ;;  %v9623_v63 = vld [vmem:[#allocation6 + $0x2958] sm:$0xff] }
 0x645   :  { %12434 = vmatpush1.bf16.msra.mxu0 %v16849_v56  ;;  %v9627_v21 = vld [vmem:[#allocation6 + $0x2978] sm:$0xff]  ;;  %v16969_v56 = vcombine.low %v9775_v31, %v9779_v33 }
 0x646   :  { %v12100_v47 = vpop.f32.mrf.mxu1  ;;  %12435 = vmatprep.subr.bf16.mxu0 %v16842_v52  ;;  %v9767_v3 = vld [vmem:[#allocation6 + $0x2dd8] sm:$0xff]  ;;  %v16817_v48 = vcombine.low %v9623_v63, %v9627_v21 }
 0x647   :  { %12421 = vmatpush2.bf16.msra.mxu1 %v16737_v41  ;;  %v9771_v28 = vld [vmem:[#allocation6 + $0x2df8] sm:$0xff] }
 0x648   :  { %v12101_v24 = vpop.f32.mrf.mxu1  ;;  %12472 = vmatprep.subr.bf16.mxu1 %v16986_v10  ;;  %v16962_v41 = vcombine.high %v9767_v3, %v9771_v28  ;;  %v9615_v52 = vld [vmem:[#allocation6 + $0x2918] sm:$0xff]  ;;  %v16961_v0 = vcombine.low %v9767_v3, %v9771_v28 }
 0x649   :  { %12436 = vmatpush1.bf16.msra.mxu0 %v16841_v43  ;;  %v9619_v10 = vld [vmem:[#allocation6 + $0x2938] sm:$0xff] }
 0x64a   :  { %12423 = vmatmul.mubr.bf16.vlgmr.msra.gmra.mxu1 %v18683_v22  ;;  %12437 = vmatprep.subr.bf16.mxu0 %v16834_v53  ;;  %v16818_v22 = vcombine.high %v9623_v63, %v9627_v21  ;;  %v9759_v45 = vld [vmem:[#allocation6 + $0x2d98] sm:$0xff] }
 0x64b   :  { %12473 = vmatpush1.bf16.msra.mxu1 %v16985_v55  ;;  %12504 = vmatprep.mubr.bf16.mxu1 %v18696_v62  ;;  %v9763_v34 = vld [vmem:[#allocation6 + $0x2db8] sm:$0xff]  ;;  %v16810_v62 = vcombine.high %v9615_v52, %v9619_v10 }
 0x64c   :  { %12474 = vmatprep.subr.bf16.mxu1 %v16978_v60  ;;  %v16954_v47 = vcombine.high %v9759_v45, %v9763_v34  ;;  %v9607_v43 = vld [vmem:[#allocation6 + $0x28d8] sm:$0xff]  ;;  %v16809_v60 = vcombine.low %v9615_v52, %v9619_v10  ;;  %v16953_v2 = vcombine.low %v9759_v45, %v9763_v34 }
 0x64d   :  { %12438 = vmatpush1.bf16.msra.mxu0 %v16833_v29  ;;  %v9611_v55 = vld [vmem:[#allocation6 + $0x28f8] sm:$0xff] }
 0x64e   :  { %12439 = vmatprep.subr.bf16.mxu0 %v16826_v44  ;;  %v9751_v53 = vld [vmem:[#allocation6 + $0x2d58] sm:$0xff]  ;;  %v16802_v61 = vcombine.high %v9607_v43, %v9611_v55 }
 0x64f   :  { %12475 = vmatpush1.bf16.msra.mxu1 %v16977_v6  ;;  %v9755_v24 = vld [vmem:[#allocation6 + $0x2d78] sm:$0xff] }
 0x650   :  { %12476 = vmatprep.subr.bf16.mxu1 %v16970_v5  ;;  %v16946_v31 = vcombine.high %v9751_v53, %v9755_v24  ;;  %v9727_v33 = vld [vmem:[#allocation6 + $0x2c98] sm:$0xff]  ;;  %v16801_v5 = vcombine.low %v9607_v43, %v9611_v55  ;;  %v16945_v63 = vcombine.low %v9751_v53, %v9755_v24 }
 0x651   :  { %12440 = vmatpush1.bf16.msra.mxu0 %v16825_v27  ;;  %v9731_v29 = vld [vmem:[#allocation6 + $0x2cb8] sm:$0xff] }
 0x652   :  { %12441 = vmatprep.subr.bf16.mxu0 %v16818_v22  ;;  %v9743_v6 = vld [vmem:[#allocation6 + $0x2d18] sm:$0xff]  ;;  %v16922_v21 = vcombine.high %v9727_v33, %v9731_v29 }
 0x653   :  { %12477 = vmatpush1.bf16.msra.mxu1 %v16969_v56  ;;  %v9747_v44 = vld [vmem:[#allocation6 + $0x2d38] sm:$0xff] }
 0x654   :  { %12478 = vmatprep.subr.bf16.mxu1 %v16962_v41  ;;  %v16938_v3 = vcombine.high %v9743_v6, %v9747_v44  ;;  %v9719_v28 = vld [vmem:[#allocation6 + $0x2c58] sm:$0xff]  ;;  %v16921_v41 = vcombine.low %v9727_v33, %v9731_v29  ;;  %v16937_v52 = vcombine.low %v9743_v6, %v9747_v44 }
 0x655   :  { %12442 = vmatpush1.bf16.msra.mxu0 %v16817_v48  ;;  %v9723_v27 = vld [vmem:[#allocation6 + $0x2c78] sm:$0xff] }
 0x656   :  { %12443 = vmatprep.subr.bf16.mxu0 %v16810_v62  ;;  %v9735_v56 = vld [vmem:[#allocation6 + $0x2cd8] sm:$0xff]  ;;  %v16914_v10 = vcombine.high %v9719_v28, %v9723_v27 }
 0x657   :  { %12479 = vmatpush1.bf16.msra.mxu1 %v16961_v0  ;;  %v9739_v22 = vld [vmem:[#allocation6 + $0x2cf8] sm:$0xff] }
 0x658   :  { %12480 = vmatprep.subr.bf16.mxu1 %v16954_v47  ;;  %v16930_v45 = vcombine.high %v9735_v56, %v9739_v22  ;;  %v9711_v34 = vld [vmem:[#allocation6 + $0x2c18] sm:$0xff]  ;;  %v16913_v47 = vcombine.low %v9719_v28, %v9723_v27  ;;  %v16929_v43 = vcombine.low %v9735_v56, %v9739_v22 }
 0x659   :  { %12444 = vmatpush1.bf16.msra.mxu0 %v16809_v60  ;;  %v9715_v48 = vld [vmem:[#allocation6 + $0x2c38] sm:$0xff] }
 0x65a   :  { %12445 = vmatprep.subr.bf16.mxu0 %v16802_v61  ;;  %v9855_v0 = vld [vmem:[#allocation6 + $0x3098] sm:$0xff]  ;;  %v16906_v55 = vcombine.high %v9711_v34, %v9715_v48 }
 0x65b   :  { %12481 = vmatpush1.bf16.msra.mxu1 %v16953_v2  ;;  %v9859_v62 = vld [vmem:[#allocation6 + $0x30b8] sm:$0xff] }
 0x65c   :  { %12482 = vmatprep.subr.bf16.mxu1 %v16946_v31  ;;  %v17050_v53 = vcombine.high %v9855_v0, %v9859_v62  ;;  %v9703_v24 = vld [vmem:[#allocation6 + $0x2bd8] sm:$0xff]  ;;  %v16905_v31 = vcombine.low %v9711_v34, %v9715_v48  ;;  %v17049_v33 = vcombine.low %v9855_v0, %v9859_v62 }
 0x65d   :  { %12446 = vmatpush1.bf16.msra.mxu0 %v16801_v5  ;;  %v9707_v60 = vld [vmem:[#allocation6 + $0x2bf8] sm:$0xff] }
 0x65e   :  { %12447 = vmatprep.subr.bf16.mxu0 %v16922_v21  ;;  %v9847_v2 = vld [vmem:[#allocation6 + $0x3058] sm:$0xff]  ;;  %v16898_v29 = vcombine.high %v9703_v24, %v9707_v60 }
 0x65f   :  { %12483 = vmatpush1.bf16.msra.mxu1 %v16945_v63  ;;  %v9851_v61 = vld [vmem:[#allocation6 + $0x3078] sm:$0xff] }
 0x660   :  { %12484 = vmatprep.subr.bf16.mxu1 %v16938_v3  ;;  %v17042_v6 = vcombine.high %v9847_v2, %v9851_v61  ;;  %v9695_v44 = vld [vmem:[#allocation6 + $0x2b98] sm:$0xff]  ;;  %v16897_v3 = vcombine.low %v9703_v24, %v9707_v60  ;;  %v17041_v28 = vcombine.low %v9847_v2, %v9851_v61  ;;  %v9882_v2 = vrot.slane %v18747_v54, %v18346_v7 }
 0x661   :  { %12448 = vmatpush2.bf16.msra.mxu0 %v16921_v41  ;;  %v9699_v5 = vld [vmem:[#allocation6 + $0x2bb8] sm:$0xff] }
 0x662   :  { %12449 = vmatprep.subr.bf16.mxu0 %v16914_v10  ;;  %v9839_v63 = vld [vmem:[#allocation6 + $0x3018] sm:$0xff]  ;;  %v16890_v27 = vcombine.high %v9695_v44, %v9699_v5 }
 0x663   :  { %12485 = vmatpush1.bf16.msra.mxu1 %v16937_v52  ;;  %v9843_v21 = vld [vmem:[#allocation6 + $0x3038] sm:$0xff] }
 0x664   :  { %12486 = vmatprep.subr.bf16.mxu1 %v16930_v45  ;;  %v17034_v56 = vcombine.high %v9839_v63, %v9843_v21  ;;  %v9687_v22 = vld [vmem:[#allocation6 + $0x2b58] sm:$0xff]  ;;  %v16889_v45 = vcombine.low %v9695_v44, %v9699_v5  ;;  %v17033_v34 = vcombine.low %v9839_v63, %v9843_v21  ;;  %v9886_v44 = vrot.slane %v18747_v54, %v18349_v13 }
 0x665   :  { %12450 = vmatpush2.bf16.msra.mxu0 %v16913_v47  ;;  %v9691_v41 = vld [vmem:[#allocation6 + $0x2b78] sm:$0xff] }
 0x666   :  { %12451 = vmatprep.subr.bf16.mxu0 %v16906_v55  ;;  %v9831_v52 = vld [vmem:[#allocation6 + $0x2fd8] sm:$0xff]  ;;  %v16882_v48 = vcombine.high %v9687_v22, %v9691_v41 }
 0x667   :  { %12487 = vmatpush1.bf16.msra.mxu1 %v16929_v43  ;;  %v9835_v10 = vld [vmem:[#allocation6 + $0x2ff8] sm:$0xff] }
 0x668   :  { %12488 = vmatprep.subr.bf16.mxu1 %v17050_v53  ;;  %v17026_v0 = vcombine.high %v9831_v52, %v9835_v10  ;;  %v9679_v62 = vld [vmem:[#allocation6 + $0x2b18] sm:$0xff]  ;;  %v16881_v53 = vcombine.low %v9687_v22, %v9691_v41  ;;  %v17025_v24 = vcombine.low %v9831_v52, %v9835_v10  ;;  %v12099_v52 = vadd.f32 %v18782_v12, %v9886_v44 }
 0x669   :  { %12452 = vmatpush2.bf16.msra.mxu0 %v16905_v31  ;;  %v9683_v47 = vld [vmem:[#allocation6 + $0x2b38] sm:$0xff]  ;;  %v3173_v44 = vmax.f32 %v18367_v17, 0.0  ;;  %v17804_v17 = vld [vmem:[#allocation9 + $0xf0] sm:$0xff]  }
 0x66a   :  { %12453 = vmatprep.subr.bf16.mxu0 %v16898_v29  ;;  %v9823_v43 = vld [vmem:[#allocation6 + $0x2f98] sm:$0xff]  ;;  %v16874_v60 = vcombine.high %v9679_v62, %v9683_v47  ;;  %v16873_v5 = vcombine.low %v9679_v62, %v9683_v47 }
 0x66b   :  { %12489 = vmatpush2.bf16.msra.mxu1 %v17049_v33  ;;  %v9827_v55 = vld [vmem:[#allocation6 + $0x2fb8] sm:$0xff] }
 0x66c   :  { %12490 = vmatprep.subr.bf16.mxu1 %v17042_v6  ;;  %v17018_v61 = vcombine.high %v9823_v43, %v9827_v55  ;;  %v9671_v31 = vld [vmem:[#allocation6 + $0x2ad8] sm:$0xff]  ;;  %v17017_v63 = vcombine.low %v9823_v43, %v9827_v55 }
 0x66d   :  { %12454 = vmatpush2.bf16.msra.mxu0 %v16897_v3  ;;  %v9675_v33 = vld [vmem:[#allocation6 + $0x2af8] sm:$0xff]  ;;  %v12097_v3 = vadd.f32 %v18779_v1, %v9882_v2 }
 0x66e   :  { %12455 = vmatprep.subr.bf16.mxu0 %v16890_v27  ;;  %v9815_v29 = vld [vmem:[#allocation6 + $0x2f58] sm:$0xff]  ;;  %v16866_v21 = vcombine.high %v9671_v31, %v9675_v33  ;;  %v16865_v13 = vcombine.low %v9671_v31, %v9675_v33 }
 0x66f   :  { %12491 = vmatpush2.bf16.msra.mxu1 %v17041_v28  ;;  %v9819_v6 = vld [vmem:[#allocation6 + $0x2f78] sm:$0xff] }
 0x670   :  { %12492 = vmatprep.subr.bf16.mxu1 %v17034_v56  ;;  %v17010_v28 = vcombine.high %v9815_v29, %v9819_v6  ;;  %v9863_v7 = vld [vmem:[#allocation6 + $0x30d8] sm:$0xff] }
 0x671   :  { %12456 = vmatpush2.bf16.msra.mxu0 %v16889_v45  ;;  %v9867_v27 = vld [vmem:[#allocation6 + $0x30f8] sm:$0xff]  ;;  %v17009_v45 = vcombine.low %v9815_v29, %v9819_v6 }
 0x672   :  { %12457 = vmatprep.subr.bf16.mxu0 %v16882_v48  ;;  %v9807_v22 = vld [vmem:[#allocation6 + $0x2f18] sm:$0xff]  ;;  %v17057_v43 = vcombine.low %v9863_v7, %v9867_v27 }
 0x673   :  { %12493 = vmatpush2.bf16.msra.mxu1 %v17033_v34  ;;  %v9811_v41 = vld [vmem:[#allocation6 + $0x2f38] sm:$0xff]  ;;  %v17058_v34 = vcombine.high %v9863_v7, %v9867_v27 }
 0x674   :  { %12494 = vmatprep.subr.bf16.mxu1 %v17026_v0  ;;  %v17002_v1 = vcombine.high %v9807_v22, %v9811_v41  ;;  %v9799_v62 = vld [vmem:[#allocation6 + $0x2ed8] sm:$0xff] }
 0x675   :  { %12458 = vmatpush2.bf16.msra.mxu0 %v16881_v53  ;;  %v9803_v47 = vld [vmem:[#allocation6 + $0x2ef8] sm:$0xff]  ;;  %v17001_v53 = vcombine.low %v9807_v22, %v9811_v41  ;;  %v17803_v22 = vld [vmem:[#allocation9 + $0x70] sm:$0xff]   ;;  %v17375_v41 = vpack.c.bf16 %v3173_v44, %v3173_v44  ;;  %v3170_v44 = vmax.f32 %v18331_v4, 0.0 }
 0x676   :  { %12459 = vmatprep.subr.bf16.mxu0 %v16874_v60  ;;  %v17799_v12 = vld [vmem:[#allocation9 + $0x78] sm:$0xff]   ;;  %v16993_v33 = vcombine.low %v9799_v62, %v9803_v47  ;;  %v17835_v4 = vld [vmem:[#allocation9 + $0x170] sm:$0xff]  }
 0x677   :  { %12495 = vmatpush2.bf16.msra.mxu1 %v17025_v24  ;;  %v16994_v24 = vcombine.high %v9799_v62, %v9803_v47  ;;  %v17800_v6 = vld [vmem:[#allocation9 + $0xf8] sm:$0xff]  }
 0x678   :  { %12496 = vmatprep.subr.bf16.mxu1 %v17018_v61  ;;  %v12137_v56 = vpop.f32.mrf.mxu0  ;;  %v17802_v27 = vld [vmem:[#allocation9 + $0xb8] sm:$0xff]  }
 0x679   :  { %v12138_v10 = vadd.f32 %v12137_v56, %v12097_v3  ;;  %12460 = vmatpush2.bf16.msra.mxu0 %v16873_v5  ;;  %v17816_v62 = vld [vmem:[#allocation9 + $0xd8] sm:$0xff]  }
 0x67a   :  { %v12139_v54 = vpop.f32.mrf.mxu0  ;;  %12461 = vmatprep.subr.bf16.mxu0 %v16866_v21  ;;  %v17817_v47 = vld [vmem:[#allocation9 + $0x18] sm:$0xff]  }
 0x67b   :  { %12497 = vmatpush2.bf16.msra.mxu1 %v17017_v63  ;;  %v12140_v48 = vadd.f32 %v12139_v54, %v12099_v52  ;;  %v17808_v54 = vld [vmem:[#allocation9 + $0xe8] sm:$0xff]  }
 0x67c   :  { %12498 = vmatprep.subr.bf16.mxu1 %v17010_v28  ;;  %v12141_v0 = vpop.f32.mrf.mxu0  ;;  %v17801_v28 = vld [vmem:[#allocation9 + $0x38] sm:$0xff]  }
 0x67d   :  { %12462 = vmatpush2.bf16.msra.mxu0 %v16865_v13  ;;  %v17807_v13 = vld [vmem:[#allocation9 + $0x68] sm:$0xff]   ;;  %v17815_v0 = vld [vmem:[#allocation9 + $0x58] sm:$0xff]  }
 0x67e   :  { %v12142_v55 = vpop.f32.mrf.mxu0  ;;  %12527 = vmatprep.subr.bf16.mxu0 %v17058_v34  ;;  %v17810_v34 = vld [vmem:[#allocation9 + $0xa8] sm:$0xff]  }
 0x67f   :  { %12499 = vmatpush2.bf16.msra.mxu1 %v17009_v45  ;;  %v17809_v45 = vld [vmem:[#allocation9 + $0x28] sm:$0xff]   ;;  %v17819_v55 = vld [vmem:[#allocation9 + $0x50] sm:$0xff]  }
 0x680   :  { %12500 = vmatprep.subr.bf16.mxu1 %v17002_v1  ;;  %12464 = vmatmul.mubr.bf16.vlgmr.msra.gmra.mxu0 %v18689_v11  ;;  %v12219_v60 = vpop.f32.mrf.mxu0  ;;  %v3171_v11 = vmax.f32 %v18335_v26, 0.0  ;;  %v17805_v26 = vld [vmem:[#allocation9 + $0x30] sm:$0xff]   ;;  %v17814_v1 = vld [vmem:[#allocation9 + $0xa0] sm:$0xff]  }
 0x681   :  { %12528 = vmatpush1.bf16.msra.mxu0 %v17057_v43  ;;  %12545 = vmatprep.mubr.bf16.mxu0 %v18891_v19  ;;  %v17818_v43 = vld [vmem:[#allocation9 + $0x98] sm:$0xff]  }
 0x682   :  { %v12178_v2 = vpop.f32.mrf.mxu1  ;;  %v12221_v31 = vpop.f32.mrf.mxu0  ;;  %17404 = vmatprep.subr.bf16.mxu0 %v17799_v12  ;;  %v17373_v52 = vpack.c.bf16 %v3171_v11, %v3171_v11  ;;  %v17821_v12 = vld [vmem:[#allocation9 + $0x10] sm:$0xff]   ;;  %v3172_v11 = vmax.f32 %v18361_v9, 0.0 }
 0x683   :  { %v12179_v61 = vadd.f32 %v12178_v2, %v12138_v10  ;;  %12501 = vmatpush2.bf16.msra.mxu1 %v17001_v53  ;;  %v17806_v10 = vld [vmem:[#allocation9 + $0xb0] sm:$0xff]   ;;  %v17824_v2 = vld [vmem:[#allocation9 + $0xc8] sm:$0xff]  }
 0x684   :  { %v12180_v29 = vpop.f32.mrf.mxu1  ;;  %12502 = vmatprep.subr.bf16.mxu1 %v16994_v24  ;;  %v12223_v21 = vpop.f32.mrf.mxu0  ;;  %v17820_v53 = vld [vmem:[#allocation9 + $0xd0] sm:$0xff]  }
 0x685   :  { %v18795_v5 = vadd.f32 %v12219_v60, %v12179_v61  ;;  %v12181_v63 = vadd.f32 %v12180_v29, %v12140_v48  ;;  %v17812_v48 = vld [vmem:[#allocation9 + $0xe0] sm:$0xff]   ;;  %v17822_v24 = vld [vmem:[#allocation9 + $0x90] sm:$0xff]   ;;  %v17823_v60 = vld [vmem:[#allocation9 + $0x48] sm:$0xff]  }
 0x686   :  { %v12182_v3 = vpop.f32.mrf.mxu1  ;;  %v12224_v19 = vpop.f32.mrf.mxu0  ;;  %v17825_v61 = vld [vmem:[#allocation9 + $0x8] sm:$0xff]   ;;  %v17828_v29 = vld [vmem:[#allocation9 + $0xc0] sm:$0xff]   ;;  %v17831_v21 = vld [vmem:[#allocation9 + $0x178] sm:$0xff]  }
 0x687   :  { %v18798_v7 = vadd.f32 %v12221_v31, %v12181_v63  ;;  %12503 = vmatpush2.bf16.msra.mxu1 %v16993_v33  ;;  %v17826_v31 = vld [vmem:[#allocation9 + $0x88] sm:$0xff]   ;;  %v17827_v33 = vld [vmem:[#allocation9 + $0x40] sm:$0xff]   ;;  %v17832_v3 = vld [vmem:[#allocation9 + $0x1f8] sm:$0xff]   ;;  %v3177_v19 = vmax.f32 %v18456_v38, 0.0 }
 0x688   :  { %v12183_v56 = vpop.f32.mrf.mxu1  ;;  %17426 = vmatprep.subr.bf16.mxu1 %v17800_v6  ;;  %17062 = vmatmul.mubr.msk.bf16.vlgmr.msra.gmra.mxu0 %vm2510_vm0, %v18765_v39  ;;  %v17811_v39 = vld [vmem:[#allocation9 + $0x60] sm:$0xff]   ;;  %v17837_v9 = vld [vmem:[#allocation9 + $0x130] sm:$0xff]   ;;  %v17839_v38 = vld [vmem:[#allocation9 + $0x168] sm:$0xff]  }
 0x689   :  { %17405 = vmatpush3.bf16.msra.mxu0 %v17801_v28  ;;  %14813 = vmatprep.mubr.bf16.mxu0 %v17373_v52  ;;  %v17829_v6 = vld [vmem:[#allocation9] sm:$0xff]   ;;  %v3175_v28 = vmax.f32 %v18432_v59, 0.0  ;;  %v17372_v56 = vpack.c.bf16 %v3170_v44, %v3170_v44  ;;  %v17836_v52 = vld [vmem:[#allocation9 + $0x1f0] sm:$0xff]  }
 0x68a   :  { %12505 = vmatmul.mubr.bf16.vlgmr.msra.gmra.mxu1 %v18717_v18  ;;  %17406 = vmatprep.subr.bf16.mxu0 %v17803_v22  ;;  %v17813_v18 = vld [vmem:[#allocation9 + $0x20] sm:$0xff]   ;;  %v17834_v22 = vld [vmem:[#allocation9 + $0x1b8] sm:$0xff]   ;;  %v17838_v59 = vld [vmem:[#allocation9 + $0x1b0] sm:$0xff]  }
 0x68b   :  { %17427 = vmatpush3.bf16.msra.mxu1 %v17802_v27  ;;  %14853 = vmatprep.mubr.bf16.mxu1 %v17375_v41  ;;  %v17830_v63 = vld [vmem:[#allocation9 + $0x80] sm:$0xff]   ;;  %v17833_v27 = vld [vmem:[#allocation9 + $0x138] sm:$0xff]   ;;  %v17374_v41 = vpack.c.bf16 %v3172_v11, %v3172_v11 }
 0x68c   :  { %17428 = vmatprep.subr.bf16.mxu1 %v17804_v17  ;;  %v17377_v17 = vpack.c.bf16 %v3175_v28, %v3175_v28  ;;  %v17861_v11 = vld [vmem:[#allocation9 + $0x100] sm:$0xff]  }
 0x68d   :  { %17407 = vmatpush3.bf16.msra.mxu0 %v17805_v26  ;;  %v17379_v26 = vpack.c.bf16 %v3177_v19, %v3177_v19  ;;  %v17863_v19 = vld [vmem:[#allocation9 + $0x278] sm:$0xff]  }
 0x68e   :  { %17408 = vmatprep.subr.bf16.mxu0 %v17807_v13  ;;  %v17841_v13 = vld [vmem:[#allocation9 + $0x128] sm:$0xff]  }
 0x68f   :  { %17429 = vmatpush3.bf16.msra.mxu1 %v17806_v10  ;;  %v17840_v10 = vld [vmem:[#allocation9 + $0x1e8] sm:$0xff]  }
 0x690   :  { %17430 = vmatprep.subr.bf16.mxu1 %v17808_v54  ;;  %v17842_v54 = vld [vmem:[#allocation9 + $0x1a8] sm:$0xff]  }
 0x691   :  { %17409 = vmatpush3.bf16.msra.mxu0 %v17809_v45  ;;  %v17843_v45 = vld [vmem:[#allocation9 + $0x160] sm:$0xff]  }
 0x692   :  { %17410 = vmatprep.subr.bf16.mxu0 %v17811_v39  ;;  %v17845_v39 = vld [vmem:[#allocation9 + $0x120] sm:$0xff]  }
 0x693   :  { %17431 = vmatpush3.bf16.msra.mxu1 %v17810_v34  ;;  %v17844_v34 = vld [vmem:[#allocation9 + $0x1e0] sm:$0xff]  }
 0x694   :  { %17432 = vmatprep.subr.bf16.mxu1 %v17812_v48  ;;  %v17846_v48 = vld [vmem:[#allocation9 + $0x1a0] sm:$0xff]  }
 0x695   :  { %17411 = vmatpush3.bf16.msra.mxu0 %v17813_v18  ;;  %v17847_v18 = vld [vmem:[#allocation9 + $0x158] sm:$0xff]  }
 0x696   :  { %17412 = vmatprep.subr.bf16.mxu0 %v17815_v0  ;;  %v17849_v0 = vld [vmem:[#allocation9 + $0x118] sm:$0xff]  }
 0x697   :  { %17433 = vmatpush3.bf16.msra.mxu1 %v17814_v1  ;;  %v17848_v1 = vld [vmem:[#allocation9 + $0x1d8] sm:$0xff]  }
 0x698   :  { %17434 = vmatprep.subr.bf16.mxu1 %v17816_v62  ;;  %v17850_v62 = vld [vmem:[#allocation9 + $0x198] sm:$0xff]  }
 0x699   :  { %17413 = vmatpush3.bf16.msra.mxu0 %v17817_v47  ;;  %v17851_v47 = vld [vmem:[#allocation9 + $0x150] sm:$0xff]  }
 0x69a   :  { %17414 = vmatprep.subr.bf16.mxu0 %v17819_v55  ;;  %v17853_v55 = vld [vmem:[#allocation9 + $0x110] sm:$0xff]  }
 0x69b   :  { %17435 = vmatpush3.bf16.msra.mxu1 %v17818_v43  ;;  %v17852_v43 = vld [vmem:[#allocation9 + $0x1d0] sm:$0xff]  }
 0x69c   :  { %17436 = vmatprep.subr.bf16.mxu1 %v17820_v53  ;;  %v17854_v53 = vld [vmem:[#allocation9 + $0x190] sm:$0xff]  }
 0x69d   :  { %17415 = vmatpush3.bf16.msra.mxu0 %v17821_v12  ;;  %v17855_v12 = vld [vmem:[#allocation9 + $0x148] sm:$0xff]  }
 0x69e   :  { %17416 = vmatprep.subr.bf16.mxu0 %v17823_v60  ;;  %v18807_v60 = vld [vmem:[#allocation8 + $0x18] sm:$0xff] }
 0x69f   :  { %17437 = vmatpush3.bf16.msra.mxu1 %v17822_v24  ;;  %v17856_v24 = vld [vmem:[#allocation9 + $0x1c8] sm:$0xff]  }
 0x6a0   :  { %17438 = vmatprep.subr.bf16.mxu1 %v17824_v2  ;;  %v9890_v2 = vrot.slane %v18807_v60, %v18382_v30  ;;  %v17862_v30 = vld [vmem:[#allocation9 + $0x180] sm:$0xff]  }
 0x6a1   :  { %17417 = vmatpush3.bf16.msra.mxu0 %v17825_v61  ;;  %v17857_v61 = vld [vmem:[#allocation9 + $0x108] sm:$0xff]  }
 0x6a2   :  { %17418 = vmatprep.subr.bf16.mxu0 %v17827_v33  ;;  %v17859_v33 = vld [vmem:[#allocation9 + $0x140] sm:$0xff]  }
 0x6a3   :  { %17439 = vmatpush3.bf16.msra.mxu1 %v17826_v31  ;;  %v17858_v31 = vld [vmem:[#allocation9 + $0x188] sm:$0xff]  }
 0x6a4   :  { %17440 = vmatprep.subr.bf16.mxu1 %v17828_v29  ;;  %v9894_v29 = vrot.slane %v18807_v60, %v18385_v37  ;;  %v17864_v37 = vld [vmem:[#allocation9 + $0x2f8] sm:$0xff]  }
 0x6a5   :  { %17419 = vmatpush3.bf16.msra.mxu0 %v17829_v6  ;;  %v17860_v6 = vld [vmem:[#allocation9 + $0x1c0] sm:$0xff]  }
 0x6a6   :  { %17448 = vmatprep.subr.bf16.mxu0 %v17831_v21 }
 0x6a7   :  { %17441 = vmatpush3.bf16.msra.mxu1 %v17830_v63 }
 0x6a8   :  { %17470 = vmatprep.subr.bf16.mxu1 %v17832_v3  ;;  %14814 = vmatmul.mubr.bf16.vlgmr.msra.gmra.mxu0 %v17372_v56  ;;  %v3174_v3 = vmax.f32 %v18424_v50, 0.0 }
 0x6a9   :  { %17449 = vmatpush3.bf16.msra.mxu0 %v17833_v27  ;;  %14893 = vmatprep.mubr.bf16.mxu0 %v17377_v17  ;;  %v3176_v27 = vmax.f32 %v18454_v23, 0.0  ;;  %v17866_v23 = vld [vmem:[#allocation9 + $0x2b8] sm:$0xff]  }
 0x6aa   :  { %14854 = vmatmul.mubr.bf16.vlgmr.msra.gmra.mxu1 %v17374_v41  ;;  %17450 = vmatprep.subr.bf16.mxu0 %v17835_v4  ;;  %v6299_v4 = vmax.f32 %v18492_v35, 0.0  ;;  %v17868_v35 = vld [vmem:[#allocation9 + $0x2f0] sm:$0xff]  }
 0x6ab   :  { %17471 = vmatpush3.bf16.msra.mxu1 %v17834_v22  ;;  %14933 = vmatprep.mubr.bf16.mxu1 %v17379_v26 }
 0x6ac   :  { %17472 = vmatprep.subr.bf16.mxu1 %v17836_v52  ;;  %v6301_v52 = vmax.f32 %v18516_v49, 0.0 }
 0x6ad   :  { %17451 = vmatpush3.bf16.msra.mxu0 %v17837_v9  ;;  %v17865_v9 = vld [vmem:[#allocation9 + $0x238] sm:$0xff]  }
 0x6ae   :  { %17452 = vmatprep.subr.bf16.mxu0 %v17839_v38 }
 0x6af   :  { %17473 = vmatpush3.bf16.msra.mxu1 %v17838_v59  ;;  %v17376_v59 = vpack.c.bf16 %v3174_v3, %v3174_v3  ;;  %v17888_v3 = vld [vmem:[#allocation9 + $0x2c8] sm:$0xff]  }
 0x6b0   :  { %17474 = vmatprep.subr.bf16.mxu1 %v17840_v10  ;;  %v17378_v10 = vpack.c.bf16 %v3176_v27, %v3176_v27  ;;  %v17892_v27 = vld [vmem:[#allocation9 + $0x2c0] sm:$0xff]  }
 0x6b1   :  { %17453 = vmatpush3.bf16.msra.mxu0 %v17841_v13 }
 0x6b2   :  { %17454 = vmatprep.subr.bf16.mxu0 %v17843_v45  ;;  %v17381_v45 = vpack.c.bf16 %v6299_v4, %v6299_v4  ;;  %v17895_v4 = vld [vmem:[#allocation9 + $0x378] sm:$0xff]  }
 0x6b3   :  { %17475 = vmatpush3.bf16.msra.mxu1 %v17842_v54  ;;  %v17867_v54 = vld [vmem:[#allocation9 + $0x270] sm:$0xff]  }
 0x6b4   :  { %17476 = vmatprep.subr.bf16.mxu1 %v17844_v34  ;;  %v17383_v34 = vpack.c.bf16 %v6301_v52, %v6301_v52  ;;  %v17896_v52 = vld [vmem:[#allocation9 + $0x3f8] sm:$0xff]  }
 0x6b5   :  { %17455 = vmatpush3.bf16.msra.mxu0 %v17845_v39  ;;  %v17869_v39 = vld [vmem:[#allocation9 + $0x230] sm:$0xff]  }
 0x6b6   :  { %17456 = vmatprep.subr.bf16.mxu0 %v17847_v18  ;;  %v17871_v18 = vld [vmem:[#allocation9 + $0x268] sm:$0xff]  }
 0x6b7   :  { %17477 = vmatpush3.bf16.msra.mxu1 %v17846_v48  ;;  %v17870_v48 = vld [vmem:[#allocation9 + $0x2b0] sm:$0xff]  }
 0x6b8   :  { %17478 = vmatprep.subr.bf16.mxu1 %v17848_v1 }
 0x6b9   :  { %17457 = vmatpush3.bf16.msra.mxu0 %v17849_v0  ;;  %v17872_v0 = vld [vmem:[#allocation9 + $0x2e8] sm:$0xff]  }
 0x6ba   :  { %17458 = vmatprep.subr.bf16.mxu0 %v17851_v47  ;;  %v17873_v47 = vld [vmem:[#allocation9 + $0x228] sm:$0xff]  }
 0x6bb   :  { %17479 = vmatpush3.bf16.msra.mxu1 %v17850_v62 }
 0x6bc   :  { %17480 = vmatprep.subr.bf16.mxu1 %v17852_v43  ;;  %v17874_v43 = vld [vmem:[#allocation9 + $0x2a8] sm:$0xff]  }
 0x6bd   :  { %17459 = vmatpush3.bf16.msra.mxu0 %v17853_v55  ;;  %v17875_v55 = vld [vmem:[#allocation9 + $0x260] sm:$0xff]  }
 0x6be   :  { %17460 = vmatprep.subr.bf16.mxu0 %v17855_v12  ;;  %v17876_v12 = vld [vmem:[#allocation9 + $0x2e0] sm:$0xff]  }
 0x6bf   :  { %17481 = vmatpush3.bf16.msra.mxu1 %v17854_v53 }
 0x6c0   :  { %17482 = vmatprep.subr.bf16.mxu1 %v17856_v24  ;;  %v12260_v44 = vpop.f32.mrf.mxu0  ;;  %v17877_v24 = vld [vmem:[#allocation9 + $0x220] sm:$0xff]  }
 0x6c1   :  { %v12261_v63 = vadd.f32 %v12260_v44, %v9890_v2  ;;  %17461 = vmatpush3.bf16.msra.mxu0 %v17857_v61  ;;  %v17878_v2 = vld [vmem:[#allocation9 + $0x2a0] sm:$0xff]   ;;  %v17879_v61 = vld [vmem:[#allocation9 + $0x258] sm:$0xff]   ;;  %v17884_v44 = vld [vmem:[#allocation9 + $0x2d0] sm:$0xff]  }
 0x6c2   :  { %v12301_v21 = vpop.f32.mrf.mxu1  ;;  %v12262_v28 = vpop.f32.mrf.mxu0  ;;  %17462 = vmatprep.subr.bf16.mxu0 %v17859_v33  ;;  %v17881_v33 = vld [vmem:[#allocation9 + $0x218] sm:$0xff]  }
 0x6c3   :  { %17483 = vmatpush3.bf16.msra.mxu1 %v17858_v31  ;;  %v18815_v56 = vadd.f32 %v12301_v21, %v12261_v63  ;;  %v12263_v22 = vadd.f32 %v12262_v28, %v9894_v29  ;;  %v17880_v31 = vld [vmem:[#allocation9 + $0x2d8] sm:$0xff]   ;;  %v17885_v63 = vld [vmem:[#allocation9 + $0x210] sm:$0xff]   ;;  %v17889_v28 = vld [vmem:[#allocation9 + $0x208] sm:$0xff]  }
 0x6c4   :  { %v12303_v41 = vpop.f32.mrf.mxu1  ;;  %17484 = vmatprep.subr.bf16.mxu1 %v17860_v6  ;;  %v12264_v17 = vpop.f32.mrf.mxu0  ;;  %v17882_v29 = vld [vmem:[#allocation9 + $0x298] sm:$0xff]   ;;  %v17883_v6 = vld [vmem:[#allocation9 + $0x250] sm:$0xff]  }
 0x6c5   :  { %v18819_v26 = vadd.f32 %v12303_v41, %v12263_v22  ;;  %17463 = vmatpush3.bf16.msra.mxu0 %v17861_v11  ;;  %v17886_v21 = vld [vmem:[#allocation9 + $0x290] sm:$0xff]   ;;  %v17887_v11 = vld [vmem:[#allocation9 + $0x248] sm:$0xff]   ;;  %v17893_v22 = vld [vmem:[#allocation9 + $0x200] sm:$0xff]   ;;  %v6298_v41 = vmax.f32 %v18488_v36, 0.0  ;;  %v6300_v17 = vmax.f32 %v18510_v42, 0.0 }
 0x6c6   :  { %v12305_v50 = vpop.f32.mrf.mxu1  ;;  %v12265_v38 = vpop.f32.mrf.mxu0  ;;  %17492 = vmatprep.subr.bf16.mxu0 %v17863_v19  ;;  %v17891_v19 = vld [vmem:[#allocation9 + $0x240] sm:$0xff]   ;;  %v17899_v36 = vld [vmem:[#allocation9 + $0x370] sm:$0xff]  }
 0x6c7   :  { %17485 = vmatpush3.bf16.msra.mxu1 %v17862_v30  ;;  %v17890_v30 = vld [vmem:[#allocation9 + $0x288] sm:$0xff]   ;;  %v6303_v50 = vmax.f32 %v18578_v51, 0.0  ;;  %v17380_v38 = vpack.c.bf16 %v6298_v41, %v6298_v41  ;;  %v17901_v42 = vld [vmem:[#allocation9 + $0x330] sm:$0xff]  }
 0x6c8   :  { %v12306_v13 = vpop.f32.mrf.mxu1  ;;  %17514 = vmatprep.subr.bf16.mxu1 %v17864_v37  ;;  %14894 = vmatmul.mubr.bf16.vlgmr.msra.gmra.mxu0 %v17376_v59  ;;  %v17894_v37 = vld [vmem:[#allocation9 + $0x280] sm:$0xff]   ;;  %v17897_v59 = vld [vmem:[#allocation9 + $0x338] sm:$0xff]   ;;  %v17902_v51 = vld [vmem:[#allocation9 + $0x3b0] sm:$0xff]  }
 0x6c9   :  { %17493 = vmatpush3.bf16.msra.mxu0 %v17865_v9  ;;  %14973 = vmatprep.mubr.bf16.mxu0 %v17381_v45  ;;  %v6305_v9 = vmax.f32 %v18598_v16, 0.0  ;;  %v17385_v13 = vpack.c.bf16 %v6303_v50, %v6303_v50  ;;  %v17903_v16 = vld [vmem:[#allocation9 + $0x368] sm:$0xff]   ;;  %v17929_v50 = vld [vmem:[#allocation9 + $0x438] sm:$0xff]  }
 0x6ca   :  { %14934 = vmatmul.mubr.bf16.vlgmr.msra.gmra.mxu1 %v17378_v10  ;;  %v18821_v49 = vpop.f32.mrf.mxu1  ;;  %17494 = vmatprep.subr.bf16.mxu0 %v17867_v54  ;;  %v17382_v10 = vpack.c.bf16 %v6300_v17, %v6300_v17  ;;  %v17900_v54 = vld [vmem:[#allocation9 + $0x3f0] sm:$0xff]  }
 0x6cb   :  { %17515 = vmatpush3.bf16.msra.mxu1 %v17866_v23  ;;  %15013 = vmatprep.mubr.bf16.mxu1 %v17383_v34  ;;  %v17898_v23 = vld [vmem:[#allocation9 + $0x3b8] sm:$0xff]   ;;  %v17387_v45 = vpack.c.bf16 %v6305_v9, %v6305_v9  ;;  %v17905_v34 = vld [vmem:[#allocation9 + $0x328] sm:$0xff]  }
 0x6cc   :  { %v18823_v1 = vpop.f32.mrf.mxu1  ;;  %17516 = vmatprep.subr.bf16.mxu1 %v17868_v35  ;;  %v17904_v35 = vld [vmem:[#allocation9 + $0x3e8] sm:$0xff]  }
 0x6cd   :  { %17495 = vmatpush3.bf16.msra.mxu0 %v17869_v39  ;;  %v17906_v39 = vld [vmem:[#allocation9 + $0x3a8] sm:$0xff]  }
 0x6ce   :  { %v12387_v62 = vpop.f32.mrf.mxu1  ;;  %17496 = vmatprep.subr.bf16.mxu0 %v17871_v18  ;;  %v17908_v18 = vld [vmem:[#allocation9 + $0x3e0] sm:$0xff]  }
 0x6cf   :  { %17517 = vmatpush3.bf16.msra.mxu1 %v17870_v48  ;;  %v17907_v48 = vld [vmem:[#allocation9 + $0x360] sm:$0xff]  }
 0x6d0   :  { %v12388_v53 = vpop.f32.mrf.mxu1  ;;  %17518 = vmatprep.subr.bf16.mxu1 %v17872_v0  ;;  %v17909_v0 = vld [vmem:[#allocation9 + $0x320] sm:$0xff]  }
 0x6d1   :  { %17497 = vmatpush3.bf16.msra.mxu0 %v17873_v47  ;;  %v17910_v62 = vld [vmem:[#allocation9 + $0x3a0] sm:$0xff]   ;;  %v17911_v47 = vld [vmem:[#allocation9 + $0x358] sm:$0xff]  }
 0x6d2   :  { %17498 = vmatprep.subr.bf16.mxu0 %v17875_v55  ;;  %v17913_v55 = vld [vmem:[#allocation9 + $0x318] sm:$0xff]  }
 0x6d3   :  { %17519 = vmatpush3.bf16.msra.mxu1 %v17874_v43  ;;  %v17912_v43 = vld [vmem:[#allocation9 + $0x3d8] sm:$0xff]  }
 0x6d4   :  { %17520 = vmatprep.subr.bf16.mxu1 %v17876_v12  ;;  %v17914_v53 = vld [vmem:[#allocation9 + $0x398] sm:$0xff]   ;;  %v17915_v12 = vld [vmem:[#allocation9 + $0x350] sm:$0xff]  }
 0x6d5   :  { %17499 = vmatpush3.bf16.msra.mxu0 %v17877_v24  ;;  %v17916_v24 = vld [vmem:[#allocation9 + $0x3d0] sm:$0xff]  }
 0x6d6   :  { %17500 = vmatprep.subr.bf16.mxu0 %v17879_v61  ;;  %v17918_v61 = vld [vmem:[#allocation9 + $0x390] sm:$0xff]  }
 0x6d7   :  { %17521 = vmatpush3.bf16.msra.mxu1 %v17878_v2  ;;  %v17917_v2 = vld [vmem:[#allocation9 + $0x310] sm:$0xff]  }
 0x6d8   :  { %17522 = vmatprep.subr.bf16.mxu1 %v17880_v31  ;;  %v17919_v31 = vld [vmem:[#allocation9 + $0x348] sm:$0xff]  }
 0x6d9   :  { %17501 = vmatpush3.bf16.msra.mxu0 %v17881_v33  ;;  %v17920_v33 = vld [vmem:[#allocation9 + $0x3c8] sm:$0xff]  }
 0x6da   :  { %17502 = vmatprep.subr.bf16.mxu0 %v17883_v6  ;;  %v17922_v6 = vld [vmem:[#allocation9 + $0x388] sm:$0xff]  }
 0x6db   :  { %17523 = vmatpush3.bf16.msra.mxu1 %v17882_v29  ;;  %v17921_v29 = vld [vmem:[#allocation9 + $0x308] sm:$0xff]  }
 0x6dc   :  { %17524 = vmatprep.subr.bf16.mxu1 %v17884_v44  ;;  %v17923_v44 = vld [vmem:[#allocation9 + $0x340] sm:$0xff]  }
 0x6dd   :  { %17503 = vmatpush3.bf16.msra.mxu0 %v17885_v63  ;;  %v17924_v63 = vld [vmem:[#allocation9 + $0x3c0] sm:$0xff]  }
 0x6de   :  { %17504 = vmatprep.subr.bf16.mxu0 %v17887_v11 }
 0x6df   :  { %17525 = vmatpush3.bf16.msra.mxu1 %v17886_v21 }
 0x6e0   :  { %17526 = vmatprep.subr.bf16.mxu1 %v17888_v3  ;;  %v17925_v3 = vld [vmem:[#allocation9 + $0x300] sm:$0xff]  }
 0x6e1   :  { %17505 = vmatpush3.bf16.msra.mxu0 %v17889_v28  ;;  %v6302_v28 = vmax.f32 %v18570_v40, 0.0 }
 0x6e2   :  { %17506 = vmatprep.subr.bf16.mxu0 %v17891_v19  ;;  %v17926_v19 = vld [vmem:[#allocation9 + $0x380] sm:$0xff]  }
 0x6e3   :  { %17527 = vmatpush3.bf16.msra.mxu1 %v17890_v30  ;;  %v17384_v9 = vpack.c.bf16 %v6302_v28, %v6302_v28  ;;  %v17960_v28 = vld [vmem:[#allocation9 + $0x5f8] sm:$0xff]  }
 0x6e4   :  { %17528 = vmatprep.subr.bf16.mxu1 %v17892_v27  ;;  %v17927_v27 = vld [vmem:[#allocation9 + $0x478] sm:$0xff]  }
 0x6e5   :  { %17507 = vmatpush3.bf16.msra.mxu0 %v17893_v22  ;;  %v6304_v22 = vmax.f32 %v18596_v8, 0.0 }
 0x6e6   :  { %17536 = vmatprep.subr.bf16.mxu0 %v17895_v4  ;;  %v17928_v4 = vld [vmem:[#allocation9 + $0x4f8] sm:$0xff]  }
 0x6e7   :  { %17529 = vmatpush3.bf16.msra.mxu1 %v17894_v37 }
 0x6e8   :  { %17558 = vmatprep.subr.bf16.mxu1 %v17896_v52  ;;  %14974 = vmatmul.mubr.bf16.vlgmr.msra.gmra.mxu0 %v17380_v38  ;;  %v9429_v52 = vmax.f32 %v18658_v32, 0.0  ;;  %v17933_v32 = vld [vmem:[#allocation9 + $0x430] sm:$0xff]  }
 0x6e9   :  { %17537 = vmatpush3.bf16.msra.mxu0 %v17897_v59  ;;  %15053 = vmatprep.mubr.bf16.mxu0 %v17385_v13  ;;  %v17386_v59 = vpack.c.bf16 %v6304_v22, %v6304_v22 }
 0x6ea   :  { %15014 = vmatmul.mubr.bf16.vlgmr.msra.gmra.mxu1 %v17382_v10  ;;  %17538 = vmatprep.subr.bf16.mxu0 %v17899_v36  ;;  %v17935_v36 = vld [vmem:[#allocation9 + $0x468] sm:$0xff]  }
 0x6eb   :  { %17559 = vmatpush3.bf16.msra.mxu1 %v17898_v23  ;;  %15093 = vmatprep.mubr.bf16.mxu1 %v17387_v45  ;;  %v17932_v23 = vld [vmem:[#allocation9 + $0x4f0] sm:$0xff]  }
 0x6ec   :  { %17560 = vmatprep.subr.bf16.mxu1 %v17900_v54  ;;  %v17936_v54 = vld [vmem:[#allocation9 + $0x4e8] sm:$0xff]  }
 0x6ed   :  { %17539 = vmatpush3.bf16.msra.mxu0 %v17901_v42  ;;  %v17937_v42 = vld [vmem:[#allocation9 + $0x428] sm:$0xff]  }
 0x6ee   :  { %17540 = vmatprep.subr.bf16.mxu0 %v17903_v16  ;;  %v17939_v16 = vld [vmem:[#allocation9 + $0x460] sm:$0xff]  }
 0x6ef   :  { %17561 = vmatpush3.bf16.msra.mxu1 %v17902_v51  ;;  %v17938_v51 = vld [vmem:[#allocation9 + $0x4a8] sm:$0xff]  }
 0x6f0   :  { %17562 = vmatprep.subr.bf16.mxu1 %v17904_v35 }
 0x6f1   :  { %17541 = vmatpush3.bf16.msra.mxu0 %v17905_v34  ;;  %v17940_v34 = vld [vmem:[#allocation9 + $0x4e0] sm:$0xff]  }
 0x6f2   :  { %17542 = vmatprep.subr.bf16.mxu0 %v17907_v48  ;;  %v17942_v48 = vld [vmem:[#allocation9 + $0x4a0] sm:$0xff]  }
 0x6f3   :  { %17563 = vmatpush3.bf16.msra.mxu1 %v17906_v39  ;;  %v17941_v39 = vld [vmem:[#allocation9 + $0x420] sm:$0xff]  }
 0x6f4   :  { %17564 = vmatprep.subr.bf16.mxu1 %v17908_v18  ;;  %v17943_v18 = vld [vmem:[#allocation9 + $0x458] sm:$0xff]  }
 0x6f5   :  { %17543 = vmatpush3.bf16.msra.mxu0 %v17909_v0  ;;  %v17944_v0 = vld [vmem:[#allocation9 + $0x4d8] sm:$0xff]  }
 0x6f6   :  { %17544 = vmatprep.subr.bf16.mxu0 %v17911_v47  ;;  %v17946_v47 = vld [vmem:[#allocation9 + $0x498] sm:$0xff]  }
 0x6f7   :  { %17565 = vmatpush3.bf16.msra.mxu1 %v17910_v62  ;;  %v17945_v62 = vld [vmem:[#allocation9 + $0x418] sm:$0xff]  }
 0x6f8   :  { %17566 = vmatprep.subr.bf16.mxu1 %v17912_v43  ;;  %v17947_v43 = vld [vmem:[#allocation9 + $0x450] sm:$0xff]  }
 0x6f9   :  { %17545 = vmatpush3.bf16.msra.mxu0 %v17913_v55  ;;  %v17948_v55 = vld [vmem:[#allocation9 + $0x4d0] sm:$0xff]  }
 0x6fa   :  { %17546 = vmatprep.subr.bf16.mxu0 %v17915_v12  ;;  %v17950_v12 = vld [vmem:[#allocation9 + $0x490] sm:$0xff]  }
 0x6fb   :  { %17567 = vmatpush3.bf16.msra.mxu1 %v17914_v53  ;;  %v17949_v53 = vld [vmem:[#allocation9 + $0x410] sm:$0xff]  }
 0x6fc   :  { %17568 = vmatprep.subr.bf16.mxu1 %v17916_v24  ;;  %v17951_v24 = vld [vmem:[#allocation9 + $0x448] sm:$0xff]  }
 0x6fd   :  { %17547 = vmatpush3.bf16.msra.mxu0 %v17917_v2  ;;  %v17952_v2 = vld [vmem:[#allocation9 + $0x4c8] sm:$0xff]  }
 0x6fe   :  { %17548 = vmatprep.subr.bf16.mxu0 %v17919_v31  ;;  %v17954_v31 = vld [vmem:[#allocation9 + $0x488] sm:$0xff]  }
 0x6ff   :  { %17569 = vmatpush3.bf16.msra.mxu1 %v17918_v61  ;;  %v17953_v61 = vld [vmem:[#allocation9 + $0x408] sm:$0xff]  }
 0x700   :  { %17570 = vmatprep.subr.bf16.mxu1 %v17920_v33  ;;  %v12342_v21 = vpop.f32.mrf.mxu0  ;;  %v17955_v33 = vld [vmem:[#allocation9 + $0x440] sm:$0xff]  }
 0x701   :  { %v12343_v11 = vadd.f32 %v12342_v21, %v18815_v56  ;;  %17549 = vmatpush3.bf16.msra.mxu0 %v17921_v29  ;;  %v9427_v56 = vmax.f32 %v18634_v46, 0.0  ;;  %v17391_v46 = vpack.c.bf16 %v9429_v52, %v9429_v52  ;;  %v17956_v29 = vld [vmem:[#allocation9 + $0x4c0] sm:$0xff]   ;;  %v17959_v21 = vld [vmem:[#allocation9 + $0x578] sm:$0xff]  }
 0x702   :  { %v12344_v30 = vpop.f32.mrf.mxu0  ;;  %17550 = vmatprep.subr.bf16.mxu0 %v17923_v44  ;;  %v9426_v44 = vmax.f32 %v18630_v57, 0.0  ;;  %v17963_v57 = vld [vmem:[#allocation9 + $0x570] sm:$0xff]  }
 0x703   :  { %17571 = vmatpush3.bf16.msra.mxu1 %v17922_v6  ;;  %v18833_v41 = vadd.f32 %v18821_v49, %v12343_v11  ;;  %v12345_v37 = vadd.f32 %v12344_v30, %v18819_v26  ;;  %v17930_v49 = vld [vmem:[#allocation9 + $0x4b8] sm:$0xff]   ;;  %v17931_v26 = vld [vmem:[#allocation9 + $0x470] sm:$0xff]   ;;  %v17389_v38 = vpack.c.bf16 %v9427_v56, %v9427_v56  ;;  %v17957_v6 = vld [vmem:[#allocation9 + $0x400] sm:$0xff]   ;;  %v9431_v30 = vmax.f32 %v18720_v20, 0.0 }
 0x704   :  { %17572 = vmatprep.subr.bf16.mxu1 %v17924_v63  ;;  %v12346_v17 = vpop.f32.mrf.mxu0  ;;  %v17958_v63 = vld [vmem:[#allocation9 + $0x480] sm:$0xff]   ;;  %v17388_v22 = vpack.c.bf16 %v9426_v44, %v9426_v44  ;;  %v17966_v20 = vld [vmem:[#allocation9 + $0x5b0] sm:$0xff]   ;;  %v17994_v44 = vld [vmem:[#allocation9 + $0x6b8] sm:$0xff]  }
 0x705   :  { %v18839_v40 = vadd.f32 %v18823_v1, %v12345_v37  ;;  %17551 = vmatpush3.bf16.msra.mxu0 %v17925_v3  ;;  %v17934_v1 = vld [vmem:[#allocation9 + $0x4b0] sm:$0xff]   ;;  %v18893_v11 = vld [vmem:[#allocation19_spill] sm:$0xff]  ;;  %v17393_v56 = vpack.c.bf16 %v9431_v30, %v9431_v30 }
 0x706   :  { %v12347_v8 = vpop.f32.mrf.mxu0  ;;  %17580 = vmatprep.subr.bf16.mxu0 %v17927_v27  ;;  %v9428_v3 = vmax.f32 %v18893_v11, 0.0  ;;  %v17961_v27 = vld [vmem:[#allocation9 + $0x538] sm:$0xff]   ;;  %v17964_v17 = vld [vmem:[#allocation9 + $0x5f0] sm:$0xff]  }
 0x707   :  { %17573 = vmatpush3.bf16.msra.mxu1 %v17926_v19  ;;  %v9433_v19 = vmax.f32 %v18740_v58, 0.0  ;;  %v17962_v37 = vld [vmem:[#allocation9 + $0x5b8] sm:$0xff]   ;;  %v17967_v58 = vld [vmem:[#allocation9 + $0x568] sm:$0xff]  }
 0x708   :  { %17602 = vmatprep.subr.bf16.mxu1 %v17928_v4  ;;  %15054 = vmatmul.mubr.bf16.vlgmr.msra.gmra.mxu0 %v17384_v9  ;;  %v17390_v4 = vpack.c.bf16 %v9428_v3, %v9428_v3  ;;  %v17968_v9 = vld [vmem:[#allocation9 + $0x5e8] sm:$0xff]  }
 0x709   :  { %17581 = vmatpush3.bf16.msra.mxu0 %v17929_v50  ;;  %15133 = vmatprep.mubr.bf16.mxu0 %v17389_v38  ;;  %v17395_v52 = vpack.c.bf16 %v9433_v19, %v9433_v19  ;;  %v17965_v50 = vld [vmem:[#allocation9 + $0x530] sm:$0xff]   ;;  %v17969_v8 = vld [vmem:[#allocation9 + $0x528] sm:$0xff]   ;;  %v17973_v38 = vld [vmem:[#allocation9 + $0x520] sm:$0xff]  }
 0x70a   :  { %v18841_v10 = vpop.f32.mrf.mxu1  ;;  %15094 = vmatmul.mubr.bf16.vlgmr.msra.gmra.mxu1 %v17386_v59  ;;  %17582 = vmatprep.subr.bf16.mxu0 %v17931_v26  ;;  %v17971_v59 = vld [vmem:[#allocation9 + $0x560] sm:$0xff]  }
 0x70b   :  { %17603 = vmatpush3.bf16.msra.mxu1 %v17930_v49  ;;  %15173 = vmatprep.mubr.bf16.mxu1 %v17391_v46  ;;  %v17970_v49 = vld [vmem:[#allocation9 + $0x5a8] sm:$0xff]   ;;  %v17972_v26 = vld [vmem:[#allocation9 + $0x5e0] sm:$0xff]   ;;  %v17975_v46 = vld [vmem:[#allocation9 + $0x558] sm:$0xff]  }
 0x70c   :  { %v18843_v13 = vpop.f32.mrf.mxu1  ;;  %17604 = vmatprep.subr.bf16.mxu1 %v17932_v23  ;;  %v17974_v23 = vld [vmem:[#allocation9 + $0x5a0] sm:$0xff]  }
 0x70d   :  { %17583 = vmatpush3.bf16.msra.mxu0 %v17933_v32  ;;  %v17976_v32 = vld [vmem:[#allocation9 + $0x5d8] sm:$0xff]  }
 0x70e   :  { %v12428_v45 = vpop.f32.mrf.mxu1  ;;  %17584 = vmatprep.subr.bf16.mxu0 %v17935_v36  ;;  %v17978_v36 = vld [vmem:[#allocation9 + $0x598] sm:$0xff]  }
 0x70f   :  { %17605 = vmatpush3.bf16.msra.mxu1 %v17934_v1  ;;  %v17977_v1 = vld [vmem:[#allocation9 + $0x518] sm:$0xff]   ;;  %v17980_v45 = vld [vmem:[#allocation9 + $0x5d0] sm:$0xff]  }
 0x710   :  { %v12429_v35 = vpop.f32.mrf.mxu1  ;;  %17606 = vmatprep.subr.bf16.mxu1 %v17936_v54  ;;  %v17979_v54 = vld [vmem:[#allocation9 + $0x550] sm:$0xff]  }
 0x711   :  { %17585 = vmatpush3.bf16.msra.mxu0 %v17937_v42  ;;  %v17981_v42 = vld [vmem:[#allocation9 + $0x510] sm:$0xff]   ;;  %v17984_v35 = vld [vmem:[#allocation9 + $0x5c8] sm:$0xff]  }
 0x712   :  { %17586 = vmatprep.subr.bf16.mxu0 %v17939_v16  ;;  %v17983_v16 = vld [vmem:[#allocation9 + $0x548] sm:$0xff]  }
 0x713   :  { %17607 = vmatpush3.bf16.msra.mxu1 %v17938_v51  ;;  %v17982_v51 = vld [vmem:[#allocation9 + $0x590] sm:$0xff]  }
 0x714   :  { %17608 = vmatprep.subr.bf16.mxu1 %v17940_v34  ;;  %v17985_v34 = vld [vmem:[#allocation9 + $0x508] sm:$0xff]  }
 0x715   :  { %17587 = vmatpush3.bf16.msra.mxu0 %v17941_v39  ;;  %v17986_v39 = vld [vmem:[#allocation9 + $0x588] sm:$0xff]  }
 0x716   :  { %17588 = vmatprep.subr.bf16.mxu0 %v17943_v18  ;;  %v17988_v18 = vld [vmem:[#allocation9 + $0x5c0] sm:$0xff]  }
 0x717   :  { %17609 = vmatpush3.bf16.msra.mxu1 %v17942_v48  ;;  %v17987_v48 = vld [vmem:[#allocation9 + $0x540] sm:$0xff]  }
 0x718   :  { %17610 = vmatprep.subr.bf16.mxu1 %v17944_v0 }
 0x719   :  { %17589 = vmatpush3.bf16.msra.mxu0 %v17945_v62  ;;  %v17989_v62 = vld [vmem:[#allocation9 + $0x500] sm:$0xff]  }
 0x71a   :  { %17590 = vmatprep.subr.bf16.mxu0 %v17947_v43 }
 0x71b   :  { %17611 = vmatpush3.bf16.msra.mxu1 %v17946_v47  ;;  %v9430_v47 = vmax.f32 %v18712_v15, 0.0 }
 0x71c   :  { %17612 = vmatprep.subr.bf16.mxu1 %v17948_v55  ;;  %v17990_v55 = vld [vmem:[#allocation9 + $0x580] sm:$0xff]  }
 0x71d   :  { %17591 = vmatpush3.bf16.msra.mxu0 %v17949_v53  ;;  %v17991_v53 = vld [vmem:[#allocation9 + $0x678] sm:$0xff]  }
 0x71e   :  { %17592 = vmatprep.subr.bf16.mxu0 %v17951_v24 }
 0x71f   :  { %17613 = vmatpush3.bf16.msra.mxu1 %v17950_v12  ;;  %v18894_v12 = vld [vmem:[#allocation20_spill] sm:$0xff] }
 0x720   :  { %17614 = vmatprep.subr.bf16.mxu1 %v17952_v2  ;;  %v9432_v24 = vmax.f32 %v18894_v12, 0.0  ;;  %v17992_v2 = vld [vmem:[#allocation9 + $0x6f8] sm:$0xff]   ;;  %v12556_v12 = vmax.f32 %v18795_v5, 0.0 }
 0x721   :  { %17593 = vmatpush3.bf16.msra.mxu0 %v17953_v61  ;;  %v12555_v61 = vmax.f32 %v18776_v14, 0.0 }
 0x722   :  { %17594 = vmatprep.subr.bf16.mxu0 %v17955_v33  ;;  %v12557_v33 = vmax.f32 %v18798_v7, 0.0  ;;  %v17997_v7 = vld [vmem:[#allocation9 + $0x630] sm:$0xff]  }
 0x723   :  { %17615 = vmatpush3.bf16.msra.mxu1 %v17954_v31  ;;  %v17397_v11 = vpack.c.bf16 %v12555_v61, %v12555_v61 }
 0x724   :  { %17616 = vmatprep.subr.bf16.mxu1 %v17956_v29  ;;  %v17993_v29 = vld [vmem:[#allocation9 + $0x638] sm:$0xff]   ;;  %v17399_v30 = vpack.c.bf16 %v12557_v33, %v12557_v33 }
 0x725   :  { %17595 = vmatpush3.bf16.msra.mxu0 %v17957_v6  ;;  %v17392_v6 = vpack.c.bf16 %v9430_v47, %v9430_v47  ;;  %v18021_v47 = vld [vmem:[#allocation9 + $0x600] sm:$0xff]  }
 0x726   :  { %17624 = vmatprep.subr.bf16.mxu0 %v17959_v21  ;;  %v17995_v21 = vld [vmem:[#allocation9 + $0x670] sm:$0xff]  }
 0x727   :  { %17617 = vmatpush3.bf16.msra.mxu1 %v17958_v63  ;;  %v17394_v63 = vpack.c.bf16 %v9432_v24, %v9432_v24  ;;  %v18024_v24 = vld [vmem:[#allocation9 + $0x7f8] sm:$0xff]  }
 0x728   :  { %17646 = vmatprep.subr.bf16.mxu1 %v17960_v28  ;;  %15134 = vmatmul.mubr.bf16.vlgmr.msra.gmra.mxu0 %v17388_v22  ;;  %v17996_v28 = vld [vmem:[#allocation9 + $0x6f0] sm:$0xff]   ;;  %v17999_v22 = vld [vmem:[#allocation9 + $0x668] sm:$0xff]  }
 0x729   :  { %17625 = vmatpush3.bf16.msra.mxu0 %v17961_v27  ;;  %15213 = vmatprep.mubr.bf16.mxu0 %v17393_v56  ;;  %v17998_v27 = vld [vmem:[#allocation9 + $0x6b0] sm:$0xff]  }
 0x72a   :  { %15174 = vmatmul.mubr.bf16.vlgmr.msra.gmra.mxu1 %v17390_v4  ;;  %17626 = vmatprep.subr.bf16.mxu0 %v17963_v57  ;;  %v18000_v4 = vld [vmem:[#allocation9 + $0x6e8] sm:$0xff]  }
 0x72b   :  { %17647 = vmatpush3.bf16.msra.mxu1 %v17962_v37  ;;  %15253 = vmatprep.mubr.bf16.mxu1 %v17395_v52 }
 0x72c   :  { %17648 = vmatprep.subr.bf16.mxu1 %v17964_v17  ;;  %v18001_v17 = vld [vmem:[#allocation9 + $0x628] sm:$0xff]  }
 0x72d   :  { %17627 = vmatpush3.bf16.msra.mxu0 %v17965_v50  ;;  %v18002_v50 = vld [vmem:[#allocation9 + $0x6a8] sm:$0xff]  }
 0x72e   :  { %17628 = vmatprep.subr.bf16.mxu0 %v17967_v58 }
 0x72f   :  { %17649 = vmatpush3.bf16.msra.mxu1 %v17966_v20  ;;  %v18003_v20 = vld [vmem:[#allocation9 + $0x660] sm:$0xff]  }
 0x730   :  { %17650 = vmatprep.subr.bf16.mxu1 %v17968_v9  ;;  %v18004_v9 = vld [vmem:[#allocation9 + $0x6e0] sm:$0xff]  }
 0x731   :  { %17629 = vmatpush3.bf16.msra.mxu0 %v17969_v8  ;;  %v18005_v8 = vld [vmem:[#allocation9 + $0x620] sm:$0xff]  }
 0x732   :  { %17630 = vmatprep.subr.bf16.mxu0 %v17971_v59  ;;  %v18007_v59 = vld [vmem:[#allocation9 + $0x658] sm:$0xff]  }
 0x733   :  { %17651 = vmatpush3.bf16.msra.mxu1 %v17970_v49  ;;  %v18006_v49 = vld [vmem:[#allocation9 + $0x6a0] sm:$0xff]  }
 0x734   :  { %17652 = vmatprep.subr.bf16.mxu1 %v17972_v26  ;;  %v18008_v26 = vld [vmem:[#allocation9 + $0x6d8] sm:$0xff]  }
 0x735   :  { %17631 = vmatpush3.bf16.msra.mxu0 %v17973_v38  ;;  %v18895_v38 = vld [vmem:[#allocation18_spill] sm:$0xff] }
 0x736   :  { %17632 = vmatprep.subr.bf16.mxu0 %v17975_v46  ;;  %v18009_v46 = vld [vmem:[#allocation9 + $0x618] sm:$0xff]  }
 0x737   :  { %17653 = vmatpush3.bf16.msra.mxu1 %v17974_v23  ;;  %v9902_v23 = vrot.slane %v18807_v60, %v18895_v38  ;;  %v18896_v38 = vld [vmem:[#allocation17_spill] sm:$0xff] }
 0x738   :  { %17654 = vmatprep.subr.bf16.mxu1 %v17976_v32  ;;  %v18010_v32 = vld [vmem:[#allocation9 + $0x698] sm:$0xff]  }
 0x739   :  { %17633 = vmatpush3.bf16.msra.mxu0 %v17977_v1  ;;  %v18011_v1 = vld [vmem:[#allocation9 + $0x650] sm:$0xff]  }
 0x73a   :  { %17634 = vmatprep.subr.bf16.mxu0 %v17979_v54  ;;  %v12427_v54 = vadd.f32 %v18843_v13, %v9902_v23  ;;  %v9898_v23 = vrot.slane %v18807_v60, %v18896_v38  ;;  %v18047_v60 = vld [vmem:[#allocation9 + $0x748] sm:$0xff]  }
 0x73b   :  { %17655 = vmatpush3.bf16.msra.mxu1 %v17978_v36  ;;  %v18012_v36 = vld [vmem:[#allocation9 + $0x6d0] sm:$0xff]  }
 0x73c   :  { %17656 = vmatprep.subr.bf16.mxu1 %v17980_v45  ;;  %v18013_v45 = vld [vmem:[#allocation9 + $0x610] sm:$0xff]  }
 0x73d   :  { %17635 = vmatpush3.bf16.msra.mxu0 %v17981_v42  ;;  %v18014_v42 = vld [vmem:[#allocation9 + $0x690] sm:$0xff]  }
 0x73e   :  { %17636 = vmatprep.subr.bf16.mxu0 %v17983_v16 }
 0x73f   :  { %17657 = vmatpush3.bf16.msra.mxu1 %v17982_v51  ;;  %v18015_v51 = vld [vmem:[#allocation9 + $0x648] sm:$0xff]  }
 0x740   :  { %17658 = vmatprep.subr.bf16.mxu1 %v17984_v35  ;;  %v18849_v0 = vpop.f32.mrf.mxu0  ;;  %v18016_v35 = vld [vmem:[#allocation9 + $0x6c8] sm:$0xff]  }
 0x741   :  { %17637 = vmatpush3.bf16.msra.mxu0 %v17985_v34 }
 0x742   :  { %v18852_v43 = vpop.f32.mrf.mxu0  ;;  %17638 = vmatprep.subr.bf16.mxu0 %v17987_v48  ;;  %v18018_v48 = vld [vmem:[#allocation9 + $0x688] sm:$0xff]  }
 0x743   :  { %17659 = vmatpush3.bf16.msra.mxu1 %v17986_v39  ;;  %v12468_v16 = vadd.f32 %v18852_v43, %v12427_v54  ;;  %v18017_v39 = vld [vmem:[#allocation9 + $0x608] sm:$0xff]   ;;  %v18023_v43 = vld [vmem:[#allocation9 + $0x778] sm:$0xff]   ;;  %v12425_v54 = vadd.f32 %v18841_v10, %v9898_v23  ;;  %v18051_v10 = vld [vmem:[#allocation9 + $0x740] sm:$0xff]  }
 0x744   :  { %17660 = vmatprep.subr.bf16.mxu1 %v17988_v18  ;;  %v12469_v31 = vpop.f32.mrf.mxu0  ;;  %v18019_v18 = vld [vmem:[#allocation9 + $0x640] sm:$0xff]  }
 0x745   :  { %17639 = vmatpush3.bf16.msra.mxu0 %v17989_v62  ;;  %v18020_v62 = vld [vmem:[#allocation9 + $0x6c0] sm:$0xff]   ;;  %v18025_v31 = vld [vmem:[#allocation9 + $0x738] sm:$0xff]  }
 0x746   :  { %v12470_v15 = vpop.f32.mrf.mxu0  ;;  %17668 = vmatprep.subr.bf16.mxu0 %v17991_v53  ;;  %v18022_v53 = vld [vmem:[#allocation9 + $0x680] sm:$0xff]  }
 0x747   :  { %17661 = vmatpush3.bf16.msra.mxu1 %v17990_v55  ;;  %v12554_v55 = vmax.f32 %v18772_v25, 0.0  ;;  %v18027_v25 = vld [vmem:[#allocation9 + $0x770] sm:$0xff]  }
 0x748   :  { %17690 = vmatprep.subr.bf16.mxu1 %v17992_v2  ;;  %15214 = vmatmul.mubr.bf16.vlgmr.msra.gmra.mxu0 %v17392_v6  ;;  %v18857_v3 = vpop.f32.mrf.mxu0  ;;  %v12559_v2 = vmax.f32 %v18839_v40, 0.0  ;;  %v17398_v6 = vpack.c.bf16 %v12556_v12, %v12556_v12  ;;  %v17067_v40 = vld [vmem:[#allocation11] ss:$0 sm:$0xff] }
 0x749   :  { %17669 = vmatpush3.bf16.msra.mxu0 %v17993_v29  ;;  %15293 = vmatprep.mubr.bf16.mxu0 %v17397_v11  ;;  %v17396_v33 = vpack.c.bf16 %v12554_v55, %v12554_v55  ;;  %v18026_v29 = vld [vmem:[#allocation9 + $0x7b8] sm:$0xff]   ;;  %v18029_v11 = vld [vmem:[#allocation9 + $0x730] sm:$0xff]  }
 0x74a   :  { %v18859_v14 = vpop.f32.mrf.mxu1  ;;  %15254 = vmatmul.mubr.bf16.vlgmr.msra.gmra.mxu1 %v17394_v63  ;;  %v12549_v19 = vpop.f32.mrf.mxu0  ;;  %17670 = vmatprep.subr.bf16.mxu0 %v17995_v21  ;;  %v17401_v15 = vpack.c.bf16 %v12559_v2, %v12559_v2  ;;  %v18028_v63 = vld [vmem:[#allocation9 + $0x7f0] sm:$0xff]  }
 0x74b   :  { %17691 = vmatpush3.bf16.msra.mxu1 %v17994_v44  ;;  %15333 = vmatprep.mubr.bf16.mxu1 %v17399_v30  ;;  %v18030_v30 = vld [vmem:[#allocation9 + $0x7b0] sm:$0xff]  }
 0x74c   :  { %v12508_v37 = vpop.f32.mrf.mxu1  ;;  %17692 = vmatprep.subr.bf16.mxu1 %v17996_v28  ;;  %v12551_v57 = vpop.f32.mrf.mxu0 }
 0x74d   :  { %17671 = vmatpush3.bf16.msra.mxu0 %v17997_v7  ;;  %v12509_v34 = vadd.f32 %v12508_v37, %v12468_v16  ;;  %v18031_v7 = vld [vmem:[#allocation9 + $0x768] sm:$0xff]   ;;  %v18046_v16 = vld [vmem:[#allocation9 + $0x790] sm:$0xff]  }
 0x74e   :  { %v12510_v56 = vpop.f32.mrf.mxu1  ;;  %v12552_v52 = vpop.f32.mrf.mxu0  ;;  %17672 = vmatprep.subr.bf16.mxu0 %v17999_v22  ;;  %v18032_v22 = vld [vmem:[#allocation9 + $0x7e8] sm:$0xff]  }
 0x74f   :  { %17693 = vmatpush3.bf16.msra.mxu1 %v17998_v27  ;;  %v12550_v13 = vadd.f32 %v12549_v19, %v12509_v34  ;;  %v18048_v34 = vld [vmem:[#allocation9 + $0x7c8] sm:$0xff]  }
 0x750   :  { %v12511_v58 = vpop.f32.mrf.mxu1  ;;  %17694 = vmatprep.subr.bf16.mxu1 %v18000_v4 }
 0x751   :  { %17673 = vmatpush3.bf16.msra.mxu0 %v18001_v17  ;;  %v12561_v61 = vmax.f32 %v12550_v13, 0.0  ;;  %v18033_v17 = vld [vmem:[#allocation9 + $0x728] sm:$0xff]   ;;  %v12558_v13 = vmax.f32 %v18833_v41, 0.0 }
 0x752   :  { %17674 = vmatprep.subr.bf16.mxu0 %v18003_v20  ;;  %v18035_v20 = vld [vmem:[#allocation9 + $0x760] sm:$0xff]  }
 0x753   :  { %17695 = vmatpush3.bf16.msra.mxu1 %v18002_v50  ;;  %v17403_v21 = vpack.c.bf16 %v12561_v61, %v12561_v61  ;;  %v18034_v50 = vld [vmem:[#allocation9 + $0x7a8] sm:$0xff]   ;;  %v17400_v55 = vpack.c.bf16 %v12558_v13, %v12558_v13 }
 0x754   :  { %17696 = vmatprep.subr.bf16.mxu1 %v18004_v9 }
 0x755   :  { %17675 = vmatpush3.bf16.msra.mxu0 %v18005_v8  ;;  %v18036_v8 = vld [vmem:[#allocation9 + $0x7e0] sm:$0xff]  }
 0x756   :  { %17676 = vmatprep.subr.bf16.mxu0 %v18007_v59  ;;  %v18038_v59 = vld [vmem:[#allocation9 + $0x7a0] sm:$0xff]  }
 0x757   :  { %17697 = vmatpush3.bf16.msra.mxu1 %v18006_v49  ;;  %v18037_v49 = vld [vmem:[#allocation9 + $0x720] sm:$0xff]  }
 0x758   :  { %17698 = vmatprep.subr.bf16.mxu1 %v18008_v26  ;;  %v18039_v26 = vld [vmem:[#allocation9 + $0x758] sm:$0xff]  }
 0x759   :  { %17677 = vmatpush3.bf16.msra.mxu0 %v18009_v46  ;;  %v18040_v46 = vld [vmem:[#allocation9 + $0x7d8] sm:$0xff]  }
 0x75a   :  { %17678 = vmatprep.subr.bf16.mxu0 %v18011_v1  ;;  %v18042_v1 = vld [vmem:[#allocation9 + $0x798] sm:$0xff]  }
 0x75b   :  { %17699 = vmatpush3.bf16.msra.mxu1 %v18010_v32  ;;  %v18041_v32 = vld [vmem:[#allocation9 + $0x718] sm:$0xff]  }
 0x75c   :  { %17700 = vmatprep.subr.bf16.mxu1 %v18012_v36  ;;  %v18043_v36 = vld [vmem:[#allocation9 + $0x750] sm:$0xff]  }
 0x75d   :  { %17679 = vmatpush3.bf16.msra.mxu0 %v18013_v45  ;;  %v18044_v45 = vld [vmem:[#allocation9 + $0x7d0] sm:$0xff]  }
 0x75e   :  { %17680 = vmatprep.subr.bf16.mxu0 %v18015_v51  ;;  %v18045_v51 = vld [vmem:[#allocation9 + $0x710] sm:$0xff]  }
 0x75f   :  { %17701 = vmatpush3.bf16.msra.mxu1 %v18014_v42  ;;  %v12466_v42 = vadd.f32 %v18849_v0, %v12425_v54  ;;  %v18052_v0 = vld [vmem:[#allocation9 + $0x7c0] sm:$0xff]  }
 0x760   :  { %17702 = vmatprep.subr.bf16.mxu1 %v18016_v35 }
 0x761   :  { %17681 = vmatpush3.bf16.msra.mxu0 %v18017_v39  ;;  %v12507_v35 = vadd.f32 %v18859_v14, %v12466_v42  ;;  %v18049_v39 = vld [vmem:[#allocation9 + $0x708] sm:$0xff]  }
 0x762   :  { %17682 = vmatprep.subr.bf16.mxu0 %v18019_v18 }
 0x763   :  { %17703 = vmatpush3.bf16.msra.mxu1 %v18018_v48  ;;  %v18050_v48 = vld [vmem:[#allocation9 + $0x788] sm:$0xff]   ;;  %v12548_v18 = vadd.f32 %v18857_v3, %v12507_v35 }
 0x764   :  { %17704 = vmatprep.subr.bf16.mxu1 %v18020_v62  ;;  %v18053_v62 = vld [vmem:[#allocation9 + $0x700] sm:$0xff]  }
 0x765   :  { %17683 = vmatpush3.bf16.msra.mxu0 %v18021_v47  ;;  %v18054_v47 = vld [vmem:[#allocation9 + $0x780] sm:$0xff]   ;;  %v12560_v14 = vmax.f32 %v12548_v18, 0.0 }
 0x766   :  { %17712 = vmatprep.subr.bf16.mxu0 %v18023_v43 }
 0x767   :  { %17705 = vmatpush3.bf16.msra.mxu1 %v18022_v53  ;;  %v17402_v53 = vpack.c.bf16 %v12560_v14, %v12560_v14 }
 0x768   :  { %17734 = vmatprep.subr.bf16.mxu1 %v18024_v24  ;;  %v17420_v44 = vpop.f32.mrf.mxu0  ;;  %15294 = vmatmul.mubr.bf16.vlgmr.msra.gmra.mxu0 %v17396_v33 }
 0x769   :  { %17713 = vmatpush3.bf16.msra.mxu0 %v18025_v31  ;;  %15373 = vmatprep.mubr.bf16.mxu0 %v17401_v15 }
 0x76a   :  { %v17442_v5 = vpop.f32.mrf.mxu1  ;;  %15334 = vmatmul.mubr.bf16.vlgmr.msra.gmra.mxu1 %v17398_v6  ;;  %v17421_v28 = vpop.f32.mrf.mxu0  ;;  %17714 = vmatprep.subr.bf16.mxu0 %v18027_v25 }
 0x76b   :  { %17735 = vmatpush3.bf16.msra.mxu1 %v18026_v29  ;;  %15413 = vmatprep.mubr.bf16.mxu1 %v17403_v21  ;;  %v17422_v19 = vadd.f32 %v17421_v28, %v17420_v44 }
 0x76c   :  { %v17443_v27 = vpop.f32.mrf.mxu1  ;;  %v17423_v4 = vpop.f32.mrf.mxu0  ;;  %17736 = vmatprep.subr.bf16.mxu1 %v18028_v63 }
 0x76d   :  { %v17444_v37 = vadd.f32 %v17443_v27, %v17442_v5  ;;  %v14816_v57 = vadd.f32 %v17422_v19, %v17067_v40  ;;  %17715 = vmatpush3.bf16.msra.mxu0 %v18029_v11 }
 0x76e   :  { %v17445_v56 = vpop.f32.mrf.mxu1  ;;  %v17424_v52 = vpop.f32.mrf.mxu0  ;;  %17716 = vmatprep.subr.bf16.mxu0 %v18031_v7 }
 0x76f   :  { %17737 = vmatpush3.bf16.msra.mxu1 %v18030_v30  ;;  %v14856_v58 = vadd.f32 %v17444_v37, %v14816_v57 }
 0x770   :  { %v17446_v9 = vpop.f32.mrf.mxu1  ;;  %17738 = vmatprep.subr.bf16.mxu1 %v18032_v22 }
 0x771   :  { %17717 = vmatpush3.bf16.msra.mxu0 %v18033_v17 }
 0x772   :  { %17718 = vmatprep.subr.bf16.mxu0 %v18035_v20 }
 0x773   :  { %17739 = vmatpush3.bf16.msra.mxu1 %v18034_v50 }
 0x774   :  { %17740 = vmatprep.subr.bf16.mxu1 %v18036_v8 }
 0x775   :  { %17719 = vmatpush3.bf16.msra.mxu0 %v18037_v49 }
 0x776   :  { %17720 = vmatprep.subr.bf16.mxu0 %v18039_v26 }
 0x777   :  { %17741 = vmatpush3.bf16.msra.mxu1 %v18038_v59 }
 0x778   :  { %17742 = vmatprep.subr.bf16.mxu1 %v18040_v46 }
 0x779   :  { %17721 = vmatpush3.bf16.msra.mxu0 %v18041_v32 }
 0x77a   :  { %17722 = vmatprep.subr.bf16.mxu0 %v18043_v36 }
 0x77b   :  { %17743 = vmatpush3.bf16.msra.mxu1 %v18042_v1 }
 0x77c   :  { %17744 = vmatprep.subr.bf16.mxu1 %v18044_v45 }
 0x77d   :  { %17723 = vmatpush3.bf16.msra.mxu0 %v18045_v51 }
 0x77e   :  { %17724 = vmatprep.subr.bf16.mxu0 %v18047_v60 }
 0x77f   :  { %17745 = vmatpush3.bf16.msra.mxu1 %v18046_v16 }
 0x780   :  { %17746 = vmatprep.subr.bf16.mxu1 %v18048_v34 }
 0x781   :  { %17725 = vmatpush3.bf16.msra.mxu0 %v18049_v39 }
 0x782   :  { %17726 = vmatprep.subr.bf16.mxu0 %v18051_v10 }
 0x783   :  { %17747 = vmatpush3.bf16.msra.mxu1 %v18050_v48 }
 0x784   :  { %17748 = vmatprep.subr.bf16.mxu1 %v18052_v0 }
 0x785   :  { %17727 = vmatpush3.bf16.msra.mxu0 %v18053_v62 }
 0x787   :  { %17749 = vmatpush3.bf16.msra.mxu1 %v18054_v47 }
 0x788   :  { %v17464_v43 = vpop.f32.mrf.mxu0  ;;  %15374 = vmatmul.mubr.bf16.vlgmr.msra.gmra.mxu0 %v17400_v55 }
 0x78a   :  { %v17486_v12 = vpop.f32.mrf.mxu1  ;;  %15414 = vmatmul.mubr.bf16.vlgmr.msra.gmra.mxu1 %v17402_v53  ;;  %v17465_v3 = vpop.f32.mrf.mxu0 }
 0x78b   :  { %v17466_v24 = vadd.f32 %v17465_v3, %v17464_v43 }
 0x78c   :  { %v17487_v2 = vpop.f32.mrf.mxu1  ;;  %v17467_v31 = vpop.f32.mrf.mxu0 }
 0x78d   :  { %v17488_v61 = vadd.f32 %v17487_v2, %v17486_v12  ;;  %v14896_v33 = vadd.f32 %v17466_v24, %v14856_v58 }
 0x78e   :  { %v17489_v41 = vpop.f32.mrf.mxu1  ;;  %v17468_v29 = vpop.f32.mrf.mxu0 }
 0x78f   :  { %v14936_v6 = vadd.f32 %v17488_v61, %v14896_v33 }
 0x790   :  { %v17490_v25 = vpop.f32.mrf.mxu1 }
 0x7a8   :  { %v17508_v15 = vpop.f32.mrf.mxu0 }
 0x7aa   :  { %v17530_v44 = vpop.f32.mrf.mxu1  ;;  %v17509_v63 = vpop.f32.mrf.mxu0 }
 0x7ab   :  { %v17510_v21 = vadd.f32 %v17509_v63, %v17508_v15 }
 0x7ac   :  { %v17531_v5 = vpop.f32.mrf.mxu1  ;;  %v17511_v40 = vpop.f32.mrf.mxu0 }
 0x7ad   :  { %v17532_v11 = vadd.f32 %v17531_v5, %v17530_v44  ;;  %v14976_v28 = vadd.f32 %v17510_v21, %v14936_v6 }
 0x7ae   :  { %v17533_v30 = vpop.f32.mrf.mxu1  ;;  %v17512_v7 = vpop.f32.mrf.mxu0 }
 0x7af   :  { %v15016_v19 = vadd.f32 %v17532_v11, %v14976_v28 }
 0x7b0   :  { %v17534_v27 = vpop.f32.mrf.mxu1 }
 0x7c8   :  { %v17552_v22 = vpop.f32.mrf.mxu0 }
 0x7ca   :  { %v17574_v37 = vpop.f32.mrf.mxu1  ;;  %v17553_v4 = vpop.f32.mrf.mxu0 }
 0x7cb   :  { %v17554_v57 = vadd.f32 %v17553_v4, %v17552_v22 }
 0x7cc   :  { %v17575_v56 = vpop.f32.mrf.mxu1  ;;  %v17555_v52 = vpop.f32.mrf.mxu0 }
 0x7cd   :  { %v17576_v17 = vadd.f32 %v17575_v56, %v17574_v37  ;;  %v15056_v50 = vadd.f32 %v17554_v57, %v15016_v19 }
 0x7ce   :  { %v17577_v20 = vpop.f32.mrf.mxu1  ;;  %v17556_v58 = vpop.f32.mrf.mxu0 }
 0x7cf   :  { %v15096_v9 = vadd.f32 %v17576_v17, %v15056_v50 }
 0x7d0   :  { %v17578_v8 = vpop.f32.mrf.mxu1 }
 0x7e8   :  { %v17596_v49 = vpop.f32.mrf.mxu0 }
 0x7ea   :  { %v17618_v59 = vpop.f32.mrf.mxu1  ;;  %v17597_v26 = vpop.f32.mrf.mxu0 }
 0x7eb   :  { %v17598_v38 = vadd.f32 %v17597_v26, %v17596_v49 }
 0x7ec   :  { %v17619_v23 = vpop.f32.mrf.mxu1  ;;  %v17599_v32 = vpop.f32.mrf.mxu0 }
 0x7ed   :  { %v17620_v46 = vadd.f32 %v17619_v23, %v17618_v59  ;;  %v15136_v1 = vadd.f32 %v17598_v38, %v15096_v9 }
 0x7ee   :  { %v17621_v36 = vpop.f32.mrf.mxu1  ;;  %v17600_v54 = vpop.f32.mrf.mxu0 }
 0x7ef   :  { %v15176_v45 = vadd.f32 %v17620_v46, %v15136_v1 }
 0x7f0   :  { %v17622_v42 = vpop.f32.mrf.mxu1 }
 0x808   :  { %v17640_v51 = vpop.f32.mrf.mxu0 }
 0x80a   :  { %v17662_v16 = vpop.f32.mrf.mxu1  ;;  %v17641_v60 = vpop.f32.mrf.mxu0 }
 0x80b   :  { %v17642_v43 = vadd.f32 %v17641_v60, %v17640_v51 }
 0x80c   :  { %v17663_v35 = vpop.f32.mrf.mxu1  ;;  %v17643_v34 = vpop.f32.mrf.mxu0 }
 0x80d   :  { %v15216_v12 = vadd.f32 %v17642_v43, %v15176_v45  ;;  %v17664_v3 = vadd.f32 %v17663_v35, %v17662_v16 }
 0x80e   :  { %v17665_v39 = vpop.f32.mrf.mxu1  ;;  %v17644_v48 = vpop.f32.mrf.mxu0 }
 0x80f   :  { %v15256_v2 = vadd.f32 %v17664_v3, %v15216_v12 }
 0x810   :  { %v17666_v10 = vpop.f32.mrf.mxu1 }
 0x828   :  { %v17684_v18 = vpop.f32.mrf.mxu0 }
 0x82a   :  { %v17706_v0 = vpop.f32.mrf.mxu1  ;;  %v17685_v62 = vpop.f32.mrf.mxu0 }
 0x82b   :  { %v17686_v24 = vadd.f32 %v17685_v62, %v17684_v18 }
 0x82c   :  { %v17707_v13 = vpop.f32.mrf.mxu1  ;;  %v17687_v47 = vpop.f32.mrf.mxu0 }
 0x82d   :  { %v15296_v61 = vadd.f32 %v17686_v24, %v15256_v2  ;;  %v17708_v33 = vadd.f32 %v17707_v13, %v17706_v0 }
 0x82e   :  { %v17709_v14 = vpop.f32.mrf.mxu1  ;;  %v17688_v55 = vpop.f32.mrf.mxu0 }
 0x82f   :  { %v15336_v6 = vadd.f32 %v17708_v33, %v15296_v61 }
 0x830   :  { %v17710_v53 = vpop.f32.mrf.mxu1 }
 0x848   :  { %v17728_v31 = vpop.f32.mrf.mxu0 }
 0x84a   :  { %v17750_v41 = vpop.f32.mrf.mxu1  ;;  %v17729_v29 = vpop.f32.mrf.mxu0 }
 0x84b   :  { %v17730_v25 = vadd.f32 %v17729_v29, %v17728_v31 }
 0x84c   :  { %v17751_v15 = vpop.f32.mrf.mxu1  ;;  %v17731_v44 = vpop.f32.mrf.mxu0 }
 0x84d   :  { %v15376_v63 = vadd.f32 %v17730_v25, %v15336_v6  ;;  %v17752_v21 = vadd.f32 %v17751_v15, %v17750_v41 }
 0x84e   :  { %v17753_v5 = vpop.f32.mrf.mxu1  ;;  %v17732_v11 = vpop.f32.mrf.mxu0 }
 0x84f   :  { %v15416_v40 = vadd.f32 %v17752_v21, %v15376_v63 }
 0x850   :  { %v17754_v28 = vpop.f32.mrf.mxu1 }
 0x851   :  { %15421 = vst [vmem:[#allocation12] sm:$0xff] %v15416_v40 }
 0x852   :  { %18176 = shalt.err (!%p18173_p1)
}
 0x853   :  { %15431 = dma.vmem_to_hbm [thread:$0]  %s15429_s4, 128, %s18883_s5, [#allocation5]  }
 0x854   :  { %18191 = dma.done.wait [#allocation5], 128  }
 0x855   :  { %18192 = vsyncadd [#allocation5], 4294967168 }
 0x856   :  { %15435 = vsyncpa [#allocation4], 1 }
 0x857   :  { %15436 = vsyncpa [#allocation7], 1 }
 0x858   :  { %15437 = vsyncpa [#allocation10], 1 }
 0x859   :  { %15438 = vsyncpa [#allocation5], 1 }

</bundles_post_ra>
